<compile_context>
chip_gen: v7x
topology: tpu7x:2x2x1
jax: 0.10.0
libtpu: 0.0.40
codegen_flags: <defaults>
</compile_context>

<pallas_src>
import jax
import jax.numpy as jnp
from jax.experimental import pallas as pl
from jax.experimental.pallas import tpu as pltpu

NEG_SLOPE = 0.1
BN_EPS = 1e-5
HEAD_OUT = (1, 3, 6, 2)          # obj, cla, angle_length, center
STACKS = ((0, 1), (2, 3))        # branch pairing per grid step (head rows 1+3, 6+2)
HROWS = 8                        # stacked head rows per step (both stacks pad to 8)


# ---------------------------------------------------------------------------
# Fused per-stack Pallas kernel (2 branches / grid step)
# ---------------------------------------------------------------------------
def _make_kernel(c, width, r_tot):
    cs = 2 * c
    # flat-position offsets of the 9 'same'-conv taps
    deltas = [(t // 3 - 1) * width + (t % 3 - 1) for t in range(9)]

    def kernel(x_ref, m16_ref, m32_ref, w1d_ref, w1bd_ref, w2bd_ref,
               wh_ref, aux_ref, out_ref):
        # ---- packed small per-stack params (single tiny DMA block) ----
        b1 = aux_ref[0, :, 0:1]             # (2c, 1) folded-BN bias, Conv #1 of ResNet
        b2 = aux_ref[0, :, 1:2]             # (2c, 1) folded-BN bias, Conv #2 of ResNet
        bh = aux_ref[0, 0:HROWS, 2:3]       # (8, 1) head bias (conv+BN folded)
        kk = aux_ref[0, 0:HROWS, 3:4]       # (8, 1) Sigmoid_al scale  (1 for plain sigmoid)
        cc = aux_ref[0, 0:HROWS, 4:5]       # (8, 1) Sigmoid_al offset (0 for plain sigmoid)

        def taps(act, m_ref):
            # 9 taps via XLU lane rolls, stacked tap-major; one pre-broadcast
            # pad-mask multiply (f32), bf16 cast only at the MXU boundary.
            parts = [act if d == 0 else pltpu.roll(act, shift=(-d) % r_tot, axis=1)
                     for d in deltas]
            stack = jnp.concatenate(parts, axis=0) * m_ref[...]
            return stack.astype(jnp.bfloat16)

        def conv(act, m_ref, w_ref, bias):
            # fused-tap 3x3 conv (single bf16 MXU dot, f32 acc) + BN bias + LeakyReLU
            y = jnp.dot(w_ref[0], taps(act, m_ref),
                        preferred_element_type=jnp.float32) + bias
            return jnp.maximum(y, NEG_SLOPE * y)

        x = x_ref[...]                                   # (c, R) shared input
        x2 = jnp.concatenate([x, x], axis=0)             # (2c, R) per-branch residual copies

        # CBL_n(c, 4) = shared-weight ResNet applied twice.
        h = conv(x, m16_ref, w1d_ref, b1)                # conv1: dense stacked weight, shared x
        f = x2 + conv(h, m32_ref, w2bd_ref, b2)          # ResNet #1
        h = conv(f, m32_ref, w1bd_ref, b1)               # same Conv weights reused (block-diag)
        f = f + conv(h, m32_ref, w2bd_ref, b2)           # ResNet #2

        # fused 1x1 heads of the 2 branches (8 stacked rows), f32 MXU dot
        logits = jnp.dot(wh_ref[0], f, preferred_element_type=jnp.float32) + bh
        sig = pl.reciprocal(1.0 + jnp.exp(-logits), approx=True)   # EUP
        out_ref[0] = sig * kk + cc                       # sigmoid / Sigmoid_al rows

        # softmax only exists in grid step 0 (rows 1:4 = 'cla' head of branch 1)
        @pl.when(pl.program_id(0) == 0)
        def _():
            cl = logits[1:4, :]
            e = jnp.exp(cl - jnp.max(cl, axis=0, keepdims=True))
            out_ref[0, 1:4, :] = e * pl.reciprocal(
                jnp.sum(e, axis=0, keepdims=True), approx=True)

    return kernel


# ---------------------------------------------------------------------------
# pallas_call wrapper (whole DetectHead forward, NCHW in / NCHW out)
# ---------------------------------------------------------------------------
def detect_head_forward(x_nchw, packed):
    n, c, h, w = x_nchw.shape
    cs = 2 * c
    hw = h * w
    r = n * hw
    # single small layout change in XLA; everything else stays in the kernel
    x_cm = jnp.transpose(x_nchw, (1, 0, 2, 3)).reshape(c, r)

    out = pl.pallas_call(
        _make_kernel(c, w, r),
        out_shape=jax.ShapeDtypeStruct((2, HROWS, r), jnp.float32),
        grid=(2,),
        in_specs=[
            pl.BlockSpec((c, r), lambda s: (0, 0)),               # x (shared, fetched once)
            pl.BlockSpec((9 * c, r), lambda s: (0, 0)),           # pad mask, 16-ch tap stack
            pl.BlockSpec((9 * cs, r), lambda s: (0, 0)),          # pad mask, 32-ch tap stack
            pl.BlockSpec((1, cs, 9 * c), lambda s: (s, 0, 0)),    # conv1 dense fused W (bf16)
            pl.BlockSpec((1, cs, 9 * cs), lambda s: (s, 0, 0)),   # conv3 block-diag fused W (bf16)
            pl.BlockSpec((1, cs, 9 * cs), lambda s: (s, 0, 0)),   # conv2/4 block-diag fused W (bf16)
            pl.BlockSpec((1, HROWS, cs), lambda s: (s, 0, 0)),    # head W^T (padded to 8 rows)
            pl.BlockSpec((1, cs, 8), lambda s: (s, 0, 0)),        # packed biases / k / c
        ],
        out_specs=pl.BlockSpec((1, HROWS, r), lambda s: (s, 0, 0)),
        compiler_params=pltpu.CompilerParams(
            dimension_semantics=("parallel",)),                   # v7x: 1 stack per TensorCore
    )(x_cm, packed["mask16"], packed["mask32"], packed["w1d"], packed["w1bd"],
      packed["w2bd"], packed["whT"], packed["aux"])

    def unstack(step, row0, rows):
        o = out[step, row0:row0 + rows].reshape(rows, n, h, w)
        return jnp.transpose(o, (1, 0, 2, 3))                     # cheap XLA fixup -> NCHW

    return [unstack(0, 0, 1),            # obj      (N, 1, H, W)
            unstack(0, 1, 3),            # cla      (N, 3, H, W)
            unstack(1, 0, 6),            # res_al   (N, 6, H, W)
            unstack(1, 6, 2)]            # center   (N, 2, H, W)


# ---------------------------------------------------------------------------
# Deterministic synthetic parameters (BatchNorm folded) + kernel packing
# ---------------------------------------------------------------------------
def _bn_params(key, n):
    kg, kb, km, kv = jax.random.split(key, 4)
    gamma = 1.0 + 0.1 * jax.random.normal(kg, (n,), jnp.float32)
    beta = 0.05 * jax.random.normal(kb, (n,), jnp.float32)
    mean = 0.05 * jax.random.normal(km, (n,), jnp.float32)
    var = 1.0 + 0.1 * jnp.abs(jax.random.normal(kv, (n,), jnp.float32))
    return gamma, beta, mean, var


def init_params(key, c):
    """Canonical per-branch params (HWIO conv weights) with BatchNorm folded."""
    branches = []
    for br in range(4):
        key, *ks = jax.random.split(key, 8)
        w1 = 0.15 * jax.random.normal(ks[0], (3, 3, c, c), jnp.float32)
        w2 = 0.15 * jax.random.normal(ks[1], (3, 3, c, c), jnp.float32)
        g1, be1, m1, v1 = _bn_params(ks[2], c)
        g2, be2, m2, v2 = _bn_params(ks[3], c)
        s1 = g1 / jnp.sqrt(v1 + BN_EPS)
        s2 = g2 / jnp.sqrt(v2 + BN_EPS)

        out = HEAD_OUT[br]
        wh = 0.2 * jax.random.normal(ks[4], (c, out), jnp.float32)
        bh0 = 0.05 * jax.random.normal(ks[5], (out,), jnp.float32)
        gh, beh, mh, vh = _bn_params(ks[6], out)
        sh = gh / jnp.sqrt(vh + BN_EPS)

        branches.append(dict(
            w1=w1 * s1, b1=be1 - m1 * s1,
            w2=w2 * s2, b2=be2 - m2 * s2,
            wh=wh * sh, bh=(bh0 - mh) * sh + beh))
    return branches


def pack_params(canon, n, h, w, c):
    """Stack / fuse / pad canonical params into the 2-branch-stack kernel layout."""
    cs = 2 * c
    r_tot = n * h * w

    # zero-pad validity masks for the 9 taps, pre-broadcast to the tap-major
    # stacked-channel layouts used by the fused-tap dots (no in-kernel broadcasts).
    pos = jnp.arange(r_tot, dtype=jnp.int32)
    wi = pos % w
    hi = (pos // w) % h
    m9 = []
    for t in range(9):
        dh, dw = t // 3 - 1, t % 3 - 1
        valid = (hi + dh >= 0) & (hi + dh < h) & (wi + dw >= 0) & (wi + dw < w)
        m9.append(valid.astype(jnp.float32))
    m9 = jnp.stack(m9)                                   # (9, R)
    mask16 = jnp.repeat(m9, c, axis=0)                   # (9*c,  R)
    mask32 = jnp.repeat(m9, cs, axis=0)                  # (9*2c, R)

    def fuse(wconv):                                     # (3,3,ci,co) -> (co, 9*ci)
        ci, co = wconv.shape[2], wconv.shape[3]
        return wconv.reshape(9, ci, co).transpose(2, 0, 1).reshape(co, 9 * ci)

    def fuse_blockdiag(wa, wb):                          # 2x (3,3,c,c) -> (2c, 9*2c)
        out = jnp.zeros((cs, 9, cs), jnp.float32)
        out = out.at[:c, :, :c].set(wa.reshape(9, c, c).transpose(2, 0, 1))
        out = out.at[c:, :, c:].set(wb.reshape(9, c, c).transpose(2, 0, 1))
        return out.reshape(cs, 9 * cs)

    w1d, w1bd, w2bd, whT, aux = [], [], [], [], []
    for (ba, bb) in STACKS:
        pa, pb = canon[ba], canon[bb]
        w1d.append(jnp.concatenate([fuse(pa["w1"]), fuse(pb["w1"])], axis=0))
        w1bd.append(fuse_blockdiag(pa["w1"], pb["w1"]))
        w2bd.append(fuse_blockdiag(pa["w2"], pb["w2"]))

        oa, ob = HEAD_OUT[ba], HEAD_OUT[bb]
        wh = jnp.zeros((HROWS, cs), jnp.float32)
        wh = wh.at[:oa, :c].set(pa["wh"].T)
        wh = wh.at[oa:oa + ob, c:].set(pb["wh"].T)
        whT.append(wh)

        bh = jnp.zeros((HROWS,), jnp.float32)
        bh = bh.at[:oa].set(pa["bh"]).at[oa:oa + ob].set(pb["bh"])
        kk = jnp.ones((HROWS,), jnp.float32)
        cc = jnp.zeros((HROWS,), jnp.float32)
        if ba == 2:  # angle_length: Sigmoid_al(0.5, 2) on 0:3, Sigmoid_al(-0.785, 0.785) on 3:6
            kk = kk.at[0:3].set(1.5).at[3:6].set(1.57)
            cc = cc.at[0:3].set(0.5).at[3:6].set(-0.785)

        a = jnp.zeros((cs, 8), jnp.float32)
        a = a.at[:, 0].set(jnp.concatenate([pa["b1"], pb["b1"]]))
        a = a.at[:, 1].set(jnp.concatenate([pa["b2"], pb["b2"]]))
        a = a.at[:HROWS, 2].set(bh)
        a = a.at[:HROWS, 3].set(kk)
        a = a.at[:HROWS, 4].set(cc)
        aux.append(a)

    return dict(
        mask16=mask16, mask32=mask32,
        w1d=jnp.stack(w1d).astype(jnp.bfloat16),
        w1bd=jnp.stack(w1bd).astype(jnp.bfloat16),
        w2bd=jnp.stack(w2bd).astype(jnp.bfloat16),
        whT=jnp.stack(whT), aux=jnp.stack(aux))


# ---------------------------------------------------------------------------
# Pure-JAX reference (correctness check only)
# ---------------------------------------------------------------------------
def ref_forward(x_nchw, canon):
    x = jnp.transpose(x_nchw, (0, 2, 3, 1))               # NHWC
    lrelu = lambda a: jnp.where(a > 0, a, NEG_SLOPE * a)

    def conv3(xx, w, b):
        y = jax.lax.conv_general_dilated(
            xx, w, (1, 1), ((1, 1), (1, 1)),
            dimension_numbers=("NHWC", "HWIO", "NHWC"))
        return y + b.reshape(1, 1, 1, -1)

    def resnet(xx, p):
        h = lrelu(conv3(xx, p["w1"], p["b1"]))
        return xx + lrelu(conv3(h, p["w2"], p["b2"]))

    outs = []
    for br, p in enumerate(canon):
        f = resnet(resnet(x, p), p)
        logits = jnp.einsum("nhwc,co->nhwo", f, p["wh"]) + p["bh"].reshape(1, 1, 1, -1)
        if br == 1:
            o = jax.nn.softmax(logits, axis=-1)
        elif br == 2:
            k6 = jnp.array([1.5] * 3 + [1.57] * 3, jnp.float32)
            c6 = jnp.array([0.5] * 3 + [-0.785] * 3, jnp.float32)
            o = jax.nn.sigmoid(logits) * k6 + c6
        else:
            o = jax.nn.sigmoid(logits)
        outs.append(jnp.transpose(o, (0, 3, 1, 2)))
    return outs


# ---------------------------------------------------------------------------
if __name__ == "__main__":
    key = jax.random.PRNGKey(0)
    kx, kp = jax.random.split(key)
    N, C, H, W = 2, 16, 16, 16                            # NCHW, in_channel = 16
    x = jax.random.normal(kx, (N, C, H, W), jnp.float32)
    canon = init_params(kp, C)
    packed = pack_params(canon, N, H, W, C)

    fwd = jax.jit(detect_head_forward)
    outs = jax.block_until_ready(fwd(x, packed))

    refs = ref_forward(x, canon)
    expected = [(N, 1, H, W), (N, 3, H, W), (N, 6, H, W), (N, 2, H, W)]
    # Tolerance loosened vs. the all-f32 variant (5e-3) to cover bf16 MXU conv
    # operands across 4 stacked convs plus pl.reciprocal(approx=True) in the
    # sigmoid/softmax normalisation; still far below any plausible structural bug.
    for o, r, s in zip(outs, refs, expected):
        assert o.shape == s, (o.shape, s)
        assert bool(jnp.all(jnp.isfinite(o)))
        assert bool(jnp.allclose(o, r, atol=4e-2, rtol=2e-2)), \
            float(jnp.max(jnp.abs(o - r)))

    print("KERNEL_OK")
</pallas_src>

<mosaic_0001>
module attributes {stable_mosaic.version = 11 : i64} {
  func.func @kernel(%arg0: i32, %arg1: memref<16x512xf32, #tpu.memory_space<vmem>>, %arg2: memref<144x512xf32, #tpu.memory_space<vmem>>, %arg3: memref<288x512xf32, #tpu.memory_space<vmem>>, %arg4: memref<1x32x144xbf16, #tpu.memory_space<vmem>>, %arg5: memref<1x32x288xbf16, #tpu.memory_space<vmem>>, %arg6: memref<1x32x288xbf16, #tpu.memory_space<vmem>>, %arg7: memref<1x8x32xf32, #tpu.memory_space<vmem>>, %arg8: memref<1x32x8xf32, #tpu.memory_space<vmem>>, %arg9: memref<1x8x512xf32, #tpu.memory_space<vmem>>) attributes {dimension_semantics = [#tpu.dimension_semantics<parallel>], iteration_bounds = array<i64: 2>, scalar_prefetch = 0 : i64, scratch_operands = 0 : i64, tpu.core_type = #tpu.core_type<tc>, window_params = [{pipeline_mode = #tpu.pipeline_mode<synchronous>, transform_indices = @transform_0, window_bounds = array<i64: 16, 512>}, {pipeline_mode = #tpu.pipeline_mode<synchronous>, transform_indices = @transform_1, window_bounds = array<i64: 144, 512>}, {pipeline_mode = #tpu.pipeline_mode<synchronous>, transform_indices = @transform_2, window_bounds = array<i64: 288, 512>}, {transform_indices = @transform_3, window_bounds = array<i64: 1, 32, 144>}, {transform_indices = @transform_4, window_bounds = array<i64: 1, 32, 288>}, {transform_indices = @transform_5, window_bounds = array<i64: 1, 32, 288>}, {transform_indices = @transform_6, window_bounds = array<i64: 1, 8, 32>}, {transform_indices = @transform_7, window_bounds = array<i64: 1, 32, 8>}, {transform_indices = @transform_8, window_bounds = array<i64: 1, 8, 512>}]} {
    %c0 = arith.constant 0 : index
    %c0_0 = arith.constant 0 : index
    %c0_1 = arith.constant 0 : index
    %0 = vector.load %arg8[%c0, %c0_0, %c0_1] : memref<1x32x8xf32, #tpu.memory_space<vmem>>, vector<1x32x1xf32>
    %1 = vector.shape_cast %0 : vector<1x32x1xf32> to vector<32x1xf32>
    %c0_2 = arith.constant 0 : index
    %c0_3 = arith.constant 0 : index
    %c1 = arith.constant 1 : index
    %2 = vector.load %arg8[%c0_2, %c0_3, %c1] : memref<1x32x8xf32, #tpu.memory_space<vmem>>, vector<1x32x1xf32>
    %3 = vector.shape_cast %2 : vector<1x32x1xf32> to vector<32x1xf32>
    %c0_4 = arith.constant 0 : index
    %c0_5 = arith.constant 0 : index
    %c2 = arith.constant 2 : index
    %4 = vector.load %arg8[%c0_4, %c0_5, %c2] : memref<1x32x8xf32, #tpu.memory_space<vmem>>, vector<1x8x1xf32>
    %5 = vector.shape_cast %4 : vector<1x8x1xf32> to vector<8x1xf32>
    %c0_6 = arith.constant 0 : index
    %c0_7 = arith.constant 0 : index
    %c3 = arith.constant 3 : index
    %6 = vector.load %arg8[%c0_6, %c0_7, %c3] : memref<1x32x8xf32, #tpu.memory_space<vmem>>, vector<1x8x1xf32>
    %7 = vector.shape_cast %6 : vector<1x8x1xf32> to vector<8x1xf32>
    %c0_8 = arith.constant 0 : index
    %c0_9 = arith.constant 0 : index
    %c4 = arith.constant 4 : index
    %8 = vector.load %arg8[%c0_8, %c0_9, %c4] : memref<1x32x8xf32, #tpu.memory_space<vmem>>, vector<1x8x1xf32>
    %9 = vector.shape_cast %8 : vector<1x8x1xf32> to vector<8x1xf32>
    %c0_10 = arith.constant 0 : index
    %c0_11 = arith.constant 0 : index
    %10 = vector.load %arg1[%c0_10, %c0_11] : memref<16x512xf32, #tpu.memory_space<vmem>>, vector<16x512xf32>
    %11 = tpu.concatenate %10, %10 in 0 : vector<16x512xf32>, vector<16x512xf32> -> vector<32x512xf32>
    %c0_12 = arith.constant 0 : index
    %c0_13 = arith.constant 0 : index
    %c0_14 = arith.constant 0 : index
    %12 = vector.load %arg4[%c0_12, %c0_13, %c0_14] : memref<1x32x144xbf16, #tpu.memory_space<vmem>>, vector<1x32x144xbf16>
    %13 = vector.shape_cast %12 : vector<1x32x144xbf16> to vector<32x144xbf16>
    %c17_i32 = arith.constant 17 : i32
    %14 = tpu.dynamic_rotate %10 by %c17_i32 dim 1 : vector<16x512xf32>, i32 -> vector<16x512xf32>
    %c16_i32 = arith.constant 16 : i32
    %15 = tpu.dynamic_rotate %10 by %c16_i32 dim 1 : vector<16x512xf32>, i32 -> vector<16x512xf32>
    %c15_i32 = arith.constant 15 : i32
    %16 = tpu.dynamic_rotate %10 by %c15_i32 dim 1 : vector<16x512xf32>, i32 -> vector<16x512xf32>
    %c1_i32 = arith.constant 1 : i32
    %17 = tpu.dynamic_rotate %10 by %c1_i32 dim 1 : vector<16x512xf32>, i32 -> vector<16x512xf32>
    %c511_i32 = arith.constant 511 : i32
    %18 = tpu.dynamic_rotate %10 by %c511_i32 dim 1 : vector<16x512xf32>, i32 -> vector<16x512xf32>
    %c497_i32 = arith.constant 497 : i32
    %19 = tpu.dynamic_rotate %10 by %c497_i32 dim 1 : vector<16x512xf32>, i32 -> vector<16x512xf32>
    %c496_i32 = arith.constant 496 : i32
    %20 = tpu.dynamic_rotate %10 by %c496_i32 dim 1 : vector<16x512xf32>, i32 -> vector<16x512xf32>
    %c495_i32 = arith.constant 495 : i32
    %21 = tpu.dynamic_rotate %10 by %c495_i32 dim 1 : vector<16x512xf32>, i32 -> vector<16x512xf32>
    %22 = tpu.concatenate %14, %15, %16, %17, %10, %18, %19, %20, %21 in 0 : vector<16x512xf32>, vector<16x512xf32>, vector<16x512xf32>, vector<16x512xf32>, vector<16x512xf32>, vector<16x512xf32>, vector<16x512xf32>, vector<16x512xf32>, vector<16x512xf32> -> vector<144x512xf32>
    %c0_15 = arith.constant 0 : index
    %c0_16 = arith.constant 0 : index
    %23 = vector.load %arg2[%c0_15, %c0_16] : memref<144x512xf32, #tpu.memory_space<vmem>>, vector<144x512xf32>
    %24 = arith.mulf %22, %23 : vector<144x512xf32>
    %25 = arith.truncf %24 : vector<144x512xf32> to vector<144x512xbf16>
    %cst = arith.constant dense<0.000000e+00> : vector<32x512xf32>
    %26 = tpu.matmul %13, %25, %cst {dimension_numbers = #tpu.dot_dimension_numbers<[1], [0], [0], [1], [0, 0, 1, 1], [], []>} : vector<32x144xbf16>, vector<144x512xbf16>, vector<32x512xf32> -> vector<32x512xf32>
    %27 = vector.broadcast %1 : vector<32x1xf32> to vector<32x512xf32>
    %28 = arith.addf %26, %27 : vector<32x512xf32>
    %cst_17 = arith.constant 1.000000e-01 : f32
    %29 = vector.broadcast %cst_17 : f32 to vector<32x512xf32>
    %30 = arith.mulf %29, %28 : vector<32x512xf32>
    %31 = arith.maximumf %28, %30 : vector<32x512xf32>
    %c0_18 = arith.constant 0 : index
    %c0_19 = arith.constant 0 : index
    %c0_20 = arith.constant 0 : index
    %32 = vector.load %arg6[%c0_18, %c0_19, %c0_20] : memref<1x32x288xbf16, #tpu.memory_space<vmem>>, vector<1x32x288xbf16>
    %33 = vector.shape_cast %32 : vector<1x32x288xbf16> to vector<32x288xbf16>
    %c17_i32_21 = arith.constant 17 : i32
    %34 = tpu.dynamic_rotate %31 by %c17_i32_21 dim 1 : vector<32x512xf32>, i32 -> vector<32x512xf32>
    %c16_i32_22 = arith.constant 16 : i32
    %35 = tpu.dynamic_rotate %31 by %c16_i32_22 dim 1 : vector<32x512xf32>, i32 -> vector<32x512xf32>
    %c15_i32_23 = arith.constant 15 : i32
    %36 = tpu.dynamic_rotate %31 by %c15_i32_23 dim 1 : vector<32x512xf32>, i32 -> vector<32x512xf32>
    %c1_i32_24 = arith.constant 1 : i32
    %37 = tpu.dynamic_rotate %31 by %c1_i32_24 dim 1 : vector<32x512xf32>, i32 -> vector<32x512xf32>
    %c511_i32_25 = arith.constant 511 : i32
    %38 = tpu.dynamic_rotate %31 by %c511_i32_25 dim 1 : vector<32x512xf32>, i32 -> vector<32x512xf32>
    %c497_i32_26 = arith.constant 497 : i32
    %39 = tpu.dynamic_rotate %31 by %c497_i32_26 dim 1 : vector<32x512xf32>, i32 -> vector<32x512xf32>
    %c496_i32_27 = arith.constant 496 : i32
    %40 = tpu.dynamic_rotate %31 by %c496_i32_27 dim 1 : vector<32x512xf32>, i32 -> vector<32x512xf32>
    %c495_i32_28 = arith.constant 495 : i32
    %41 = tpu.dynamic_rotate %31 by %c495_i32_28 dim 1 : vector<32x512xf32>, i32 -> vector<32x512xf32>
    %42 = tpu.concatenate %34, %35, %36, %37, %31, %38, %39, %40, %41 in 0 : vector<32x512xf32>, vector<32x512xf32>, vector<32x512xf32>, vector<32x512xf32>, vector<32x512xf32>, vector<32x512xf32>, vector<32x512xf32>, vector<32x512xf32>, vector<32x512xf32> -> vector<288x512xf32>
    %c0_29 = arith.constant 0 : index
    %c0_30 = arith.constant 0 : index
    %43 = vector.load %arg3[%c0_29, %c0_30] : memref<288x512xf32, #tpu.memory_space<vmem>>, vector<288x512xf32>
    %44 = arith.mulf %42, %43 : vector<288x512xf32>
    %45 = arith.truncf %44 : vector<288x512xf32> to vector<288x512xbf16>
    %cst_31 = arith.constant dense<0.000000e+00> : vector<32x512xf32>
    %46 = tpu.matmul %33, %45, %cst_31 {dimension_numbers = #tpu.dot_dimension_numbers<[1], [0], [0], [1], [0, 0, 1, 1], [], []>} : vector<32x288xbf16>, vector<288x512xbf16>, vector<32x512xf32> -> vector<32x512xf32>
    %47 = vector.broadcast %3 : vector<32x1xf32> to vector<32x512xf32>
    %48 = arith.addf %46, %47 : vector<32x512xf32>
    %cst_32 = arith.constant 1.000000e-01 : f32
    %49 = vector.broadcast %cst_32 : f32 to vector<32x512xf32>
    %50 = arith.mulf %49, %48 : vector<32x512xf32>
    %51 = arith.maximumf %48, %50 : vector<32x512xf32>
    %52 = arith.addf %11, %51 : vector<32x512xf32>
    %c0_33 = arith.constant 0 : index
    %c0_34 = arith.constant 0 : index
    %c0_35 = arith.constant 0 : index
    %53 = vector.load %arg5[%c0_33, %c0_34, %c0_35] : memref<1x32x288xbf16, #tpu.memory_space<vmem>>, vector<1x32x288xbf16>
    %54 = vector.shape_cast %53 : vector<1x32x288xbf16> to vector<32x288xbf16>
    %c17_i32_36 = arith.constant 17 : i32
    %55 = tpu.dynamic_rotate %52 by %c17_i32_36 dim 1 : vector<32x512xf32>, i32 -> vector<32x512xf32>
    %c16_i32_37 = arith.constant 16 : i32
    %56 = tpu.dynamic_rotate %52 by %c16_i32_37 dim 1 : vector<32x512xf32>, i32 -> vector<32x512xf32>
    %c15_i32_38 = arith.constant 15 : i32
    %57 = tpu.dynamic_rotate %52 by %c15_i32_38 dim 1 : vector<32x512xf32>, i32 -> vector<32x512xf32>
    %c1_i32_39 = arith.constant 1 : i32
    %58 = tpu.dynamic_rotate %52 by %c1_i32_39 dim 1 : vector<32x512xf32>, i32 -> vector<32x512xf32>
    %c511_i32_40 = arith.constant 511 : i32
    %59 = tpu.dynamic_rotate %52 by %c511_i32_40 dim 1 : vector<32x512xf32>, i32 -> vector<32x512xf32>
    %c497_i32_41 = arith.constant 497 : i32
    %60 = tpu.dynamic_rotate %52 by %c497_i32_41 dim 1 : vector<32x512xf32>, i32 -> vector<32x512xf32>
    %c496_i32_42 = arith.constant 496 : i32
    %61 = tpu.dynamic_rotate %52 by %c496_i32_42 dim 1 : vector<32x512xf32>, i32 -> vector<32x512xf32>
    %c495_i32_43 = arith.constant 495 : i32
    %62 = tpu.dynamic_rotate %52 by %c495_i32_43 dim 1 : vector<32x512xf32>, i32 -> vector<32x512xf32>
    %63 = tpu.concatenate %55, %56, %57, %58, %52, %59, %60, %61, %62 in 0 : vector<32x512xf32>, vector<32x512xf32>, vector<32x512xf32>, vector<32x512xf32>, vector<32x512xf32>, vector<32x512xf32>, vector<32x512xf32>, vector<32x512xf32>, vector<32x512xf32> -> vector<288x512xf32>
    %c0_44 = arith.constant 0 : index
    %c0_45 = arith.constant 0 : index
    %64 = vector.load %arg3[%c0_44, %c0_45] : memref<288x512xf32, #tpu.memory_space<vmem>>, vector<288x512xf32>
    %65 = arith.mulf %63, %64 : vector<288x512xf32>
    %66 = arith.truncf %65 : vector<288x512xf32> to vector<288x512xbf16>
    %cst_46 = arith.constant dense<0.000000e+00> : vector<32x512xf32>
    %67 = tpu.matmul %54, %66, %cst_46 {dimension_numbers = #tpu.dot_dimension_numbers<[1], [0], [0], [1], [0, 0, 1, 1], [], []>} : vector<32x288xbf16>, vector<288x512xbf16>, vector<32x512xf32> -> vector<32x512xf32>
    %68 = vector.broadcast %1 : vector<32x1xf32> to vector<32x512xf32>
    %69 = arith.addf %67, %68 : vector<32x512xf32>
    %cst_47 = arith.constant 1.000000e-01 : f32
    %70 = vector.broadcast %cst_47 : f32 to vector<32x512xf32>
    %71 = arith.mulf %70, %69 : vector<32x512xf32>
    %72 = arith.maximumf %69, %71 : vector<32x512xf32>
    %c0_48 = arith.constant 0 : index
    %c0_49 = arith.constant 0 : index
    %c0_50 = arith.constant 0 : index
    %73 = vector.load %arg6[%c0_48, %c0_49, %c0_50] : memref<1x32x288xbf16, #tpu.memory_space<vmem>>, vector<1x32x288xbf16>
    %74 = vector.shape_cast %73 : vector<1x32x288xbf16> to vector<32x288xbf16>
    %c17_i32_51 = arith.constant 17 : i32
    %75 = tpu.dynamic_rotate %72 by %c17_i32_51 dim 1 : vector<32x512xf32>, i32 -> vector<32x512xf32>
    %c16_i32_52 = arith.constant 16 : i32
    %76 = tpu.dynamic_rotate %72 by %c16_i32_52 dim 1 : vector<32x512xf32>, i32 -> vector<32x512xf32>
    %c15_i32_53 = arith.constant 15 : i32
    %77 = tpu.dynamic_rotate %72 by %c15_i32_53 dim 1 : vector<32x512xf32>, i32 -> vector<32x512xf32>
    %c1_i32_54 = arith.constant 1 : i32
    %78 = tpu.dynamic_rotate %72 by %c1_i32_54 dim 1 : vector<32x512xf32>, i32 -> vector<32x512xf32>
    %c511_i32_55 = arith.constant 511 : i32
    %79 = tpu.dynamic_rotate %72 by %c511_i32_55 dim 1 : vector<32x512xf32>, i32 -> vector<32x512xf32>
    %c497_i32_56 = arith.constant 497 : i32
    %80 = tpu.dynamic_rotate %72 by %c497_i32_56 dim 1 : vector<32x512xf32>, i32 -> vector<32x512xf32>
    %c496_i32_57 = arith.constant 496 : i32
    %81 = tpu.dynamic_rotate %72 by %c496_i32_57 dim 1 : vector<32x512xf32>, i32 -> vector<32x512xf32>
    %c495_i32_58 = arith.constant 495 : i32
    %82 = tpu.dynamic_rotate %72 by %c495_i32_58 dim 1 : vector<32x512xf32>, i32 -> vector<32x512xf32>
    %83 = tpu.concatenate %75, %76, %77, %78, %72, %79, %80, %81, %82 in 0 : vector<32x512xf32>, vector<32x512xf32>, vector<32x512xf32>, vector<32x512xf32>, vector<32x512xf32>, vector<32x512xf32>, vector<32x512xf32>, vector<32x512xf32>, vector<32x512xf32> -> vector<288x512xf32>
    %c0_59 = arith.constant 0 : index
    %c0_60 = arith.constant 0 : index
    %84 = vector.load %arg3[%c0_59, %c0_60] : memref<288x512xf32, #tpu.memory_space<vmem>>, vector<288x512xf32>
    %85 = arith.mulf %83, %84 : vector<288x512xf32>
    %86 = arith.truncf %85 : vector<288x512xf32> to vector<288x512xbf16>
    %cst_61 = arith.constant dense<0.000000e+00> : vector<32x512xf32>
    %87 = tpu.matmul %74, %86, %cst_61 {dimension_numbers = #tpu.dot_dimension_numbers<[1], [0], [0], [1], [0, 0, 1, 1], [], []>} : vector<32x288xbf16>, vector<288x512xbf16>, vector<32x512xf32> -> vector<32x512xf32>
    %88 = vector.broadcast %3 : vector<32x1xf32> to vector<32x512xf32>
    %89 = arith.addf %87, %88 : vector<32x512xf32>
    %cst_62 = arith.constant 1.000000e-01 : f32
    %90 = vector.broadcast %cst_62 : f32 to vector<32x512xf32>
    %91 = arith.mulf %90, %89 : vector<32x512xf32>
    %92 = arith.maximumf %89, %91 : vector<32x512xf32>
    %93 = arith.addf %52, %92 : vector<32x512xf32>
    %c0_63 = arith.constant 0 : index
    %c0_64 = arith.constant 0 : index
    %c0_65 = arith.constant 0 : index
    %94 = vector.load %arg7[%c0_63, %c0_64, %c0_65] : memref<1x8x32xf32, #tpu.memory_space<vmem>>, vector<1x8x32xf32>
    %95 = vector.shape_cast %94 : vector<1x8x32xf32> to vector<8x32xf32>
    %cst_66 = arith.constant dense<0.000000e+00> : vector<8x512xf32>
    %96 = tpu.matmul %95, %93, %cst_66 {dimension_numbers = #tpu.dot_dimension_numbers<[1], [0], [0], [1], [0, 0, 1, 1], [], []>} : vector<8x32xf32>, vector<32x512xf32>, vector<8x512xf32> -> vector<8x512xf32>
    %97 = vector.broadcast %5 : vector<8x1xf32> to vector<8x512xf32>
    %98 = arith.addf %96, %97 : vector<8x512xf32>
    %cst_67 = arith.constant 0.000000e+00 : f32
    %99 = vector.broadcast %cst_67 : f32 to vector<8x512xf32>
    %100 = arith.subf %99, %98 : vector<8x512xf32>
    %101 = math.exp %100 : vector<8x512xf32>
    %cst_68 = arith.constant 1.000000e+00 : f32
    %102 = vector.broadcast %cst_68 : f32 to vector<8x512xf32>
    %103 = arith.addf %102, %101 : vector<8x512xf32>
    %104 = tpu.reciprocal %103 {approx = true} : vector<8x512xf32> -> vector<8x512xf32>
    %105 = vector.broadcast %7 : vector<8x1xf32> to vector<8x512xf32>
    %106 = arith.mulf %104, %105 : vector<8x512xf32>
    %107 = vector.broadcast %9 : vector<8x1xf32> to vector<8x512xf32>
    %108 = arith.addf %106, %107 : vector<8x512xf32>
    %c0_69 = arith.constant 0 : index
    %c0_70 = arith.constant 0 : index
    %c0_71 = arith.constant 0 : index
    %109 = vector.load %arg9[%c0_69, %c0_70, %c0_71] : memref<1x8x512xf32, #tpu.memory_space<vmem>>, vector<1x8x512xf32>
    %110 = vector.shape_cast %109 : vector<1x8x512xf32> to vector<8x512xf32>
    %111 = vector.shape_cast %108 : vector<8x512xf32> to vector<1x8x512xf32>
    tpu.vector_store %arg9[%c0_69, %c0_70, %c0_71], %111 {strides = array<i32>} : memref<1x8x512xf32, #tpu.memory_space<vmem>>, vector<1x8x512xf32>,
    %c0_i32 = arith.constant 0 : i32
    %112 = arith.cmpi eq, %arg0, %c0_i32 : i32
    %113 = arith.extui %112 : i1 to i32
    %c0_i32_72 = arith.constant 0 : i32
    %114 = arith.cmpi ne, %113, %c0_i32_72 : i32
    scf.if %114 {
      %115 = vector.extract_strided_slice %98 {offsets = [1, 0], sizes = [3, 512], strides = [1, 1]} : vector<8x512xf32> to vector<3x512xf32>
      %cst_73 = arith.constant dense<0xFF800000> : vector<512xf32>
      %116 = vector.multi_reduction <maximumf>, %115, %cst_73 [0] : vector<3x512xf32> to vector<512xf32>
      %117 = vector.shape_cast %116 : vector<512xf32> to vector<1x512xf32>
      %118 = vector.broadcast %117 : vector<1x512xf32> to vector<3x512xf32>
      %119 = arith.subf %115, %118 : vector<3x512xf32>
      %120 = math.exp %119 : vector<3x512xf32>
      %cst_74 = arith.constant dense<0.000000e+00> : vector<512xf32>
      %121 = vector.multi_reduction <add>, %120, %cst_74 [0] : vector<3x512xf32> to vector<512xf32>
      %122 = vector.shape_cast %121 : vector<512xf32> to vector<1x512xf32>
      %123 = tpu.reciprocal %122 {approx = true} : vector<1x512xf32> -> vector<1x512xf32>
      %124 = vector.broadcast %123 : vector<1x512xf32> to vector<3x512xf32>
      %125 = arith.mulf %120, %124 : vector<3x512xf32>
      %c0_75 = arith.constant 0 : index
      %c1_76 = arith.constant 1 : index
      %c0_77 = arith.constant 0 : index
      %126 = vector.load %arg9[%c0_75, %c1_76, %c0_77] : memref<1x8x512xf32, #tpu.memory_space<vmem>>, vector<1x3x512xf32>
      %127 = vector.shape_cast %126 : vector<1x3x512xf32> to vector<3x512xf32>
      %128 = vector.shape_cast %125 : vector<3x512xf32> to vector<1x3x512xf32>
      tpu.vector_store %arg9[%c0_75, %c1_76, %c0_77], %128 {strides = array<i32>} : memref<1x8x512xf32, #tpu.memory_space<vmem>>, vector<1x3x512xf32>,
    } else {
    }
    return
  }
  func.func @transform_0(%arg0: i32) -> (i32, i32) {
    %c0_i32 = arith.constant 0 : i32
    %c0_i32_0 = arith.constant 0 : i32
    %c0_i32_1 = arith.constant 0 : i32
    return %c0_i32, %c0_i32_0 : i32, i32
  }
  func.func @transform_1(%arg0: i32) -> (i32, i32) {
    %c0_i32 = arith.constant 0 : i32
    %c0_i32_0 = arith.constant 0 : i32
    %c0_i32_1 = arith.constant 0 : i32
    return %c0_i32, %c0_i32_0 : i32, i32
  }
  func.func @transform_2(%arg0: i32) -> (i32, i32) {
    %c0_i32 = arith.constant 0 : i32
    %c0_i32_0 = arith.constant 0 : i32
    %c0_i32_1 = arith.constant 0 : i32
    return %c0_i32, %c0_i32_0 : i32, i32
  }
  func.func @transform_3(%arg0: i32) -> (i32, i32, i32) {
    %c0_i32 = arith.constant 0 : i32
    %c0_i32_0 = arith.constant 0 : i32
    %c0_i32_1 = arith.constant 0 : i32
    return %arg0, %c0_i32, %c0_i32_0 : i32, i32, i32
  }
  func.func @transform_4(%arg0: i32) -> (i32, i32, i32) {
    %c0_i32 = arith.constant 0 : i32
    %c0_i32_0 = arith.constant 0 : i32
    %c0_i32_1 = arith.constant 0 : i32
    return %arg0, %c0_i32, %c0_i32_0 : i32, i32, i32
  }
  func.func @transform_5(%arg0: i32) -> (i32, i32, i32) {
    %c0_i32 = arith.constant 0 : i32
    %c0_i32_0 = arith.constant 0 : i32
    %c0_i32_1 = arith.constant 0 : i32
    return %arg0, %c0_i32, %c0_i32_0 : i32, i32, i32
  }
  func.func @transform_6(%arg0: i32) -> (i32, i32, i32) {
    %c0_i32 = arith.constant 0 : i32
    %c0_i32_0 = arith.constant 0 : i32
    %c0_i32_1 = arith.constant 0 : i32
    return %arg0, %c0_i32, %c0_i32_0 : i32, i32, i32
  }
  func.func @transform_7(%arg0: i32) -> (i32, i32, i32) {
    %c0_i32 = arith.constant 0 : i32
    %c0_i32_0 = arith.constant 0 : i32
    %c0_i32_1 = arith.constant 0 : i32
    return %arg0, %c0_i32, %c0_i32_0 : i32, i32, i32
  }
  func.func @transform_8(%arg0: i32) -> (i32, i32, i32) {
    %c0_i32 = arith.constant 0 : i32
    %c0_i32_0 = arith.constant 0 : i32
    %c0_i32_1 = arith.constant 0 : i32
    return %arg0, %c0_i32, %c0_i32_0 : i32, i32, i32
  }
}

</mosaic_0001>

<bundles_post_ra>
// kernel: squeeze.6
= control target key start
LH: loop header
LB: loop body
LE: loop exit
PB: predicated region body
PF: predicated region fallthrough
CT: control target
= control target key end

     0   :  { %vm63_vm0 = vcmask 1047556   ;;  %s436_s14 = smov 112   ;;  %s437_s2 = smov 96   ;;  %vm3_vm1 = vcmask 130048   ;;  %s879_s0 = inlined_call_operand.vmem [shape: f32[1,6,512], index: 0, kind: input, shape index: {}]   ;;  %s880_s1 = inlined_call_operand.vmem [shape: f32[6,2,16,16], index: 1, kind: output, shape index: {}]  }
   0x1   :  { %v60_v0 = vld [vmem:[%s879_s0] ss:$8 sm:$0xf]   ;;  %v352_v1 = vld [vmem:[%s879_s0 - $0x1f] ss:$8 sm:$0xf0]  }
   0x2   :  { %v64_v2 = vsel %vm63_vm0, %v352_v1, %v60_v0  ;;  %v359_v3 = vld [vmem:[%s879_s0 + $0x4] ss:$8 sm:$0xf]   ;;  %v360_v4 = vld [vmem:[%s879_s0 - $0x1b] ss:$8 sm:$0xf0]  }
   0x3   :  { %65 = vrot.lane.b32.xlu0 %v64_v2, %s436_s14  ;;  %v90_v5 = vsel %vm63_vm0, %v360_v4, %v359_v3  ;;  %v355_v6 = vld [vmem:[%s879_s0 + $0x2] ss:$8 sm:$0xf]   ;;  %v356_v7 = vld [vmem:[%s879_s0 - $0x1d] ss:$8 sm:$0xf0]  }
   0x4   :  { %91 = vrot.lane.b32.xlu1 %v90_v5, %s436_s14  ;;  %v77_v8 = vsel %vm63_vm0, %v356_v7, %v355_v6  ;;  %v98_v9 = vld [vmem:[%s879_s0] ss:$8 sm:$0xf]   ;;  %v363_v10 = vld [vmem:[%s879_s0 - $0x1f] ss:$8 sm:$0xf0]  }
   0x5   :  { %v102_v11 = vsel %vm63_vm0, %v363_v10, %v98_v9  ;;  %v366_v12 = vld [vmem:[%s879_s0 + $0x2] ss:$8 sm:$0xf]   ;;  %v367_v13 = vld [vmem:[%s879_s0 - $0x1d] ss:$8 sm:$0xf0]  }
   0x6   :  { %v370_v14 = vld [vmem:[%s879_s0 + $0x4] ss:$8 sm:$0xf]   ;;  %v371_v15 = vld [vmem:[%s879_s0 - $0x1b] ss:$8 sm:$0xf0]   ;;  %v115_v16 = vsel %vm63_vm0, %v367_v13, %v366_v12 }
   0x7   :  { %78 = vrot.lane.b32.xlu0 %v77_v8, %s436_s14  ;;  %v128_v17 = vsel %vm63_vm0, %v371_v15, %v370_v14  ;;  %v136_v18 = vld [vmem:[%s879_s0] ss:$8 sm:$0xf]   ;;  %v374_v19 = vld [vmem:[%s879_s0 - $0x1f] ss:$8 sm:$0xf0]  }
   0x8   :  { %103 = vrot.lane.b32.xlu1 %v102_v11, %s437_s2  ;;  %v377_v20 = vld [vmem:[%s879_s0 + $0x2] ss:$8 sm:$0xf]   ;;  %v378_v21 = vld [vmem:[%s879_s0 - $0x1d] ss:$8 sm:$0xf0]   ;;  %v140_v22 = vsel %vm63_vm0, %v374_v19, %v136_v18 }
   0x9   :  { %v153_v23 = vsel %vm63_vm0, %v378_v21, %v377_v20  ;;  %v381_v24 = vld [vmem:[%s879_s0 + $0x4] ss:$8 sm:$0xf]   ;;  %v382_v25 = vld [vmem:[%s879_s0 - $0x1b] ss:$8 sm:$0xf0]  }
   0xa   :  { %v174_v26 = vld [vmem:[%s879_s0] ss:$8 sm:$0xf]   ;;  %v385_v27 = vld [vmem:[%s879_s0 - $0x1f] ss:$8 sm:$0xf0]   ;;  %v166_v28 = vsel %vm63_vm0, %v382_v25, %v381_v24 }
   0xb   :  { %116 = vrot.lane.b32.xlu0 %v115_v16, %s437_s2  ;;  %s438_s19 = smov 80   ;;  %v178_v29 = vsel %vm63_vm0, %v385_v27, %v174_v26  ;;  %v388_v30 = vld [vmem:[%s879_s0 + $0x2] ss:$8 sm:$0xf]   ;;  %s439_s28 = smov 64  }
   0xc   :  { %129 = vrot.lane.b32.xlu1 %v128_v17, %s437_s2  ;;  %v389_v31 = vld [vmem:[%s879_s0 - $0x1d] ss:$8 sm:$0xf0]   ;;  %v392_v32 = vld [vmem:[%s879_s0 + $0x4] ss:$8 sm:$0xf]  }
   0xd   :  { %v393_v33 = vld [vmem:[%s879_s0 - $0x1b] ss:$8 sm:$0xf0]   ;;  %v191_v34 = vsel %vm63_vm0, %v389_v31, %v388_v30  ;;  %v212_v36 = vld [vmem:[%s879_s0] ss:$8 sm:$0xf]  }
   0xe   :  { %v204_v35 = vsel %vm63_vm0, %v393_v33, %v392_v32  ;;  %v396_v37 = vld [vmem:[%s879_s0 - $0x1f] ss:$8 sm:$0xf0]   ;;  %v399_v38 = vld [vmem:[%s879_s0 + $0x2] ss:$8 sm:$0xf]  }
   0xf   :  { %141 = vrot.lane.b32.xlu0 %v140_v22, %s438_s19  ;;  %v400_v39 = vld [vmem:[%s879_s0 - $0x1d] ss:$8 sm:$0xf0]   ;;  %v216_v40 = vsel %vm63_vm0, %v396_v37, %v212_v36  ;;  %v403_v42 = vld [vmem:[%s879_s0 + $0x4] ss:$8 sm:$0xf]  }
  0x10   :  { %154 = vrot.lane.b32.xlu1 %v153_v23, %s438_s19  ;;  %v229_v41 = vsel %vm63_vm0, %v400_v39, %v399_v38  ;;  %v404_v43 = vld [vmem:[%s879_s0 - $0x1b] ss:$8 sm:$0xf0]   ;;  %v250_v44 = vld [vmem:[%s879_s0] ss:$8 sm:$0xf]  }
  0x11   :  { %v407_v45 = vld [vmem:[%s879_s0 - $0x1f] ss:$8 sm:$0xf0]   ;;  %s440_s16 = smov 48   ;;  %v242_v47 = vsel %vm63_vm0, %v404_v43, %v403_v42  ;;  %s441_s24 = smov 32  }
  0x12   :  { %v410_v46 = vld [vmem:[%s879_s0 + $0x2] ss:$8 sm:$0xf]   ;;  %v411_v48 = vld [vmem:[%s879_s0 - $0x1d] ss:$8 sm:$0xf0]   ;;  %v254_v50 = vsel %vm63_vm0, %v407_v45, %v250_v44 }
  0x13   :  { %167 = vrot.lane.b32.xlu0 %v166_v28, %s438_s19  ;;  %v414_v49 = vld [vmem:[%s879_s0 + $0x4] ss:$8 sm:$0xf]   ;;  %v415_v54 = vld [vmem:[%s879_s0 - $0x1b] ss:$8 sm:$0xf0]   ;;  %v267_v56 = vsel %vm63_vm0, %v411_v48, %v410_v46 }
  0x14   :  { %179 = vrot.lane.b32.xlu1 %v178_v29, %s439_s28  ;;  %v2_v51 = vld [vmem:[%s879_s0] sm:$0x3f]   ;;  %v331_v52 = vld [vmem:[%s879_s0 + $0x8] sm:$0x3f]   ;;  %v338_v53 = vld [vmem:[%s879_s0 + $0x10] sm:$0x3f]   ;;  %v280_v57 = vsel %vm63_vm0, %v415_v54, %v414_v49 }
  0x15   :  { %4 = vst.msk [vmem:[%s880_s1] sm:$0x1] %vm3_vm1, %v2_v51   ;;  %326 = vst.msk [vmem:[%s880_s1 + $0x1f] sm:$0x2] %vm3_vm1, %v2_v51   ;;  %v345_v55 = vld [vmem:[%s879_s0 + $0x18] sm:$0x3f]  }
  0x16   :  { %327 = vst.msk [vmem:[%s880_s1 + $0x3e] sm:$0x4] %vm3_vm1, %v2_v51   ;;  %328 = vst.msk [vmem:[%s880_s1 + $0x5d] sm:$0x8] %vm3_vm1, %v2_v51  }
  0x17   :  { %192 = vrot.lane.b32.xlu0 %v191_v34, %s439_s28  ;;  %329 = vst.msk [vmem:[%s880_s1 + $0x7c] sm:$0x10] %vm3_vm1, %v2_v51   ;;  %330 = vst.msk [vmem:[%s880_s1 + $0x9b] sm:$0x20] %vm3_vm1, %v2_v51  }
  0x18   :  { %205 = vrot.lane.b32.xlu1 %v204_v35, %s439_s28  ;;  %332 = vst.msk [vmem:[%s880_s1 + $0x8] sm:$0x1] %vm3_vm1, %v331_v52   ;;  %333 = vst.msk [vmem:[%s880_s1 + $0x27] sm:$0x2] %vm3_vm1, %v331_v52  }
  0x19   :  { %334 = vst.msk [vmem:[%s880_s1 + $0x46] sm:$0x4] %vm3_vm1, %v331_v52   ;;  %335 = vst.msk [vmem:[%s880_s1 + $0x65] sm:$0x8] %vm3_vm1, %v331_v52  }
  0x1a   :  { %336 = vst.msk [vmem:[%s880_s1 + $0x84] sm:$0x10] %vm3_vm1, %v331_v52   ;;  %337 = vst.msk [vmem:[%s880_s1 + $0xa3] sm:$0x20] %vm3_vm1, %v331_v52  }
  0x1b   :  { %217 = vrot.lane.b32.xlu0 %v216_v40, %s440_s16  ;;  %339 = vst.msk [vmem:[%s880_s1 + $0x10] sm:$0x1] %vm3_vm1, %v338_v53   ;;  %340 = vst.msk [vmem:[%s880_s1 + $0x2f] sm:$0x2] %vm3_vm1, %v338_v53  }
  0x1c   :  { %230 = vrot.lane.b32.xlu1 %v229_v41, %s440_s16  ;;  %341 = vst.msk [vmem:[%s880_s1 + $0x4e] sm:$0x4] %vm3_vm1, %v338_v53   ;;  %342 = vst.msk [vmem:[%s880_s1 + $0x6d] sm:$0x8] %vm3_vm1, %v338_v53  }
  0x1d   :  { %343 = vst.msk [vmem:[%s880_s1 + $0x8c] sm:$0x10] %vm3_vm1, %v338_v53   ;;  %344 = vst.msk [vmem:[%s880_s1 + $0xab] sm:$0x20] %vm3_vm1, %v338_v53  }
  0x1e   :  { %346 = vst.msk [vmem:[%s880_s1 + $0x18] sm:$0x1] %vm3_vm1, %v345_v55   ;;  %347 = vst.msk [vmem:[%s880_s1 + $0x37] sm:$0x2] %vm3_vm1, %v345_v55  }
  0x1f   :  { %243 = vrot.lane.b32.xlu0 %v242_v47, %s440_s16  ;;  %348 = vst.msk [vmem:[%s880_s1 + $0x56] sm:$0x4] %vm3_vm1, %v345_v55   ;;  %349 = vst.msk [vmem:[%s880_s1 + $0x75] sm:$0x8] %vm3_vm1, %v345_v55  }
  0x20   :  { %350 = vst.msk [vmem:[%s880_s1 + $0x94] sm:$0x10] %vm3_vm1, %v345_v55   ;;  %351 = vst.msk [vmem:[%s880_s1 + $0xb3] sm:$0x20] %vm3_vm1, %v345_v55   ;;  %255 = vrot.lane.b32.xlu1 %v254_v50, %s441_s24 }
  0x21   :  { %v288_v58 = vld [vmem:[%s879_s0] ss:$8 sm:$0xf]   ;;  %v418_v59 = vld [vmem:[%s879_s0 - $0x1f] ss:$8 sm:$0xf0]  }
  0x22   :  { %v421_v60 = vld [vmem:[%s879_s0 + $0x2] ss:$8 sm:$0xf]   ;;  %v422_v61 = vld [vmem:[%s879_s0 - $0x1d] ss:$8 sm:$0xf0]   ;;  %v292_v62 = vsel %vm63_vm0, %v418_v59, %v288_v58 }
  0x23   :  { %268 = vrot.lane.b32.xlu0 %v267_v56, %s441_s24  ;;  %v305_v63 = vsel %vm63_vm0, %v422_v61, %v421_v60  ;;  %v425_v0 = vld [vmem:[%s879_s0 + $0x4] ss:$8 sm:$0xf]   ;;  %v426_v1 = vld [vmem:[%s879_s0 - $0x1b] ss:$8 sm:$0xf0]  }
  0x24   :  { %281 = vrot.lane.b32.xlu1 %v280_v57, %s441_s24  ;;  %s442_s0 = smov 16   ;;  %v318_v2 = vsel %vm63_vm0, %v426_v1, %v425_v0 }
  0x27   :  { %293 = vrot.lane.b32.xlu0 %v292_v62, %s442_s0 }
  0x28   :  { %306 = vrot.lane.b32.xlu1 %v305_v63, %s442_s0 }
  0x2b   :  { %319 = vrot.lane.b32.xlu0 %v318_v2, %s442_s0 }
  0x75   :  { %v66_v3 = vpop.permute.xlu0 %65  }
  0x76   :  { %353 = vst.msk [vmem:[%s880_s1 + $0x1] ss:$8 sm:$0xf] %vm3_vm1, %v66_v3   ;;  %354 = vst.msk [vmem:[%s880_s1 + $0x1] ss:$8 sm:$0xf0] %vm3_vm1, %v66_v3   ;;  %v92_v4 = vpop.permute.xlu1 %91  }
  0x77   :  { %361 = vst.msk [vmem:[%s880_s1 + $0x81] ss:$8 sm:$0xf] %vm3_vm1, %v92_v4   ;;  %362 = vst.msk [vmem:[%s880_s1 + $0x81] ss:$8 sm:$0xf0] %vm3_vm1, %v92_v4  }
  0x79   :  { %v79_v5 = vpop.permute.xlu0 %78  }
  0x7a   :  { %357 = vst.msk [vmem:[%s880_s1 + $0x41] ss:$8 sm:$0xf] %vm3_vm1, %v79_v5   ;;  %358 = vst.msk [vmem:[%s880_s1 + $0x41] ss:$8 sm:$0xf0] %vm3_vm1, %v79_v5   ;;  %v104_v6 = vpop.permute.xlu1 %103  }
  0x7b   :  { %364 = vst.msk [vmem:[%s880_s1 + $0x2] ss:$8 sm:$0xf] %vm3_vm1, %v104_v6   ;;  %365 = vst.msk [vmem:[%s880_s1 + $0x2] ss:$8 sm:$0xf0] %vm3_vm1, %v104_v6  }
  0x7d   :  { %v117_v7 = vpop.permute.xlu0 %116  }
  0x7e   :  { %368 = vst.msk [vmem:[%s880_s1 + $0x42] ss:$8 sm:$0xf] %vm3_vm1, %v117_v7   ;;  %369 = vst.msk [vmem:[%s880_s1 + $0x42] ss:$8 sm:$0xf0] %vm3_vm1, %v117_v7   ;;  %v130_v8 = vpop.permute.xlu1 %129  }
  0x7f   :  { %372 = vst.msk [vmem:[%s880_s1 + $0x82] ss:$8 sm:$0xf] %vm3_vm1, %v130_v8   ;;  %373 = vst.msk [vmem:[%s880_s1 + $0x82] ss:$8 sm:$0xf0] %vm3_vm1, %v130_v8  }
  0x81   :  { %v142_v9 = vpop.permute.xlu0 %141  }
  0x82   :  { %375 = vst.msk [vmem:[%s880_s1 + $0x3] ss:$8 sm:$0xf] %vm3_vm1, %v142_v9   ;;  %376 = vst.msk [vmem:[%s880_s1 + $0x3] ss:$8 sm:$0xf0] %vm3_vm1, %v142_v9   ;;  %v155_v10 = vpop.permute.xlu1 %154  }
  0x83   :  { %379 = vst.msk [vmem:[%s880_s1 + $0x43] ss:$8 sm:$0xf] %vm3_vm1, %v155_v10   ;;  %380 = vst.msk [vmem:[%s880_s1 + $0x43] ss:$8 sm:$0xf0] %vm3_vm1, %v155_v10  }
  0x85   :  { %v168_v11 = vpop.permute.xlu0 %167  }
  0x86   :  { %383 = vst.msk [vmem:[%s880_s1 + $0x83] ss:$8 sm:$0xf] %vm3_vm1, %v168_v11   ;;  %384 = vst.msk [vmem:[%s880_s1 + $0x83] ss:$8 sm:$0xf0] %vm3_vm1, %v168_v11   ;;  %v180_v12 = vpop.permute.xlu1 %179  }
  0x87   :  { %386 = vst.msk [vmem:[%s880_s1 + $0x4] ss:$8 sm:$0xf] %vm3_vm1, %v180_v12   ;;  %387 = vst.msk [vmem:[%s880_s1 + $0x4] ss:$8 sm:$0xf0] %vm3_vm1, %v180_v12  }
  0x89   :  { %v193_v13 = vpop.permute.xlu0 %192  }
  0x8a   :  { %390 = vst.msk [vmem:[%s880_s1 + $0x44] ss:$8 sm:$0xf] %vm3_vm1, %v193_v13   ;;  %391 = vst.msk [vmem:[%s880_s1 + $0x44] ss:$8 sm:$0xf0] %vm3_vm1, %v193_v13   ;;  %v206_v14 = vpop.permute.xlu1 %205  }
  0x8b   :  { %394 = vst.msk [vmem:[%s880_s1 + $0x84] ss:$8 sm:$0xf] %vm3_vm1, %v206_v14   ;;  %395 = vst.msk [vmem:[%s880_s1 + $0x84] ss:$8 sm:$0xf0] %vm3_vm1, %v206_v14  }
  0x8d   :  { %v218_v15 = vpop.permute.xlu0 %217  }
  0x8e   :  { %397 = vst.msk [vmem:[%s880_s1 + $0x5] ss:$8 sm:$0xf] %vm3_vm1, %v218_v15   ;;  %398 = vst.msk [vmem:[%s880_s1 + $0x5] ss:$8 sm:$0xf0] %vm3_vm1, %v218_v15   ;;  %v231_v16 = vpop.permute.xlu1 %230  }
  0x8f   :  { %401 = vst.msk [vmem:[%s880_s1 + $0x45] ss:$8 sm:$0xf] %vm3_vm1, %v231_v16   ;;  %402 = vst.msk [vmem:[%s880_s1 + $0x45] ss:$8 sm:$0xf0] %vm3_vm1, %v231_v16  }
  0x91   :  { %v244_v17 = vpop.permute.xlu0 %243  }
  0x92   :  { %405 = vst.msk [vmem:[%s880_s1 + $0x85] ss:$8 sm:$0xf] %vm3_vm1, %v244_v17   ;;  %406 = vst.msk [vmem:[%s880_s1 + $0x85] ss:$8 sm:$0xf0] %vm3_vm1, %v244_v17   ;;  %v256_v18 = vpop.permute.xlu1 %255  }
  0x93   :  { %408 = vst.msk [vmem:[%s880_s1 + $0x6] ss:$8 sm:$0xf] %vm3_vm1, %v256_v18   ;;  %409 = vst.msk [vmem:[%s880_s1 + $0x6] ss:$8 sm:$0xf0] %vm3_vm1, %v256_v18  }
  0x95   :  { %v269_v19 = vpop.permute.xlu0 %268  }
  0x96   :  { %412 = vst.msk [vmem:[%s880_s1 + $0x46] ss:$8 sm:$0xf] %vm3_vm1, %v269_v19   ;;  %413 = vst.msk [vmem:[%s880_s1 + $0x46] ss:$8 sm:$0xf0] %vm3_vm1, %v269_v19   ;;  %v282_v20 = vpop.permute.xlu1 %281  }
  0x97   :  { %416 = vst.msk [vmem:[%s880_s1 + $0x86] ss:$8 sm:$0xf] %vm3_vm1, %v282_v20   ;;  %417 = vst.msk [vmem:[%s880_s1 + $0x86] ss:$8 sm:$0xf0] %vm3_vm1, %v282_v20  }
  0x99   :  { %v294_v21 = vpop.permute.xlu0 %293  }
  0x9a   :  { %419 = vst.msk [vmem:[%s880_s1 + $0x7] ss:$8 sm:$0xf] %vm3_vm1, %v294_v21   ;;  %420 = vst.msk [vmem:[%s880_s1 + $0x7] ss:$8 sm:$0xf0] %vm3_vm1, %v294_v21   ;;  %v307_v22 = vpop.permute.xlu1 %306  }
  0x9b   :  { %423 = vst.msk [vmem:[%s880_s1 + $0x47] ss:$8 sm:$0xf] %vm3_vm1, %v307_v22   ;;  %424 = vst.msk [vmem:[%s880_s1 + $0x47] ss:$8 sm:$0xf0] %vm3_vm1, %v307_v22  }
  0x9d   :  { %v320_v23 = vpop.permute.xlu0 %319  }
  0x9e   :  { %427 = vst.msk [vmem:[%s880_s1 + $0x87] ss:$8 sm:$0xf] %vm3_vm1, %v320_v23   ;;  %428 = vst.msk [vmem:[%s880_s1 + $0x87] ss:$8 sm:$0xf0] %vm3_vm1, %v320_v23  }

// kernel: squeeze.5
= control target key start
LH: loop header
LB: loop body
LE: loop exit
PB: predicated region body
PF: predicated region fallthrough
CT: control target
= control target key end

     0   :  { %vm57_vm0 = vcmask 1047556   ;;  %s232_s14 = smov 112   ;;  %s233_s15 = smov 80   ;;  %vm21_vm1 = vcmask 130048   ;;  %s399_s0 = inlined_call_operand.vmem [shape: f32[1,3,512], index: 0, kind: input, shape index: {}]   ;;  %s400_s1 = inlined_call_operand.vmem [shape: f32[3,2,16,16], index: 1, kind: output, shape index: {}]  }
   0x1   :  { %v189_v0 = vld [vmem:[%s399_s0 + $0xc] sm:$0xf]  ;;  %v190_v1 = vld [vmem:[%s399_s0 + $0x8] sm:$0xf]  ;;  %v191_v2 = vld [vmem:[%s399_s0 + $0x4] sm:$0xf] }
   0x2   :  { %8 = vst [vmem:[#allocation0 + $0x18] sm:$0xf] %v189_v0  ;;  %13 = vst [vmem:[#allocation0 + $0x10] sm:$0xf] %v190_v1  ;;  %v18_v3 = vld [vmem:[%s399_s0] sm:$0xf] }
   0x3   :  { %17 = vst [vmem:[#allocation0 + $0x8] sm:$0xf] %v191_v2  ;;  %19 = vst [vmem:[#allocation0] sm:$0xf] %v18_v3  ;;  %s231_s0 = smov 96   ;;  %s234_s5 = smov 64  }
   0x4   :  { %s235_s12 = smov 48   ;;  %s236_s13 = smov 32  }
   0x9   :  { %v37_v24 = vld [vmem:[#allocation0 + $0x10] sm:$0x7]   ;;  %v46_v25 = vld [vmem:[#allocation0 + $0x18] sm:$0x7]  }
   0xa   :  { %v86_v4 = vld [vmem:[#allocation0 + $0x2] ss:$8 sm:$0xf]   ;;  %v54_v7 = vld [vmem:[#allocation0] ss:$8 sm:$0xf]  }
   0xb   :  { %v67_v5 = vld [vmem:[#allocation0 + $0x2] ss:$8 sm:$0xf]   ;;  %87 = vrot.lane.b32.xlu1 %v86_v4, %s231_s0  ;;  %v56_v8 = vld [vmem:[#allocation0 - $0x1f] ss:$8 sm:$0xf0]  }
   0xc   :  { %68 = vrot.lane.b32.xlu0 %v67_v5, %s232_s14  ;;  %v105_v6 = vld [vmem:[#allocation0 + $0x2] ss:$8 sm:$0xf]   ;;  %v73_v9 = vld [vmem:[#allocation0] ss:$8 sm:$0xf]   ;;  %v58_v10 = vsel %vm57_vm0, %v56_v8, %v54_v7 }
   0xd   :  { %v75_v11 = vld [vmem:[#allocation0 - $0x1f] ss:$8 sm:$0xf0]   ;;  %v92_v12 = vld [vmem:[#allocation0] ss:$8 sm:$0xf]  }
   0xe   :  { %v94_v13 = vld [vmem:[#allocation0 - $0x1f] ss:$8 sm:$0xf0]   ;;  %v77_v14 = vsel %vm57_vm0, %v75_v11, %v73_v9  ;;  %v111_v16 = vld [vmem:[#allocation0] ss:$8 sm:$0xf]  }
   0xf   :  { %106 = vrot.lane.b32.xlu1 %v105_v6, %s233_s15  ;;  %v96_v15 = vsel %vm57_vm0, %v94_v13, %v92_v12  ;;  %v113_v17 = vld [vmem:[#allocation0 - $0x1f] ss:$8 sm:$0xf0]   ;;  %v124_v18 = vld [vmem:[#allocation0 + $0x2] ss:$8 sm:$0xf]  }
  0x10   :  { %59 = vrot.lane.b32.xlu0 %v58_v10, %s232_s14  ;;  %v115_v19 = vsel %vm57_vm0, %v113_v17, %v111_v16  ;;  %v130_v20 = vld [vmem:[#allocation0] ss:$8 sm:$0xf]   ;;  %v132_v21 = vld [vmem:[#allocation0 - $0x1f] ss:$8 sm:$0xf0]  }
  0x11   :  { %v20_v22 = vld [vmem:[#allocation0] sm:$0x7]   ;;  %v28_v23 = vld [vmem:[#allocation0 + $0x8] sm:$0x7]   ;;  %197 = vst.msk [vmem:[%s400_s1 + $0x10] sm:$0x1] %vm21_vm1, %v37_v24   ;;  %v134_v27 = vsel %vm57_vm0, %v132_v21, %v130_v20 }
  0x12   :  { %22 = vst.msk [vmem:[%s400_s1] sm:$0x1] %vm21_vm1, %v20_v22   ;;  %192 = vst.msk [vmem:[%s400_s1 + $0x1f] sm:$0x2] %vm21_vm1, %v20_v22  }
  0x13   :  { %78 = vrot.lane.b32.xlu1 %v77_v14, %s231_s0  ;;  %193 = vst.msk [vmem:[%s400_s1 + $0x3e] sm:$0x4] %vm21_vm1, %v20_v22   ;;  %194 = vst.msk [vmem:[%s400_s1 + $0x8] sm:$0x1] %vm21_vm1, %v28_v23   ;;  %s237_s0 = smov 16  }
  0x14   :  { %97 = vrot.lane.b32.xlu0 %v96_v15, %s233_s15  ;;  %195 = vst.msk [vmem:[%s400_s1 + $0x27] sm:$0x2] %vm21_vm1, %v28_v23   ;;  %196 = vst.msk [vmem:[%s400_s1 + $0x46] sm:$0x4] %vm21_vm1, %v28_v23  }
  0x15   :  { %198 = vst.msk [vmem:[%s400_s1 + $0x2f] sm:$0x2] %vm21_vm1, %v37_v24   ;;  %199 = vst.msk [vmem:[%s400_s1 + $0x4e] sm:$0x4] %vm21_vm1, %v37_v24  }
  0x16   :  { %200 = vst.msk [vmem:[%s400_s1 + $0x18] sm:$0x1] %vm21_vm1, %v46_v25   ;;  %201 = vst.msk [vmem:[%s400_s1 + $0x37] sm:$0x2] %vm21_vm1, %v46_v25  }
  0x17   :  { %125 = vrot.lane.b32.xlu1 %v124_v18, %s234_s5  ;;  %202 = vst.msk [vmem:[%s400_s1 + $0x56] sm:$0x4] %vm21_vm1, %v46_v25   ;;  %v143_v26 = vld [vmem:[#allocation0 + $0x2] ss:$8 sm:$0xf]  }
  0x18   :  { %116 = vrot.lane.b32.xlu0 %v115_v19, %s234_s5  ;;  %v149_v28 = vld [vmem:[#allocation0] ss:$8 sm:$0xf]   ;;  %v151_v29 = vld [vmem:[#allocation0 - $0x1f] ss:$8 sm:$0xf0]  }
  0x19   :  { %v162_v30 = vld [vmem:[#allocation0 + $0x2] ss:$8 sm:$0xf]   ;;  %v153_v31 = vsel %vm57_vm0, %v151_v29, %v149_v28  ;;  %v168_v32 = vld [vmem:[#allocation0] ss:$8 sm:$0xf]  }
  0x1a   :  { %v170_v33 = vld [vmem:[#allocation0 - $0x1f] ss:$8 sm:$0xf0]   ;;  %v181_v34 = vld [vmem:[#allocation0 + $0x2] ss:$8 sm:$0xf]  }
  0x1b   :  { %144 = vrot.lane.b32.xlu1 %v143_v26, %s235_s12  ;;  %v172_v35 = vsel %vm57_vm0, %v170_v33, %v168_v32 }
  0x1c   :  { %135 = vrot.lane.b32.xlu0 %v134_v27, %s235_s12 }
  0x1f   :  { %163 = vrot.lane.b32.xlu1 %v162_v30, %s236_s13 }
  0x20   :  { %154 = vrot.lane.b32.xlu0 %v153_v31, %s236_s13 }
  0x23   :  { %182 = vrot.lane.b32.xlu1 %v181_v34, %s237_s0 }
  0x24   :  { %173 = vrot.lane.b32.xlu0 %v172_v35, %s237_s0 }
  0x7d   :  { %v88_v36 = vpop.permute.xlu1 %87  }
  0x7e   :  { %v69_v37 = vpop.permute.xlu0 %68   ;;  %208 = vst.msk [vmem:[%s400_s1 + $0x42] ss:$8 sm:$0xf] %vm21_vm1, %v88_v36  }
  0x7f   :  { %205 = vst.msk [vmem:[%s400_s1 + $0x41] ss:$8 sm:$0xf] %vm21_vm1, %v69_v37  }
  0x81   :  { %v107_v38 = vpop.permute.xlu1 %106  }
  0x82   :  { %v60_v39 = vpop.permute.xlu0 %59   ;;  %211 = vst.msk [vmem:[%s400_s1 + $0x43] ss:$8 sm:$0xf] %vm21_vm1, %v107_v38  }
  0x83   :  { %203 = vst.msk [vmem:[%s400_s1 + $0x1] ss:$8 sm:$0xf] %vm21_vm1, %v60_v39   ;;  %204 = vst.msk [vmem:[%s400_s1 + $0x1] ss:$8 sm:$0xf0] %vm21_vm1, %v60_v39  }
  0x85   :  { %v79_v40 = vpop.permute.xlu1 %78  }
  0x86   :  { %v98_v41 = vpop.permute.xlu0 %97   ;;  %206 = vst.msk [vmem:[%s400_s1 + $0x2] ss:$8 sm:$0xf] %vm21_vm1, %v79_v40   ;;  %207 = vst.msk [vmem:[%s400_s1 + $0x2] ss:$8 sm:$0xf0] %vm21_vm1, %v79_v40  }
  0x87   :  { %209 = vst.msk [vmem:[%s400_s1 + $0x3] ss:$8 sm:$0xf] %vm21_vm1, %v98_v41   ;;  %210 = vst.msk [vmem:[%s400_s1 + $0x3] ss:$8 sm:$0xf0] %vm21_vm1, %v98_v41  }
  0x89   :  { %v126_v42 = vpop.permute.xlu1 %125  }
  0x8a   :  { %v117_v43 = vpop.permute.xlu0 %116   ;;  %214 = vst.msk [vmem:[%s400_s1 + $0x44] ss:$8 sm:$0xf] %vm21_vm1, %v126_v42  }
  0x8b   :  { %212 = vst.msk [vmem:[%s400_s1 + $0x4] ss:$8 sm:$0xf] %vm21_vm1, %v117_v43   ;;  %213 = vst.msk [vmem:[%s400_s1 + $0x4] ss:$8 sm:$0xf0] %vm21_vm1, %v117_v43  }
  0x8d   :  { %v145_v44 = vpop.permute.xlu1 %144  }
  0x8e   :  { %v136_v45 = vpop.permute.xlu0 %135   ;;  %217 = vst.msk [vmem:[%s400_s1 + $0x45] ss:$8 sm:$0xf] %vm21_vm1, %v145_v44  }
  0x8f   :  { %215 = vst.msk [vmem:[%s400_s1 + $0x5] ss:$8 sm:$0xf] %vm21_vm1, %v136_v45   ;;  %216 = vst.msk [vmem:[%s400_s1 + $0x5] ss:$8 sm:$0xf0] %vm21_vm1, %v136_v45  }
  0x91   :  { %v164_v46 = vpop.permute.xlu1 %163  }
  0x92   :  { %v155_v47 = vpop.permute.xlu0 %154   ;;  %220 = vst.msk [vmem:[%s400_s1 + $0x46] ss:$8 sm:$0xf] %vm21_vm1, %v164_v46  }
  0x93   :  { %218 = vst.msk [vmem:[%s400_s1 + $0x6] ss:$8 sm:$0xf] %vm21_vm1, %v155_v47   ;;  %219 = vst.msk [vmem:[%s400_s1 + $0x6] ss:$8 sm:$0xf0] %vm21_vm1, %v155_v47  }
  0x95   :  { %v183_v48 = vpop.permute.xlu1 %182  }
  0x96   :  { %v174_v49 = vpop.permute.xlu0 %173   ;;  %223 = vst.msk [vmem:[%s400_s1 + $0x47] ss:$8 sm:$0xf] %vm21_vm1, %v183_v48  }
  0x97   :  { %221 = vst.msk [vmem:[%s400_s1 + $0x7] ss:$8 sm:$0xf] %vm21_vm1, %v174_v49   ;;  %222 = vst.msk [vmem:[%s400_s1 + $0x7] ss:$8 sm:$0xf0] %vm21_vm1, %v174_v49  }

// kernel: squeeze.7
= control target key start
LH: loop header
LB: loop body
LE: loop exit
PB: predicated region body
PF: predicated region fallthrough
CT: control target
= control target key end

     0   :  { %vm49_vm0 = vcmask 1047556   ;;  %s164_s14 = smov 80   ;;  %s165_s15 = smov 96   ;;  %vm21_vm1 = vcmask 130048   ;;  %s287_s0 = inlined_call_operand.vmem [shape: f32[1,2,512], index: 0, kind: input, shape index: {}]   ;;  %s288_s1 = inlined_call_operand.vmem [shape: f32[2,2,16,16], index: 1, kind: output, shape index: {}]  }
   0x1   :  { %v132_v0 = vld [vmem:[%s287_s0 + $0x6] sm:$0x3]  ;;  %v133_v1 = vld [vmem:[%s287_s0 + $0x4] sm:$0x3]  ;;  %v134_v2 = vld [vmem:[%s287_s0 + $0x2] sm:$0x3] }
   0x2   :  { %8 = vst [vmem:[#allocation0 + $0x18] sm:$0x3] %v132_v0  ;;  %13 = vst [vmem:[#allocation0 + $0x10] sm:$0x3] %v133_v1  ;;  %v18_v3 = vld [vmem:[%s287_s0] sm:$0x3] }
   0x3   :  { %17 = vst [vmem:[#allocation0 + $0x8] sm:$0x3] %v134_v2  ;;  %19 = vst [vmem:[#allocation0] sm:$0x3] %v18_v3  ;;  %s163_s0 = smov 112   ;;  %s166_s16 = smov 64  }
   0x4   :  { %s167_s4 = smov 48   ;;  %s168_s5 = smov 32  }
   0x5   :  { %s169_s6 = smov 16  }
   0x9   :  { %v33_v24 = vld [vmem:[#allocation0 + $0x10] sm:$0x3]   ;;  %v40_v27 = vld [vmem:[#allocation0 + $0x18] sm:$0x3]  }
   0xa   :  { %v46_v4 = vld [vmem:[#allocation0] ss:$8 sm:$0xf]   ;;  %v48_v5 = vld [vmem:[#allocation0 - $0x1f] ss:$8 sm:$0xf0]  }
   0xb   :  { %v50_v6 = vsel %vm49_vm0, %v48_v5, %v46_v4  ;;  %v70_v7 = vld [vmem:[#allocation0] ss:$8 sm:$0xf]   ;;  %v72_v8 = vld [vmem:[#allocation0 - $0x1f] ss:$8 sm:$0xf0]  }
   0xc   :  { %51 = vrot.lane.b32.xlu0 %v50_v6, %s163_s0  ;;  %v74_v9 = vsel %vm49_vm0, %v72_v8, %v70_v7  ;;  %v58_v10 = vld [vmem:[#allocation0] ss:$8 sm:$0xf]   ;;  %v60_v11 = vld [vmem:[#allocation0 - $0x1f] ss:$8 sm:$0xf0]  }
   0xd   :  { %75 = vrot.lane.b32.xlu1 %v74_v9, %s164_s14  ;;  %v62_v12 = vsel %vm49_vm0, %v60_v11, %v58_v10  ;;  %v82_v13 = vld [vmem:[#allocation0] ss:$8 sm:$0xf]   ;;  %v84_v14 = vld [vmem:[#allocation0 - $0x1f] ss:$8 sm:$0xf0]  }
   0xe   :  { %v86_v15 = vsel %vm49_vm0, %v84_v14, %v82_v13  ;;  %v94_v16 = vld [vmem:[#allocation0] ss:$8 sm:$0xf]   ;;  %v96_v17 = vld [vmem:[#allocation0 - $0x1f] ss:$8 sm:$0xf0]  }
   0xf   :  { %v106_v18 = vld [vmem:[#allocation0] ss:$8 sm:$0xf]   ;;  %v108_v19 = vld [vmem:[#allocation0 - $0x1f] ss:$8 sm:$0xf0]   ;;  %v98_v21 = vsel %vm49_vm0, %v96_v17, %v94_v16 }
  0x10   :  { %63 = vrot.lane.b32.xlu0 %v62_v12, %s165_s15  ;;  %v118_v20 = vld [vmem:[#allocation0] ss:$8 sm:$0xf]   ;;  %v110_v25 = vsel %vm49_vm0, %v108_v19, %v106_v18  ;;  %v120_v26 = vld [vmem:[#allocation0 - $0x1f] ss:$8 sm:$0xf0]  }
  0x11   :  { %87 = vrot.lane.b32.xlu1 %v86_v15, %s166_s16  ;;  %v20_v22 = vld [vmem:[#allocation0] sm:$0x3]   ;;  %v26_v23 = vld [vmem:[#allocation0 + $0x8] sm:$0x3]   ;;  %138 = vst.msk [vmem:[%s288_s1 + $0x10] sm:$0x1] %vm21_vm1, %v33_v24   ;;  %v122_v28 = vsel %vm49_vm0, %v120_v26, %v118_v20 }
  0x12   :  { %22 = vst.msk [vmem:[%s288_s1] sm:$0x1] %vm21_vm1, %v20_v22   ;;  %135 = vst.msk [vmem:[%s288_s1 + $0x1f] sm:$0x2] %vm21_vm1, %v20_v22  }
  0x13   :  { %136 = vst.msk [vmem:[%s288_s1 + $0x8] sm:$0x1] %vm21_vm1, %v26_v23   ;;  %137 = vst.msk [vmem:[%s288_s1 + $0x27] sm:$0x2] %vm21_vm1, %v26_v23  }
  0x14   :  { %139 = vst.msk [vmem:[%s288_s1 + $0x2f] sm:$0x2] %vm21_vm1, %v33_v24   ;;  %140 = vst.msk [vmem:[%s288_s1 + $0x18] sm:$0x1] %vm21_vm1, %v40_v27   ;;  %99 = vrot.lane.b32.xlu0 %v98_v21, %s167_s4 }
  0x15   :  { %141 = vst.msk [vmem:[%s288_s1 + $0x37] sm:$0x2] %vm21_vm1, %v40_v27   ;;  %111 = vrot.lane.b32.xlu1 %v110_v25, %s168_s5 }
  0x18   :  { %123 = vrot.lane.b32.xlu0 %v122_v28, %s169_s6 }
  0x7e   :  { %v52_v29 = vpop.permute.xlu0 %51  }
  0x7f   :  { %142 = vst.msk [vmem:[%s288_s1 + $0x1] ss:$8 sm:$0xf] %vm21_vm1, %v52_v29   ;;  %143 = vst.msk [vmem:[%s288_s1 + $0x1] ss:$8 sm:$0xf0] %vm21_vm1, %v52_v29   ;;  %v76_v30 = vpop.permute.xlu1 %75  }
  0x80   :  { %146 = vst.msk [vmem:[%s288_s1 + $0x3] ss:$8 sm:$0xf] %vm21_vm1, %v76_v30   ;;  %147 = vst.msk [vmem:[%s288_s1 + $0x3] ss:$8 sm:$0xf0] %vm21_vm1, %v76_v30  }
  0x82   :  { %v64_v31 = vpop.permute.xlu0 %63  }
  0x83   :  { %144 = vst.msk [vmem:[%s288_s1 + $0x2] ss:$8 sm:$0xf] %vm21_vm1, %v64_v31   ;;  %145 = vst.msk [vmem:[%s288_s1 + $0x2] ss:$8 sm:$0xf0] %vm21_vm1, %v64_v31   ;;  %v88_v32 = vpop.permute.xlu1 %87  }
  0x84   :  { %148 = vst.msk [vmem:[%s288_s1 + $0x4] ss:$8 sm:$0xf] %vm21_vm1, %v88_v32   ;;  %149 = vst.msk [vmem:[%s288_s1 + $0x4] ss:$8 sm:$0xf0] %vm21_vm1, %v88_v32  }
  0x86   :  { %v100_v33 = vpop.permute.xlu0 %99  }
  0x87   :  { %150 = vst.msk [vmem:[%s288_s1 + $0x5] ss:$8 sm:$0xf] %vm21_vm1, %v100_v33   ;;  %151 = vst.msk [vmem:[%s288_s1 + $0x5] ss:$8 sm:$0xf0] %vm21_vm1, %v100_v33   ;;  %v112_v34 = vpop.permute.xlu1 %111  }
  0x88   :  { %152 = vst.msk [vmem:[%s288_s1 + $0x6] ss:$8 sm:$0xf] %vm21_vm1, %v112_v34   ;;  %153 = vst.msk [vmem:[%s288_s1 + $0x6] ss:$8 sm:$0xf0] %vm21_vm1, %v112_v34  }
  0x8a   :  { %v124_v35 = vpop.permute.xlu0 %123  }
  0x8b   :  { %154 = vst.msk [vmem:[%s288_s1 + $0x7] ss:$8 sm:$0xf] %vm21_vm1, %v124_v35   ;;  %155 = vst.msk [vmem:[%s288_s1 + $0x7] ss:$8 sm:$0xf0] %vm21_vm1, %v124_v35  }

// kernel: squeeze.4
= control target key start
LH: loop header
LB: loop body
LE: loop exit
PB: predicated region body
PF: predicated region fallthrough
CT: control target
= control target key end

     0   :  { %s135_s0 = inlined_call_operand.vmem [shape: f32[512], index: 0, kind: input, shape index: {}]   ;;  %s136_s1 = inlined_call_operand.hbm [shape: f32[2,1,16,16], index: 1, kind: output, shape index: {}]  }
   0x1   :  { %v5_v0 = vld [vmem:[%s135_s0] sm:$0xf] }
   0x2   :  { %6 = vst [vmem:[#allocation2] sm:$0xf] %v5_v0 }
   0x3   :  { %2 = vsyncpa [#allocation1], 0  ;;  %s94_s0 = smov 112   ;;  %s95_s8 = smov 80   ;;  %vm8_vm0 = vcmask 130048  }
   0x4   :  { %s96_s9 = smov 96   ;;  %s97_s10 = smov 64  }
   0x5   :  { %s98_s11 = smov 48   ;;  %s99_s12 = smov 32  }
   0x6   :  { %s100_s13 = smov 16   ;;  %s101_s14 = smov [#allocation0]  }
   0x7   :  { %s56_s15 = sshll.u32 %s101_s14, 4  ;;  %s57_s15 = int_to_ptr.vmem [resolvable:$true] %s56_s15 }
   0x8   :  { %s70_s16 = scalar_lea.vmem %s57_s15, 512  ;;  %p75_p1 = scmp.lt.s32.totalorder %s57_s15, %s57_s15 }
   0x9   :  { %v10_v1 = vld [vmem:[#allocation2] sm:$0xf]   ;;  %p71_p0 = scmp.ne.s32.totalorder %s57_s15, %s70_s16  ;;  %p76_p2 = scmp.lt.s32.totalorder %s70_s16, %s70_s16 }
   0xa   :  { %v22_v2 = vld [vmem:[#allocation2] sm:$0xf]   ;;  %11 = vrot.lane.b32.xlu0 %v10_v1, %s94_s0 }
   0xb   :  { %23 = vrot.lane.b32.xlu1 %v22_v2, %s95_s8  ;;  %v16_v3 = vld [vmem:[#allocation2] sm:$0xf]   ;;  %p77_p3 = por %p76_p2, %p75_p1 }
   0xc   :  { %v28_v4 = vld [vmem:[#allocation2] sm:$0xf]  }
   0xd   :  { %v7_v5 = vld [vmem:[#allocation2] sm:$0xf]   ;;  %p78_p4 = pnand %p77_p3, %p71_p0 }
   0xe   :  { %9 = vst.msk [vmem:[#allocation0] ss:$8 sm:$0xf] %vm8_vm0, %v7_v5   ;;  %17 = vrot.lane.b32.xlu0 %v16_v3, %s96_s9  ;;  %v34_v6 = vld [vmem:[#allocation2] sm:$0xf]  }
   0xf   :  { %29 = vrot.lane.b32.xlu1 %v28_v4, %s97_s10  ;;  %v40_v7 = vld [vmem:[#allocation2] sm:$0xf]  }
  0x10   :  { %v46_v8 = vld [vmem:[#allocation2] sm:$0xf]  }
  0x12   :  { %35 = vrot.lane.b32.xlu0 %v34_v6, %s98_s11 }
  0x13   :  { %41 = vrot.lane.b32.xlu1 %v40_v7, %s99_s12 }
  0x16   :  { %47 = vrot.lane.b32.xlu0 %v46_v8, %s100_s13 }
  0x7c   :  { %v12_v9 = vpop.permute.xlu0 %11  }
  0x7d   :  { %v24_v10 = vpop.permute.xlu1 %23   ;;  %15 = vst.msk [vmem:[#allocation0 + $0x1] ss:$8 sm:$0xf] %vm8_vm0, %v12_v9  }
  0x7e   :  { %27 = vst.msk [vmem:[#allocation0 + $0x3] ss:$8 sm:$0xf] %vm8_vm0, %v24_v10  }
  0x80   :  { %v18_v11 = vpop.permute.xlu0 %17  }
  0x81   :  { %v30_v12 = vpop.permute.xlu1 %29   ;;  %21 = vst.msk [vmem:[#allocation0 + $0x2] ss:$8 sm:$0xf] %vm8_vm0, %v18_v11  }
  0x82   :  { %33 = vst.msk [vmem:[#allocation0 + $0x4] ss:$8 sm:$0xf] %vm8_vm0, %v30_v12  }
  0x84   :  { %v36_v13 = vpop.permute.xlu0 %35  }
  0x85   :  { %v42_v14 = vpop.permute.xlu1 %41   ;;  %39 = vst.msk [vmem:[#allocation0 + $0x5] ss:$8 sm:$0xf] %vm8_vm0, %v36_v13  }
  0x86   :  { %45 = vst.msk [vmem:[#allocation0 + $0x6] ss:$8 sm:$0xf] %vm8_vm0, %v42_v14  }
  0x88   :  { %v48_v15 = vpop.permute.xlu0 %47  }
  0x89   :  { %51 = vst.msk [vmem:[#allocation0 + $0x7] ss:$8 sm:$0xf] %vm8_vm0, %v48_v15  }
  0x8a   :  { %81 = shalt.err (!%p78_p4)
}
  0x8b   :  { %s82_s19 = scalar_lea.hbm %s136_s1, 512 }
  0x8c   :  { %p83_p5 = scmp.ne.s32.totalorder %s136_s1, %s82_s19  ;;  %p86_p6 = scmp.lt.u32.totalorder %s82_s19, %s136_s1 }
  0x8e   :  { %p88_p7 = pnand %p86_p6, %p83_p5 }
  0x90   :  { %91 = shalt.err (!%p88_p7)
}
  0x91   :  { %59 = dma.vmem_to_hbm [thread:$0]  %s57_s15, 512, %s136_s1, [#allocation1]  }
  0x92   :  { %92 = dma.done.wait [#allocation1], 512  }
  0x93   :  { %93 = vsyncadd [#allocation1], 4294966784 }
  0x94   :  { %61 = vsyncpa [#allocation1], 1 }

// kernel: detect_head_forward.1
= control target key start
LH: loop header
LB: loop body
LE: loop exit
PB: predicated region body
PF: predicated region fallthrough
CT: control target
= control target key end

     0   :  { %13 = vsyncpa [#allocation3], 0  ;;  %s4869_s27 = smov 0   ;;  %s10226_s0 = inlined_call_operand.vmem [shape: f32[16,512], index: 0, kind: input, shape index: {}]   ;;  %s10227_s1 = inlined_call_operand.hbm [shape: f32[144,512], index: 1, kind: input, shape index: {}]   ;;  %s10228_s2 = inlined_call_operand.vmem [shape: f32[288,512], index: 2, kind: input, shape index: {}]   ;;  %s10229_s3 = inlined_call_operand.vmem [shape: bf16[2,32,144], index: 3, kind: input, shape index: {}]   ;;  %s10230_s4 = inlined_call_operand.vmem [shape: bf16[2,32,288], index: 4, kind: input, shape index: {}]   ;;  %s10231_s5 = inlined_call_operand.vmem [shape: bf16[2,32,288], index: 5, kind: input, shape index: {}]   ;;  %s10232_s6 = inlined_call_operand.vmem [shape: f32[2,8,32], index: 6, kind: input, shape index: {}]   ;;  %s10233_s7 = inlined_call_operand.vmem [shape: f32[2,32,8], index: 7, kind: input, shape index: {}]   ;;  %s10234_s8 = inlined_call_operand.vmem [shape: f32[2,8,512], index: 8, kind: output, shape index: {}]  }
   0x1 LB: > { %s4875_s28 = sadd.s32 4294967295, %s4805_s27   ;;  %p4198_p0 = scmp.ge.s32.totalorder %s4805_s27, 1  ;;  %s4805_s27 = sphi %s4869_s27, %s19_s27  }
   0x2   : > { %p243_p1 = scmp.lt.s32.totalorder %s4805_s27, 3  ;;  %s4807_s29 = smov [#allocation2]  }
   0x3   : > { %s258_s30 = sshll.u32 %s4807_s29, 4  ;;  %p10235_p4 = scmp.eq.s32.totalorder %s4875_s28, 0  ;;  %s259_s30 = int_to_ptr.vmem [resolvable:$true] %s258_s30 }
   0x4   : > { %p4880_p3 = pnand %p4198_p0, %p243_p1  ;;  %s4767_s13 = scalar_lea.hbm %s10227_s1, 9216 }
   0x5   : > { %p4768_p7 = scmp.ne.s32.totalorder %s10227_s1, %s4767_s13  ;;  %p4774_p11 = scmp.lt.u32.totalorder %s4767_s13, %s10227_s1 }
   0x6   : > { %s10437_s9 = scalar_select %p4880_p3, 1, 0 }
   0x7   : > { %p4369_p5 = pneg %p4880_p3 }
   0x9   : > { %p4889_p6 = pnand %p10235_p4, %p4369_p5 }
   0xb   : > { %p4769_p8 = pneg %p4889_p6 }
   0xd   : > { %p4770_p9 = pnand %p4769_p8, %p4768_p7 }
   0xf   : > { %p4771_p10 = pneg %p4770_p9 }
  0x11   : > { %p4776_p12 = pnand %p4774_p11, %p4771_p10 }
  0x13   : > { %4779 = shalt.err (!%p4776_p12)
}
  0x14   : > { %s4780_s18 = scalar_lea.vmem %s259_s30, 9216  ;;  %p4788_p5 = scmp.lt.s32.totalorder %s259_s30, %s259_s30 }
  0x15   : > { %p4781_p13 = scmp.ne.s32.totalorder %s259_s30, %s4780_s18  ;;  %p4789_p2 = scmp.lt.s32.totalorder %s4780_s18, %s4780_s18 }
  0x17   : > { %p4783_p0 = pnand %p4781_p13, %p4769_p8  ;;  %p4790_p4 = por %p4789_p2, %p4788_p5 }
  0x19   : > { %p4784_p1 = pneg %p4783_p0 }
  0x1b   : > { %p4791_p3 = pnand %p4790_p4, %p4784_p1 }
  0x1d   : > { %4794 = shalt.err (!%p4791_p3)
}
  0x1e   : > { %s4808_s19 = smov 512   ;;  %s4809_s20 = smov 32  }
  0x1f   : > { %4372 = dma.hbm_to_vmem [thread:$0]  (!%p4889_p6), %s10227_s1, 9216, %s259_s30, [#allocation3], %s4808_s19, %s4808_s19, %s4809_s20  }
  0x20   : > { %p10439_p7 = scmp.ne.s32.totalorder %s10437_s9, 0 }
  0x22   : > { %316 = sbr.rel (%p10439_p7) target bundleno = 2598 (0xa26), region = 52 }
  0x29   : > { %p10440_p9 = scmp.eq.s32.totalorder %s4875_s28, 0 }
  0x2b   : > { %4800 = dma.done.wait (%p10440_p9), [#allocation3], 9216   ;;  %p10441_p8 = pmov %p10440_p9 }
  0x2c   : > { %v4918_v0 = vld [vmem:[%s10226_s0 + $0x8] sm:$0xff]  ;;  %v4923_v1 = vld [vmem:[%s10226_s0] sm:$0xff]  ;;  %s4810_s29 = smov 17   ;;  %v4946_v4 = vld [vmem:[%s10226_s0 + $0x30] sm:$0xff]  ;;  %s4811_s20 = smov 16   ;;  %v431_v8 = vlaneseq  ;;  %vm835_vm1 = vcmask 130048  }
  0x2d   : > { %4802 = vsyncadd (%p10441_p8), [#allocation3], 4294958080  ;;  %419 = vrot.lane.b32.xlu1 %v4918_v0, %s4810_s29  ;;  %415 = vrot.lane.b32.xlu0 %v4923_v1, %s4810_s29  ;;  %v4932_v2 = vld [vmem:[%s10226_s0 + $0x28] sm:$0xff]  ;;  %v4937_v3 = vld [vmem:[%s10226_s0 + $0x20] sm:$0xff]  ;;  %s4812_s21 = smov 15   ;;  %s4813_s22 = smov 1  }
  0x2e   : > { %v4951_v5 = vld [vmem:[%s10226_s0 + $0x10] sm:$0xff]  ;;  %v4960_v6 = vld [vmem:[%s10226_s0 + $0x38] sm:$0xff]  ;;  %s10387_s23 = smov 127   ;;  %s10282_s24 = smov 113   ;;  %v5068_v9 = vand.u32 127, %v431_v8  ;;  %v618_v12 = vld [vmem:[#allocation2 + $0x8] sm:$0xff] }
  0x2f   : > { %v4965_v7 = vld [vmem:[%s10226_s0 + $0x18] sm:$0xff]  ;;  %s10280_s25 = smov 112   ;;  %p369_p2 = scmp.lt.s32.totalorder %s4875_s28, 1  ;;  %v622_v14 = vld [vmem:[#allocation2 + $0x28] sm:$0xff]  ;;  %v619_v26 = vld [vmem:[#allocation2 + $0x10] sm:$0xff]  ;;  %v10237_v50 = vmov 0  }
  0x30   : > { %s10278_s30 = smov 111   ;;  %vm433_vm0 = vcmp.lt.s32.totalorder %v5068_v9, 17  ;;  %v623_v27 = vld [vmem:[#allocation2 + $0x30] sm:$0xff]  ;;  %v617_v28 = vld [vmem:[#allocation2] sm:$0xff]  ;;  %v620_v30 = vld [vmem:[#allocation2 + $0x18] sm:$0xff]  ;;  %4401 = vset.pattern.permute.xlu1 %v10237_v50  ;;  %4400 = vset.pattern.permute.xlu0 %v10237_v50  ;;  %vm458_vm2 = vcmp.lt.s32.totalorder %v5068_v9, 16 }
  0x31   : > { %421 = vrot.lane.b32.xlu1 %v4932_v2, %s4810_s29  ;;  %417 = vrot.lane.b32.xlu0 %v4937_v3, %s4810_s29  ;;  %s5071_s26 = scalar_select %p369_p2, %s4875_s28, 1  ;;  %v621_v29 = vld [vmem:[#allocation2 + $0x20] sm:$0xff]  ;;  %v624_v31 = vld [vmem:[#allocation2 + $0x38] sm:$0xff]  ;;  %v630_v54 = vld [vmem:[#allocation2 + $0x68] sm:$0xff]  ;;  %vm483_vm3 = vcmp.lt.s32.totalorder %v5068_v9, 15  ;;  %vm508_vm4 = vcmp.lt.s32.totalorder %v5068_v9, 1 }
  0x32   : > { %v626_v55 = vld [vmem:[#allocation2 + $0x48] sm:$0xff]  ;;  %vm533_vm5 = vcmp.lt.s32.totalorder %v5068_v9, 127  ;;  %vm558_vm6 = vcmp.lt.s32.totalorder %v5068_v9, 113  ;;  %vm583_vm7 = vcmp.lt.s32.totalorder %v5068_v9, 112  ;;  %vm608_vm8 = vcmp.lt.s32.totalorder %v5068_v9, 111  ;;  %s10588_s18 = smov 111  }
  0x33   : > { %s5078_s9 = sshll.u32 %s5071_s26, 5  ;;  %s4364_s13 = smul.u32 48, %s5071_s26  ;;  %vm1778_vm9 = vcmask 261120  }
  0x34   : > { %s5084_s12 = scalar_lea.vmem %s10229_s3, %s5078_s9  ;;  %s10203_s11 = scalar_lea.vmem %s10234_s8, %s5078_s9 }
  0x35   : > { %425 = vrot.lane.b32.xlu1 %v4946_v4, %s4810_s29  ;;  %423 = vrot.lane.b32.xlu0 %v4951_v5, %s4810_s29  ;;  %s5091_s16 = scalar_lea.vmem %s10231_s5, %s4364_s13  ;;  %v4410_v13 = vld [vmem:[%s5084_s12 + $0x4] ss:$8 sps:$4 sm:$0xff]   ;;  %s5105_s19 = scalar_lea.vmem %s10230_s4, %s4364_s13 }
  0x36   : > { %4216 = vmatprep.mubr.msk.bf16.mxu0 %vm835_vm1, %v4410_v13  ;;  %4218 = vmatprep.mubr.msk.bf16.mxu1 %vm835_vm1, %v4410_v13  ;;  %s5133_s13 = scalar_lea.vmem %s10233_s7, %s5078_s9  ;;  %p10865_p3 = scmp.ne.s32.totalorder %s4875_s28, 0 }
  0x37   : > { %v400_v44 = vld [vmem:[%s5133_s13 + $0x8] sm:$0xff]  ;;  %v399_v45 = vld [vmem:[%s5133_s13] sm:$0xff]  ;;  %v401_v52 = vld [vmem:[%s5133_s13 + $0x10] sm:$0xff]  ;;  %vm3987_vm10 = vcmask (!%p10865_p3), 1043457   ;;  %vm4040_vm11 = vcmask (!%p10865_p3), 1042432  }
  0x38   : > { %v402_v53 = vld [vmem:[%s5133_s13 + $0x18] sm:$0xff] }
  0x39   : > { %429 = vrot.lane.b32.xlu1 %v4960_v6, %s4810_s29  ;;  %427 = vrot.lane.b32.xlu0 %v4965_v7, %s4810_s29 }
  0x3d   : > { %444 = vrot.lane.b32.xlu1 %v4937_v3, %s4811_s20  ;;  %442 = vrot.lane.b32.xlu0 %v4923_v1, %s4811_s20 }
  0x41   : > { %448 = vrot.lane.b32.xlu1 %v4932_v2, %s4811_s20  ;;  %446 = vrot.lane.b32.xlu0 %v4918_v0, %s4811_s20 }
  0x45   : > { %452 = vrot.lane.b32.xlu1 %v4946_v4, %s4811_s20  ;;  %450 = vrot.lane.b32.xlu0 %v4951_v5, %s4811_s20 }
  0x49   : > { %456 = vrot.lane.b32.xlu1 %v4960_v6, %s4811_s20  ;;  %454 = vrot.lane.b32.xlu0 %v4965_v7, %s4811_s20 }
  0x4d   : > { %469 = vrot.lane.b32.xlu1 %v4937_v3, %s4812_s21  ;;  %467 = vrot.lane.b32.xlu0 %v4923_v1, %s4812_s21 }
  0x51   : > { %473 = vrot.lane.b32.xlu1 %v4932_v2, %s4812_s21  ;;  %471 = vrot.lane.b32.xlu0 %v4918_v0, %s4812_s21 }
  0x55   : > { %477 = vrot.lane.b32.xlu1 %v4946_v4, %s4812_s21  ;;  %475 = vrot.lane.b32.xlu0 %v4951_v5, %s4812_s21 }
  0x59   : > { %481 = vrot.lane.b32.xlu1 %v4960_v6, %s4812_s21  ;;  %479 = vrot.lane.b32.xlu0 %v4965_v7, %s4812_s21 }
  0x5d   : > { %494 = vrot.lane.b32.xlu1 %v4937_v3, %s4813_s22  ;;  %492 = vrot.lane.b32.xlu0 %v4923_v1, %s4813_s22 }
  0x61   : > { %498 = vrot.lane.b32.xlu1 %v4932_v2, %s4813_s22  ;;  %496 = vrot.lane.b32.xlu0 %v4918_v0, %s4813_s22 }
  0x65   : > { %502 = vrot.lane.b32.xlu1 %v4946_v4, %s4813_s22  ;;  %500 = vrot.lane.b32.xlu0 %v4951_v5, %s4813_s22 }
  0x69   : > { %506 = vrot.lane.b32.xlu1 %v4960_v6, %s4813_s22  ;;  %504 = vrot.lane.b32.xlu0 %v4965_v7, %s4813_s22 }
  0x6d   : > { %519 = vrot.lane.b32.xlu1 %v4937_v3, %s10387_s23  ;;  %517 = vrot.lane.b32.xlu0 %v4923_v1, %s10387_s23 }
  0x71   : > { %523 = vrot.lane.b32.xlu1 %v4932_v2, %s10387_s23  ;;  %521 = vrot.lane.b32.xlu0 %v4918_v0, %s10387_s23 }
  0x75   : > { %527 = vrot.lane.b32.xlu1 %v4946_v4, %s10387_s23  ;;  %525 = vrot.lane.b32.xlu0 %v4951_v5, %s10387_s23 }
  0x79   : > { %531 = vrot.lane.b32.xlu1 %v4960_v6, %s10387_s23  ;;  %529 = vrot.lane.b32.xlu0 %v4965_v7, %s10387_s23 }
  0x7d   : > { %544 = vrot.lane.b32.xlu1 %v4937_v3, %s10282_s24  ;;  %542 = vrot.lane.b32.xlu0 %v4923_v1, %s10282_s24 }
  0x81   : > { %548 = vrot.lane.b32.xlu1 %v4932_v2, %s10282_s24  ;;  %546 = vrot.lane.b32.xlu0 %v4918_v0, %s10282_s24 }
  0x85   : > { %552 = vrot.lane.b32.xlu1 %v4946_v4, %s10282_s24  ;;  %550 = vrot.lane.b32.xlu0 %v4951_v5, %s10282_s24 }
  0x89   : > { %556 = vrot.lane.b32.xlu1 %v4960_v6, %s10282_s24  ;;  %554 = vrot.lane.b32.xlu0 %v4965_v7, %s10282_s24 }
  0x8d   : > { %569 = vrot.lane.b32.xlu1 %v4937_v3, %s10280_s25  ;;  %567 = vrot.lane.b32.xlu0 %v4923_v1, %s10280_s25 }
  0x91   : > { %573 = vrot.lane.b32.xlu1 %v4932_v2, %s10280_s25  ;;  %571 = vrot.lane.b32.xlu0 %v4918_v0, %s10280_s25 }
  0x95   : > { %577 = vrot.lane.b32.xlu1 %v4946_v4, %s10280_s25  ;;  %575 = vrot.lane.b32.xlu0 %v4951_v5, %s10280_s25 }
  0x99   : > { %581 = vrot.lane.b32.xlu1 %v4960_v6, %s10280_s25  ;;  %579 = vrot.lane.b32.xlu0 %v4965_v7, %s10280_s25 }
  0x9d   : > { %594 = vrot.lane.b32.xlu1 %v4937_v3, %s10278_s30  ;;  %592 = vrot.lane.b32.xlu0 %v4923_v1, %s10278_s30 }
  0x9f   : > { %v420_v10 = vpop.permute.xlu1 %419  ;;  %v416_v11 = vpop.permute.xlu0 %415 }
  0xa0   : > { %v438_v15 = vsel %vm433_vm0, %v416_v11, %v420_v10 }
  0xa1   : > { %598 = vrot.lane.b32.xlu1 %v4932_v2, %s10278_s30  ;;  %596 = vrot.lane.b32.xlu0 %v4918_v0, %s10278_s30  ;;  %v690_v19 = vmul.f32 %v618_v12, %v438_v15  ;;  %v627_v12 = vld [vmem:[#allocation2 + $0x50] sm:$0xff]  ;;  %v632_v15 = vld [vmem:[#allocation2 + $0x78] sm:$0xff] }
  0xa3   : > { %v422_v16 = vpop.permute.xlu1 %421  ;;  %v418_v17 = vpop.permute.xlu0 %417 }
  0xa4   : > { %v439_v18 = vsel %vm433_vm0, %v418_v17, %v422_v16 }
  0xa5   : > { %602 = vrot.lane.b32.xlu1 %v4946_v4, %s10278_s30  ;;  %600 = vrot.lane.b32.xlu0 %v4951_v5, %s10278_s30  ;;  %v694_v20 = vmul.f32 %v622_v14, %v439_v18  ;;  %v629_v14 = vld [vmem:[#allocation2 + $0x60] sm:$0xff] }
  0xa7   : > { %v426_v21 = vpop.permute.xlu1 %425  ;;  %v424_v22 = vpop.permute.xlu0 %423  ;;  %v762_v23 = vpack.c.bf16 %v694_v20, %v690_v19 }
  0xa8   : > { %v437_v24 = vsel %vm433_vm0, %v422_v16, %v426_v21  ;;  %v436_v25 = vsel %vm433_vm0, %v420_v10, %v424_v22  ;;  %v631_v10 = vld [vmem:[#allocation2 + $0x70] sm:$0xff]  ;;  %v625_v16 = vld [vmem:[#allocation2 + $0x40] sm:$0xff] }
  0xa9   : > { %606 = vrot.lane.b32.xlu1 %v4960_v6, %s10278_s30  ;;  %604 = vrot.lane.b32.xlu0 %v4965_v7, %s10278_s30  ;;  %v691_v34 = vmul.f32 %v619_v26, %v436_v25  ;;  %v695_v35 = vmul.f32 %v623_v27, %v437_v24 }
  0xaa   : > { %842 = vmatprep.subr.bf16.mxu0 %v762_v23 }
  0xab   : > { %v430_v32 = vpop.permute.xlu1 %429  ;;  %v428_v33 = vpop.permute.xlu0 %427  ;;  %v763_v51 = vpack.c.bf16 %v695_v35, %v691_v34  ;;  %v638_v35 = vld [vmem:[#allocation2 + $0xa8] sm:$0xff] }
  0xac   : > { %v441_v36 = vsel %vm433_vm0, %v430_v32, %v418_v17  ;;  %v440_v37 = vsel %vm433_vm0, %v428_v33, %v416_v11  ;;  %v434_v38 = vsel %vm433_vm0, %v424_v22, %v428_v33  ;;  %v435_v39 = vsel %vm433_vm0, %v426_v21, %v430_v32  ;;  %v628_v17 = vld [vmem:[#allocation2 + $0x58] sm:$0xff] }
  0xad   : > { %v689_v40 = vmul.f32 %v617_v28, %v440_v37  ;;  %v693_v41 = vmul.f32 %v621_v29, %v441_v36  ;;  %v692_v42 = vmul.f32 %v620_v30, %v434_v38  ;;  %v696_v43 = vmul.f32 %v624_v31, %v435_v39  ;;  %804 = vperm.xlu1 %4401, %v400_v44   ;;  %v634_v36 = vld [vmem:[#allocation2 + $0x88] sm:$0xff] }
  0xae   : > { %799 = vperm.xlu0 %4400, %v399_v45  }
  0xaf   : > { %v445_v46 = vpop.permute.xlu1 %444  ;;  %v443_v47 = vpop.permute.xlu0 %442  ;;  %v761_v48 = vpack.c.bf16 %v693_v41, %v689_v40  ;;  %v764_v49 = vpack.c.bf16 %v696_v43, %v692_v42 }
  0xb1   : > { %843 = vmatpush1.bf16.msra.mxu0 %v761_v48  ;;  %895 = vmatprep.subr.bf16.mxu1 %v764_v49  ;;  %v635_v48 = vld [vmem:[#allocation2 + $0x90] sm:$0xff] }
  0xb2   : > { %896 = vmatpush1.bf16.msra.mxu1 %v763_v51  ;;  %809 = vperm.xlu1 %4401, %v401_v52   ;;  %v637_v51 = vld [vmem:[#allocation2 + $0xa0] sm:$0xff]  ;;  %v640_v52 = vld [vmem:[#allocation2 + $0xb8] sm:$0xff] }
  0xb3   : > { %v449_v56 = vpop.permute.xlu1 %448  ;;  %v447_v57 = vpop.permute.xlu0 %446  ;;  %814 = vperm.xlu0 %4400, %v402_v53   ;;  %v633_v53 = vld [vmem:[#allocation2 + $0x80] sm:$0xff] }
  0xb4   : > { %v464_v58 = vsel %vm458_vm2, %v445_v46, %v449_v56  ;;  %v463_v59 = vsel %vm458_vm2, %v443_v47, %v447_v57 }
  0xb5   : > { %v702_v60 = vmul.f32 %v630_v54, %v464_v58  ;;  %v698_v61 = vmul.f32 %v626_v55, %v463_v59  ;;  %v636_v54 = vld [vmem:[#allocation2 + $0x98] sm:$0xff] }
  0xb7   : > { %v453_v62 = vpop.permute.xlu1 %452  ;;  %v451_v63 = vpop.permute.xlu0 %450  ;;  %v766_v8 = vpack.c.bf16 %v702_v60, %v698_v61 }
  0xb8   : > { %v462_v11 = vsel %vm458_vm2, %v449_v56, %v453_v62  ;;  %v461_v13 = vsel %vm458_vm2, %v447_v57, %v451_v63 }
  0xb9   : > { %844 = vmatprep.subr.bf16.mxu0 %v766_v8  ;;  %v703_v18 = vmul.f32 %v631_v10, %v462_v11  ;;  %v699_v19 = vmul.f32 %v627_v12, %v461_v13 }
  0xbb   : > { %v457_v20 = vpop.permute.xlu1 %456  ;;  %v455_v21 = vpop.permute.xlu0 %454  ;;  %v767_v34 = vpack.c.bf16 %v703_v18, %v699_v19  ;;  %v642_v18 = vld [vmem:[#allocation2 + $0xc8] sm:$0xff] }
  0xbc   : > { %v460_v22 = vsel %vm458_vm2, %v453_v62, %v457_v20  ;;  %v466_v23 = vsel %vm458_vm2, %v457_v20, %v445_v46  ;;  %v459_v24 = vsel %vm458_vm2, %v451_v63, %v455_v21  ;;  %v465_v25 = vsel %vm458_vm2, %v455_v21, %v443_v47  ;;  %v639_v46 = vld [vmem:[#allocation2 + $0xb0] sm:$0xff] }
  0xbd   : > { %v701_v26 = vmul.f32 %v629_v14, %v466_v23  ;;  %v704_v27 = vmul.f32 %v632_v15, %v460_v22  ;;  %v697_v28 = vmul.f32 %v625_v16, %v465_v25  ;;  %v700_v29 = vmul.f32 %v628_v17, %v459_v24  ;;  %v646_v17 = vld [vmem:[#allocation2 + $0xe8] sm:$0xff]  ;;  %v647_v25 = vld [vmem:[#allocation2 + $0xf0] sm:$0xff] }
  0xbf   : > { %v470_v30 = vpop.permute.xlu1 %469  ;;  %v468_v31 = vpop.permute.xlu0 %467  ;;  %v765_v32 = vpack.c.bf16 %v701_v26, %v697_v28  ;;  %v768_v33 = vpack.c.bf16 %v704_v27, %v700_v29  ;;  %v650_v26 = vld [vmem:[#allocation2 + $0x108] sm:$0xff] }
  0xc1   : > { %845 = vmatpush1.bf16.msra.mxu0 %v765_v32  ;;  %897 = vmatprep.subr.bf16.mxu1 %v768_v33  ;;  %v653_v32 = vld [vmem:[#allocation2 + $0x120] sm:$0xff] }
  0xc2   : > { %898 = vmatpush1.bf16.msra.mxu1 %v767_v34  ;;  %v643_v34 = vld [vmem:[#allocation2 + $0xd0] sm:$0xff] }
  0xc3   : > { %v474_v37 = vpop.permute.xlu1 %473  ;;  %v472_v38 = vpop.permute.xlu0 %471 }
  0xc4   : > { %v489_v39 = vsel %vm483_vm3, %v470_v30, %v474_v37  ;;  %v488_v40 = vsel %vm483_vm3, %v468_v31, %v472_v38 }
  0xc5   : > { %v710_v41 = vmul.f32 %v638_v35, %v489_v39  ;;  %v706_v42 = vmul.f32 %v634_v36, %v488_v40  ;;  %v652_v36 = vld [vmem:[#allocation2 + $0x118] sm:$0xff]  ;;  %v641_v40 = vld [vmem:[#allocation2 + $0xc0] sm:$0xff] }
  0xc6   : > { %v648_v39 = vld [vmem:[#allocation2 + $0xf8] sm:$0xff] }
  0xc7   : > { %v478_v43 = vpop.permute.xlu1 %477  ;;  %v476_v44 = vpop.permute.xlu0 %475  ;;  %v770_v45 = vpack.c.bf16 %v710_v41, %v706_v42  ;;  %v644_v41 = vld [vmem:[#allocation2 + $0xd8] sm:$0xff]  ;;  %v722_v42 = vmul.f32 %v650_v26, %v4918_v0 }
  0xc8   : > { %v487_v47 = vsel %vm483_vm3, %v474_v37, %v478_v43  ;;  %v486_v49 = vsel %vm483_vm3, %v472_v38, %v476_v44  ;;  %v656_v37 = vld [vmem:[#allocation2 + $0x138] sm:$0xff]  ;;  %v645_v38 = vld [vmem:[#allocation2 + $0xe0] sm:$0xff] }
  0xc9   : > { %846 = vmatprep.subr.bf16.mxu0 %v770_v45  ;;  %v711_v55 = vmul.f32 %v639_v46, %v487_v47  ;;  %v707_v56 = vmul.f32 %v635_v48, %v486_v49  ;;  %v725_v45 = vmul.f32 %v653_v32, %v4937_v3 }
  0xcb   : > { %v482_v57 = vpop.permute.xlu1 %481  ;;  %v480_v58 = vpop.permute.xlu0 %479  ;;  %v771_v16 = vpack.c.bf16 %v711_v55, %v707_v56 }
  0xcc   : > { %v485_v59 = vsel %vm483_vm3, %v478_v43, %v482_v57  ;;  %v491_v60 = vsel %vm483_vm3, %v482_v57, %v470_v30  ;;  %v484_v61 = vsel %vm483_vm3, %v476_v44, %v480_v58  ;;  %v490_v62 = vsel %vm483_vm3, %v480_v58, %v468_v31  ;;  %v654_v30 = vld [vmem:[#allocation2 + $0x128] sm:$0xff]  ;;  %v649_v31 = vld [vmem:[#allocation2 + $0x100] sm:$0xff] }
  0xcd   : > { %v709_v63 = vmul.f32 %v637_v51, %v491_v60  ;;  %v712_v8 = vmul.f32 %v640_v52, %v485_v59  ;;  %v705_v10 = vmul.f32 %v633_v53, %v490_v62  ;;  %v708_v11 = vmul.f32 %v636_v54, %v484_v61  ;;  %v651_v53 = vld [vmem:[#allocation2 + $0x110] sm:$0xff] }
  0xce   : > { %v726_v43 = vmul.f32 %v654_v30, %v4932_v2  ;;  %v721_v44 = vmul.f32 %v649_v31, %v4923_v1  ;;  %v724_v51 = vmul.f32 %v652_v36, %v4965_v7  ;;  %v728_v52 = vmul.f32 %v656_v37, %v4960_v6  ;;  %v655_v54 = vld [vmem:[#allocation2 + $0x130] sm:$0xff]  ;;  %v660_v30 = vld [vmem:[#allocation2 + $0x158] sm:$0xff] }
  0xcf   : > { %v495_v12 = vpop.permute.xlu1 %494  ;;  %v493_v13 = vpop.permute.xlu0 %492  ;;  %v769_v14 = vpack.c.bf16 %v709_v63, %v705_v10  ;;  %v772_v15 = vpack.c.bf16 %v712_v8, %v708_v11  ;;  %v723_v6 = vmul.f32 %v651_v53, %v4951_v5  ;;  %v727_v59 = vmul.f32 %v655_v54, %v4946_v4  ;;  %v661_v5 = vld [vmem:[#allocation2 + $0x160] sm:$0xff]  ;;  %v670_v54 = vld [vmem:[#allocation2 + $0x1a8] sm:$0xff] }
  0xd0   : > { %v778_v58 = vpack.c.bf16 %v726_v43, %v722_v42  ;;  %v780_v8 = vpack.c.bf16 %v728_v52, %v724_v51  ;;  %v777_v11 = vpack.c.bf16 %v725_v45, %v721_v44  ;;  %v665_v52 = vld [vmem:[#allocation2 + $0x180] sm:$0xff] }
  0xd1   : > { %847 = vmatpush1.bf16.msra.mxu0 %v769_v14  ;;  %899 = vmatprep.subr.bf16.mxu1 %v772_v15  ;;  %v657_v15 = vld [vmem:[#allocation2 + $0x140] sm:$0xff] }
  0xd2   : > { %900 = vmatpush1.bf16.msra.mxu1 %v771_v16 }
  0xd3   : > { %v499_v19 = vpop.permute.xlu1 %498  ;;  %v497_v20 = vpop.permute.xlu0 %496 }
  0xd4   : > { %v514_v21 = vsel %vm508_vm4, %v495_v12, %v499_v19  ;;  %v513_v22 = vsel %vm508_vm4, %v493_v13, %v497_v20 }
  0xd5   : > { %v718_v23 = vmul.f32 %v646_v17, %v514_v21  ;;  %v714_v24 = vmul.f32 %v642_v18, %v513_v22  ;;  %v662_v17 = vld [vmem:[#allocation2 + $0x168] sm:$0xff] }
  0xd6   : > { %v658_v18 = vld [vmem:[#allocation2 + $0x148] sm:$0xff] }
  0xd7   : > { %v503_v27 = vpop.permute.xlu1 %502  ;;  %v501_v28 = vpop.permute.xlu0 %500  ;;  %v774_v29 = vpack.c.bf16 %v718_v23, %v714_v24 }
  0xd8   : > { %v512_v33 = vsel %vm508_vm4, %v499_v19, %v503_v27  ;;  %v511_v35 = vsel %vm508_vm4, %v497_v20, %v501_v28 }
  0xd9   : > { %848 = vmatprep.subr.bf16.mxu0 %v774_v29  ;;  %v719_v46 = vmul.f32 %v647_v25, %v512_v33  ;;  %v715_v47 = vmul.f32 %v643_v34, %v511_v35  ;;  %v659_v29 = vld [vmem:[#allocation2 + $0x150] sm:$0xff] }
  0xdb   : > { %v507_v48 = vpop.permute.xlu1 %506  ;;  %v505_v49 = vpop.permute.xlu0 %504  ;;  %v775_v10 = vpack.c.bf16 %v719_v46, %v715_v47 }
  0xdc   : > { %v510_v55 = vsel %vm508_vm4, %v503_v27, %v507_v48  ;;  %v516_v0 = vsel %vm508_vm4, %v507_v48, %v495_v12  ;;  %v509_v1 = vsel %vm508_vm4, %v501_v28, %v505_v49  ;;  %v515_v2 = vsel %vm508_vm4, %v505_v49, %v493_v13  ;;  %v663_v27 = vld [vmem:[#allocation2 + $0x170] sm:$0xff]  ;;  %v664_v28 = vld [vmem:[#allocation2 + $0x178] sm:$0xff]  ;;  %v669_v49 = vld [vmem:[#allocation2 + $0x1a0] sm:$0xff] }
  0xdd   : > { %v717_v3 = vmul.f32 %v645_v38, %v516_v0  ;;  %v720_v56 = vmul.f32 %v648_v39, %v510_v55  ;;  %v713_v57 = vmul.f32 %v641_v40, %v515_v2  ;;  %v716_v7 = vmul.f32 %v644_v41, %v509_v1  ;;  %v666_v55 = vld [vmem:[#allocation2 + $0x188] sm:$0xff] }
  0xde   : > { %v779_v12 = vpack.c.bf16 %v727_v59, %v723_v6  ;;  %v671_v6 = vld [vmem:[#allocation2 + $0x1b0] sm:$0xff]  ;;  %v672_v59 = vld [vmem:[#allocation2 + $0x1b8] sm:$0xff] }
  0xdf   : > { %v520_v60 = vpop.permute.xlu1 %519  ;;  %v518_v61 = vpop.permute.xlu0 %517  ;;  %v773_v62 = vpack.c.bf16 %v717_v3, %v713_v57  ;;  %v776_v63 = vpack.c.bf16 %v720_v56, %v716_v7 }
  0xe1   : > { %849 = vmatpush1.bf16.msra.mxu0 %v773_v62  ;;  %901 = vmatprep.subr.bf16.mxu1 %v776_v63 }
  0xe2   : > { %902 = vmatpush1.bf16.msra.mxu1 %v775_v10  ;;  %850 = vmatprep.subr.bf16.mxu0 %v778_v58 }
  0xe3   : > { %v524_v13 = vpop.permute.xlu1 %523  ;;  %v522_v14 = vpop.permute.xlu0 %521  ;;  %903 = vmatprep.subr.bf16.mxu1 %v780_v8 }
  0xe4   : > { %v539_v4 = vsel %vm533_vm5, %v520_v60, %v524_v13  ;;  %v538_v16 = vsel %vm533_vm5, %v518_v61, %v522_v14 }
  0xe5   : > { %851 = vmatpush1.bf16.msra.mxu0 %v777_v11  ;;  %v733_v19 = vmul.f32 %v661_v5, %v539_v4  ;;  %v729_v20 = vmul.f32 %v657_v15, %v538_v16 }
  0xe6   : > { %904 = vmatpush1.bf16.msra.mxu1 %v779_v12 }
  0xe7   : > { %v528_v21 = vpop.permute.xlu1 %527  ;;  %v526_v22 = vpop.permute.xlu0 %525  ;;  %v781_v34 = vpack.c.bf16 %v733_v19, %v729_v20 }
  0xe8   : > { %v537_v23 = vsel %vm533_vm5, %v524_v13, %v528_v21  ;;  %v536_v24 = vsel %vm533_vm5, %v522_v14, %v526_v22 }
  0xe9   : > { %v734_v25 = vmul.f32 %v662_v17, %v537_v23  ;;  %v730_v26 = vmul.f32 %v658_v18, %v536_v24  ;;  %v677_v23 = vld [vmem:[#allocation2 + $0x1e0] sm:$0xff] }
  0xeb   : > { %v532_v31 = vpop.permute.xlu1 %531  ;;  %v530_v32 = vpop.permute.xlu0 %529  ;;  %v782_v33 = vpack.c.bf16 %v734_v25, %v730_v26  ;;  %v673_v25 = vld [vmem:[#allocation2 + $0x1c0] sm:$0xff] }
  0xec   : > { %v535_v35 = vsel %vm533_vm5, %v528_v21, %v532_v31  ;;  %v541_v36 = vsel %vm533_vm5, %v532_v31, %v520_v60  ;;  %v534_v37 = vsel %vm533_vm5, %v526_v22, %v530_v32  ;;  %v540_v38 = vsel %vm533_vm5, %v530_v32, %v518_v61  ;;  %v667_v60 = vld [vmem:[#allocation2 + $0x190] sm:$0xff]  ;;  %v668_v61 = vld [vmem:[#allocation2 + $0x198] sm:$0xff] }
  0xed   : > { %v735_v39 = vmul.f32 %v663_v27, %v535_v35  ;;  %v736_v40 = vmul.f32 %v664_v28, %v541_v36  ;;  %v731_v41 = vmul.f32 %v659_v29, %v534_v37  ;;  %v732_v42 = vmul.f32 %v660_v30, %v540_v38  ;;  %852 = vmatprep.subr.bf16.mxu0 %v782_v33  ;;  %v678_v27 = vld [vmem:[#allocation2 + $0x1e8] sm:$0xff]  ;;  %v679_v37 = vld [vmem:[#allocation2 + $0x1f0] sm:$0xff]  ;;  %v680_v38 = vld [vmem:[#allocation2 + $0x1f8] sm:$0xff] }
  0xee   : > { %853 = vmatpush1.bf16.msra.mxu0 %v781_v34  ;;  %v674_v28 = vld [vmem:[#allocation2 + $0x1c8] sm:$0xff] }
  0xef   : > { %v545_v43 = vpop.permute.xlu1 %544  ;;  %v543_v44 = vpop.permute.xlu0 %542  ;;  %v784_v45 = vpack.c.bf16 %v736_v40, %v732_v42  ;;  %v783_v46 = vpack.c.bf16 %v735_v39, %v731_v41  ;;  %v675_v39 = vld [vmem:[#allocation2 + $0x1d0] sm:$0xff]  ;;  %v676_v40 = vld [vmem:[#allocation2 + $0x1d8] sm:$0xff] }
  0xf1   : > { %905 = vmatprep.subr.bf16.mxu1 %v784_v45 }
  0xf2   : > { %906 = vmatpush1.bf16.msra.mxu1 %v783_v46 }
  0xf3   : > { %v549_v47 = vpop.permute.xlu1 %548  ;;  %v547_v48 = vpop.permute.xlu0 %546 }
  0xf4   : > { %v564_v51 = vsel %vm558_vm6, %v545_v43, %v549_v47  ;;  %v563_v53 = vsel %vm558_vm6, %v543_v44, %v547_v48 }
  0xf5   : > { %v741_v0 = vmul.f32 %v669_v49, %v564_v51  ;;  %v737_v1 = vmul.f32 %v665_v52, %v563_v53 }
  0xf7   : > { %v553_v2 = vpop.permute.xlu1 %552  ;;  %v551_v3 = vpop.permute.xlu0 %550  ;;  %v785_v10 = vpack.c.bf16 %v741_v0, %v737_v1 }
  0xf8   : > { %v562_v56 = vsel %vm558_vm6, %v549_v47, %v553_v2  ;;  %v561_v57 = vsel %vm558_vm6, %v547_v48, %v551_v3 }
  0xf9   : > { %v742_v7 = vmul.f32 %v670_v54, %v562_v56  ;;  %v738_v58 = vmul.f32 %v666_v55, %v561_v57  ;;  %v685_v56 = vld [vmem:[#allocation2 + $0x220] sm:$0xff] }
  0xfb   : > { %v557_v62 = vpop.permute.xlu1 %556  ;;  %v555_v63 = vpop.permute.xlu0 %554  ;;  %v786_v8 = vpack.c.bf16 %v742_v7, %v738_v58  ;;  %v681_v7 = vld [vmem:[#allocation2 + $0x200] sm:$0xff] }
  0xfc   : > { %v560_v11 = vsel %vm558_vm6, %v553_v2, %v557_v62  ;;  %v566_v12 = vsel %vm558_vm6, %v557_v62, %v545_v43  ;;  %v559_v13 = vsel %vm558_vm6, %v551_v3, %v555_v63  ;;  %v565_v14 = vsel %vm558_vm6, %v555_v63, %v543_v44 }
  0xfd   : > { %v743_v5 = vmul.f32 %v671_v6, %v560_v11  ;;  %v744_v4 = vmul.f32 %v672_v59, %v566_v12  ;;  %v739_v15 = vmul.f32 %v667_v60, %v559_v13  ;;  %v740_v16 = vmul.f32 %v668_v61, %v565_v14  ;;  %854 = vmatprep.subr.bf16.mxu0 %v786_v8  ;;  %v686_v6 = vld [vmem:[#allocation2 + $0x228] sm:$0xff]  ;;  %v687_v13 = vld [vmem:[#allocation2 + $0x230] sm:$0xff]  ;;  %v688_v14 = vld [vmem:[#allocation2 + $0x238] sm:$0xff] }
  0xfe   : > { %855 = vmatpush1.bf16.msra.mxu0 %v785_v10  ;;  %v682_v59 = vld [vmem:[#allocation2 + $0x208] sm:$0xff] }
  0xff   : > { %v570_v17 = vpop.permute.xlu1 %569  ;;  %v568_v18 = vpop.permute.xlu0 %567  ;;  %v788_v19 = vpack.c.bf16 %v744_v4, %v740_v16  ;;  %v787_v20 = vpack.c.bf16 %v743_v5, %v739_v15  ;;  %v683_v5 = vld [vmem:[#allocation2 + $0x210] sm:$0xff]  ;;  %v684_v4 = vld [vmem:[#allocation2 + $0x218] sm:$0xff] }
 0x101   : > { %907 = vmatprep.subr.bf16.mxu1 %v788_v19 }
 0x102   : > { %908 = vmatpush1.bf16.msra.mxu1 %v787_v20 }
 0x103   : > { %v574_v21 = vpop.permute.xlu1 %573  ;;  %v572_v22 = vpop.permute.xlu0 %571 }
 0x104   : > { %v589_v24 = vsel %vm583_vm7, %v570_v17, %v574_v21  ;;  %v588_v26 = vsel %vm583_vm7, %v568_v18, %v572_v22 }
 0x105   : > { %v749_v29 = vmul.f32 %v677_v23, %v589_v24  ;;  %v745_v30 = vmul.f32 %v673_v25, %v588_v26 }
 0x107   : > { %v578_v31 = vpop.permute.xlu1 %577  ;;  %v576_v32 = vpop.permute.xlu0 %575  ;;  %v789_v44 = vpack.c.bf16 %v749_v29, %v745_v30 }
 0x108   : > { %v587_v33 = vsel %vm583_vm7, %v574_v21, %v578_v31  ;;  %v586_v34 = vsel %vm583_vm7, %v572_v22, %v576_v32 }
 0x109   : > { %v750_v35 = vmul.f32 %v678_v27, %v587_v33  ;;  %v746_v36 = vmul.f32 %v674_v28, %v586_v34  ;;  %v4408_v27 = vld [vmem:[%s5084_s12] ss:$8 sps:$4 sm:$0xff]   ;;  %v4411_v28 = vld [vmem:[%s5084_s12 + $0x14] ss:$8 sps:$4 sm:$0xff]  }
 0x10b   : > { %v582_v41 = vpop.permute.xlu1 %581  ;;  %v580_v42 = vpop.permute.xlu0 %579  ;;  %v790_v43 = vpack.c.bf16 %v750_v35, %v746_v36 }
 0x10c   : > { %v585_v45 = vsel %vm583_vm7, %v578_v31, %v582_v41  ;;  %v591_v46 = vsel %vm583_vm7, %v582_v41, %v570_v17  ;;  %v584_v47 = vsel %vm583_vm7, %v576_v32, %v580_v42  ;;  %v590_v48 = vsel %vm583_vm7, %v580_v42, %v568_v18  ;;  %v4413_v31 = vld [vmem:[%s5084_s12 + $0x10] ss:$8 sps:$4 sm:$0xff]  }
 0x10d   : > { %v751_v49 = vmul.f32 %v679_v37, %v585_v45  ;;  %v752_v51 = vmul.f32 %v680_v38, %v591_v46  ;;  %v747_v52 = vmul.f32 %v675_v39, %v584_v47  ;;  %v748_v53 = vmul.f32 %v676_v40, %v590_v48  ;;  %856 = vmatprep.subr.bf16.mxu0 %v790_v43  ;;  %v1436_v47 = vld [vmem:[%s10228_s2 + $0x200] sm:$0xff] }
 0x10e   : > { %857 = vmatpush1.bf16.msra.mxu0 %v789_v44  ;;  %v1440_v48 = vld [vmem:[%s10228_s2 + $0x220] sm:$0xff] }
 0x10f   : > { %v595_v54 = vpop.permute.xlu1 %594  ;;  %v593_v55 = vpop.permute.xlu0 %592  ;;  %v792_v0 = vpack.c.bf16 %v752_v51, %v748_v53  ;;  %v791_v1 = vpack.c.bf16 %v751_v49, %v747_v52 }
 0x111   : > { %909 = vmatprep.subr.bf16.mxu1 %v792_v0 }
 0x112   : > { %910 = vmatpush1.bf16.msra.mxu1 %v791_v1 }
 0x113   : > { %v599_v2 = vpop.permute.xlu1 %598  ;;  %v597_v3 = vpop.permute.xlu0 %596 }
 0x114   : > { %v614_v57 = vsel %vm608_vm8, %v595_v54, %v599_v2  ;;  %v613_v58 = vsel %vm608_vm8, %v593_v55, %v597_v3 }
 0x115   : > { %v757_v60 = vmul.f32 %v685_v56, %v614_v57  ;;  %v753_v61 = vmul.f32 %v681_v7, %v613_v58  ;;  %v1378_v58 = vld [vmem:[%s10228_s2 + $0x30] sm:$0xff] }
 0x117   : > { %v603_v62 = vpop.permute.xlu1 %602  ;;  %v601_v63 = vpop.permute.xlu0 %600  ;;  %v793_v18 = vpack.c.bf16 %v757_v60, %v753_v61 }
 0x118   : > { %v612_v8 = vsel %vm608_vm8, %v599_v2, %v603_v62  ;;  %v611_v10 = vsel %vm608_vm8, %v597_v3, %v601_v63 }
 0x119   : > { %v758_v11 = vmul.f32 %v686_v6, %v612_v8  ;;  %v754_v12 = vmul.f32 %v682_v59, %v611_v10 }
 0x11b   : > { %v607_v15 = vpop.permute.xlu1 %606  ;;  %v605_v16 = vpop.permute.xlu0 %604  ;;  %v794_v17 = vpack.c.bf16 %v758_v11, %v754_v12 }
 0x11c   : > { %v610_v19 = vsel %vm608_vm8, %v603_v62, %v607_v15  ;;  %v616_v20 = vsel %vm608_vm8, %v607_v15, %v595_v54  ;;  %v609_v21 = vsel %vm608_vm8, %v601_v63, %v605_v16  ;;  %v615_v22 = vsel %vm608_vm8, %v605_v16, %v593_v55 }
 0x11d   : > { %v759_v23 = vmul.f32 %v687_v13, %v610_v19  ;;  %v760_v24 = vmul.f32 %v688_v14, %v616_v20  ;;  %v755_v25 = vmul.f32 %v683_v5, %v609_v21  ;;  %v756_v26 = vmul.f32 %v684_v4, %v615_v22  ;;  %858 = vmatprep.subr.bf16.mxu0 %v794_v17 }
 0x11e   : > { %859 = vmatpush1.bf16.msra.mxu0 %v793_v18 }
 0x11f   : > { %v796_v29 = vpack.c.bf16 %v760_v24, %v756_v26  ;;  %v795_v30 = vpack.c.bf16 %v759_v23, %v755_v25 }
 0x121   : > { %875 = vmatmul.mubr.bf16.vlgmr.msra.gmra.mrb[0].mxu0 %v4408_v27  ;;  %911 = vmatprep.subr.bf16.mxu1 %v796_v29 }
 0x122   : > { %912 = vmatpush1.bf16.msra.mxu1 %v795_v30  ;;  %4217 = vmatprep.mubr.msk.bf16.mxu0 %vm835_vm1, %v4411_v28 }
 0x125   : > { %928 = vmatmul.mubr.bf16.vlgmr.msra.gmra.mrb[0].mxu1 %v4408_v27 }
 0x126   : > { %4219 = vmatprep.mubr.msk.bf16.mxu1 %vm835_vm1, %v4411_v28 }
 0x129   : > { %885 = vmatmul.mubr.bf16.gmra.mrb[4].mxu0 %v4413_v31 }
 0x12c   : > { %v5276_v36 = vpop.permute.xlu1 %804 }
 0x12d   : > { %938 = vmatmul.mubr.bf16.gmra.mrb[4].mxu1 %v4413_v31  ;;  %v5273_v32 = vpop.permute.xlu0 %799  ;;  %10443 = vst [vmem:[#allocation6_spill] sm:$0xff] %v5276_v36 }
 0x12e   : > { %10442 = vst [vmem:[#allocation5_spill] sm:$0xff] %v5273_v32 }
 0x131   : > { %v5419_v17 = vpop.permute.xlu1 %809 }
 0x132   : > { %10446 = vst [vmem:[#allocation9_spill] sm:$0xff] %v5419_v17  ;;  %v5425_v19 = vpop.permute.xlu0 %814 }
 0x133   : > { %10447 = vst [vmem:[#allocation10_spill] sm:$0xff] %v5425_v19 }
 0x1f4   : > { %v876_v33 = vpop.f32.mrb[0].mxu0 }
 0x1f5   : > { %v877_v34 = vadd.f32 %v876_v33, %v5273_v32  ;;  %v878_v35 = vpop.f32.mrb[1].mxu0 }
 0x1f6   : > { %v880_v37 = vpop.f32.mrb[2].mxu0  ;;  %v879_v62 = vadd.f32 %v878_v35, %v5273_v32 }
 0x1f7   : > { %v948_v38 = vmul.f32 0.1, %v877_v34  ;;  %v881_v39 = vadd.f32 %v880_v37, %v5276_v36  ;;  %v882_v40 = vpop.f32.mrb[3].mxu0 }
 0x1f8   : > { %v929_v41 = vpop.f32.mrb[0].mxu1  ;;  %v883_v63 = vadd.f32 %v882_v40, %v5276_v36  ;;  %v949_v8 = vmul.f32 0.1, %v879_v62 }
 0x1f9   : > { %v964_v42 = vmax.f32 %v877_v34, %v948_v38  ;;  %v952_v43 = vmul.f32 0.1, %v881_v39  ;;  %v930_v44 = vadd.f32 %v929_v41, %v5273_v32  ;;  %v931_v45 = vpop.f32.mrb[1].mxu1 }
 0x1fa   : > { %v933_v46 = vpop.f32.mrb[2].mxu1  ;;  %v932_v10 = vadd.f32 %v931_v45, %v5273_v32  ;;  %v953_v11 = vmul.f32 0.1, %v883_v63  ;;  %v5360_v13 = vmax.f32 %v879_v62, %v949_v8 }
 0x1fb   : > { %v968_v49 = vmax.f32 %v881_v39, %v952_v43  ;;  %v950_v51 = vmul.f32 0.1, %v930_v44  ;;  %v934_v52 = vadd.f32 %v933_v46, %v5276_v36  ;;  %v935_v53 = vpop.f32.mrb[3].mxu1  ;;  %988 = vrot.lane.b32.xlu1 %v964_v42, %s4810_s29  ;;  %v5295_v2 = vmul.f32 %v1436_v47, %v964_v42 }
 0x1fc   : > { %v5288_v54 = vpop.f32.mrb[4].mxu0  ;;  %v936_v12 = vadd.f32 %v935_v53, %v5276_v36  ;;  %v951_v14 = vmul.f32 0.1, %v932_v10  ;;  %v5363_v5 = vmax.f32 %v883_v63, %v953_v11 }
 0x1fd   : > { %v5290_v55 = vmax.f32 %v930_v44, %v950_v51  ;;  %v954_v0 = vmul.f32 0.1, %v934_v52  ;;  %v5292_v1 = vpop.f32.mrb[5].mxu0  ;;  %990 = vrot.lane.b32.xlu0 %v968_v49, %s4810_s29  ;;  %10444 = vst [vmem:[#allocation7_spill] sm:$0xff] %v5295_v2  ;;  %v5297_v3 = vmul.f32 %v1440_v48, %v968_v49  ;;  %v887_v18 = vadd.f32 %v5288_v54, %v5419_v17 }
 0x1fe   : > { %v5299_v56 = vpop.f32.mrb[6].mxu0  ;;  %v955_v4 = vmul.f32 0.1, %v936_v12  ;;  %v5367_v15 = vmax.f32 %v932_v10, %v951_v14  ;;  %v889_v63 = vadd.f32 %v5292_v1, %v5419_v17 }
 0x1ff   : > { %10445 = vst [vmem:[#allocation8_spill] sm:$0xff] %v5297_v3  ;;  %v5301_v57 = vmax.f32 %v934_v52, %v954_v0  ;;  %v5303_v7 = vpop.f32.mrb[7].mxu0  ;;  %1004 = vrot.lane.b32.xlu1 %v5290_v55, %s4810_s29  ;;  %v891_v20 = vadd.f32 %v5299_v56, %v5425_v19  ;;  %v956_v21 = vmul.f32 0.1, %v887_v18 }
 0x200   : > { %v5309_v6 = vpop.f32.mrb[4].mxu1  ;;  %v5371_v16 = vmax.f32 %v936_v12, %v955_v4  ;;  %v893_v10 = vadd.f32 %v5303_v7, %v5425_v19  ;;  %v957_v12 = vmul.f32 0.1, %v889_v63 }
 0x201   : > { %v5311_v59 = vpop.f32.mrb[5].mxu1  ;;  %1006 = vrot.lane.b32.xlu0 %v5301_v57, %s4810_s29  ;;  %v940_v22 = vadd.f32 %v5309_v6, %v5419_v17  ;;  %v960_v24 = vmul.f32 0.1, %v891_v20  ;;  %v5443_v27 = vmax.f32 %v887_v18, %v956_v21 }
 0x202   : > { %v5315_v60 = vpop.f32.mrb[6].mxu1  ;;  %v942_v14 = vadd.f32 %v5311_v59, %v5419_v17  ;;  %v961_v1 = vmul.f32 0.1, %v893_v10  ;;  %v1373_v59 = vld [vmem:[%s10228_s2 + $0x8] sm:$0xff] }
 0x203   : > { %v5317_v61 = vpop.f32.mrb[7].mxu1  ;;  %1036 = vrot.lane.b32.xlu1 %v964_v42, %s4811_s20  ;;  %v944_v25 = vadd.f32 %v5315_v60, %v5425_v19  ;;  %v958_v28 = vmul.f32 0.1, %v940_v22  ;;  %v5449_v30 = vmax.f32 %v891_v20, %v960_v24  ;;  %v5571_v20 = vmax.f32 %v889_v63, %v957_v12  ;;  %v1377_v24 = vld [vmem:[%s10228_s2 + $0x28] sm:$0xff] }
 0x204   : > { %v946_v18 = vadd.f32 %v5317_v61, %v5425_v19  ;;  %v959_v21 = vmul.f32 0.1, %v942_v14  ;;  %v1372_v19 = vld [vmem:[%s10228_s2] sm:$0xff] }
 0x205   : > { %1038 = vrot.lane.b32.xlu0 %v968_v49, %s4811_s20  ;;  %v962_v31 = vmul.f32 0.1, %v944_v25  ;;  %v5455_v34 = vmax.f32 %v940_v22, %v958_v28 }
 0x206   : > { %v963_v28 = vmul.f32 0.1, %v946_v18  ;;  %v5591_v12 = vmax.f32 %v942_v14, %v959_v21  ;;  %v1375_v14 = vld [vmem:[%s10228_s2 + $0x18] sm:$0xff] }
 0x207   : > { %1052 = vrot.lane.b32.xlu1 %v5290_v55, %s4811_s20  ;;  %v5461_v37 = vmax.f32 %v944_v25, %v962_v31  ;;  %v5584_v25 = vmax.f32 %v893_v10, %v961_v1 }
 0x209   : > { %1054 = vrot.lane.b32.xlu0 %v5301_v57, %s4811_s20 }
 0x20b   : > { %1084 = vrot.lane.b32.xlu1 %v964_v42, %s4812_s21 }
 0x20d   : > { %1086 = vrot.lane.b32.xlu0 %v968_v49, %s4812_s21 }
 0x20f   : > { %1100 = vrot.lane.b32.xlu1 %v5290_v55, %s4812_s21 }
 0x211   : > { %1102 = vrot.lane.b32.xlu0 %v5301_v57, %s4812_s21 }
 0x213   : > { %1132 = vrot.lane.b32.xlu1 %v964_v42, %s4813_s22 }
 0x215   : > { %1134 = vrot.lane.b32.xlu0 %v968_v49, %s4813_s22 }
 0x217   : > { %1148 = vrot.lane.b32.xlu1 %v5290_v55, %s4813_s22 }
 0x219   : > { %1150 = vrot.lane.b32.xlu0 %v5301_v57, %s4813_s22 }
 0x21b   : > { %1180 = vrot.lane.b32.xlu1 %v964_v42, %s10387_s23 }
 0x21d   : > { %1182 = vrot.lane.b32.xlu0 %v968_v49, %s10387_s23 }
 0x21f   : > { %1196 = vrot.lane.b32.xlu1 %v5290_v55, %s10387_s23 }
 0x221   : > { %1198 = vrot.lane.b32.xlu0 %v5301_v57, %s10387_s23 }
 0x223   : > { %1228 = vrot.lane.b32.xlu1 %v964_v42, %s10282_s24 }
 0x225   : > { %1230 = vrot.lane.b32.xlu0 %v968_v49, %s10282_s24 }
 0x227   : > { %1244 = vrot.lane.b32.xlu1 %v5290_v55, %s10282_s24 }
 0x229   : > { %1246 = vrot.lane.b32.xlu0 %v5301_v57, %s10282_s24 }
 0x22b   : > { %1276 = vrot.lane.b32.xlu1 %v964_v42, %s10280_s25 }
 0x22d   : > { %1278 = vrot.lane.b32.xlu0 %v968_v49, %s10280_s25 }
 0x22f   : > { %1292 = vrot.lane.b32.xlu1 %v5290_v55, %s10280_s25 }
 0x231   : > { %1294 = vrot.lane.b32.xlu0 %v5301_v57, %s10280_s25 }
 0x233   : > { %1324 = vrot.lane.b32.xlu1 %v964_v42, %s10278_s30 }
 0x235   : > { %1326 = vrot.lane.b32.xlu0 %v968_v49, %s10278_s30 }
 0x237   : > { %996 = vrot.lane.b32.xlu1 %v5360_v13, %s4810_s29 }
 0x239   : > { %998 = vrot.lane.b32.xlu0 %v5363_v5, %s4810_s29 }
 0x23b   : > { %1012 = vrot.lane.b32.xlu1 %v5367_v15, %s4810_s29 }
 0x23d   : > { %1014 = vrot.lane.b32.xlu0 %v5371_v16, %s4810_s29 }
 0x23f   : > { %1044 = vrot.lane.b32.xlu1 %v5360_v13, %s4811_s20 }
 0x241   : > { %1046 = vrot.lane.b32.xlu0 %v5363_v5, %s4811_s20 }
 0x243   : > { %1060 = vrot.lane.b32.xlu1 %v5367_v15, %s4811_s20 }
 0x245   : > { %1062 = vrot.lane.b32.xlu0 %v5371_v16, %s4811_s20 }
 0x247   : > { %1092 = vrot.lane.b32.xlu1 %v5360_v13, %s4812_s21 }
 0x249   : > { %1094 = vrot.lane.b32.xlu0 %v5363_v5, %s4812_s21 }
 0x24b   : > { %1108 = vrot.lane.b32.xlu1 %v5367_v15, %s4812_s21 }
 0x24d   : > { %1110 = vrot.lane.b32.xlu0 %v5371_v16, %s4812_s21 }
 0x24f   : > { %1140 = vrot.lane.b32.xlu1 %v5360_v13, %s4813_s22 }
 0x251   : > { %1142 = vrot.lane.b32.xlu0 %v5363_v5, %s4813_s22 }
 0x253   : > { %1156 = vrot.lane.b32.xlu1 %v5367_v15, %s4813_s22 }
 0x255   : > { %1158 = vrot.lane.b32.xlu0 %v5371_v16, %s4813_s22 }
 0x257   : > { %1188 = vrot.lane.b32.xlu1 %v5360_v13, %s10387_s23 }
 0x259   : > { %1190 = vrot.lane.b32.xlu0 %v5363_v5, %s10387_s23 }
 0x25b   : > { %1204 = vrot.lane.b32.xlu1 %v5367_v15, %s10387_s23 }
 0x25d   : > { %1206 = vrot.lane.b32.xlu0 %v5371_v16, %s10387_s23 }
 0x25f   : > { %1236 = vrot.lane.b32.xlu1 %v5360_v13, %s10282_s24 }
 0x261   : > { %1238 = vrot.lane.b32.xlu0 %v5363_v5, %s10282_s24 }
 0x263   : > { %1252 = vrot.lane.b32.xlu1 %v5367_v15, %s10282_s24 }
 0x265   : > { %1254 = vrot.lane.b32.xlu0 %v5371_v16, %s10282_s24 }
 0x267   : > { %1284 = vrot.lane.b32.xlu1 %v5360_v13, %s10280_s25 }
 0x269   : > { %1286 = vrot.lane.b32.xlu0 %v5363_v5, %s10280_s25 }
 0x26b   : > { %1300 = vrot.lane.b32.xlu1 %v5367_v15, %s10280_s25 }
 0x26d   : > { %1302 = vrot.lane.b32.xlu0 %v5371_v16, %s10280_s25  ;;  %v5435_v23 = vpop.permute.xlu1 %988 }
 0x26f   : > { %1332 = vrot.lane.b32.xlu1 %v5360_v13, %s10278_s30  ;;  %v5441_v26 = vpop.permute.xlu0 %990 }
 0x271   : > { %1334 = vrot.lane.b32.xlu0 %v5363_v5, %s10278_s30  ;;  %v5447_v29 = vpop.permute.xlu1 %1004 }
 0x273   : > { %992 = vrot.lane.b32.xlu1 %v5443_v27, %s4810_s29  ;;  %v5453_v33 = vpop.permute.xlu0 %1006 }
 0x275   : > { %v5457_v35 = vpop.permute.xlu1 %1036  ;;  %994 = vrot.lane.b32.xlu0 %v5449_v30, %s4810_s29 }
 0x277   : > { %1008 = vrot.lane.b32.xlu1 %v5455_v34, %s4810_s29  ;;  %v5465_v38 = vpop.permute.xlu0 %1038 }
 0x279   : > { %v5467_v39 = vpop.permute.xlu1 %1052  ;;  %1010 = vrot.lane.b32.xlu0 %v5461_v37, %s4810_s29 }
 0x27b   : > { %1040 = vrot.lane.b32.xlu1 %v5443_v27, %s4811_s20  ;;  %v5473_v40 = vpop.permute.xlu0 %1054 }
 0x27d   : > { %v5475_v41 = vpop.permute.xlu1 %1084  ;;  %1042 = vrot.lane.b32.xlu0 %v5449_v30, %s4811_s20 }
 0x27f   : > { %1056 = vrot.lane.b32.xlu1 %v5455_v34, %s4811_s20  ;;  %v5481_v42 = vpop.permute.xlu0 %1086 }
 0x281   : > { %v5483_v43 = vpop.permute.xlu1 %1100  ;;  %1058 = vrot.lane.b32.xlu0 %v5461_v37, %s4811_s20 }
 0x283   : > { %1088 = vrot.lane.b32.xlu1 %v5443_v27, %s4812_s21  ;;  %v5489_v44 = vpop.permute.xlu0 %1102 }
 0x285   : > { %v5491_v45 = vpop.permute.xlu1 %1132  ;;  %1090 = vrot.lane.b32.xlu0 %v5449_v30, %s4812_s21 }
 0x287   : > { %1104 = vrot.lane.b32.xlu1 %v5455_v34, %s4812_s21  ;;  %v5497_v46 = vpop.permute.xlu0 %1134 }
 0x289   : > { %v5499_v47 = vpop.permute.xlu1 %1148  ;;  %1106 = vrot.lane.b32.xlu0 %v5461_v37, %s4812_s21 }
 0x28b   : > { %1136 = vrot.lane.b32.xlu1 %v5443_v27, %s4813_s22  ;;  %v5505_v48 = vpop.permute.xlu0 %1150 }
 0x28d   : > { %v5507_v49 = vpop.permute.xlu1 %1180  ;;  %1138 = vrot.lane.b32.xlu0 %v5449_v30, %s4813_s22 }
 0x28e   : > { %10448 = vst [vmem:[#allocation11_spill] sm:$0xff] %v5507_v49 }
 0x28f   : > { %1152 = vrot.lane.b32.xlu1 %v5455_v34, %s4813_s22  ;;  %v5513_v51 = vpop.permute.xlu0 %1182 }
 0x290   : > { %10449 = vst [vmem:[#allocation12_spill] sm:$0xff] %v5513_v51  ;;  %v4448_v51 = vld [vmem:[%s5133_s13 + $0x10] sm:$0xff] }
 0x291   : > { %v5515_v52 = vpop.permute.xlu1 %1196  ;;  %1154 = vrot.lane.b32.xlu0 %v5461_v37, %s4813_s22 }
 0x292   : > { %10450 = vst [vmem:[#allocation13_spill] sm:$0xff] %v5515_v52  ;;  %v1409_v52 = vld [vmem:[%s10228_s2 + $0x128] sm:$0xff] }
 0x293   : > { %1184 = vrot.lane.b32.xlu1 %v5443_v27, %s10387_s23  ;;  %v5521_v53 = vpop.permute.xlu0 %1198 }
 0x294   : > { %10451 = vst [vmem:[#allocation14_spill] sm:$0xff] %v5521_v53 }
 0x295   : > { %v5523_v54 = vpop.permute.xlu1 %1228  ;;  %1186 = vrot.lane.b32.xlu0 %v5449_v30, %s10387_s23 }
 0x296   : > { %10452 = vst [vmem:[#allocation15_spill] sm:$0xff] %v5523_v54 }
 0x297   : > { %1200 = vrot.lane.b32.xlu1 %v5455_v34, %s10387_s23  ;;  %v5529_v0 = vpop.permute.xlu0 %1230 }
 0x298   : > { %10453 = vst [vmem:[#allocation16_spill] sm:$0xff] %v5529_v0  ;;  %v4446_v0 = vld [vmem:[%s5133_s13] sm:$0xff] }
 0x299   : > { %v5531_v56 = vpop.permute.xlu1 %1244  ;;  %1202 = vrot.lane.b32.xlu0 %v5461_v37, %s10387_s23 }
 0x29a   : > { %10454 = vst [vmem:[#allocation17_spill] sm:$0xff] %v5531_v56 }
 0x29b   : > { %1232 = vrot.lane.b32.xlu1 %v5443_v27, %s10282_s24  ;;  %v5537_v6 = vpop.permute.xlu0 %1246 }
 0x29c   : > { %10455 = vst [vmem:[#allocation18_spill] sm:$0xff] %v5537_v6 }
 0x29d   : > { %v5539_v60 = vpop.permute.xlu1 %1276  ;;  %1234 = vrot.lane.b32.xlu0 %v5449_v30, %s10282_s24 }
 0x29e   : > { %10456 = vst [vmem:[#allocation19_spill] sm:$0xff] %v5539_v60 }
 0x29f   : > { %1248 = vrot.lane.b32.xlu1 %v5455_v34, %s10282_s24  ;;  %v5545_v62 = vpop.permute.xlu0 %1278 }
 0x2a0   : > { %10457 = vst [vmem:[#allocation20_spill] sm:$0xff] %v5545_v62  ;;  %v4416_v62 = vld [vmem:[%s5091_s16 + $0x4] ss:$12 sps:$4 sm:$0xff]  }
 0x2a1   : > { %v5549_v8 = vpop.permute.xlu1 %1292  ;;  %1250 = vrot.lane.b32.xlu0 %v5461_v37, %s10282_s24  ;;  %1817 = vmatprep.mubr.bf16.mxu0 %v4416_v62 }
 0x2a2   : > { %10458 = vst [vmem:[#allocation21_spill] sm:$0xff] %v5549_v8  ;;  %1923 = vmatprep.mubr.bf16.mxu1 %v4416_v62 }
 0x2a3   : > { %1280 = vrot.lane.b32.xlu1 %v5443_v27, %s10280_s25  ;;  %v5557_v11 = vpop.permute.xlu0 %1294 }
 0x2a4   : > { %10459 = vst [vmem:[#allocation22_spill] sm:$0xff] %v5557_v11 }
 0x2a5   : > { %v5561_v4 = vpop.permute.xlu1 %1324  ;;  %1282 = vrot.lane.b32.xlu0 %v5449_v30, %s10280_s25 }
 0x2a6   : > { %10460 = vst [vmem:[#allocation23_spill] sm:$0xff] %v5561_v4 }
 0x2a7   : > { %1296 = vrot.lane.b32.xlu1 %v5455_v34, %s10280_s25  ;;  %v5569_v7 = vpop.permute.xlu0 %1326 }
 0x2a8   : > { %10461 = vst [vmem:[#allocation24_spill] sm:$0xff] %v5569_v7 }
 0x2a9   : > { %v997_v22 = vpop.permute.xlu1 %996  ;;  %1298 = vrot.lane.b32.xlu0 %v5461_v37, %s10280_s25 }
 0x2aa   : > { %v1028_v61 = vsel %vm433_vm0, %v5435_v23, %v997_v22 }
 0x2ab   : > { %1000 = vrot.lane.b32.xlu1 %v5571_v20, %s4810_s29  ;;  %v999_v31 = vpop.permute.xlu0 %998  ;;  %v1517_v50 = vmul.f32 %v1373_v59, %v1028_v61  ;;  %v1376_v61 = vld [vmem:[%s10228_s2 + $0x20] sm:$0xff] }
 0x2ac   : > { %v1029_v63 = vsel %vm433_vm0, %v5441_v26, %v999_v31  ;;  %v1025_v10 = vsel %vm433_vm0, %v999_v31, %v5453_v33  ;;  %v5619_v31 = vmax.f32 %v946_v18, %v963_v28 }
 0x2ad   : > { %v1521_v1 = vmul.f32 %v1377_v24, %v1029_v63  ;;  %v1013_v17 = vpop.permute.xlu1 %1012  ;;  %1002 = vrot.lane.b32.xlu0 %v5584_v25, %s4810_s29  ;;  %v1379_v24 = vld [vmem:[%s10228_s2 + $0x38] sm:$0xff]  ;;  %v1024_v63 = vsel %vm433_vm0, %v997_v22, %v5447_v29 }
 0x2ae   : > { %v1020_v21 = vsel %vm433_vm0, %v5447_v29, %v1013_v17  ;;  %v1032_v59 = vsel %vm433_vm0, %v1013_v17, %v5435_v23  ;;  %v1374_v17 = vld [vmem:[%s10228_s2 + $0x10] sm:$0xff]  ;;  %v1522_v23 = vmul.f32 %v1378_v58, %v1025_v10 }
 0x2af   : > { %1016 = vrot.lane.b32.xlu1 %v5591_v12, %s4810_s29  ;;  %v1015_v36 = vpop.permute.xlu0 %1014  ;;  %v1661_v32 = vpack.c.bf16 %v1521_v1, %v1517_v50  ;;  %v1516_v7 = vmul.f32 %v1372_v19, %v1032_v59  ;;  %v1519_v29 = vmul.f32 %v1375_v14, %v1020_v21  ;;  %v1518_v50 = vmul.f32 %v1374_v17, %v1024_v63 }
 0x2b0   : > { %v1021_v18 = vsel %vm433_vm0, %v5453_v33, %v1015_v36  ;;  %v1033_v28 = vsel %vm433_vm0, %v1015_v36, %v5441_v26 }
 0x2b1   : > { %v1520_v22 = vmul.f32 %v1376_v61, %v1033_v28  ;;  %v1523_v4 = vmul.f32 %v1379_v24, %v1021_v18  ;;  %v5635_v11 = vpop.permute.xlu1 %1044  ;;  %1018 = vrot.lane.b32.xlu0 %v5619_v31, %s4810_s29  ;;  %1785 = vmatprep.subr.bf16.mxu0 %v1661_v32  ;;  %v1662_v10 = vpack.c.bf16 %v1522_v23, %v1518_v50 }
 0x2b3   : > { %v1660_v58 = vpack.c.bf16 %v1520_v22, %v1516_v7  ;;  %1048 = vrot.lane.b32.xlu1 %v5571_v20, %s4811_s20  ;;  %v5641_v19 = vpop.permute.xlu0 %1046  ;;  %v1663_v33 = vpack.c.bf16 %v1523_v4, %v1519_v29 }
 0x2b5   : > { %v5643_v1 = vpop.permute.xlu1 %1060  ;;  %1050 = vrot.lane.b32.xlu0 %v5584_v25, %s4811_s20  ;;  %1786 = vmatpush1.bf16.msra.mxu0 %v1660_v58 }
 0x2b6   : > { %1891 = vmatprep.subr.bf16.mxu1 %v1663_v33 }
 0x2b7   : > { %1892 = vmatpush1.bf16.msra.mxu1 %v1662_v10  ;;  %1064 = vrot.lane.b32.xlu1 %v5591_v12, %s4811_s20  ;;  %v5649_v32 = vpop.permute.xlu0 %1062 }
 0x2b9   : > { %v5651_v36 = vpop.permute.xlu1 %1092  ;;  %1066 = vrot.lane.b32.xlu0 %v5619_v31, %s4811_s20 }
 0x2bb   : > { %1096 = vrot.lane.b32.xlu1 %v5571_v20, %s4812_s21  ;;  %v5657_v26 = vpop.permute.xlu0 %1094 }
 0x2bd   : > { %v5659_v4 = vpop.permute.xlu1 %1108  ;;  %1098 = vrot.lane.b32.xlu0 %v5584_v25, %s4812_s21 }
 0x2bf   : > { %1112 = vrot.lane.b32.xlu1 %v5591_v12, %s4812_s21  ;;  %v5665_v7 = vpop.permute.xlu0 %1110 }
 0x2c1   : > { %v5667_v14 = vpop.permute.xlu1 %1140  ;;  %1114 = vrot.lane.b32.xlu0 %v5619_v31, %s4812_s21 }
 0x2c3   : > { %1144 = vrot.lane.b32.xlu1 %v5571_v20, %s4813_s22  ;;  %v5673_v21 = vpop.permute.xlu0 %1142 }
 0x2c5   : > { %v5675_v59 = vpop.permute.xlu1 %1156  ;;  %1146 = vrot.lane.b32.xlu0 %v5584_v25, %s4813_s22 }
 0x2c7   : > { %1160 = vrot.lane.b32.xlu1 %v5591_v12, %s4813_s22  ;;  %v5681_v61 = vpop.permute.xlu0 %1158 }
 0x2c9   : > { %v5683_v24 = vpop.permute.xlu1 %1188  ;;  %1162 = vrot.lane.b32.xlu0 %v5619_v31, %s4813_s22 }
 0x2ca   : > { %10462 = vst [vmem:[#allocation25_spill] sm:$0xff] %v5683_v24  ;;  %v1120_v24 = vsel %vm483_vm3, %v5651_v36, %v5483_v43 }
 0x2cb   : > { %1340 = vrot.lane.b32.xlu1 %v5290_v55, %s10278_s30  ;;  %v5689_v63 = vpop.permute.xlu0 %1190 }
 0x2cc   : > { %10463 = vst [vmem:[#allocation26_spill] sm:$0xff] %v5689_v63 }
 0x2cd   : > { %v5691_v17 = vpop.permute.xlu1 %1204  ;;  %1342 = vrot.lane.b32.xlu0 %v5301_v57, %s10278_s30 }
 0x2ce   : > { %10464 = vst [vmem:[#allocation27_spill] sm:$0xff] %v5691_v17 }
 0x2cf   : > { %1192 = vrot.lane.b32.xlu1 %v5571_v20, %s10387_s23  ;;  %v5697_v23 = vpop.permute.xlu0 %1206 }
 0x2d0   : > { %10465 = vst [vmem:[#allocation28_spill] sm:$0xff] %v5697_v23 }
 0x2d1   : > { %v5699_v18 = vpop.permute.xlu1 %1236  ;;  %1350 = vrot.lane.b32.xlu0 %v5371_v16, %s10278_s30 }
 0x2d2   : > { %10466 = vst [vmem:[#allocation29_spill] sm:$0xff] %v5699_v18 }
 0x2d3   : > { %1208 = vrot.lane.b32.xlu1 %v5591_v12, %s10387_s23  ;;  %v5705_v28 = vpop.permute.xlu0 %1238 }
 0x2d4   : > { %10467 = vst [vmem:[#allocation30_spill] sm:$0xff] %v5705_v28  ;;  %v4447_v28 = vld [vmem:[%s5133_s13 + $0x8] sm:$0xff] }
 0x2d5   : > { %v5707_v29 = vpop.permute.xlu1 %1252  ;;  %1194 = vrot.lane.b32.xlu0 %v5584_v25, %s10387_s23 }
 0x2d6   : > { %10468 = vst [vmem:[#allocation31_spill] sm:$0xff] %v5707_v29 }
 0x2d7   : > { %1240 = vrot.lane.b32.xlu1 %v5571_v20, %s10282_s24  ;;  %v5713_v22 = vpop.permute.xlu0 %1254 }
 0x2d8   : > { %10469 = vst [vmem:[#allocation32_spill] sm:$0xff] %v5713_v22  ;;  %v4819_v22 = vmov 1  }
 0x2d9   : > { %v5715_v50 = vpop.permute.xlu1 %1284  ;;  %1210 = vrot.lane.b32.xlu0 %v5619_v31, %s10387_s23  ;;  %4402 = vset.pattern.permute.xlu1 %v4819_v22 }
 0x2da   : > { %10470 = vst [vmem:[#allocation33_spill] sm:$0xff] %v5715_v50  ;;  %4403 = vset.pattern.permute.xlu0 %v4819_v22 }
 0x2db   : > { %1256 = vrot.lane.b32.xlu1 %v5591_v12, %s10282_s24  ;;  %v5721_v58 = vpop.permute.xlu0 %1286 }
 0x2dc   : > { %10471 = vst [vmem:[#allocation34_spill] sm:$0xff] %v5721_v58 }
 0x2dd   : > { %v5723_v33 = vpop.permute.xlu1 %1300  ;;  %1242 = vrot.lane.b32.xlu0 %v5584_v25, %s10282_s24 }
 0x2de   : > { %10472 = vst [vmem:[#allocation35_spill] sm:$0xff] %v5723_v33 }
 0x2df   : > { %1288 = vrot.lane.b32.xlu1 %v5571_v20, %s10280_s25  ;;  %v5729_v10 = vpop.permute.xlu0 %1302 }
 0x2e0   : > { %10473 = vst [vmem:[#allocation36_spill] sm:$0xff] %v5729_v10 }
 0x2e1   : > { %v5731_v2 = vpop.permute.xlu1 %1332  ;;  %1258 = vrot.lane.b32.xlu0 %v5619_v31, %s10282_s24  ;;  %s10586_s24 = smov 113  }
 0x2e2   : > { %10474 = vst [vmem:[#allocation37_spill] sm:$0xff] %v5731_v2 }
 0x2e3   : > { %1304 = vrot.lane.b32.xlu1 %v5591_v12, %s10280_s25  ;;  %v5737_v3 = vpop.permute.xlu0 %1334 }
 0x2e4   : > { %10475 = vst [vmem:[#allocation38_spill] sm:$0xff] %v5737_v3 }
 0x2e5   : > { %v5740_v33 = vpop.permute.xlu1 %992  ;;  %1290 = vrot.lane.b32.xlu0 %v5584_v25, %s10280_s25 }
 0x2e7   : > { %1348 = vrot.lane.b32.xlu1 %v5367_v15, %s10278_s30  ;;  %v5746_v2 = vpop.permute.xlu0 %994 }
 0x2e9   : > { %v5748_v10 = vpop.permute.xlu1 %1008  ;;  %1306 = vrot.lane.b32.xlu0 %v5619_v31, %s10280_s25  ;;  %s10587_s25 = smov 112  }
 0x2eb   : > { %1328 = vrot.lane.b32.xlu1 %v5443_v27, %s10278_s30  ;;  %v5754_v3 = vpop.permute.xlu0 %1010 }
 0x2ed   : > { %v5756_v58 = vpop.permute.xlu1 %1040  ;;  %1330 = vrot.lane.b32.xlu0 %v5449_v30, %s10278_s30 }
 0x2ef   : > { %1336 = vrot.lane.b32.xlu1 %v5571_v20, %s10278_s30  ;;  %v5762_v62 = vpop.permute.xlu0 %1042 }
 0x2f1   : > { %v5764_v8 = vpop.permute.xlu1 %1056  ;;  %1346 = vrot.lane.b32.xlu0 %v5461_v37, %s10278_s30 }
 0x2f3   : > { %1344 = vrot.lane.b32.xlu1 %v5455_v34, %s10278_s30  ;;  %v5770_v60 = vpop.permute.xlu0 %1058 }
 0x2f5   : > { %v5772_v50 = vpop.permute.xlu1 %1088  ;;  %1338 = vrot.lane.b32.xlu0 %v5584_v25, %s10278_s30 }
 0x2f7   : > { %1352 = vrot.lane.b32.xlu1 %v5591_v12, %s10278_s30  ;;  %v5778_v29 = vpop.permute.xlu0 %1090 }
 0x2f8   : > { %10476 = vst [vmem:[#allocation39_spill] sm:$0xff] %v5778_v29 }
 0x2f9   : > { %v5780_v54 = vpop.permute.xlu1 %1104  ;;  %1354 = vrot.lane.b32.xlu0 %v5619_v31, %s10278_s30 }
 0x2fa   : > { %10477 = vst [vmem:[#allocation40_spill] sm:$0xff] %v5780_v54 }
 0x2fb   : > { %v5784_v18 = vpop.permute.xlu0 %1106  ;;  %1733 = vperm.xlu1 %4402, %v4446_v0   ;;  %v1441_v0 = vld [vmem:[%s10228_s2 + $0x228] sm:$0xff] }
 0x2fc   : > { %10478 = vst [vmem:[#allocation41_spill] sm:$0xff] %v5784_v18 }
 0x2fd   : > { %v5786_v56 = vpop.permute.xlu1 %1136  ;;  %1737 = vperm.xlu0 %4403, %v4447_v28   ;;  %v1442_v28 = vld [vmem:[%s10228_s2 + $0x230] sm:$0xff] }
 0x2fe   : > { %10479 = vst [vmem:[#allocation42_spill] sm:$0xff] %v5786_v56  ;;  %v4449_v56 = vld [vmem:[%s5133_s13 + $0x18] sm:$0xff] }
 0x2ff   : > { %v5788_v6 = vpop.permute.xlu0 %1138  ;;  %1741 = vperm.xlu1 %4402, %v4448_v51   ;;  %v1443_v51 = vld [vmem:[%s10228_s2 + $0x238] sm:$0xff] }
 0x300   : > { %10480 = vst [vmem:[#allocation43_spill] sm:$0xff] %v5788_v6 }
 0x301   : > { %v5792_v23 = vpop.permute.xlu1 %1152 }
 0x302   : > { %10481 = vst [vmem:[#allocation44_spill] sm:$0xff] %v5792_v23  ;;  %v1448_v23 = vld [vmem:[%s10228_s2 + $0x260] sm:$0xff] }
 0x303   : > { %v5794_v17 = vpop.permute.xlu0 %1154  ;;  %1745 = vperm.xlu1 %4402, %v4449_v56   ;;  %v1437_v56 = vld [vmem:[%s10228_s2 + $0x208] sm:$0xff] }
 0x304   : > { %10482 = vst [vmem:[#allocation45_spill] sm:$0xff] %v5794_v17  ;;  %v1450_v17 = vld [vmem:[%s10228_s2 + $0x270] sm:$0xff] }
 0x305   : > { %v5797_v63 = vpop.permute.xlu1 %1184 }
 0x306   : > { %10483 = vst [vmem:[#allocation46_spill] sm:$0xff] %v5797_v63 }
 0x307   : > { %v5799_v53 = vpop.permute.xlu0 %1186 }
 0x308   : > { %10484 = vst [vmem:[#allocation47_spill] sm:$0xff] %v5799_v53  ;;  %v1438_v53 = vld [vmem:[%s10228_s2 + $0x210] sm:$0xff] }
 0x309   : > { %v5802_v54 = vpop.permute.xlu1 %1200  ;;  %v5861_v49 = vmul.f32 %v1438_v53, %v5290_v55  ;;  %v1447_v53 = vld [vmem:[%s10228_s2 + $0x258] sm:$0xff] }
 0x30a   : > { %10485 = vst [vmem:[#allocation48_spill] sm:$0xff] %v5802_v54  ;;  %v5832_v54 = vmul.f32 %v1443_v51, %v5371_v16  ;;  %v5849_v16 = vmul.f32 %v1442_v28, %v5301_v57  ;;  %v5855_v51 = vmul.f32 %v1437_v56, %v5360_v13  ;;  %v1446_v57 = vld [vmem:[%s10228_s2 + $0x250] sm:$0xff]  ;;  %v1073_v13 = vsel %vm458_vm2, %v5641_v19, %v5473_v40 }
 0x30b   : > { %v5804_v22 = vpop.permute.xlu0 %1202  ;;  %10491 = vst [vmem:[#allocation54_spill] sm:$0xff] %v5861_v49  ;;  %v1394_v28 = vld [vmem:[%s10228_s2 + $0xb0] sm:$0xff]  ;;  %v5888_v56 = vmul.f32 %v1450_v17, %v5461_v37  ;;  %v1072_v37 = vsel %vm458_vm2, %v5635_v11, %v5467_v39 }
 0x30c   : > { %10486 = vst [vmem:[#allocation49_spill] sm:$0xff] %v5804_v22  ;;  %v5829_v22 = vmul.f32 %v1441_v0, %v5363_v5  ;;  %v1445_v5 = vld [vmem:[%s10228_s2 + $0x248] sm:$0xff]  ;;  %10490 = vst [vmem:[#allocation53_spill] sm:$0xff] %v5849_v16  ;;  %v1451_v0 = vld [vmem:[%s10228_s2 + $0x278] sm:$0xff] }
 0x30d   : > { %v5806_v6 = vpop.permute.xlu1 %1232  ;;  %10495 = vst [vmem:[#allocation58_spill] sm:$0xff] %v5888_v56 }
 0x30e   : > { %10487 = vst [vmem:[#allocation50_spill] sm:$0xff] %v5806_v6  ;;  %v1439_v6 = vld [vmem:[%s10228_s2 + $0x218] sm:$0xff] }
 0x30f   : > { %v5817_v63 = vpop.permute.xlu0 %1234  ;;  %v5858_v29 = vmul.f32 %v1439_v6, %v5367_v15  ;;  %v5885_v6 = vmul.f32 %v1448_v23, %v5449_v30  ;;  %v1390_v30 = vld [vmem:[%s10228_s2 + $0x90] sm:$0xff]  ;;  %v1389_v23 = vld [vmem:[%s10228_s2 + $0x88] sm:$0xff] }
 0x310   : > { %10488 = vst [vmem:[#allocation51_spill] sm:$0xff] %v5817_v63  ;;  %v1449_v63 = vld [vmem:[%s10228_s2 + $0x268] sm:$0xff] }
 0x311   : > { %v5843_v18 = vpop.permute.xlu1 %1248  ;;  %v5879_v55 = vmul.f32 %v1449_v63, %v5584_v25  ;;  %10494 = vst [vmem:[#allocation57_spill] sm:$0xff] %v5885_v6  ;;  %v5898_v25 = vmul.f32 %v1451_v0, %v5619_v31  ;;  %v5915_v31 = vmul.f32 %v1446_v57, %v5455_v34  ;;  %v1393_v0 = vld [vmem:[%s10228_s2 + $0xa8] sm:$0xff]  ;;  %v5931_v34 = vmul.f32 %v1394_v28, %v1073_v13  ;;  %v1392_v57 = vld [vmem:[%s10228_s2 + $0xa0] sm:$0xff]  ;;  %v1395_v13 = vld [vmem:[%s10228_s2 + $0xb8] sm:$0xff] }
 0x312   : > { %10489 = vst [vmem:[#allocation52_spill] sm:$0xff] %v5843_v18  ;;  %v1444_v18 = vld [vmem:[%s10228_s2 + $0x240] sm:$0xff]  ;;  %v5951_v28 = vmul.f32 %v1390_v30, %v1072_v37 }
 0x313   : > { %v5876_v15 = vpop.permute.xlu0 %1250  ;;  %10493 = vst [vmem:[#allocation56_spill] sm:$0xff] %v5879_v55  ;;  %10497 = vst [vmem:[#allocation60_spill] sm:$0xff] %v5898_v25 }
 0x314   : > { %10492 = vst [vmem:[#allocation55_spill] sm:$0xff] %v5876_v15  ;;  %v5895_v15 = vmul.f32 %v1445_v5, %v5571_v20  ;;  %v5912_v20 = vmul.f32 %v1444_v18, %v5443_v27  ;;  %10500 = vst [vmem:[#allocation63_spill] sm:$0xff] %v5915_v31  ;;  %v1076_v5 = vsel %vm458_vm2, %v5457_v35, %v5635_v11  ;;  %v1422_v31 = vld [vmem:[%s10228_s2 + $0x190] sm:$0xff] }
 0x315   : > { %v5907_v63 = vpop.permute.xlu1 %1280  ;;  %v1077_v27 = vsel %vm458_vm2, %v5465_v38, %v5641_v19  ;;  %v5934_v18 = vmul.f32 %v1447_v53, %v5591_v12  ;;  %v1081_v11 = vsel %vm458_vm2, %v5649_v32, %v5465_v38  ;;  %v1069_v38 = vsel %vm458_vm2, %v5473_v40, %v5649_v32  ;;  %v1410_v53 = vld [vmem:[%s10228_s2 + $0x130] sm:$0xff]  ;;  %v1388_v40 = vld [vmem:[%s10228_s2 + $0x80] sm:$0xff] }
 0x316   : > { %10496 = vst [vmem:[#allocation59_spill] sm:$0xff] %v5895_v15  ;;  %10498 = vst [vmem:[#allocation61_spill] sm:$0xff] %v5907_v63  ;;  %v1121_v12 = vsel %vm483_vm3, %v5657_v26, %v5489_v44  ;;  %v5969_v37 = vmul.f32 %v1389_v23, %v1076_v5  ;;  %v5971_v19 = vmul.f32 %v1393_v0, %v1077_v27  ;;  %v1391_v27 = vld [vmem:[%s10228_s2 + $0x98] sm:$0xff] }
 0x317   : > { %10499 = vst [vmem:[#allocation62_spill] sm:$0xff] %v5912_v20  ;;  %10501 = vst [vmem:[#allocation64_spill] sm:$0xff] %v5934_v18  ;;  %v5943_v17 = vpop.permute.xlu0 %1282  ;;  %v1080_v32 = vsel %vm458_vm2, %v5643_v1, %v5457_v35  ;;  %v1125_v23 = vsel %vm483_vm3, %v5481_v42, %v5657_v26  ;;  %v1068_v35 = vsel %vm458_vm2, %v5467_v39, %v5643_v1  ;;  %v1406_v26 = vld [vmem:[%s10228_s2 + $0x110] sm:$0xff] }
 0x318   : > { %10502 = vst [vmem:[#allocation65_spill] sm:$0xff] %v5943_v17  ;;  %v5998_v30 = vmul.f32 %v1392_v57, %v1081_v11  ;;  %v6007_v0 = vmul.f32 %v1395_v13, %v1069_v38  ;;  %v1405_v17 = vld [vmem:[%s10228_s2 + $0x108] sm:$0xff]  ;;  %v1124_v39 = vsel %vm483_vm3, %v5475_v41, %v5651_v36  ;;  %v6016_v1 = vmul.f32 %v1410_v53, %v1121_v12  ;;  %v1408_v57 = vld [vmem:[%s10228_s2 + $0x120] sm:$0xff]  ;;  %v1407_v12 = vld [vmem:[%s10228_s2 + $0x118] sm:$0xff] }
 0x319   : > { %v5987_v5 = vpop.permute.xlu1 %1296  ;;  %v1129_v11 = vsel %vm483_vm3, %v5665_v7, %v5481_v42  ;;  %v6027_v38 = vmul.f32 %v1388_v40, %v1080_v32  ;;  %v6029_v63 = vmul.f32 %v1409_v52, %v1125_v23  ;;  %v1404_v36 = vld [vmem:[%s10228_s2 + $0x100] sm:$0xff]  ;;  %v1116_v53 = vsel %vm483_vm3, %v5483_v43, %v5659_v4  ;;  %v1411_v32 = vld [vmem:[%s10228_s2 + $0x138] sm:$0xff] }
 0x31a   : > { %10503 = vst [vmem:[#allocation66_spill] sm:$0xff] %v5987_v5  ;;  %v1128_v42 = vsel %vm483_vm3, %v5659_v4, %v5475_v41  ;;  %v6045_v52 = vmul.f32 %v1391_v27, %v1068_v35  ;;  %v6047_v40 = vmul.f32 %v1406_v26, %v1120_v24  ;;  %v1117_v23 = vsel %vm483_vm3, %v5489_v44, %v5665_v7  ;;  %v1381_v27 = vld [vmem:[%s10228_s2 + $0x48] sm:$0xff] }
 0x31b   : > { %v6025_v13 = vpop.permute.xlu0 %1298  ;;  %v6060_v4 = vmul.f32 %v1405_v17, %v1124_v39  ;;  %v6062_v24 = vmul.f32 %v1408_v57, %v1129_v11  ;;  %v1385_v44 = vld [vmem:[%s10228_s2 + $0x68] sm:$0xff]  ;;  %v6075_v26 = vmul.f32 %v1404_v36, %v1128_v42  ;;  %v6077_v17 = vmul.f32 %v1407_v12, %v1116_v53  ;;  %v1426_v53 = vld [vmem:[%s10228_s2 + $0x1b0] sm:$0xff]  ;;  %v1380_v12 = vld [vmem:[%s10228_s2 + $0x40] sm:$0xff] }
 0x31c   : > { %10504 = vst [vmem:[#allocation67_spill] sm:$0xff] %v6025_v13  ;;  %v6081_v11 = vmul.f32 %v1411_v32, %v1117_v23  ;;  %v1421_v41 = vld [vmem:[%s10228_s2 + $0x188] sm:$0xff]  ;;  %v1172_v43 = vsel %vm508_vm4, %v5491_v45, %v5667_v14  ;;  %v1169_v42 = vsel %vm508_vm4, %v5673_v21, %v5505_v48  ;;  %v1386_v23 = vld [vmem:[%s10228_s2 + $0x70] sm:$0xff]  ;;  %v1173_v20 = vsel %vm508_vm4, %v5497_v46, %v5673_v21 }
 0x31d   : > { %v1001_v13 = vpop.permute.xlu1 %1000  ;;  %v6135_v56 = vmul.f32 %v1421_v41, %v1172_v43  ;;  %v1425_v43 = vld [vmem:[%s10228_s2 + $0x1a8] sm:$0xff]  ;;  %v6150_v41 = vmul.f32 %v1426_v53, %v1169_v42 }
 0x31e   : > { %v1030_v35 = vsel %vm433_vm0, %v5740_v33, %v1001_v13 }
 0x31f   : > { %v1003_v39 = vpop.permute.xlu0 %1002  ;;  %v1525_v32 = vmul.f32 %v1381_v27, %v1030_v35  ;;  %v1168_v27 = vsel %vm508_vm4, %v5667_v14, %v5499_v47  ;;  %v1383_v35 = vld [vmem:[%s10228_s2 + $0x58] sm:$0xff] }
 0x320   : > { %v1031_v36 = vsel %vm433_vm0, %v5746_v2, %v1003_v39  ;;  %v1027_v7 = vsel %vm433_vm0, %v1003_v39, %v5754_v3  ;;  %v1387_v14 = vld [vmem:[%s10228_s2 + $0x78] sm:$0xff] }
 0x321   : > { %v1529_v57 = vmul.f32 %v1385_v44, %v1031_v36  ;;  %v1017_v5 = vpop.permute.xlu1 %1016  ;;  %v1384_v36 = vld [vmem:[%s10228_s2 + $0x60] sm:$0xff]  ;;  %v1530_v25 = vmul.f32 %v1386_v23, %v1027_v7  ;;  %v1397_v7 = vld [vmem:[%s10228_s2 + $0xc8] sm:$0xff] }
 0x322   : > { %v1022_v44 = vsel %vm433_vm0, %v5748_v10, %v1017_v5  ;;  %v1034_v39 = vsel %vm433_vm0, %v1017_v5, %v5740_v33  ;;  %v1382_v33 = vld [vmem:[%s10228_s2 + $0x50] sm:$0xff]  ;;  %v1026_v5 = vsel %vm433_vm0, %v1001_v13, %v5748_v10 }
 0x323   : > { %v1019_v6 = vpop.permute.xlu0 %1018  ;;  %v1665_v18 = vpack.c.bf16 %v1529_v57, %v1525_v32  ;;  %v1524_v16 = vmul.f32 %v1380_v12, %v1034_v39  ;;  %v1527_v15 = vmul.f32 %v1383_v35, %v1022_v44  ;;  %v6158_v32 = vmul.f32 %v1422_v31, %v1168_v27  ;;  %v1420_v31 = vld [vmem:[%s10228_s2 + $0x180] sm:$0xff] }
 0x324   : > { %v1023_v21 = vsel %vm433_vm0, %v5754_v3, %v1019_v6  ;;  %v1035_v49 = vsel %vm433_vm0, %v1019_v6, %v5746_v2  ;;  %v1526_v55 = vmul.f32 %v1382_v33, %v1026_v5  ;;  %v1401_v2 = vld [vmem:[%s10228_s2 + $0xe8] sm:$0xff]  ;;  %v6171_v6 = vmul.f32 %v1425_v43, %v1173_v20  ;;  %v1423_v20 = vld [vmem:[%s10228_s2 + $0x198] sm:$0xff]  ;;  %v1400_v5 = vld [vmem:[%s10228_s2 + $0xe0] sm:$0xff] }
 0x325   : > { %v1528_v10 = vmul.f32 %v1384_v36, %v1035_v49  ;;  %v1531_v13 = vmul.f32 %v1387_v14, %v1023_v21  ;;  %v1049_v57 = vpop.permute.xlu1 %1048  ;;  %1787 = vmatprep.subr.bf16.mxu0 %v1665_v18  ;;  %v1679_v49 = vpack.c.bf16 %v6081_v11, %v6077_v17  ;;  %v1176_v18 = vsel %vm508_vm4, %v5675_v59, %v5491_v45  ;;  %v1396_v36 = vld [vmem:[%s10228_s2 + $0xc0] sm:$0xff]  ;;  %v1403_v43 = vld [vmem:[%s10228_s2 + $0xf8] sm:$0xff]  ;;  %v1457_v11 = vld [vmem:[%s10228_s2 + $0x2a8] sm:$0xff] }
 0x326   : > { %v1078_v3 = vsel %vm458_vm2, %v5756_v58, %v1049_v57  ;;  %v1686_v23 = vpack.c.bf16 %v6150_v41, %v6158_v32  ;;  %v1164_v27 = vsel %vm508_vm4, %v5499_v47, %v5675_v59  ;;  %v1666_v35 = vpack.c.bf16 %v1530_v25, %v1526_v55  ;;  %v1399_v55 = vld [vmem:[%s10228_s2 + $0xd8] sm:$0xff]  ;;  %v1473_v41 = vld [vmem:[%s10228_s2 + $0x328] sm:$0xff] }
 0x327   : > { %v1664_v12 = vpack.c.bf16 %v1528_v10, %v1524_v16  ;;  %v1051_v53 = vpop.permute.xlu0 %1050  ;;  %v1667_v42 = vpack.c.bf16 %v1531_v13, %v1527_v15  ;;  %v1541_v16 = vmul.f32 %v1397_v7, %v1078_v3  ;;  %v1402_v15 = vld [vmem:[%s10228_s2 + $0xf0] sm:$0xff]  ;;  %v6201_v59 = vmul.f32 %v1420_v31, %v1176_v18  ;;  %v1424_v10 = vld [vmem:[%s10228_s2 + $0x1a0] sm:$0xff]  ;;  %v10529_v32 = vld [vmem:[#allocation18_spill] sm:$0xff] }
 0x328   : > { %v1079_v45 = vsel %vm458_vm2, %v5762_v62, %v1051_v53  ;;  %v1075_v44 = vsel %vm458_vm2, %v1051_v53, %v5770_v60  ;;  %v10505_v33 = vpack.c.bf16 %v5971_v19, %v5969_v37  ;;  %v6221_v21 = vmul.f32 %v1423_v20, %v1164_v27  ;;  %v1398_v19 = vld [vmem:[%s10228_s2 + $0xd0] sm:$0xff] }
 0x329   : > { %v1545_v39 = vmul.f32 %v1401_v2, %v1079_v45  ;;  %v1065_v47 = vpop.permute.xlu1 %1064  ;;  %1788 = vmatpush1.bf16.msra.mxu0 %v1664_v12  ;;  %1893 = vmatprep.subr.bf16.mxu1 %v1667_v42  ;;  %v1074_v37 = vsel %vm458_vm2, %v1049_v57, %v5764_v8  ;;  %v10506_v13 = vpack.c.bf16 %v6007_v0, %v6045_v52  ;;  %v1427_v2 = vld [vmem:[%s10228_s2 + $0x1b8] sm:$0xff] }
 0x32a   : > { %v1070_v25 = vsel %vm458_vm2, %v5764_v8, %v1065_v47  ;;  %v1082_v14 = vsel %vm458_vm2, %v1065_v47, %v5756_v58  ;;  %1789 = vmatprep.subr.bf16.mxu0 %v10505_v33  ;;  %1894 = vmatpush1.bf16.msra.mxu1 %v1666_v35  ;;  %v1177_v58 = vsel %vm508_vm4, %v5681_v61, %v5497_v46  ;;  %v1418_v33 = vld [vmem:[%s10228_s2 + $0x170] sm:$0xff] }
 0x32b   : > { %1895 = vmatprep.subr.bf16.mxu1 %v10506_v13  ;;  %v1067_v7 = vpop.permute.xlu0 %1066  ;;  %v1673_v3 = vpack.c.bf16 %v1545_v39, %v1541_v16  ;;  %v1165_v46 = vsel %vm508_vm4, %v5505_v48, %v5681_v61  ;;  %v1546_v31 = vmul.f32 %v1402_v15, %v1075_v44  ;;  %v1540_v52 = vmul.f32 %v1396_v36, %v1082_v14  ;;  %v1452_v15 = vld [vmem:[%s10228_s2 + $0x280] sm:$0xff]  ;;  %v1415_v13 = vld [vmem:[%s10228_s2 + $0x158] sm:$0xff] }
 0x32c   : > { %v1071_v8 = vsel %vm458_vm2, %v5770_v60, %v1067_v7  ;;  %v1083_v0 = vsel %vm458_vm2, %v1067_v7, %v5762_v62  ;;  %v1543_v57 = vmul.f32 %v1399_v55, %v1070_v25  ;;  %v10507_v42 = vpack.c.bf16 %v5998_v30, %v6027_v38  ;;  %v1413_v60 = vld [vmem:[%s10228_s2 + $0x148] sm:$0xff]  ;;  %v10509_v44 = vld [vmem:[#allocation13_spill] sm:$0xff]  ;;  %v10512_v55 = vld [vmem:[#allocation39_spill] sm:$0xff] }
 0x32d   : > { %v1544_v18 = vmul.f32 %v1400_v5, %v1083_v0  ;;  %v1547_v12 = vmul.f32 %v1403_v43, %v1071_v8  ;;  %v1097_v53 = vpop.permute.xlu1 %1096  ;;  %v6255_v20 = vmul.f32 %v1424_v10, %v1177_v58  ;;  %v1542_v48 = vmul.f32 %v1398_v19, %v1074_v37  ;;  %v1417_v30 = vld [vmem:[%s10228_s2 + $0x168] sm:$0xff]  ;;  %v10510_v39 = vld [vmem:[#allocation25_spill] sm:$0xff]  ;;  %v10514_v7 = vld [vmem:[#allocation40_spill] sm:$0xff] }
 0x32e   : > { %1790 = vmatpush1.bf16.msra.mxu0 %v10507_v42  ;;  %v1126_v61 = vsel %vm483_vm3, %v5772_v50, %v1097_v53  ;;  %v10508_v62 = vpack.c.bf16 %v5931_v34, %v5951_v28  ;;  %v6269_v38 = vmul.f32 %v1427_v2, %v1165_v46  ;;  %v1685_v16 = vpack.c.bf16 %v6171_v6, %v6135_v56  ;;  %v10511_v28 = vld [vmem:[#allocation11_spill] sm:$0xff]  ;;  %v10513_v5 = vld [vmem:[#allocation41_spill] sm:$0xff]  ;;  %v1419_v8 = vld [vmem:[%s10228_s2 + $0x178] sm:$0xff] }
 0x32f   : > { %1791 = vmatprep.subr.bf16.mxu0 %v1673_v3  ;;  %v1672_v27 = vpack.c.bf16 %v1544_v18, %v1540_v52  ;;  %v1099_v35 = vpop.permute.xlu0 %1098  ;;  %v1675_v45 = vpack.c.bf16 %v1547_v12, %v1543_v57  ;;  %v1216_v34 = vsel %vm533_vm5, %v10510_v39, %v10509_v44  ;;  %v1220_v36 = vsel %vm533_vm5, %v10511_v28, %v10510_v39  ;;  %v1412_v58 = vld [vmem:[%s10228_s2 + $0x140] sm:$0xff]  ;;  %v1453_v0 = vld [vmem:[%s10228_s2 + $0x288] sm:$0xff]  ;;  %v1455_v56 = vld [vmem:[%s10228_s2 + $0x298] sm:$0xff] }
 0x330   : > { %1896 = vmatpush1.bf16.msra.mxu1 %v10508_v62  ;;  %v1674_v47 = vpack.c.bf16 %v1546_v31, %v1542_v48  ;;  %v1127_v25 = vsel %vm483_vm3, %v10512_v55, %v1099_v35  ;;  %v1557_v14 = vmul.f32 %v1413_v60, %v1126_v61  ;;  %v1123_v43 = vsel %vm483_vm3, %v1099_v35, %v10513_v5  ;;  %v1416_v31 = vld [vmem:[%s10228_s2 + $0x160] sm:$0xff]  ;;  %v10517_v57 = vld [vmem:[#allocation26_spill] sm:$0xff]  ;;  %v10518_v60 = vld [vmem:[#allocation12_spill] sm:$0xff] }
 0x331   : > { %v1561_v10 = vmul.f32 %v1417_v30, %v1127_v25  ;;  %v1113_v19 = vpop.permute.xlu1 %1112  ;;  %1897 = vmatprep.subr.bf16.mxu1 %v1675_v45  ;;  %v1684_v37 = vpack.c.bf16 %v6255_v20, %v6201_v59  ;;  %v10515_v46 = vpack.c.bf16 %v6029_v63, %v6060_v4  ;;  %v6319_v52 = vmul.f32 %v1452_v15, %v1220_v36  ;;  %v1414_v4 = vld [vmem:[%s10228_s2 + $0x150] sm:$0xff]  ;;  %v1456_v48 = vld [vmem:[%s10228_s2 + $0x2a0] sm:$0xff]  ;;  %v10526_v6 = vld [vmem:[#allocation28_spill] sm:$0xff] }
 0x332   : > { %1792 = vmatpush1.bf16.msra.mxu0 %v1672_v27  ;;  %v1118_v3 = vsel %vm483_vm3, %v10514_v7, %v1113_v19  ;;  %v1130_v2 = vsel %vm483_vm3, %v1113_v19, %v5772_v50  ;;  %v10516_v50 = vld [vmem:[#allocation14_spill] sm:$0xff]  ;;  %v1122_v18 = vsel %vm483_vm3, %v1097_v53, %v10514_v7  ;;  %v1221_v61 = vsel %vm533_vm5, %v10518_v60, %v10517_v57  ;;  %v10523_v19 = vld [vmem:[#allocation43_spill] sm:$0xff] }
 0x333   : > { %1793 = vmatprep.subr.bf16.mxu0 %v10515_v46  ;;  %v1217_v63 = vsel %vm533_vm5, %v10517_v57, %v10516_v50  ;;  %v1115_v12 = vpop.permute.xlu0 %1114  ;;  %v1681_v42 = vpack.c.bf16 %v1561_v10, %v1557_v14  ;;  %v1562_v62 = vmul.f32 %v1418_v33, %v1123_v43  ;;  %v1559_v30 = vmul.f32 %v1415_v13, %v1118_v3  ;;  %v1434_v3 = vld [vmem:[%s10228_s2 + $0x1f0] sm:$0xff]  ;;  %v1428_v46 = vld [vmem:[%s10228_s2 + $0x1c0] sm:$0xff] }
 0x334   : > { %1898 = vmatpush1.bf16.msra.mxu1 %v1674_v47  ;;  %v1119_v53 = vsel %vm483_vm3, %v10513_v5, %v1115_v12  ;;  %v1131_v17 = vsel %vm483_vm3, %v1115_v12, %v10512_v55  ;;  %v10519_v15 = vpack.c.bf16 %v6062_v24, %v6075_v26  ;;  %v6353_v39 = vmul.f32 %v1453_v0, %v1216_v34  ;;  %v1429_v47 = vld [vmem:[%s10228_s2 + $0x1c8] sm:$0xff]  ;;  %v10525_v0 = vld [vmem:[#allocation44_spill] sm:$0xff]  ;;  %v1454_v12 = vld [vmem:[%s10228_s2 + $0x290] sm:$0xff] }
 0x335   : > { %1899 = vmatprep.subr.bf16.mxu1 %v1679_v49  ;;  %v1556_v49 = vmul.f32 %v1412_v58, %v1130_v2  ;;  %v1560_v27 = vmul.f32 %v1416_v31, %v1131_v17  ;;  %v1563_v35 = vmul.f32 %v1419_v8, %v1119_v53  ;;  %v1145_v45 = vpop.permute.xlu1 %1144  ;;  %v1558_v36 = vmul.f32 %v1414_v4, %v1122_v18  ;;  %v10520_v55 = vld [vmem:[#allocation42_spill] sm:$0xff]  ;;  %v10522_v58 = vld [vmem:[#allocation27_spill] sm:$0xff]  ;;  %v10524_v2 = vld [vmem:[#allocation45_spill] sm:$0xff] }
 0x336   : > { %1794 = vmatpush1.bf16.msra.mxu0 %v10519_v15  ;;  %v1174_v25 = vsel %vm508_vm4, %v10520_v55, %v1145_v45  ;;  %v10521_v14 = vpack.c.bf16 %v6016_v1, %v6047_v40  ;;  %v1433_v24 = vld [vmem:[%s10228_s2 + $0x1e8] sm:$0xff]  ;;  %v6367_v26 = vmul.f32 %v1456_v48, %v1221_v61  ;;  %v1687_v43 = vpack.c.bf16 %v6269_v38, %v6221_v21  ;;  %v1431_v8 = vld [vmem:[%s10228_s2 + $0x1d8] sm:$0xff]  ;;  %v1458_v53 = vld [vmem:[%s10228_s2 + $0x2b0] sm:$0xff] }
 0x337   : > { %1795 = vmatprep.subr.bf16.mxu0 %v1681_v42  ;;  %v1680_v34 = vpack.c.bf16 %v1560_v27, %v1556_v49  ;;  %v1147_v33 = vpop.permute.xlu0 %1146  ;;  %v1683_v5 = vpack.c.bf16 %v1563_v35, %v1559_v30  ;;  %v6371_v10 = vmul.f32 %v1457_v11, %v1217_v63  ;;  %v1212_v1 = vsel %vm533_vm5, %v10509_v44, %v10522_v58  ;;  %v1435_v4 = vld [vmem:[%s10228_s2 + $0x1f8] sm:$0xff]  ;;  %v1430_v42 = vld [vmem:[%s10228_s2 + $0x1d0] sm:$0xff] }
 0x338   : > { %1900 = vmatpush1.bf16.msra.mxu1 %v10521_v14  ;;  %v1682_v40 = vpack.c.bf16 %v1562_v62, %v1558_v36  ;;  %v1175_v13 = vsel %vm508_vm4, %v10523_v19, %v1147_v33  ;;  %v1573_v7 = vmul.f32 %v1429_v47, %v1174_v25  ;;  %v1171_v21 = vsel %vm508_vm4, %v1147_v33, %v10524_v2  ;;  %v1459_v30 = vld [vmem:[%s10228_s2 + $0x2b8] sm:$0xff]  ;;  %v1472_v14 = vld [vmem:[%s10228_s2 + $0x320] sm:$0xff] }
 0x339   : > { %v1577_v38 = vmul.f32 %v1433_v24, %v1175_v13  ;;  %v1161_v44 = vpop.permute.xlu1 %1160  ;;  %1901 = vmatprep.subr.bf16.mxu1 %v1683_v5  ;;  %v1224_v31 = vsel %vm533_vm5, %v10522_v58, %v10511_v28  ;;  %v1432_v28 = vld [vmem:[%s10228_s2 + $0x1e0] sm:$0xff]  ;;  %v1700_v18 = vpack.c.bf16 %v6367_v26, %v6319_v52  ;;  %v1170_v48 = vsel %vm508_vm4, %v1145_v45, %v10525_v0  ;;  %v10527_v24 = vld [vmem:[#allocation30_spill] sm:$0xff]  ;;  %v10530_v58 = vld [vmem:[#allocation32_spill] sm:$0xff] }
 0x33a   : > { %1796 = vmatpush1.bf16.msra.mxu0 %v1680_v34  ;;  %v1166_v57 = vsel %vm508_vm4, %v10525_v0, %v1161_v44  ;;  %v1178_v63 = vsel %vm508_vm4, %v1161_v44, %v10520_v55  ;;  %v1578_v17 = vmul.f32 %v1434_v3, %v1171_v21  ;;  %v6452_v47 = vmul.f32 %v1455_v56, %v1224_v31  ;;  %v10528_v34 = vld [vmem:[#allocation16_spill] sm:$0xff]  ;;  %v1469_v13 = vld [vmem:[%s10228_s2 + $0x308] sm:$0xff]  ;;  %v10532_v3 = vld [vmem:[#allocation29_spill] sm:$0xff] }
 0x33b   : > { %1797 = vmatprep.subr.bf16.mxu0 %v1685_v16  ;;  %v1213_v16 = vsel %vm533_vm5, %v10516_v50, %v10526_v6  ;;  %v1163_v61 = vpop.permute.xlu0 %1162  ;;  %v1689_v62 = vpack.c.bf16 %v1577_v38, %v1573_v7  ;;  %v1225_v50 = vsel %vm533_vm5, %v10526_v6, %v10518_v60  ;;  %v1572_v27 = vmul.f32 %v1428_v46, %v1178_v63  ;;  %v10531_v7 = vld [vmem:[#allocation17_spill] sm:$0xff]  ;;  %v10533_v21 = vld [vmem:[#allocation15_spill] sm:$0xff]  ;;  %v1475_v63 = vld [vmem:[%s10228_s2 + $0x338] sm:$0xff] }
 0x33c   : > { %1902 = vmatpush1.bf16.msra.mxu1 %v1682_v40  ;;  %v1167_v11 = vsel %vm508_vm4, %v10524_v2, %v1163_v61  ;;  %v1179_v49 = vsel %vm508_vm4, %v1163_v61, %v10523_v19  ;;  %v1575_v35 = vmul.f32 %v1431_v8, %v1166_v57  ;;  %v6450_v60 = vmul.f32 %v1454_v12, %v1212_v1  ;;  %v1468_v19 = vld [vmem:[%s10228_s2 + $0x300] sm:$0xff]  ;;  %v1470_v8 = vld [vmem:[%s10228_s2 + $0x310] sm:$0xff]  ;;  %v1471_v12 = vld [vmem:[%s10228_s2 + $0x318] sm:$0xff] }
 0x33d   : > { %1903 = vmatprep.subr.bf16.mxu1 %v1687_v43  ;;  %v1576_v45 = vmul.f32 %v1432_v28, %v1179_v49  ;;  %v1579_v15 = vmul.f32 %v1435_v4, %v1167_v11  ;;  %v6445_v36 = vpop.permute.xlu1 %1340  ;;  %v1574_v55 = vmul.f32 %v1430_v42, %v1170_v48  ;;  %v6457_v25 = vmul.f32 %v1458_v53, %v1213_v16  ;;  %v1474_v43 = vld [vmem:[%s10228_s2 + $0x330] sm:$0xff]  ;;  %v1484_v48 = vld [vmem:[%s10228_s2 + $0x380] sm:$0xff]  ;;  %v1481_v52 = vld [vmem:[%s10228_s2 + $0x368] sm:$0xff] }
 0x33e   : > { %1798 = vmatpush1.bf16.msra.mxu0 %v1684_v37  ;;  %v1269_v59 = vsel %vm558_vm6, %v10528_v34, %v10527_v24  ;;  %v6468_v5 = vmul.f32 %v1459_v30, %v1225_v50  ;;  %v1261_v1 = vsel %vm558_vm6, %v10529_v32, %v10530_v58  ;;  %v1264_v2 = vsel %vm558_vm6, %v10532_v3, %v10531_v7  ;;  %v10534_v0 = vld [vmem:[#allocation31_spill] sm:$0xff]  ;;  %v10537_v61 = vld [vmem:[#allocation33_spill] sm:$0xff] }
 0x33f   : > { %1799 = vmatprep.subr.bf16.mxu0 %v1689_v62  ;;  %v1688_v20 = vpack.c.bf16 %v1576_v45, %v1572_v27  ;;  %v6466_v37 = vpop.permute.xlu0 %1342  ;;  %v1691_v33 = vpack.c.bf16 %v1579_v15, %v1575_v35  ;;  %v1690_v40 = vpack.c.bf16 %v1578_v17, %v1574_v55  ;;  %v1268_v38 = vsel %vm558_vm6, %v10533_v21, %v10532_v3  ;;  %v10538_v62 = vld [vmem:[#allocation19_spill] sm:$0xff]  ;;  %v1485_v17 = vld [vmem:[%s10228_s2 + $0x388] sm:$0xff]  ;;  %v10539_v11 = vld [vmem:[#allocation21_spill] sm:$0xff] }
 0x340   : > { %1904 = vmatpush1.bf16.msra.mxu1 %v1686_v23  ;;  %v1265_v23 = vsel %vm558_vm6, %v10527_v24, %v10529_v32  ;;  %v1701_v44 = vpack.c.bf16 %v6371_v10, %v6353_v39  ;;  %v6500_v31 = vmul.f32 %v1472_v14, %v1269_v59  ;;  %v1260_v57 = vsel %vm558_vm6, %v10531_v7, %v10534_v0  ;;  %v1488_v30 = vld [vmem:[%s10228_s2 + $0x3a0] sm:$0xff]  ;;  %v10540_v27 = vld [vmem:[#allocation34_spill] sm:$0xff]  ;;  %v10541_v35 = vld [vmem:[#allocation20_spill] sm:$0xff] }
 0x341   : > { %v1193_v46 = vpop.permute.xlu1 %1192  ;;  %1905 = vmatprep.subr.bf16.mxu1 %v1691_v33  ;;  %v1273_v39 = vsel %vm558_vm6, %v10530_v58, %v10528_v34  ;;  %v10535_v10 = vpack.c.bf16 %v5829_v22, %v5855_v51  ;;  %v1702_v28 = vpack.c.bf16 %v6457_v25, %v6450_v60  ;;  %v6521_v4 = vmul.f32 %v1473_v41, %v1265_v23  ;;  %v10543_v55 = vld [vmem:[#allocation7_spill] sm:$0xff]  ;;  %v1461_v59 = vld [vmem:[%s10228_s2 + $0x2c8] sm:$0xff]  ;;  %v10549_v23 = vld [vmem:[#allocation53_spill] sm:$0xff] }
 0x342   : > { %1800 = vmatpush1.bf16.msra.mxu0 %v1688_v20  ;;  %v1272_v56 = vsel %vm558_vm6, %v10534_v0, %v10533_v21  ;;  %v6530_v6 = vmul.f32 %v1474_v43, %v1261_v1  ;;  %v10536_v22 = vpack.c.bf16 %v5832_v54, %v5858_v29  ;;  %v6537_v16 = vmul.f32 %v1468_v19, %v1268_v38  ;;  %v10545_v20 = vld [vmem:[#allocation48_spill] sm:$0xff]  ;;  %v10547_v41 = vld [vmem:[#allocation59_spill] sm:$0xff]  ;;  %v10550_v43 = vld [vmem:[#allocation54_spill] sm:$0xff] }
 0x343   : > { %1801 = vmatprep.subr.bf16.mxu0 %v10535_v10  ;;  %v6535_v51 = vpop.permute.xlu0 %1350  ;;  %v6539_v42 = vmul.f32 %v1469_v13, %v1264_v2  ;;  %v1316_v53 = vsel %vm583_vm7, %v10538_v62, %v10537_v61  ;;  %v1703_v50 = vpack.c.bf16 %v6468_v5, %v6452_v47  ;;  %v6550_v54 = vmul.f32 %v1470_v8, %v1260_v57  ;;  %v10542_v47 = vld [vmem:[#allocation8_spill] sm:$0xff]  ;;  %v1465_v1 = vld [vmem:[%s10228_s2 + $0x2e8] sm:$0xff]  ;;  %v10556_v10 = vld [vmem:[#allocation49_spill] sm:$0xff] }
 0x344   : > { %1906 = vmatpush1.bf16.msra.mxu1 %v1690_v40  ;;  %v6552_v29 = vmul.f32 %v1475_v63, %v1273_v39  ;;  %v1312_v49 = vsel %vm583_vm7, %v10537_v61, %v10539_v11  ;;  %v1317_v45 = vsel %vm583_vm7, %v10541_v35, %v10540_v27  ;;  %v10544_v14 = vpack.c.bf16 %v10542_v47, %v10543_v55  ;;  %v10546_v5 = vld [vmem:[#allocation56_spill] sm:$0xff]  ;;  %v1489_v13 = vld [vmem:[%s10228_s2 + $0x3a8] sm:$0xff]  ;;  %v1464_v39 = vld [vmem:[%s10228_s2 + $0x2e0] sm:$0xff] }
 0x345   : > { %1907 = vmatprep.subr.bf16.mxu1 %v10536_v22  ;;  %v1209_v15 = vpop.permute.xlu1 %1208  ;;  %v1708_v24 = vpack.c.bf16 %v6500_v31, %v6537_v16  ;;  %v6573_v34 = vmul.f32 %v1471_v12, %v1272_v56  ;;  %v1218_v33 = vsel %vm533_vm5, %v1193_v46, %v10545_v20  ;;  %v10548_v32 = vpack.c.bf16 %v10546_v5, %v10547_v41  ;;  %v10552_v7 = vld [vmem:[#allocation22_spill] sm:$0xff]  ;;  %v10553_v2 = vld [vmem:[#allocation60_spill] sm:$0xff]  ;;  %v10557_v56 = vld [vmem:[#allocation47_spill] sm:$0xff] }
 0x346   : > { %1802 = vmatpush1.bf16.msra.mxu0 %v10544_v14  ;;  %v10551_v58 = vpack.c.bf16 %v10549_v23, %v10550_v43  ;;  %v1710_v40 = vpack.c.bf16 %v6530_v6, %v6550_v54  ;;  %v6592_v19 = vmul.f32 %v1484_v48, %v1316_v53  ;;  %v1313_v3 = vsel %vm583_vm7, %v10540_v27, %v10552_v7  ;;  %v10554_v21 = vld [vmem:[#allocation64_spill] sm:$0xff]  ;;  %v1460_v48 = vld [vmem:[%s10228_s2 + $0x2c0] sm:$0xff]  ;;  %v10558_v61 = vld [vmem:[#allocation46_spill] sm:$0xff] }
 0x347   : > { %1803 = vmatprep.subr.bf16.mxu0 %v10548_v32  ;;  %v10555_v38 = vpack.c.bf16 %v10553_v2, %v10554_v21  ;;  %v1195_v8 = vpop.permute.xlu0 %1194  ;;  %v1709_v0 = vpack.c.bf16 %v6521_v4, %v6539_v42  ;;  %v6606_v57 = vmul.f32 %v1485_v17, %v1312_v49  ;;  %v6608_v63 = vmul.f32 %v1488_v30, %v1317_v45  ;;  %v1462_v49 = vld [vmem:[%s10228_s2 + $0x2d0] sm:$0xff]  ;;  %v10559_v45 = vld [vmem:[#allocation57_spill] sm:$0xff]  ;;  %v10560_v47 = vld [vmem:[#allocation62_spill] sm:$0xff] }
 0x348   : > { %1908 = vmatpush1.bf16.msra.mxu1 %v10551_v58  ;;  %v1219_v12 = vsel %vm533_vm5, %v1195_v8, %v10556_v10  ;;  %v1223_v22 = vsel %vm533_vm5, %v10557_v56, %v1195_v8  ;;  %v1222_v53 = vsel %vm533_vm5, %v10558_v61, %v1193_v46  ;;  %v1605_v17 = vmul.f32 %v1461_v59, %v1218_v33  ;;  %v1463_v46 = vld [vmem:[%s10228_s2 + $0x2d8] sm:$0xff]  ;;  %v10562_v41 = vld [vmem:[#allocation58_spill] sm:$0xff]  ;;  %v10563_v32 = vld [vmem:[#allocation63_spill] sm:$0xff] }
 0x349   : > { %1909 = vmatprep.subr.bf16.mxu1 %v10555_v38  ;;  %v1609_v30 = vmul.f32 %v1465_v1, %v1219_v12  ;;  %v1241_v27 = vpop.permute.xlu1 %1240  ;;  %v10561_v55 = vpack.c.bf16 %v10559_v45, %v10560_v47  ;;  %v1711_v14 = vpack.c.bf16 %v6552_v29, %v6573_v34  ;;  %v6633_v5 = vmul.f32 %v1489_v13, %v1313_v3  ;;  %v1466_v43 = vld [vmem:[%s10228_s2 + $0x2f0] sm:$0xff]  ;;  %v1467_v58 = vld [vmem:[%s10228_s2 + $0x2f8] sm:$0xff]  ;;  %v10568_v47 = vld [vmem:[#allocation50_spill] sm:$0xff] }
 0x34a   : > { %v1214_v59 = vsel %vm533_vm5, %v10545_v20, %v1209_v15  ;;  %v1226_v33 = vsel %vm533_vm5, %v1209_v15, %v10558_v61  ;;  %v10564_v23 = vpack.c.bf16 %v10562_v41, %v10563_v32  ;;  %v1486_v20 = vld [vmem:[%s10228_s2 + $0x390] sm:$0xff]  ;;  %v1608_v13 = vmul.f32 %v1464_v39, %v1223_v22  ;;  %v1476_v32 = vld [vmem:[%s10228_s2 + $0x340] sm:$0xff]  ;;  %v1493_v29 = vld [vmem:[%s10228_s2 + $0x3c8] sm:$0xff] }
 0x34b   : > { %1804 = vmatpush1.bf16.msra.mxu0 %v10561_v55  ;;  %v10565_v1 = vld [vmem:[#allocation35_spill] sm:$0xff]  ;;  %v1211_v3 = vpop.permute.xlu0 %1210  ;;  %v1705_v2 = vpack.c.bf16 %v1609_v30, %v1605_v17  ;;  %v1716_v21 = vpack.c.bf16 %v6608_v63, %v6592_v19  ;;  %v1604_v38 = vmul.f32 %v1460_v48, %v1222_v53  ;;  %v1606_v39 = vmul.f32 %v1462_v49, %v1214_v59  ;;  %v1477_v53 = vld [vmem:[%s10228_s2 + $0x348] sm:$0xff]  ;;  %v10567_v17 = vld [vmem:[#allocation52_spill] sm:$0xff] }
 0x34c   : > { %1805 = vmatprep.subr.bf16.mxu0 %v1701_v44  ;;  %1910 = vmatpush1.bf16.msra.mxu1 %v10564_v23  ;;  %v1308_v44 = vsel %vm583_vm7, %v10539_v11, %v10565_v1  ;;  %v1320_v15 = vsel %vm583_vm7, %v10565_v1, %v10538_v62  ;;  %v1215_v8 = vsel %vm533_vm5, %v10556_v10, %v1211_v3  ;;  %v1487_v62 = vld [vmem:[%s10228_s2 + $0x398] sm:$0xff]  ;;  %v1490_v26 = vld [vmem:[%s10228_s2 + $0x3b0] sm:$0xff]  ;;  %v10573_v34 = vld [vmem:[#allocation66_spill] sm:$0xff] }
 0x34d   : > { %1911 = vmatprep.subr.bf16.mxu1 %v1703_v50  ;;  %v1227_v11 = vsel %vm533_vm5, %v1211_v3, %v10557_v56  ;;  %v1607_v50 = vmul.f32 %v1463_v46, %v1226_v33  ;;  %v1610_v12 = vmul.f32 %v1466_v43, %v1215_v8  ;;  %v1257_v61 = vpop.permute.xlu1 %1256  ;;  %v6678_v48 = vmul.f32 %v1486_v20, %v1308_v44  ;;  %v10566_v10 = vld [vmem:[#allocation36_spill] sm:$0xff]  ;;  %v1480_v46 = vld [vmem:[%s10228_s2 + $0x360] sm:$0xff]  ;;  %v10569_v59 = vld [vmem:[#allocation55_spill] sm:$0xff] }
 0x34e   : > { %v1611_v22 = vmul.f32 %v1467_v58, %v1227_v11  ;;  %v1309_v56 = vsel %vm583_vm7, %v10552_v7, %v10566_v10  ;;  %v1266_v49 = vsel %vm558_vm6, %v1241_v27, %v10567_v17  ;;  %v1321_v7 = vsel %vm583_vm7, %v10566_v10, %v10541_v35  ;;  %v10570_v41 = vld [vmem:[#allocation51_spill] sm:$0xff]  ;;  %v1505_v16 = vld [vmem:[%s10228_s2 + $0x428] sm:$0xff] }
 0x34f   : > { %1806 = vmatpush1.bf16.msra.mxu0 %v1700_v18  ;;  %v1491_v18 = vld [vmem:[%s10228_s2 + $0x3b8] sm:$0xff]  ;;  %v1704_v30 = vpack.c.bf16 %v1608_v13, %v1604_v38  ;;  %v1706_v60 = vpack.c.bf16 %v1610_v12, %v1606_v39  ;;  %v1243_v25 = vpop.permute.xlu0 %1242  ;;  %v6706_v45 = vmul.f32 %v1487_v62, %v1320_v15  ;;  %v1270_v55 = vsel %vm558_vm6, %v10568_v47, %v1241_v27  ;;  %v1478_v27 = vld [vmem:[%s10228_s2 + $0x350] sm:$0xff]  ;;  %v10571_v38 = vld [vmem:[#allocation37_spill] sm:$0xff] }
 0x350   : > { %1807 = vmatprep.subr.bf16.mxu0 %v1705_v2  ;;  %1912 = vmatpush1.bf16.msra.mxu1 %v1702_v28  ;;  %v1707_v28 = vpack.c.bf16 %v1611_v22, %v1607_v50  ;;  %v1267_v33 = vsel %vm558_vm6, %v1243_v25, %v10569_v59  ;;  %v1271_v35 = vsel %vm558_vm6, %v10570_v41, %v1243_v25  ;;  %v1479_v15 = vld [vmem:[%s10228_s2 + $0x358] sm:$0xff]  ;;  %v1482_v3 = vld [vmem:[%s10228_s2 + $0x370] sm:$0xff] }
 0x351   : > { %v1621_v23 = vmul.f32 %v1477_v53, %v1266_v49  ;;  %v1262_v43 = vsel %vm558_vm6, %v10567_v17, %v1257_v61  ;;  %v1625_v58 = vmul.f32 %v1481_v52, %v1267_v33  ;;  %v1289_v20 = vpop.permute.xlu1 %1288  ;;  %v6729_v1 = vmul.f32 %v1490_v26, %v1309_v56  ;;  %v1483_v2 = vld [vmem:[%s10228_s2 + $0x378] sm:$0xff]  ;;  %v10572_v8 = vld [vmem:[#allocation23_spill] sm:$0xff]  ;;  %v10574_v53 = vld [vmem:[#allocation38_spill] sm:$0xff] }
 0x352   : > { %1913 = vmatprep.subr.bf16.mxu1 %v1707_v28  ;;  %v6731_v44 = vmul.f32 %v1491_v18, %v1321_v7  ;;  %v1274_v13 = vsel %vm558_vm6, %v1257_v61, %v10568_v47  ;;  %v6752_v11 = vsel %vm608_vm8, %v10572_v8, %v10571_v38  ;;  %v1624_v62 = vmul.f32 %v1480_v46, %v1271_v35  ;;  %v10575_v17 = vld [vmem:[#allocation24_spill] sm:$0xff]  ;;  %v1497_v52 = vld [vmem:[%s10228_s2 + $0x3e8] sm:$0xff]  ;;  %v10576_v18 = vld [vmem:[#allocation61_spill] sm:$0xff] }
 0x353   : > { %1808 = vmatpush1.bf16.msra.mxu0 %v1704_v30  ;;  %v1259_v4 = vpop.permute.xlu0 %1258  ;;  %v1713_v42 = vpack.c.bf16 %v1625_v58, %v1621_v23  ;;  %v1620_v39 = vmul.f32 %v1476_v32, %v1270_v55  ;;  %v1622_v50 = vmul.f32 %v1478_v27, %v1262_v43  ;;  %v1623_v61 = vmul.f32 %v1479_v15, %v1274_v13  ;;  %v10577_v25 = vld [vmem:[#allocation67_spill] sm:$0xff]  ;;  %v1495_v46 = vld [vmem:[%s10228_s2 + $0x3d8] sm:$0xff] }
 0x354   : > { %1809 = vmatprep.subr.bf16.mxu0 %v1709_v0  ;;  %1914 = vmatpush1.bf16.msra.mxu1 %v1706_v60  ;;  %v1717_v0 = vpack.c.bf16 %v6633_v5, %v6606_v57  ;;  %v1263_v12 = vsel %vm558_vm6, %v10569_v59, %v1259_v4  ;;  %v1275_v22 = vsel %vm558_vm6, %v1259_v4, %v10570_v41  ;;  %v1496_v60 = vld [vmem:[%s10228_s2 + $0x3e0] sm:$0xff]  ;;  %v1494_v55 = vld [vmem:[%s10228_s2 + $0x3d0] sm:$0xff]  ;;  %v1503_v27 = vld [vmem:[%s10228_s2 + $0x418] sm:$0xff] }
 0x355   : > { %1915 = vmatprep.subr.bf16.mxu1 %v1711_v14  ;;  %v1314_v14 = vsel %vm583_vm7, %v1289_v20, %v10573_v34  ;;  %v1626_v57 = vmul.f32 %v1482_v3, %v1263_v12  ;;  %v1627_v5 = vmul.f32 %v1483_v2, %v1275_v22  ;;  %v1305_v10 = vpop.permute.xlu1 %1304  ;;  %v1718_v56 = vpack.c.bf16 %v6729_v1, %v6678_v48  ;;  %v1498_v58 = vld [vmem:[%s10228_s2 + $0x3f0] sm:$0xff]  ;;  %v1504_v1 = vld [vmem:[%s10228_s2 + $0x420] sm:$0xff] }
 0x356   : > { %v1365_v49 = vsel %vm608_vm8, %v10575_v17, %v10574_v53  ;;  %v1719_v31 = vpack.c.bf16 %v6731_v44, %v6706_v45  ;;  %v1712_v48 = vpack.c.bf16 %v1624_v62, %v1620_v39  ;;  %v1318_v7 = vsel %vm583_vm7, %v10576_v18, %v1289_v20  ;;  %v10578_v45 = vld [vmem:[#allocation65_spill] sm:$0xff]  ;;  %v1499_v20 = vld [vmem:[%s10228_s2 + $0x3f8] sm:$0xff]  ;;  %v1501_v44 = vld [vmem:[%s10228_s2 + $0x408] sm:$0xff] }
 0x357   : > { %1810 = vmatpush1.bf16.msra.mxu0 %v1708_v24  ;;  %v1361_v24 = vsel %vm608_vm8, %v10574_v53, %v6466_v37  ;;  %v1714_v26 = vpack.c.bf16 %v1626_v57, %v1622_v50  ;;  %v1291_v6 = vpop.permute.xlu0 %1290  ;;  %v1715_v54 = vpack.c.bf16 %v1627_v5, %v1623_v61  ;;  %v1637_v30 = vmul.f32 %v1493_v29, %v1314_v14  ;;  %v1502_v39 = vld [vmem:[%s10228_s2 + $0x410] sm:$0xff] }
 0x358   : > { %1811 = vmatprep.subr.bf16.mxu0 %v1713_v42  ;;  %1916 = vmatpush1.bf16.msra.mxu1 %v1710_v40  ;;  %v1492_v40 = vld [vmem:[%s10228_s2 + $0x3c0] sm:$0xff]  ;;  %v1315_v28 = vsel %vm583_vm7, %v1291_v6, %v10577_v25  ;;  %v1319_v47 = vsel %vm583_vm7, %v10578_v45, %v1291_v6  ;;  %v1310_v59 = vsel %vm583_vm7, %v10573_v34, %v1305_v10  ;;  %v1506_v5 = vld [vmem:[%s10228_s2 + $0x430] sm:$0xff] }
 0x359   : > { %v1322_v33 = vsel %vm583_vm7, %v1305_v10, %v10576_v18  ;;  %v1641_v41 = vmul.f32 %v1497_v52, %v1315_v28  ;;  %v1349_v35 = vpop.permute.xlu1 %1348  ;;  %1917 = vmatprep.subr.bf16.mxu1 %v1715_v54  ;;  %v1360_v32 = vsel %vm608_vm8, %v10571_v38, %v6445_v36  ;;  %v1649_v23 = vmul.f32 %v1505_v16, %v1361_v24  ;;  %v1500_v34 = vld [vmem:[%s10228_s2 + $0x400] sm:$0xff] }
 0x35a   : > { %v1368_v43 = vsel %vm608_vm8, %v1349_v35, %v10572_v8  ;;  %v1369_v15 = vsel %vm608_vm8, %v6535_v51, %v10575_v17  ;;  %v1636_v13 = vmul.f32 %v1492_v40, %v1318_v7  ;;  %v1640_v3 = vmul.f32 %v1496_v60, %v1319_v47  ;;  %v1507_v8 = vld [vmem:[%s10228_s2 + $0x438] sm:$0xff]  ;;  %v4414_v52 = vld [vmem:[%s5091_s16] ss:$12 sps:$4 sm:$0xff]  }
 0x35b   : > { %1812 = vmatpush1.bf16.msra.mxu0 %v1712_v48  ;;  %v1307_v2 = vpop.permute.xlu0 %1306  ;;  %v1721_v38 = vpack.c.bf16 %v1641_v41, %v1637_v30  ;;  %v1638_v62 = vmul.f32 %v1494_v55, %v1310_v59  ;;  %v1639_v4 = vmul.f32 %v1495_v46, %v1322_v33  ;;  %v1356_v50 = vsel %vm608_vm8, %v6445_v36, %v1349_v35  ;;  %v1508_v6 = vld [vmem:[%s10228_s2 + $0x440] sm:$0xff]  ;;  %v1509_v40 = vld [vmem:[%s10228_s2 + $0x448] sm:$0xff]  ;;  %v1510_v33 = vld [vmem:[%s10228_s2 + $0x450] sm:$0xff] }
 0x35c   : > { %1813 = vmatprep.subr.bf16.mxu0 %v1717_v0  ;;  %1918 = vmatpush1.bf16.msra.mxu1 %v1714_v26  ;;  %v1311_v42 = vsel %vm583_vm7, %v10577_v25, %v1307_v2  ;;  %v1323_v0 = vsel %vm583_vm7, %v1307_v2, %v10578_v45  ;;  %v1647_v12 = vmul.f32 %v1503_v27, %v1368_v43  ;;  %v1512_v7 = vld [vmem:[%s10228_s2 + $0x460] sm:$0xff]  ;;  %v1513_v30 = vld [vmem:[%s10228_s2 + $0x468] sm:$0xff]  ;;  %v1511_v35 = vld [vmem:[%s10228_s2 + $0x458] sm:$0xff] }
 0x35d   : > { %1919 = vmatprep.subr.bf16.mxu1 %v1719_v31  ;;  %v1642_v22 = vmul.f32 %v1498_v58, %v1311_v42  ;;  %v1643_v61 = vmul.f32 %v1499_v20, %v1323_v0  ;;  %v1329_v29 = vpop.permute.xlu1 %1328  ;;  %v1648_v14 = vmul.f32 %v1504_v1, %v1365_v49  ;;  %v1645_v57 = vmul.f32 %v1501_v44, %v1360_v32  ;;  %v4419_v45 = vld [vmem:[%s5091_s16 + $0x18] ss:$12 sps:$4 sm:$0xff]   ;;  %v1514_v27 = vld [vmem:[%s10228_s2 + $0x470] sm:$0xff]  ;;  %v4421_v0 = vld [vmem:[%s5091_s16 + $0x20] ss:$12 sps:$4 sm:$0xff]  }
 0x35e   : > { %v1357_v36 = vsel %vm608_vm8, %v6466_v37, %v6535_v51  ;;  %v1651_v19 = vmul.f32 %v1507_v8, %v1369_v15  ;;  %v1720_v63 = vpack.c.bf16 %v1640_v3, %v1636_v13  ;;  %v1646_v17 = vmul.f32 %v1502_v39, %v1356_v50  ;;  %v1515_v43 = vld [vmem:[%s10228_s2 + $0x478] sm:$0xff]  ;;  %v4420_v42 = vld [vmem:[%s5091_s16 + $0x8] ss:$12 sps:$4 sm:$0xff]  }
 0x35f   : > { %1814 = vmatpush1.bf16.msra.mxu0 %v1716_v21  ;;  %v1722_v21 = vpack.c.bf16 %v1642_v22, %v1638_v62  ;;  %v1331_v10 = vpop.permute.xlu0 %1330  ;;  %v1723_v53 = vpack.c.bf16 %v1643_v61, %v1639_v4  ;;  %v1725_v49 = vpack.c.bf16 %v1649_v23, %v1645_v57  ;;  %v1644_v31 = vmul.f32 %v1500_v34, %v6752_v11 }
 0x360   : > { %1815 = vmatprep.subr.bf16.mxu0 %v1721_v38  ;;  %1920 = vmatpush1.bf16.msra.mxu1 %v1718_v56  ;;  %v1727_v37 = vpack.c.bf16 %v1651_v19, %v1647_v12  ;;  %v1650_v51 = vmul.f32 %v1506_v5, %v1357_v36  ;;  %v4417_v56 = vld [vmem:[%s5091_s16 + $0x1c] ss:$12 sps:$4 sm:$0xff]   ;;  %v10579_v8 = vmov 0  }
 0x361   : > { %v1337_v16 = vpop.permute.xlu1 %1336  ;;  %1921 = vmatprep.subr.bf16.mxu1 %v1723_v53  ;;  %v1724_v24 = vpack.c.bf16 %v1648_v14, %v1644_v31  ;;  %v6941_v31 = vld [vmem:[%s10226_s0] sm:$0xff] }
 0x362   : > { %v1726_v26 = vpack.c.bf16 %v1650_v51, %v1646_v17  ;;  %v1366_v11 = vsel %vm608_vm8, %v1329_v29, %v1337_v16 }
 0x363   : > { %1816 = vmatpush1.bf16.msra.mxu0 %v1720_v63  ;;  %v1347_v48 = vpop.permute.xlu0 %1346  ;;  %v1652_v47 = vmul.f32 %v1508_v6, %v1366_v11 }
 0x364   : > { %1838 = vmatprep.subr.bf16.mxu0 %v1725_v49  ;;  %1922 = vmatpush1.bf16.msra.mxu1 %v1722_v21 }
 0x365   : > { %1944 = vmatprep.subr.bf16.mxu1 %v1727_v37  ;;  %v1345_v54 = vpop.permute.xlu1 %1344 }
 0x366   : > { %1818 = vmatmul.mubr.bf16.vlgmr.msra.gmra.mrb[8].mxu0 %v4414_v52  ;;  %v1362_v18 = vsel %vm608_vm8, %v1337_v16, %v1345_v54 }
 0x367   : > { %1839 = vmatpush1.bf16.msra.mxu0 %v1724_v24  ;;  %1924 = vmatmul.mubr.bf16.vlgmr.msra.gmra.mrb[8].mxu1 %v4414_v52  ;;  %v1339_v60 = vpop.permute.xlu0 %1338  ;;  %v1653_v55 = vmul.f32 %v1509_v40, %v1362_v18  ;;  %v6951_v24 = vld [vmem:[%s10226_s0 + $0x20] sm:$0xff]  ;;  %v6969_v18 = vld [vmem:[%s10226_s0 + $0x10] sm:$0xff] }
 0x368   : > { %1945 = vmatpush1.bf16.msra.mxu1 %v1726_v26  ;;  %1827 = vmatprep.mubr.bf16.mxu0 %v4417_v56  ;;  %v1363_v25 = vsel %vm608_vm8, %v1339_v60, %v1347_v48  ;;  %v1367_v28 = vsel %vm608_vm8, %v1331_v10, %v1339_v60 }
 0x369   : > { %1933 = vmatprep.mubr.bf16.mxu1 %v4417_v56  ;;  %v1656_v46 = vmul.f32 %v1512_v7, %v1367_v28  ;;  %v1657_v59 = vmul.f32 %v1513_v30, %v1363_v25  ;;  %v1353_v41 = vpop.permute.xlu1 %1352  ;;  %v6985_v28 = vld [vmem:[%s10226_s0 + $0x30] sm:$0xff] }
 0x36a   : > { %v1358_v32 = vsel %vm608_vm8, %v1345_v54, %v1353_v41  ;;  %v1370_v23 = vsel %vm608_vm8, %v1353_v41, %v1329_v29 }
 0x36b   : > { %v1728_v58 = vpack.c.bf16 %v1656_v46, %v1652_v47  ;;  %v1355_v20 = vpop.permute.xlu0 %1354  ;;  %v1729_v1 = vpack.c.bf16 %v1657_v59, %v1653_v55  ;;  %v1654_v44 = vmul.f32 %v1510_v33, %v1358_v32  ;;  %v1655_v3 = vmul.f32 %v1511_v35, %v1370_v23 }
 0x36c   : > { %v1359_v15 = vsel %vm608_vm8, %v1347_v48, %v1355_v20  ;;  %v1371_v13 = vsel %vm608_vm8, %v1355_v20, %v1331_v10 }
 0x36d   : > { %v1658_v2 = vmul.f32 %v1514_v27, %v1359_v15  ;;  %v1659_v38 = vmul.f32 %v1515_v43, %v1371_v13  ;;  %1840 = vmatprep.subr.bf16.mxu0 %v1729_v1  ;;  %v7051_v43 = vld [vmem:[%s10226_s0 + $0x8] sm:$0xff]  ;;  %v7071_v13 = vld [vmem:[%s10226_s0 + $0x18] sm:$0xff] }
 0x36e   : > { %1828 = vmatmul.mubr.bf16.gmra.mrb[12].mxu0 %v4419_v45  ;;  %v7061_v1 = vld [vmem:[%s10226_s0 + $0x28] sm:$0xff] }
 0x36f   : > { %1934 = vmatmul.mubr.bf16.gmra.mrb[12].mxu1 %v4419_v45  ;;  %1841 = vmatpush1.bf16.msra.mxu0 %v1728_v58  ;;  %v1730_v62 = vpack.c.bf16 %v1658_v2, %v1654_v44  ;;  %v1731_v4 = vpack.c.bf16 %v1659_v38, %v1655_v3  ;;  %v7081_v2 = vld [vmem:[%s10226_s0 + $0x38] sm:$0xff] }
 0x370   : > { %1870 = vmatprep.mubr.bf16.mxu0 %v10579_v8  ;;  %1976 = vmatprep.mubr.bf16.mxu1 %v10579_v8 }
 0x371   : > { %1946 = vmatprep.subr.bf16.mxu1 %v1731_v4 }
 0x372   : > { %1947 = vmatpush1.bf16.msra.mxu1 %v1730_v62 }
 0x376   : > { %4226 = vmatmul.mubr.msk.bf16.vlgmr.msra.gmra.mrb[8].mxu0 %vm1778_vm9, %v4420_v42 }
 0x377   : > { %4228 = vmatmul.mubr.msk.bf16.vlgmr.msra.gmra.mrb[8].mxu1 %vm1778_vm9, %v4420_v42  ;;  %1880 = vmatprep.mubr.bf16.mxu0 %v10579_v8 }
 0x378   : > { %1986 = vmatprep.mubr.bf16.mxu1 %v10579_v8 }
 0x37a   : > { %v6930_v39 = vpop.permute.xlu1 %1733 }
 0x37b   : > { %10580 = vst [vmem:[#allocation13_spill] sm:$0xff] %v6930_v39 }
 0x37c   : > { %v6932_v12 = vpop.permute.xlu0 %1737 }
 0x37d   : > { %10581 = vst [vmem:[#allocation25_spill] sm:$0xff] %v6932_v12 }
 0x37e   : > { %4227 = vmatmul.mubr.msk.bf16.gmra.mrb[12].mxu0 %vm1778_vm9, %v4421_v0  ;;  %v7124_v62 = vpop.permute.xlu1 %1741 }
 0x37f   : > { %4229 = vmatmul.mubr.msk.bf16.gmra.mrb[12].mxu1 %vm1778_vm9, %v4421_v0  ;;  %10593 = vst [vmem:[#allocation27_spill] sm:$0xff] %v7124_v62 }
 0x382   : > { %v7134_v42 = vpop.permute.xlu1 %1745 }
 0x383   : > { %10594 = vst [vmem:[#allocation43_spill] sm:$0xff] %v7134_v42 }
 0x449   : > { %v1872_v50 = vpop.f32.mrb[8].mxu0 }
 0x44a   : > { %v4268_v22 = vadd.f32 %v1872_v50, %v6930_v39  ;;  %v1874_v61 = vpop.f32.mrb[9].mxu0  ;;  %v1978_v29 = vpop.f32.mrb[8].mxu1 }
 0x44b   : > { %v4276_v34 = vadd.f32 %v1978_v29, %v6930_v39  ;;  %v1876_v14 = vpop.f32.mrb[10].mxu0  ;;  %v1980_v57 = vpop.f32.mrb[9].mxu1  ;;  %v4269_v47 = vadd.f32 %v1874_v61, %v6930_v39 }
 0x44c   : > { %v1997_v36 = vmul.f32 0.1, %v4268_v22  ;;  %v4270_v5 = vadd.f32 %v1876_v14, %v6932_v12  ;;  %v1878_v19 = vpop.f32.mrb[11].mxu0  ;;  %v1982_v63 = vpop.f32.mrb[10].mxu1  ;;  %v4277_v59 = vadd.f32 %v1980_v57, %v6930_v39 }
 0x44d   : > { %v1999_v21 = vmul.f32 0.1, %v4276_v34  ;;  %v4278_v10 = vadd.f32 %v1982_v63, %v6932_v12  ;;  %v1984_v53 = vpop.f32.mrb[11].mxu1  ;;  %v4271_v55 = vadd.f32 %v1878_v19, %v6932_v12  ;;  %v1998_v46 = vmul.f32 0.1, %v4269_v47 }
 0x44e   : > { %v2013_v17 = vmax.f32 %v4268_v22, %v1997_v36  ;;  %v2001_v49 = vmul.f32 0.1, %v4270_v5  ;;  %v4279_v41 = vadd.f32 %v1984_v53, %v6932_v12  ;;  %v2000_v32 = vmul.f32 0.1, %v4277_v59 }
 0x44f   : > { %v2003_v52 = vmul.f32 0.1, %v4278_v10  ;;  %v2015_v37 = vmax.f32 %v4276_v34, %v1999_v21  ;;  %v2002_v33 = vmul.f32 0.1, %v4271_v55  ;;  %v2014_v35 = vmax.f32 %v4269_v47, %v1998_v46 }
 0x450   : > { %v6944_v16 = vadd.f32 %v6941_v31, %v2013_v17  ;;  %v2017_v51 = vmax.f32 %v4270_v5, %v2001_v49  ;;  %v2004_v27 = vmul.f32 0.1, %v4279_v41  ;;  %v2016_v20 = vmax.f32 %v4277_v59, %v2000_v32 }
 0x451   : > { %v6946_v56 = vpop.f32.mrb[12].mxu0  ;;  %v2019_v26 = vmax.f32 %v4278_v10, %v2003_v52  ;;  %v6972_v7 = vadd.f32 %v6969_v18, %v2015_v37  ;;  %v2018_v23 = vmax.f32 %v4271_v55, %v2002_v33  ;;  %v7054_v58 = vadd.f32 %v7051_v43, %v2014_v35 }
 0x452   : > { %10582 = vst [vmem:[#allocation11_spill] sm:$0xff] %v6944_v16  ;;  %v6954_v48 = vadd.f32 %v6951_v24, %v2017_v51  ;;  %v6956_v6 = vpop.f32.mrb[13].mxu0  ;;  %2053 = vrot.lane.b32.xlu0 %v6944_v16, %s4810_s29  ;;  %v6960_v54 = vpop.f32.mrb[12].mxu1  ;;  %v2020_v15 = vmax.f32 %v4279_v41, %v2004_v27  ;;  %v7074_v3 = vadd.f32 %v7071_v13, %v2016_v20 }
 0x453   : > { %v6962_v11 = vpop.f32.mrb[14].mxu0  ;;  %v6964_v40 = vpop.f32.mrb[13].mxu1  ;;  %10584 = vst [vmem:[#allocation41_spill] sm:$0xff] %v6972_v7  ;;  %v6988_v45 = vadd.f32 %v6985_v28, %v2019_v26  ;;  %10589 = vst [vmem:[#allocation14_spill] sm:$0xff] %v7054_v58  ;;  %v7064_v44 = vadd.f32 %v7061_v1, %v2018_v23  ;;  %v4272_v4 = vadd.f32 %v6946_v56, %v7124_v62 }
 0x454   : > { %10583 = vst [vmem:[#allocation39_spill] sm:$0xff] %v6954_v48  ;;  %v6974_v30 = vpop.f32.mrb[15].mxu0  ;;  %v6976_v60 = vpop.f32.mrb[14].mxu1  ;;  %2055 = vrot.lane.b32.xlu1 %v6954_v48, %s4810_s29  ;;  %10591 = vst [vmem:[#allocation12_spill] sm:$0xff] %v7074_v3  ;;  %v7084_v38 = vadd.f32 %v7081_v2, %v2020_v15  ;;  %v4274_v0 = vadd.f32 %v6962_v11, %v7134_v42  ;;  %v4280_v22 = vadd.f32 %v6960_v54, %v7124_v62 }
 0x455   : > { %v6980_v25 = vpop.f32.mrb[15].mxu1  ;;  %10585 = vst [vmem:[#allocation40_spill] sm:$0xff] %v6988_v45  ;;  %10590 = vst [vmem:[#allocation26_spill] sm:$0xff] %v7064_v44  ;;  %v2005_v50 = vmul.f32 0.1, %v4272_v4  ;;  %v4282_v29 = vadd.f32 %v6976_v60, %v7134_v42  ;;  %v4273_v20 = vadd.f32 %v6956_v6, %v7124_v62 }
 0x456   : > { %2069 = vrot.lane.b32.xlu0 %v6972_v7, %s4810_s29  ;;  %10592 = vst [vmem:[#allocation42_spill] sm:$0xff] %v7084_v38  ;;  %v2009_v61 = vmul.f32 0.1, %v4274_v0  ;;  %v2007_v14 = vmul.f32 0.1, %v4280_v22 }
 0x457   : > { %v2021_v34 = vmax.f32 %v4272_v4, %v2005_v50  ;;  %v2011_v5 = vmul.f32 0.1, %v4282_v29  ;;  %v4275_v4 = vadd.f32 %v6974_v30, %v7134_v42  ;;  %v2006_v50 = vmul.f32 0.1, %v4273_v20 }
 0x458   : > { %2071 = vrot.lane.b32.xlu1 %v6988_v45, %s4810_s29  ;;  %v2025_v36 = vmax.f32 %v4274_v0, %v2009_v61  ;;  %v2023_v21 = vmax.f32 %v4280_v22, %v2007_v14  ;;  %v4281_v22 = vadd.f32 %v6964_v40, %v7124_v62 }
 0x459   : > { %v7157_v63 = vadd.f32 %v6941_v31, %v2021_v34  ;;  %v2027_v17 = vmax.f32 %v4282_v29, %v2011_v5  ;;  %v2010_v61 = vmul.f32 0.1, %v4275_v4  ;;  %v4283_v29 = vadd.f32 %v6980_v25, %v7134_v42 }
 0x45a   : > { %2101 = vrot.lane.b32.xlu0 %v6944_v16, %s4811_s20  ;;  %v7164_v53 = vadd.f32 %v6951_v24, %v2025_v36  ;;  %v7171_v52 = vadd.f32 %v6969_v18, %v2023_v21  ;;  %v2022_v34 = vmax.f32 %v4273_v20, %v2006_v50  ;;  %v2008_v14 = vmul.f32 0.1, %v4281_v22 }
 0x45b   : > { %10595 = vst [vmem:[#allocation45_spill] sm:$0xff] %v7157_v63  ;;  %v7178_v37 = vadd.f32 %v6985_v28, %v2027_v17  ;;  %v2026_v36 = vmax.f32 %v4275_v4, %v2010_v61  ;;  %v2012_v5 = vmul.f32 0.1, %v4283_v29 }
 0x45c   : > { %2103 = vrot.lane.b32.xlu1 %v6954_v48, %s4811_s20  ;;  %10596 = vst [vmem:[#allocation44_spill] sm:$0xff] %v7164_v53  ;;  %10597 = vst [vmem:[#allocation28_spill] sm:$0xff] %v7171_v52  ;;  %v7289_v25 = vadd.f32 %v7051_v43, %v2022_v34  ;;  %v2024_v17 = vmax.f32 %v4281_v22, %v2008_v14  ;;  %v4458_v34 = vld [vmem:[%s10228_s2 + $0x8] sm:$0xff] }
 0x45d   : > { %10598 = vst [vmem:[#allocation30_spill] sm:$0xff] %v7178_v37  ;;  %v7297_v4 = vadd.f32 %v7061_v1, %v2026_v36  ;;  %v2028_v61 = vmax.f32 %v4283_v29, %v2012_v5  ;;  %v4459_v29 = vld [vmem:[%s10228_s2 + $0x28] sm:$0xff] }
 0x45e   : > { %2117 = vrot.lane.b32.xlu0 %v6972_v7, %s4811_s20  ;;  %10611 = vst [vmem:[#allocation8_spill] sm:$0xff] %v7289_v25  ;;  %v7305_v22 = vadd.f32 %v7071_v13, %v2024_v17 }
 0x45f   : > { %10612 = vst [vmem:[#allocation7_spill] sm:$0xff] %v7297_v4 }
 0x460   : > { %2119 = vrot.lane.b32.xlu1 %v6988_v45, %s4811_s20  ;;  %10613 = vst [vmem:[#allocation48_spill] sm:$0xff] %v7305_v22 }
 0x462   : > { %2149 = vrot.lane.b32.xlu0 %v6944_v16, %s4812_s21 }
 0x464   : > { %2151 = vrot.lane.b32.xlu1 %v6954_v48, %s4812_s21 }
 0x466   : > { %2165 = vrot.lane.b32.xlu0 %v6972_v7, %s4812_s21 }
 0x468   : > { %2167 = vrot.lane.b32.xlu1 %v6988_v45, %s4812_s21 }
 0x46a   : > { %2197 = vrot.lane.b32.xlu0 %v6944_v16, %s4813_s22 }
 0x46c   : > { %2199 = vrot.lane.b32.xlu1 %v6954_v48, %s4813_s22 }
 0x46e   : > { %2213 = vrot.lane.b32.xlu0 %v6972_v7, %s4813_s22 }
 0x470   : > { %2215 = vrot.lane.b32.xlu1 %v6988_v45, %s4813_s22 }
 0x472   : > { %2245 = vrot.lane.b32.xlu0 %v6944_v16, %s10387_s23 }
 0x474   : > { %2247 = vrot.lane.b32.xlu1 %v6954_v48, %s10387_s23 }
 0x476   : > { %2261 = vrot.lane.b32.xlu0 %v6972_v7, %s10387_s23 }
 0x478   : > { %2263 = vrot.lane.b32.xlu1 %v6988_v45, %s10387_s23 }
 0x47a   : > { %2293 = vrot.lane.b32.xlu0 %v6944_v16, %s10586_s24 }
 0x47c   : > { %2295 = vrot.lane.b32.xlu1 %v6954_v48, %s10586_s24 }
 0x47e   : > { %2309 = vrot.lane.b32.xlu0 %v6972_v7, %s10586_s24 }
 0x480   : > { %2311 = vrot.lane.b32.xlu1 %v6988_v45, %s10586_s24 }
 0x482   : > { %2341 = vrot.lane.b32.xlu0 %v6944_v16, %s10587_s25 }
 0x484   : > { %2343 = vrot.lane.b32.xlu1 %v6954_v48, %s10587_s25 }
 0x486   : > { %2357 = vrot.lane.b32.xlu0 %v6972_v7, %s10587_s25 }
 0x488   : > { %2359 = vrot.lane.b32.xlu1 %v6988_v45, %s10587_s25 }
 0x48a   : > { %2389 = vrot.lane.b32.xlu0 %v6944_v16, %s10588_s18 }
 0x48c   : > { %2391 = vrot.lane.b32.xlu1 %v6954_v48, %s10588_s18 }
 0x48e   : > { %2061 = vrot.lane.b32.xlu0 %v7054_v58, %s4810_s29 }
 0x490   : > { %2063 = vrot.lane.b32.xlu1 %v7064_v44, %s4810_s29 }
 0x492   : > { %2077 = vrot.lane.b32.xlu0 %v7074_v3, %s4810_s29 }
 0x494   : > { %2079 = vrot.lane.b32.xlu1 %v7084_v38, %s4810_s29 }
 0x496   : > { %2109 = vrot.lane.b32.xlu0 %v7054_v58, %s4811_s20 }
 0x498   : > { %2111 = vrot.lane.b32.xlu1 %v7064_v44, %s4811_s20 }
 0x49a   : > { %2125 = vrot.lane.b32.xlu0 %v7074_v3, %s4811_s20 }
 0x49c   : > { %2127 = vrot.lane.b32.xlu1 %v7084_v38, %s4811_s20 }
 0x49e   : > { %2157 = vrot.lane.b32.xlu0 %v7054_v58, %s4812_s21 }
 0x4a0   : > { %2159 = vrot.lane.b32.xlu1 %v7064_v44, %s4812_s21 }
 0x4a2   : > { %2173 = vrot.lane.b32.xlu0 %v7074_v3, %s4812_s21 }
 0x4a4   : > { %2175 = vrot.lane.b32.xlu1 %v7084_v38, %s4812_s21 }
 0x4a6   : > { %2205 = vrot.lane.b32.xlu0 %v7054_v58, %s4813_s22 }
 0x4a8   : > { %2207 = vrot.lane.b32.xlu1 %v7064_v44, %s4813_s22 }
 0x4aa   : > { %2221 = vrot.lane.b32.xlu0 %v7074_v3, %s4813_s22 }
 0x4ac   : > { %2223 = vrot.lane.b32.xlu1 %v7084_v38, %s4813_s22 }
 0x4ae   : > { %2253 = vrot.lane.b32.xlu0 %v7054_v58, %s10387_s23 }
 0x4b0   : > { %2255 = vrot.lane.b32.xlu1 %v7064_v44, %s10387_s23 }
 0x4b2   : > { %2269 = vrot.lane.b32.xlu0 %v7074_v3, %s10387_s23 }
 0x4b4   : > { %2271 = vrot.lane.b32.xlu1 %v7084_v38, %s10387_s23 }
 0x4b6   : > { %2301 = vrot.lane.b32.xlu0 %v7054_v58, %s10586_s24 }
 0x4b8   : > { %2303 = vrot.lane.b32.xlu1 %v7064_v44, %s10586_s24 }
 0x4ba   : > { %2317 = vrot.lane.b32.xlu0 %v7074_v3, %s10586_s24 }
 0x4bc   : > { %2319 = vrot.lane.b32.xlu1 %v7084_v38, %s10586_s24 }
 0x4be   : > { %2349 = vrot.lane.b32.xlu0 %v7054_v58, %s10587_s25 }
 0x4c0   : > { %2351 = vrot.lane.b32.xlu1 %v7064_v44, %s10587_s25 }
 0x4c2   : > { %2365 = vrot.lane.b32.xlu0 %v7074_v3, %s10587_s25 }
 0x4c4   : > { %2367 = vrot.lane.b32.xlu1 %v7084_v38, %s10587_s25  ;;  %v7150_v57 = vpop.permute.xlu0 %2053 }
 0x4c6   : > { %2397 = vrot.lane.b32.xlu0 %v7054_v58, %s10588_s18  ;;  %v7154_v19 = vpop.permute.xlu1 %2055 }
 0x4c8   : > { %2399 = vrot.lane.b32.xlu1 %v7064_v44, %s10588_s18  ;;  %v7161_v10 = vpop.permute.xlu0 %2069 }
 0x4ca   : > { %2057 = vrot.lane.b32.xlu0 %v7157_v63, %s4810_s29  ;;  %v7168_v49 = vpop.permute.xlu1 %2071 }
 0x4cc   : > { %2059 = vrot.lane.b32.xlu1 %v7164_v53, %s4810_s29  ;;  %v7175_v31 = vpop.permute.xlu0 %2101 }
 0x4ce   : > { %2073 = vrot.lane.b32.xlu0 %v7171_v52, %s4810_s29  ;;  %v7182_v51 = vpop.permute.xlu1 %2103 }
 0x4d0   : > { %2075 = vrot.lane.b32.xlu1 %v7178_v37, %s4810_s29  ;;  %v7186_v56 = vpop.permute.xlu0 %2117 }
 0x4d2   : > { %2105 = vrot.lane.b32.xlu0 %v7157_v63, %s4811_s20  ;;  %v7190_v24 = vpop.permute.xlu1 %2119 }
 0x4d4   : > { %2107 = vrot.lane.b32.xlu1 %v7164_v53, %s4811_s20  ;;  %v7194_v26 = vpop.permute.xlu0 %2149 }
 0x4d6   : > { %2121 = vrot.lane.b32.xlu0 %v7171_v52, %s4811_s20  ;;  %v7198_v54 = vpop.permute.xlu1 %2151 }
 0x4d8   : > { %2123 = vrot.lane.b32.xlu1 %v7178_v37, %s4811_s20  ;;  %v7202_v11 = vpop.permute.xlu0 %2165 }
 0x4da   : > { %2153 = vrot.lane.b32.xlu0 %v7157_v63, %s4812_s21  ;;  %v7206_v18 = vpop.permute.xlu1 %2167 }
 0x4dc   : > { %2155 = vrot.lane.b32.xlu1 %v7164_v53, %s4812_s21  ;;  %v7210_v60 = vpop.permute.xlu0 %2197 }
 0x4de   : > { %2169 = vrot.lane.b32.xlu0 %v7171_v52, %s4812_s21  ;;  %v7214_v28 = vpop.permute.xlu1 %2199 }
 0x4e0   : > { %2171 = vrot.lane.b32.xlu1 %v7178_v37, %s4812_s21  ;;  %v7218_v47 = vpop.permute.xlu0 %2213 }
 0x4e2   : > { %2201 = vrot.lane.b32.xlu0 %v7157_v63, %s4813_s22  ;;  %v7222_v55 = vpop.permute.xlu1 %2215 }
 0x4e4   : > { %2203 = vrot.lane.b32.xlu1 %v7164_v53, %s4813_s22  ;;  %v7226_v46 = vpop.permute.xlu0 %2245 }
 0x4e6   : > { %2217 = vrot.lane.b32.xlu0 %v7171_v52, %s4813_s22  ;;  %v7230_v59 = vpop.permute.xlu1 %2247 }
 0x4e7   : > { %10599 = vst [vmem:[#allocation16_spill] sm:$0xff] %v7230_v59 }
 0x4e8   : > { %2219 = vrot.lane.b32.xlu1 %v7178_v37, %s4813_s22  ;;  %v7234_v33 = vpop.permute.xlu0 %2261 }
 0x4ea   : > { %2249 = vrot.lane.b32.xlu0 %v7157_v63, %s10387_s23  ;;  %v7238_v41 = vpop.permute.xlu1 %2263 }
 0x4eb   : > { %10600 = vst [vmem:[#allocation18_spill] sm:$0xff] %v7238_v41 }
 0x4ec   : > { %2251 = vrot.lane.b32.xlu1 %v7164_v53, %s10387_s23  ;;  %v7242_v35 = vpop.permute.xlu0 %2293 }
 0x4ed   : > { %10601 = vst [vmem:[#allocation32_spill] sm:$0xff] %v7242_v35 }
 0x4ee   : > { %2265 = vrot.lane.b32.xlu0 %v7171_v52, %s10387_s23  ;;  %v7246_v32 = vpop.permute.xlu1 %2295 }
 0x4ef   : > { %10602 = vst [vmem:[#allocation17_spill] sm:$0xff] %v7246_v32 }
 0x4f0   : > { %2267 = vrot.lane.b32.xlu1 %v7178_v37, %s10387_s23  ;;  %v7250_v23 = vpop.permute.xlu0 %2309 }
 0x4f1   : > { %10603 = vst [vmem:[#allocation29_spill] sm:$0xff] %v7250_v23 }
 0x4f2   : > { %2297 = vrot.lane.b32.xlu0 %v7157_v63, %s10586_s24  ;;  %v7254_v27 = vpop.permute.xlu1 %2311 }
 0x4f3   : > { %10604 = vst [vmem:[#allocation15_spill] sm:$0xff] %v7254_v27 }
 0x4f4   : > { %2299 = vrot.lane.b32.xlu1 %v7164_v53, %s10586_s24  ;;  %v7260_v15 = vpop.permute.xlu0 %2341 }
 0x4f5   : > { %10605 = vst [vmem:[#allocation31_spill] sm:$0xff] %v7260_v15 }
 0x4f6   : > { %2313 = vrot.lane.b32.xlu0 %v7171_v52, %s10586_s24  ;;  %v7266_v0 = vpop.permute.xlu1 %2343 }
 0x4f7   : > { %10606 = vst [vmem:[#allocation33_spill] sm:$0xff] %v7266_v0 }
 0x4f8   : > { %2315 = vrot.lane.b32.xlu1 %v7178_v37, %s10586_s24  ;;  %v7272_v6 = vpop.permute.xlu0 %2357 }
 0x4f9   : > { %10607 = vst [vmem:[#allocation19_spill] sm:$0xff] %v7272_v6 }
 0x4fa   : > { %2345 = vrot.lane.b32.xlu0 %v7157_v63, %s10587_s25  ;;  %v7278_v30 = vpop.permute.xlu1 %2359 }
 0x4fb   : > { %10608 = vst [vmem:[#allocation21_spill] sm:$0xff] %v7278_v30 }
 0x4fc   : > { %2347 = vrot.lane.b32.xlu1 %v7164_v53, %s10587_s25  ;;  %v7282_v40 = vpop.permute.xlu0 %2389 }
 0x4fd   : > { %10609 = vst [vmem:[#allocation34_spill] sm:$0xff] %v7282_v40 }
 0x4fe   : > { %2361 = vrot.lane.b32.xlu0 %v7171_v52, %s10587_s25  ;;  %v7286_v21 = vpop.permute.xlu1 %2391 }
 0x4ff   : > { %10610 = vst [vmem:[#allocation20_spill] sm:$0xff] %v7286_v21 }
 0x500   : > { %2363 = vrot.lane.b32.xlu1 %v7178_v37, %s10587_s25  ;;  %v2062_v20 = vpop.permute.xlu0 %2061 }
 0x501   : > { %v2093_v50 = vsel %vm433_vm0, %v7150_v57, %v2062_v20 }
 0x502   : > { %2065 = vrot.lane.b32.xlu0 %v7289_v25, %s4810_s29  ;;  %v2064_v42 = vpop.permute.xlu1 %2063  ;;  %v2438_v14 = vmul.f32 %v4458_v34, %v2093_v50  ;;  %v7325_v50 = vadd.f32 %v7081_v2, %v2028_v61 }
 0x503   : > { %v2094_v43 = vsel %vm433_vm0, %v7154_v19, %v2064_v42  ;;  %v2090_v1 = vsel %vm433_vm0, %v2064_v42, %v7168_v49  ;;  %v2089_v42 = vsel %vm433_vm0, %v2062_v20, %v7161_v10  ;;  %v4462_v20 = vld [vmem:[%s10228_s2 + $0x18] sm:$0xff] }
 0x504   : > { %v2442_v36 = vmul.f32 %v4459_v29, %v2094_v43  ;;  %2067 = vrot.lane.b32.xlu1 %v7297_v4, %s4810_s29  ;;  %v2078_v5 = vpop.permute.xlu0 %2077  ;;  %10614 = vst [vmem:[#allocation56_spill] sm:$0xff] %v7325_v50  ;;  %v4460_v29 = vld [vmem:[%s10228_s2 + $0x30] sm:$0xff] }
 0x505   : > { %v2085_v13 = vsel %vm433_vm0, %v7161_v10, %v2078_v5  ;;  %v2097_v17 = vsel %vm433_vm0, %v2078_v5, %v7150_v57  ;;  %v2443_v62 = vmul.f32 %v4460_v29, %v2090_v1  ;;  %v4461_v57 = vld [vmem:[%s10228_s2] sm:$0xff]  ;;  %v4464_v5 = vld [vmem:[%s10228_s2 + $0x38] sm:$0xff] }
 0x506   : > { %2081 = vrot.lane.b32.xlu0 %v7305_v22, %s4810_s29  ;;  %v2080_v43 = vpop.permute.xlu1 %2079  ;;  %v2582_v34 = vpack.c.bf16 %v2442_v36, %v2438_v14  ;;  %v2437_v2 = vmul.f32 %v4461_v57, %v2097_v17  ;;  %v2440_v14 = vmul.f32 %v4462_v20, %v2085_v13  ;;  %v4463_v1 = vld [vmem:[%s10228_s2 + $0x20] sm:$0xff] }
 0x507   : > { %v2086_v61 = vsel %vm433_vm0, %v7168_v49, %v2080_v43  ;;  %v2098_v10 = vsel %vm433_vm0, %v2080_v43, %v7154_v19  ;;  %v4465_v49 = vld [vmem:[%s10228_s2 + $0x10] sm:$0xff] }
 0x508   : > { %v2441_v36 = vmul.f32 %v4463_v1, %v2098_v10  ;;  %v2444_v17 = vmul.f32 %v4464_v5, %v2086_v61  ;;  %2083 = vrot.lane.b32.xlu1 %v7325_v50, %s4810_s29  ;;  %2689 = vmatprep.subr.bf16.mxu0 %v2582_v34  ;;  %v7355_v19 = vpop.permute.xlu0 %2109  ;;  %v2439_v13 = vmul.f32 %v4465_v49, %v2089_v42 }
 0x50a   : > { %v2581_v43 = vpack.c.bf16 %v2441_v36, %v2437_v2  ;;  %2113 = vrot.lane.b32.xlu0 %v7289_v25, %s4811_s20  ;;  %v7362_v29 = vpop.permute.xlu1 %2111  ;;  %v2584_v57 = vpack.c.bf16 %v2444_v17, %v2440_v14  ;;  %v2583_v10 = vpack.c.bf16 %v2443_v62, %v2439_v13 }
 0x50c   : > { %2115 = vrot.lane.b32.xlu1 %v7297_v4, %s4811_s20  ;;  %2690 = vmatpush1.bf16.msra.mxu0 %v2581_v43  ;;  %v7366_v34 = vpop.permute.xlu0 %2125 }
 0x50d   : > { %2795 = vmatprep.subr.bf16.mxu1 %v2584_v57 }
 0x50e   : > { %2796 = vmatpush1.bf16.msra.mxu1 %v2583_v10  ;;  %2129 = vrot.lane.b32.xlu0 %v7305_v22, %s4811_s20  ;;  %v7370_v42 = vpop.permute.xlu1 %2127 }
 0x510   : > { %2131 = vrot.lane.b32.xlu1 %v7325_v50, %s4811_s20  ;;  %v7374_v2 = vpop.permute.xlu0 %2157 }
 0x512   : > { %v7376_v61 = vpop.permute.xlu1 %2159  ;;  %2161 = vrot.lane.b32.xlu0 %v7289_v25, %s4812_s21 }
 0x514   : > { %2163 = vrot.lane.b32.xlu1 %v7297_v4, %s4812_s21  ;;  %v7382_v62 = vpop.permute.xlu0 %2173 }
 0x516   : > { %v7384_v20 = vpop.permute.xlu1 %2175  ;;  %2177 = vrot.lane.b32.xlu0 %v7305_v22, %s4812_s21 }
 0x518   : > { %2179 = vrot.lane.b32.xlu1 %v7325_v50, %s4812_s21  ;;  %v7390_v14 = vpop.permute.xlu0 %2205 }
 0x51a   : > { %v7392_v1 = vpop.permute.xlu1 %2207  ;;  %2209 = vrot.lane.b32.xlu0 %v7289_v25, %s4813_s22 }
 0x51c   : > { %2211 = vrot.lane.b32.xlu1 %v7297_v4, %s4813_s22  ;;  %v7398_v36 = vpop.permute.xlu0 %2221 }
 0x51e   : > { %v7400_v5 = vpop.permute.xlu1 %2223  ;;  %2225 = vrot.lane.b32.xlu0 %v7305_v22, %s4813_s22 }
 0x520   : > { %2227 = vrot.lane.b32.xlu1 %v7325_v50, %s4813_s22  ;;  %v7406_v17 = vpop.permute.xlu0 %2253 }
 0x522   : > { %v7408_v49 = vpop.permute.xlu1 %2255  ;;  %2405 = vrot.lane.b32.xlu0 %v6972_v7, %s10588_s18 }
 0x523   : > { %10615 = vst [vmem:[#allocation59_spill] sm:$0xff] %v7408_v49 }
 0x524   : > { %2407 = vrot.lane.b32.xlu1 %v6988_v45, %s10588_s18  ;;  %v7414_v13 = vpop.permute.xlu0 %2269 }
 0x525   : > { %10616 = vst [vmem:[#allocation53_spill] sm:$0xff] %v7414_v13 }
 0x526   : > { %v7416_v43 = vpop.permute.xlu1 %2271  ;;  %2257 = vrot.lane.b32.xlu0 %v7289_v25, %s10387_s23 }
 0x527   : > { %10617 = vst [vmem:[#allocation54_spill] sm:$0xff] %v7416_v43 }
 0x528   : > { %2415 = vrot.lane.b32.xlu1 %v7084_v38, %s10588_s18  ;;  %v7422_v57 = vpop.permute.xlu0 %2301 }
 0x529   : > { %10618 = vst [vmem:[#allocation22_spill] sm:$0xff] %v7422_v57 }
 0x52a   : > { %v7424_v10 = vpop.permute.xlu1 %2303  ;;  %2273 = vrot.lane.b32.xlu0 %v7305_v22, %s10387_s23 }
 0x52b   : > { %10619 = vst [vmem:[#allocation60_spill] sm:$0xff] %v7424_v10 }
 0x52c   : > { %2259 = vrot.lane.b32.xlu1 %v7297_v4, %s10387_s23  ;;  %v7430_v12 = vpop.permute.xlu0 %2317 }
 0x52d   : > { %10620 = vst [vmem:[#allocation64_spill] sm:$0xff] %v7430_v12 }
 0x52e   : > { %v7432_v39 = vpop.permute.xlu1 %2319  ;;  %2305 = vrot.lane.b32.xlu0 %v7289_v25, %s10586_s24 }
 0x52f   : > { %10621 = vst [vmem:[#allocation49_spill] sm:$0xff] %v7432_v39 }
 0x530   : > { %2275 = vrot.lane.b32.xlu1 %v7325_v50, %s10387_s23  ;;  %v7438_v8 = vpop.permute.xlu0 %2349 }
 0x531   : > { %10622 = vst [vmem:[#allocation47_spill] sm:$0xff] %v7438_v8 }
 0x532   : > { %v7440_v21 = vpop.permute.xlu1 %2351  ;;  %2321 = vrot.lane.b32.xlu0 %v7305_v22, %s10586_s24 }
 0x533   : > { %10623 = vst [vmem:[#allocation46_spill] sm:$0xff] %v7440_v21  ;;  %v4424_v21 = vld [vmem:[%s5105_s19 + $0x4] ss:$12 sps:$4 sm:$0xff]  }
 0x534   : > { %2307 = vrot.lane.b32.xlu1 %v7297_v4, %s10586_s24  ;;  %v7446_v40 = vpop.permute.xlu0 %2365  ;;  %2721 = vmatprep.mubr.bf16.mxu0 %v4424_v21 }
 0x535   : > { %10624 = vst [vmem:[#allocation57_spill] sm:$0xff] %v7446_v40  ;;  %2827 = vmatprep.mubr.bf16.mxu1 %v4424_v21 }
 0x536   : > { %v7448_v30 = vpop.permute.xlu1 %2367  ;;  %2353 = vrot.lane.b32.xlu0 %v7289_v25, %s10587_s25 }
 0x537   : > { %10625 = vst [vmem:[#allocation62_spill] sm:$0xff] %v7448_v30 }
 0x538   : > { %2323 = vrot.lane.b32.xlu1 %v7325_v50, %s10586_s24  ;;  %v7454_v0 = vpop.permute.xlu0 %2397 }
 0x539   : > { %10626 = vst [vmem:[#allocation58_spill] sm:$0xff] %v7454_v0 }
 0x53a   : > { %v7456_v6 = vpop.permute.xlu1 %2399  ;;  %2369 = vrot.lane.b32.xlu0 %v7305_v22, %s10587_s25 }
 0x53b   : > { %10627 = vst [vmem:[#allocation63_spill] sm:$0xff] %v7456_v6 }
 0x53c   : > { %2355 = vrot.lane.b32.xlu1 %v7297_v4, %s10587_s25  ;;  %v7463_v40 = vpop.permute.xlu0 %2057 }
 0x53e   : > { %v7465_v30 = vpop.permute.xlu1 %2059  ;;  %2413 = vrot.lane.b32.xlu0 %v7074_v3, %s10588_s18 }
 0x540   : > { %2371 = vrot.lane.b32.xlu1 %v7325_v50, %s10587_s25  ;;  %v7471_v6 = vpop.permute.xlu0 %2073 }
 0x542   : > { %v7473_v0 = vpop.permute.xlu1 %2075  ;;  %2393 = vrot.lane.b32.xlu0 %v7157_v63, %s10588_s18 }
 0x544   : > { %2395 = vrot.lane.b32.xlu1 %v7164_v53, %s10588_s18  ;;  %v7479_v15 = vpop.permute.xlu0 %2105 }
 0x546   : > { %v7481_v21 = vpop.permute.xlu1 %2107  ;;  %2401 = vrot.lane.b32.xlu0 %v7289_v25, %s10588_s18 }
 0x548   : > { %2411 = vrot.lane.b32.xlu1 %v7178_v37, %s10588_s18  ;;  %v7487_v8 = vpop.permute.xlu0 %2121 }
 0x54a   : > { %v7489_v12 = vpop.permute.xlu1 %2123  ;;  %2409 = vrot.lane.b32.xlu0 %v7171_v52, %s10588_s18 }
 0x54c   : > { %2403 = vrot.lane.b32.xlu1 %v7297_v4, %s10588_s18  ;;  %v7495_v35 = vpop.permute.xlu0 %2153 }
 0x54e   : > { %v7497_v57 = vpop.permute.xlu1 %2155  ;;  %2417 = vrot.lane.b32.xlu0 %v7305_v22, %s10588_s18 }
 0x54f   : > { %10628 = vst [vmem:[#allocation35_spill] sm:$0xff] %v7497_v57 }
 0x550   : > { %2419 = vrot.lane.b32.xlu1 %v7325_v50, %s10588_s18  ;;  %v7503_v23 = vpop.permute.xlu0 %2169 }
 0x552   : > { %v7505_v39 = vpop.permute.xlu1 %2171 }
 0x554   : > { %v7507_v27 = vpop.permute.xlu0 %2201 }
 0x555   : > { %10629 = vst [vmem:[#allocation36_spill] sm:$0xff] %v7507_v27  ;;  %v4466_v27 = vld [vmem:[%s10228_s2 + $0x228] sm:$0xff] }
 0x556   : > { %v7509_v32 = vpop.permute.xlu1 %2203 }
 0x557   : > { %10630 = vst [vmem:[#allocation52_spill] sm:$0xff] %v7509_v32  ;;  %v7529_v32 = vmul.f32 %v4466_v27, %v7064_v44  ;;  %v7548_v27 = vld [vmem:[%s10228_s2 + $0x220] sm:$0xff] }
 0x558   : > { %v7511_v10 = vpop.permute.xlu0 %2217  ;;  %10638 = vst [vmem:[#allocation24_spill] sm:$0xff] %v7548_v27  ;;  %v7552_v44 = vmul.f32 %v7548_v27, %v6954_v48  ;;  %v7573_v48 = vld [vmem:[%s10228_s2 + $0x200] sm:$0xff] }
 0x559   : > { %10631 = vst [vmem:[#allocation50_spill] sm:$0xff] %v7511_v10  ;;  %10640 = vst [vmem:[#allocation67_spill] sm:$0xff] %v7573_v48  ;;  %v7577_v27 = vmul.f32 %v7573_v48, %v6944_v16  ;;  %v4475_v48 = vld [vmem:[%s10228_s2 + $0x278] sm:$0xff] }
 0x55a   : > { %v7513_v43 = vpop.permute.xlu1 %2219 }
 0x55c   : > { %v7515_v13 = vpop.permute.xlu0 %2249 }
 0x55d   : > { %10632 = vst [vmem:[#allocation55_spill] sm:$0xff] %v7515_v13  ;;  %v4467_v13 = vld [vmem:[%s10228_s2 + $0x208] sm:$0xff] }
 0x55e   : > { %v7517_v59 = vpop.permute.xlu1 %2251 }
 0x55f   : > { %10633 = vst [vmem:[#allocation51_spill] sm:$0xff] %v7517_v59  ;;  %v7537_v59 = vmul.f32 %v4467_v13, %v7054_v58  ;;  %v4470_v13 = vld [vmem:[%s10228_s2 + $0x268] sm:$0xff] }
 0x560   : > { %v7519_v49 = vpop.permute.xlu0 %2265  ;;  %v7560_v58 = vmul.f32 %v4470_v13, %v7297_v4  ;;  %v4473_v13 = vld [vmem:[%s10228_s2 + $0x248] sm:$0xff] }
 0x561   : > { %10634 = vst [vmem:[#allocation37_spill] sm:$0xff] %v7519_v49 }
 0x562   : > { %v7521_v41 = vpop.permute.xlu1 %2267 }
 0x563   : > { %10635 = vst [vmem:[#allocation23_spill] sm:$0xff] %v7521_v41 }
 0x564   : > { %v7523_v57 = vpop.permute.xlu0 %2297 }
 0x565   : > { %10636 = vst [vmem:[#allocation66_spill] sm:$0xff] %v7523_v57  ;;  %v4468_v57 = vld [vmem:[%s10228_s2 + $0x238] sm:$0xff] }
 0x566   : > { %v7531_v10 = vpop.permute.xlu1 %2299  ;;  %v7543_v41 = vmul.f32 %v4468_v57, %v7084_v38  ;;  %v4471_v38 = vld [vmem:[%s10228_s2 + $0x218] sm:$0xff]  ;;  %v7583_v57 = vmul.f32 %v4473_v13, %v7289_v25  ;;  %v7601_v13 = vmul.f32 %v4475_v48, %v7325_v50  ;;  %v4476_v25 = vld [vmem:[%s10228_s2 + $0x260] sm:$0xff]  ;;  %v4478_v50 = vld [vmem:[%s10228_s2 + $0x270] sm:$0xff] }
 0x567   : > { %10637 = vst [vmem:[#allocation38_spill] sm:$0xff] %v7531_v10  ;;  %v7568_v49 = vmul.f32 %v4471_v38, %v7074_v3  ;;  %v2138_v38 = vsel %vm458_vm2, %v7362_v29, %v7190_v24  ;;  %v4474_v3 = vld [vmem:[%s10228_s2 + $0x230] sm:$0xff] }
 0x568   : > { %v7554_v10 = vpop.permute.xlu0 %2313  ;;  %10641 = vst [vmem:[#allocation65_spill] sm:$0xff] %v7583_v57  ;;  %v7595_v16 = vmul.f32 %v4474_v3, %v6988_v45  ;;  %10643 = vst [vmem:[#allocation69_spill] sm:$0xff] %v7601_v13  ;;  %v4477_v45 = vld [vmem:[%s10228_s2 + $0x210] sm:$0xff] }
 0x569   : > { %10639 = vst [vmem:[#allocation61_spill] sm:$0xff] %v7554_v10  ;;  %v7617_v48 = vmul.f32 %v4477_v45, %v6972_v7  ;;  %v2137_v10 = vsel %vm458_vm2, %v7355_v19, %v7186_v56  ;;  %v4479_v45 = vld [vmem:[%s10228_s2 + $0x258] sm:$0xff] }
 0x56a   : > { %v7589_v4 = vpop.permute.xlu1 %2315  ;;  %v7637_v7 = vmul.f32 %v4479_v45, %v7305_v22  ;;  %v4481_v45 = vld [vmem:[%s10228_s2 + $0xb0] sm:$0xff] }
 0x56b   : > { %10642 = vst [vmem:[#allocation68_spill] sm:$0xff] %v7589_v4  ;;  %v7607_v4 = vmul.f32 %v4476_v25, %v7164_v53  ;;  %v7623_v25 = vmul.f32 %v4478_v50, %v7178_v37  ;;  %v4480_v50 = vld [vmem:[%s10228_s2 + $0x240] sm:$0xff]  ;;  %v2142_v53 = vsel %vm458_vm2, %v7182_v51, %v7362_v29  ;;  %v7656_v22 = vmul.f32 %v4481_v45, %v2138_v38  ;;  %v4484_v45 = vld [vmem:[%s10228_s2 + $0x88] sm:$0xff] }
 0x56c   : > { %v7629_v3 = vpop.permute.xlu0 %2345  ;;  %10647 = vst [vmem:[#allocation73_spill] sm:$0xff] %v7637_v7  ;;  %v7643_v37 = vmul.f32 %v4480_v50, %v7157_v63  ;;  %v4482_v50 = vld [vmem:[%s10228_s2 + $0x250] sm:$0xff]  ;;  %v2186_v29 = vsel %vm483_vm3, %v7376_v61, %v7206_v18  ;;  %v2233_v7 = vsel %vm508_vm4, %v7390_v14, %v7218_v47 }
 0x56d   : > { %10644 = vst [vmem:[#allocation70_spill] sm:$0xff] %v7607_v4  ;;  %10645 = vst [vmem:[#allocation71_spill] sm:$0xff] %v7623_v25  ;;  %v7662_v63 = vmul.f32 %v4482_v50, %v7171_v52  ;;  %v4483_v50 = vld [vmem:[%s10228_s2 + $0x90] sm:$0xff]  ;;  %v4499_v25 = vld [vmem:[%s10228_s2 + $0x68] sm:$0xff] }
 0x56e   : > { %10646 = vst [vmem:[#allocation72_spill] sm:$0xff] %v7629_v3  ;;  %10648 = vst [vmem:[#allocation74_spill] sm:$0xff] %v7643_v37  ;;  %v2141_v3 = vsel %vm458_vm2, %v7175_v31, %v7355_v19  ;;  %v2146_v19 = vsel %vm458_vm2, %v7370_v42, %v7182_v51  ;;  %v7668_v57 = vpop.permute.xlu1 %2347  ;;  %v7679_v52 = vmul.f32 %v4483_v50, %v2137_v10  ;;  %v4485_v10 = vld [vmem:[%s10228_s2 + $0xa8] sm:$0xff] }
 0x56f   : > { %10649 = vst [vmem:[#allocation75_spill] sm:$0xff] %v7662_v63  ;;  %10650 = vst [vmem:[#allocation76_spill] sm:$0xff] %v7668_v57  ;;  %v2134_v51 = vsel %vm458_vm2, %v7190_v24, %v7370_v42  ;;  %v7694_v57 = vmul.f32 %v4484_v45, %v2141_v3  ;;  %v7699_v50 = vmul.f32 %v4485_v10, %v2142_v53  ;;  %v4486_v45 = vld [vmem:[%s10228_s2 + $0xa0] sm:$0xff]  ;;  %v4487_v10 = vld [vmem:[%s10228_s2 + $0xb8] sm:$0xff] }
 0x570   : > { %v2145_v24 = vsel %vm458_vm2, %v7366_v34, %v7175_v31  ;;  %v2190_v42 = vsel %vm483_vm3, %v7198_v54, %v7376_v61  ;;  %v7709_v38 = vpop.permute.xlu0 %2361  ;;  %v2133_v53 = vsel %vm458_vm2, %v7186_v56, %v7366_v34  ;;  %v7720_v31 = vmul.f32 %v4486_v45, %v2146_v19  ;;  %v4488_v34 = vld [vmem:[%s10228_s2 + $0x130] sm:$0xff] }
 0x571   : > { %10651 = vst [vmem:[#allocation77_spill] sm:$0xff] %v7709_v38  ;;  %v2185_v61 = vsel %vm483_vm3, %v7374_v2, %v7202_v11  ;;  %v7729_v3 = vmul.f32 %v4487_v10, %v2134_v51  ;;  %v2189_v56 = vsel %vm483_vm3, %v7194_v26, %v7374_v2  ;;  %v7738_v19 = vmul.f32 %v4488_v34, %v2186_v29  ;;  %v4489_v51 = vld [vmem:[%s10228_s2 + $0x80] sm:$0xff]  ;;  %v4490_v2 = vld [vmem:[%s10228_s2 + $0x128] sm:$0xff] }
 0x572   : > { %v2194_v45 = vsel %vm483_vm3, %v7384_v20, %v7198_v54  ;;  %v7744_v38 = vpop.permute.xlu1 %2363  ;;  %v7749_v10 = vmul.f32 %v4489_v51, %v2145_v24  ;;  %v7754_v63 = vmul.f32 %v4490_v2, %v2190_v42  ;;  %v2181_v29 = vsel %vm483_vm3, %v7202_v11, %v7382_v62  ;;  %v4491_v24 = vld [vmem:[%s10228_s2 + $0x98] sm:$0xff]  ;;  %v4492_v42 = vld [vmem:[%s10228_s2 + $0x110] sm:$0xff] }
 0x573   : > { %10652 = vst [vmem:[#allocation78_spill] sm:$0xff] %v7744_v38  ;;  %v2193_v54 = vsel %vm483_vm3, %v7382_v62, %v7194_v26  ;;  %v7767_v34 = vmul.f32 %v4491_v24, %v2133_v53  ;;  %v7772_v51 = vmul.f32 %v4492_v42, %v2185_v61  ;;  %v2182_v11 = vsel %vm483_vm3, %v7206_v18, %v7384_v20  ;;  %v4493_v53 = vld [vmem:[%s10228_s2 + $0x108] sm:$0xff]  ;;  %v4494_v61 = vld [vmem:[%s10228_s2 + $0x120] sm:$0xff]  ;;  %v4497_v20 = vld [vmem:[%s10228_s2 + $0x138] sm:$0xff] }
 0x574   : > { %v2066_v2 = vpop.permute.xlu0 %2065  ;;  %v7785_v24 = vmul.f32 %v4493_v53, %v2189_v56  ;;  %v7790_v42 = vmul.f32 %v4494_v61, %v2194_v45  ;;  %v4495_v62 = vld [vmem:[%s10228_s2 + $0x100] sm:$0xff]  ;;  %v4496_v56 = vld [vmem:[%s10228_s2 + $0x118] sm:$0xff]  ;;  %v7812_v38 = vmul.f32 %v4497_v20, %v2182_v11  ;;  %v4498_v11 = vld [vmem:[%s10228_s2 + $0x48] sm:$0xff] }
 0x575   : > { %v2095_v18 = vsel %vm433_vm0, %v7463_v40, %v2066_v2  ;;  %v7800_v26 = vmul.f32 %v4495_v62, %v2193_v54  ;;  %v7805_v53 = vmul.f32 %v4496_v56, %v2181_v29  ;;  %v2237_v54 = vsel %vm508_vm4, %v7210_v60, %v7390_v14 }
 0x576   : > { %v2068_v45 = vpop.permute.xlu1 %2067  ;;  %v2234_v56 = vsel %vm508_vm4, %v7392_v1, %v7222_v55  ;;  %v2446_v20 = vmul.f32 %v4498_v11, %v2095_v18  ;;  %v2238_v11 = vsel %vm508_vm4, %v7214_v28, %v7392_v1  ;;  %v2091_v14 = vsel %vm433_vm0, %v2066_v2, %v7471_v6 }
 0x577   : > { %v2096_v29 = vsel %vm433_vm0, %v7465_v30, %v2068_v45  ;;  %v2092_v61 = vsel %vm433_vm0, %v2068_v45, %v7473_v0 }
 0x578   : > { %v2450_v37 = vmul.f32 %v4499_v25, %v2096_v29  ;;  %v2082_v62 = vpop.permute.xlu0 %2081  ;;  %v4500_v25 = vld [vmem:[%s10228_s2 + $0x188] sm:$0xff] }
 0x579   : > { %v2087_v18 = vsel %vm433_vm0, %v7471_v6, %v2082_v62  ;;  %v2099_v45 = vsel %vm433_vm0, %v2082_v62, %v7463_v40  ;;  %v7851_v29 = vmul.f32 %v4500_v25, %v2237_v54  ;;  %v4501_v40 = vld [vmem:[%s10228_s2 + $0x1b0] sm:$0xff] }
 0x57a   : > { %v2084_v4 = vpop.permute.xlu1 %2083  ;;  %v2586_v13 = vpack.c.bf16 %v2450_v37, %v2446_v20  ;;  %v7863_v62 = vmul.f32 %v4501_v40, %v2234_v56  ;;  %v4502_v54 = vld [vmem:[%s10228_s2 + $0x70] sm:$0xff]  ;;  %v4503_v37 = vld [vmem:[%s10228_s2 + $0x40] sm:$0xff]  ;;  %v4504_v56 = vld [vmem:[%s10228_s2 + $0x58] sm:$0xff] }
 0x57b   : > { %v2451_v25 = vmul.f32 %v4502_v54, %v2092_v61  ;;  %v2088_v1 = vsel %vm433_vm0, %v7473_v0, %v2084_v4  ;;  %v2100_v6 = vsel %vm433_vm0, %v2084_v4, %v7465_v30  ;;  %v2445_v2 = vmul.f32 %v4503_v37, %v2099_v45  ;;  %v4505_v61 = vld [vmem:[%s10228_s2 + $0x60] sm:$0xff]  ;;  %v4506_v0 = vld [vmem:[%s10228_s2 + $0x78] sm:$0xff]  ;;  %v4507_v45 = vld [vmem:[%s10228_s2 + $0x190] sm:$0xff] }
 0x57c   : > { %v2448_v20 = vmul.f32 %v4504_v56, %v2087_v18  ;;  %v2449_v40 = vmul.f32 %v4505_v61, %v2100_v6  ;;  %v2452_v30 = vmul.f32 %v4506_v0, %v2088_v1  ;;  %2691 = vmatprep.subr.bf16.mxu0 %v2586_v13  ;;  %v2114_v4 = vpop.permute.xlu0 %2113  ;;  %v7889_v54 = vmul.f32 %v4507_v45, %v2233_v7  ;;  %v4508_v18 = vld [vmem:[%s10228_s2 + $0x50] sm:$0xff]  ;;  %v4509_v13 = vld [vmem:[%s10228_s2 + $0x1a8] sm:$0xff] }
 0x57d   : > { %v2447_v37 = vmul.f32 %v4508_v18, %v2091_v14  ;;  %v2143_v6 = vsel %vm458_vm2, %v7479_v15, %v2114_v4  ;;  %v7902_v56 = vmul.f32 %v4509_v13, %v2238_v11  ;;  %v2241_v7 = vsel %vm508_vm4, %v7398_v36, %v7210_v60  ;;  %v4510_v60 = vld [vmem:[%s10228_s2 + $0xc8] sm:$0xff] }
 0x57e   : > { %v2585_v61 = vpack.c.bf16 %v2449_v40, %v2445_v2  ;;  %v2116_v14 = vpop.permute.xlu1 %2115  ;;  %v2588_v0 = vpack.c.bf16 %v2452_v30, %v2448_v20  ;;  %v2607_v45 = vpack.c.bf16 %v7863_v62, %v7889_v54  ;;  %v2229_v18 = vsel %vm508_vm4, %v7218_v47, %v7398_v36  ;;  %v4511_v40 = vld [vmem:[%s10228_s2 + $0xe8] sm:$0xff]  ;;  %v4512_v36 = vld [vmem:[%s10228_s2 + $0x180] sm:$0xff]  ;;  %v4545_v62 = vld [vmem:[%s10228_s2 + $0x2b8] sm:$0xff] }
 0x57f   : > { %v2587_v1 = vpack.c.bf16 %v2451_v25, %v2447_v37  ;;  %v2144_v11 = vsel %vm458_vm2, %v7481_v21, %v2116_v14  ;;  %v2462_v2 = vmul.f32 %v4510_v60, %v2143_v6  ;;  %v2140_v20 = vsel %vm458_vm2, %v2116_v14, %v7489_v12 }
 0x580   : > { %v2466_v30 = vmul.f32 %v4511_v40, %v2144_v11  ;;  %2692 = vmatpush1.bf16.msra.mxu0 %v2585_v61  ;;  %2797 = vmatprep.subr.bf16.mxu1 %v2588_v0  ;;  %v2130_v47 = vpop.permute.xlu0 %2129  ;;  %v7929_v25 = vmul.f32 %v4512_v36, %v2241_v7  ;;  %v10653_v13 = vpack.c.bf16 %v7699_v50, %v7694_v57  ;;  %v4513_v61 = vld [vmem:[%s10228_s2 + $0x198] sm:$0xff]  ;;  %v4517_v11 = vld [vmem:[%s10228_s2 + $0xe0] sm:$0xff] }
 0x581   : > { %v2135_v37 = vsel %vm458_vm2, %v7487_v8, %v2130_v47  ;;  %v2147_v6 = vsel %vm458_vm2, %v2130_v47, %v7479_v15  ;;  %2798 = vmatpush1.bf16.msra.mxu1 %v2587_v1  ;;  %v7943_v14 = vmul.f32 %v4513_v61, %v2229_v18  ;;  %v2242_v7 = vsel %vm508_vm4, %v7400_v5, %v7214_v28  ;;  %v4514_v18 = vld [vmem:[%s10228_s2 + $0xf0] sm:$0xff]  ;;  %v4519_v40 = vld [vmem:[%s10228_s2 + $0x1a0] sm:$0xff] }
 0x582   : > { %2693 = vmatprep.subr.bf16.mxu0 %v10653_v13  ;;  %v2139_v15 = vsel %vm458_vm2, %v2114_v4, %v7487_v8  ;;  %v2132_v0 = vpop.permute.xlu1 %2131  ;;  %v10654_v57 = vpack.c.bf16 %v7729_v3, %v7767_v34  ;;  %v2594_v50 = vpack.c.bf16 %v2466_v30, %v2462_v2  ;;  %v2230_v1 = vsel %vm508_vm4, %v7222_v55, %v7400_v5  ;;  %v4515_v34 = vld [vmem:[%s10228_s2 + $0xc0] sm:$0xff]  ;;  %v4516_v55 = vld [vmem:[%s10228_s2 + $0xd8] sm:$0xff]  ;;  %v4520_v47 = vld [vmem:[%s10228_s2 + $0xd0] sm:$0xff] }
 0x583   : > { %v2467_v28 = vmul.f32 %v4514_v18, %v2140_v20  ;;  %v2136_v8 = vsel %vm458_vm2, %v7489_v12, %v2132_v0  ;;  %v2148_v3 = vsel %vm458_vm2, %v2132_v0, %v7481_v21  ;;  %v2461_v4 = vmul.f32 %v4515_v34, %v2147_v6  ;;  %v4518_v12 = vld [vmem:[%s10228_s2 + $0xf8] sm:$0xff] }
 0x584   : > { %2799 = vmatprep.subr.bf16.mxu1 %v10654_v57  ;;  %v2464_v5 = vmul.f32 %v4516_v55, %v2135_v37  ;;  %v2465_v60 = vmul.f32 %v4517_v11, %v2148_v3  ;;  %v2468_v21 = vmul.f32 %v4518_v12, %v2136_v8  ;;  %v10655_v2 = vpack.c.bf16 %v7720_v31, %v7749_v10  ;;  %v2162_v20 = vpop.permute.xlu0 %2161  ;;  %v4521_v10 = vld [vmem:[%s10228_s2 + $0x1b8] sm:$0xff]  ;;  %v10657_v57 = vld [vmem:[#allocation35_spill] sm:$0xff]  ;;  %v4523_v3 = vld [vmem:[%s10228_s2 + $0x168] sm:$0xff] }
 0x585   : > { %v7986_v30 = vmul.f32 %v4519_v40, %v2242_v7  ;;  %v2463_v36 = vmul.f32 %v4520_v47, %v2139_v15  ;;  %v2191_v37 = vsel %vm483_vm3, %v7495_v35, %v2162_v20  ;;  %v10656_v31 = vpack.c.bf16 %v7656_v22, %v7679_v52  ;;  %v4524_v11 = vld [vmem:[%s10228_s2 + $0x280] sm:$0xff]  ;;  %v10659_v12 = vld [vmem:[#allocation18_spill] sm:$0xff]  ;;  %v10662_v47 = vld [vmem:[#allocation16_spill] sm:$0xff] }
 0x586   : > { %2694 = vmatpush1.bf16.msra.mxu0 %v10655_v2  ;;  %v8000_v6 = vmul.f32 %v4521_v10, %v2230_v1  ;;  %v2593_v13 = vpack.c.bf16 %v2465_v60, %v2461_v4  ;;  %v2164_v61 = vpop.permute.xlu1 %2163  ;;  %v2596_v7 = vpack.c.bf16 %v2468_v21, %v2464_v5  ;;  %v2606_v15 = vpack.c.bf16 %v7902_v56, %v7851_v29  ;;  %v4522_v1 = vld [vmem:[%s10228_s2 + $0x148] sm:$0xff]  ;;  %v10660_v21 = vld [vmem:[#allocation59_spill] sm:$0xff]  ;;  %v4527_v10 = vld [vmem:[%s10228_s2 + $0x158] sm:$0xff] }
 0x587   : > { %2695 = vmatprep.subr.bf16.mxu0 %v2594_v50  ;;  %2800 = vmatpush1.bf16.msra.mxu1 %v10656_v31  ;;  %v2281_v0 = vsel %vm533_vm5, %v7406_v17, %v7234_v33  ;;  %v2285_v52 = vsel %vm533_vm5, %v7226_v46, %v7406_v17  ;;  %v2595_v22 = vpack.c.bf16 %v2467_v28, %v2463_v36  ;;  %v4536_v56 = vld [vmem:[%s10228_s2 + $0x1f0] sm:$0xff] }
 0x588   : > { %v2192_v50 = vsel %vm483_vm3, %v10657_v57, %v2164_v61  ;;  %v2478_v18 = vmul.f32 %v4522_v1, %v2191_v37  ;;  %v2188_v8 = vsel %vm483_vm3, %v2164_v61, %v7505_v39  ;;  %2801 = vmatprep.subr.bf16.mxu1 %v2596_v7  ;;  %v2178_v17 = vpop.permute.xlu0 %2177  ;;  %v2605_v28 = vpack.c.bf16 %v7986_v30, %v7929_v25  ;;  %v4525_v37 = vld [vmem:[%s10228_s2 + $0x170] sm:$0xff]  ;;  %v4528_v61 = vld [vmem:[%s10228_s2 + $0x160] sm:$0xff] }
 0x589   : > { %v2482_v34 = vmul.f32 %v4523_v3, %v2192_v50  ;;  %v2183_v4 = vsel %vm483_vm3, %v7503_v23, %v2178_v17  ;;  %v2195_v55 = vsel %vm483_vm3, %v2178_v17, %v7495_v35  ;;  %v10658_v5 = vpack.c.bf16 %v7754_v63, %v7785_v24  ;;  %v4530_v50 = vld [vmem:[%s10228_s2 + $0x288] sm:$0xff]  ;;  %v10664_v3 = vld [vmem:[#allocation36_spill] sm:$0xff]  ;;  %v4544_v30 = vld [vmem:[%s10228_s2 + $0x2b0] sm:$0xff] }
 0x58a   : > { %2696 = vmatpush1.bf16.msra.mxu0 %v2593_v13  ;;  %v8038_v60 = vmul.f32 %v4524_v11, %v2285_v52  ;;  %v2282_v2 = vsel %vm533_vm5, %v10660_v21, %v10659_v12  ;;  %v2187_v35 = vsel %vm483_vm3, %v2162_v20, %v7503_v23  ;;  %v2180_v40 = vpop.permute.xlu1 %2179  ;;  %v10661_v63 = vpack.c.bf16 %v7812_v38, %v7805_v53  ;;  %v4526_v53 = vld [vmem:[%s10228_s2 + $0x140] sm:$0xff]  ;;  %v4533_v11 = vld [vmem:[%s10228_s2 + $0x2a8] sm:$0xff] }
 0x58b   : > { %2697 = vmatprep.subr.bf16.mxu0 %v10658_v5  ;;  %2802 = vmatpush1.bf16.msra.mxu1 %v2595_v22  ;;  %v2602_v24 = vpack.c.bf16 %v2482_v34, %v2478_v18  ;;  %v2286_v36 = vsel %vm533_vm5, %v10662_v47, %v10660_v21  ;;  %v2483_v31 = vmul.f32 %v4525_v37, %v2188_v8  ;;  %v4531_v18 = vld [vmem:[%s10228_s2 + $0x150] sm:$0xff] }
 0x58c   : > { %2803 = vmatprep.subr.bf16.mxu1 %v10661_v63  ;;  %v2184_v23 = vsel %vm483_vm3, %v7505_v39, %v2180_v40  ;;  %v2196_v38 = vsel %vm483_vm3, %v2180_v40, %v10657_v57  ;;  %v2477_v20 = vmul.f32 %v4526_v53, %v2195_v55  ;;  %v2480_v13 = vmul.f32 %v4527_v10, %v2183_v4  ;;  %v4529_v39 = vld [vmem:[%s10228_s2 + $0x178] sm:$0xff]  ;;  %v2210_v57 = vpop.permute.xlu0 %2209 }
 0x58d   : > { %v2481_v7 = vmul.f32 %v4528_v61, %v2196_v38  ;;  %v2484_v52 = vmul.f32 %v4529_v39, %v2184_v23  ;;  %v10663_v22 = vpack.c.bf16 %v7790_v42, %v7800_v26  ;;  %v8081_v1 = vmul.f32 %v4530_v50, %v2281_v0  ;;  %v4532_v42 = vld [vmem:[%s10228_s2 + $0x2a0] sm:$0xff]  ;;  %v10667_v40 = vld [vmem:[#allocation52_spill] sm:$0xff] }
 0x58e   : > { %v2479_v8 = vmul.f32 %v4531_v18, %v2187_v35  ;;  %v2239_v34 = vsel %vm508_vm4, %v10664_v3, %v2210_v57  ;;  %v10665_v26 = vpack.c.bf16 %v7738_v19, %v7772_v51  ;;  %v8095_v0 = vmul.f32 %v4532_v42, %v2286_v36  ;;  %v2212_v4 = vpop.permute.xlu1 %2211  ;;  %v10666_v19 = vld [vmem:[#allocation53_spill] sm:$0xff] }
 0x58f   : > { %2698 = vmatpush1.bf16.msra.mxu0 %v10663_v22  ;;  %v2601_v17 = vpack.c.bf16 %v2481_v7, %v2477_v20  ;;  %v2604_v55 = vpack.c.bf16 %v2484_v52, %v2480_v13  ;;  %v2608_v5 = vpack.c.bf16 %v8000_v6, %v7943_v14  ;;  %v8102_v21 = vmul.f32 %v4533_v11, %v2282_v2  ;;  %v4534_v14 = vld [vmem:[%s10228_s2 + $0x1c8] sm:$0xff]  ;;  %v4537_v39 = vld [vmem:[%s10228_s2 + $0x1c0] sm:$0xff] }
 0x590   : > { %2699 = vmatprep.subr.bf16.mxu0 %v2602_v24  ;;  %2804 = vmatpush1.bf16.msra.mxu1 %v10665_v26  ;;  %v2277_v51 = vsel %vm533_vm5, %v7234_v33, %v10666_v19  ;;  %v2603_v35 = vpack.c.bf16 %v2483_v31, %v2479_v8  ;;  %v2240_v63 = vsel %vm508_vm4, %v10667_v40, %v2212_v4  ;;  %v4535_v24 = vld [vmem:[%s10228_s2 + $0x1e8] sm:$0xff]  ;;  %v2226_v33 = vpop.permute.xlu0 %2225  ;;  %v4542_v26 = vld [vmem:[%s10228_s2 + $0x298] sm:$0xff] }
 0x591   : > { %v2494_v6 = vmul.f32 %v4534_v14, %v2239_v34  ;;  %v2236_v2 = vsel %vm508_vm4, %v2212_v4, %v7513_v43  ;;  %v2498_v36 = vmul.f32 %v4535_v24, %v2240_v63  ;;  %2805 = vmatprep.subr.bf16.mxu1 %v2604_v55  ;;  %v2289_v37 = vsel %vm533_vm5, %v10666_v19, %v7226_v46  ;;  %v10668_v31 = vld [vmem:[#allocation50_spill] sm:$0xff]  ;;  %v10670_v4 = vld [vmem:[#allocation60_spill] sm:$0xff]  ;;  %v10671_v55 = vld [vmem:[#allocation17_spill] sm:$0xff] }
 0x592   : > { %v2231_v23 = vsel %vm508_vm4, %v10668_v31, %v2226_v33  ;;  %v2243_v38 = vsel %vm508_vm4, %v2226_v33, %v10664_v3  ;;  %v2621_v53 = vpack.c.bf16 %v8095_v0, %v8038_v60  ;;  %v10669_v20 = vld [vmem:[#allocation54_spill] sm:$0xff]  ;;  %v2235_v10 = vsel %vm508_vm4, %v2210_v57, %v10668_v31  ;;  %v2228_v13 = vpop.permute.xlu1 %2227  ;;  %v4539_v57 = vld [vmem:[%s10228_s2 + $0x1e0] sm:$0xff]  ;;  %v4541_v3 = vld [vmem:[%s10228_s2 + $0x290] sm:$0xff] }
 0x593   : > { %2700 = vmatpush1.bf16.msra.mxu0 %v2601_v17  ;;  %v2278_v46 = vsel %vm533_vm5, %v10659_v12, %v10669_v20  ;;  %v2610_v61 = vpack.c.bf16 %v2498_v36, %v2494_v6  ;;  %v2290_v29 = vsel %vm533_vm5, %v10669_v20, %v10662_v47  ;;  %v2232_v12 = vsel %vm508_vm4, %v7513_v43, %v2228_v13  ;;  %v4538_v47 = vld [vmem:[%s10228_s2 + $0x1d8] sm:$0xff]  ;;  %v4543_v17 = vld [vmem:[%s10228_s2 + $0x1d0] sm:$0xff]  ;;  %v10674_v6 = vld [vmem:[#allocation29_spill] sm:$0xff] }
 0x594   : > { %2701 = vmatprep.subr.bf16.mxu0 %v2606_v15  ;;  %2806 = vmatpush1.bf16.msra.mxu1 %v2603_v35  ;;  %v2499_v15 = vmul.f32 %v4536_v56, %v2236_v2  ;;  %v2244_v7 = vsel %vm508_vm4, %v2228_v13, %v10667_v40  ;;  %v2493_v52 = vmul.f32 %v4537_v39, %v2243_v38  ;;  %v4540_v43 = vld [vmem:[%s10228_s2 + $0x1f8] sm:$0xff]  ;;  %v8170_v8 = vpop.permute.xlu0 %2405  ;;  %v10673_v40 = vld [vmem:[#allocation49_spill] sm:$0xff]  ;;  %v10675_v2 = vld [vmem:[#allocation22_spill] sm:$0xff] }
 0x595   : > { %2807 = vmatprep.subr.bf16.mxu1 %v2608_v5  ;;  %v2496_v22 = vmul.f32 %v4538_v47, %v2231_v23  ;;  %v2497_v50 = vmul.f32 %v4539_v57, %v2244_v7  ;;  %v2500_v18 = vmul.f32 %v4540_v43, %v2232_v12  ;;  %v8175_v34 = vmul.f32 %v4541_v3, %v2277_v51  ;;  %v10676_v36 = vld [vmem:[#allocation32_spill] sm:$0xff]  ;;  %v4546_v23 = vld [vmem:[%s10228_s2 + $0x320] sm:$0xff]  ;;  %v4550_v39 = vld [vmem:[%s10228_s2 + $0x308] sm:$0xff] }
 0x596   : > { %v8180_v42 = vmul.f32 %v4542_v26, %v2289_v37  ;;  %v2495_v25 = vmul.f32 %v4543_v17, %v2235_v10  ;;  %v2334_v5 = vsel %vm558_vm6, %v10671_v55, %v10670_v4  ;;  %v8197_v19 = vpop.permute.xlu1 %2407  ;;  %v8202_v54 = vmul.f32 %v4545_v62, %v2290_v29  ;;  %v10677_v20 = vld [vmem:[#allocation64_spill] sm:$0xff]  ;;  %v4549_v12 = vld [vmem:[%s10228_s2 + $0x300] sm:$0xff]  ;;  %v10680_v47 = vld [vmem:[#allocation47_spill] sm:$0xff] }
 0x597   : > { %2702 = vmatpush1.bf16.msra.mxu0 %v2605_v28  ;;  %v8191_v28 = vmul.f32 %v4544_v30, %v2278_v46  ;;  %v2609_v11 = vpack.c.bf16 %v2497_v50, %v2493_v52  ;;  %v2612_v51 = vpack.c.bf16 %v2500_v18, %v2496_v22  ;;  %v2329_v24 = vsel %vm558_vm6, %v10675_v2, %v10674_v6  ;;  %v10681_v22 = vld [vmem:[#allocation31_spill] sm:$0xff]  ;;  %v4552_v43 = vld [vmem:[%s10228_s2 + $0x338] sm:$0xff]  ;;  %v10683_v17 = vld [vmem:[#allocation46_spill] sm:$0xff] }
 0x598   : > { %2703 = vmatprep.subr.bf16.mxu0 %v2610_v61  ;;  %2808 = vmatpush1.bf16.msra.mxu1 %v2607_v45  ;;  %v10672_v45 = vld [vmem:[#allocation15_spill] sm:$0xff]  ;;  %v2611_v14 = vpack.c.bf16 %v2499_v15, %v2495_v25  ;;  %v2333_v33 = vsel %vm558_vm6, %v10676_v36, %v10675_v2  ;;  %v2258_v37 = vpop.permute.xlu0 %2257  ;;  %v2622_v31 = vpack.c.bf16 %v8102_v21, %v8081_v1  ;;  %v4547_v21 = vld [vmem:[%s10228_s2 + $0x328] sm:$0xff]  ;;  %v10684_v25 = vld [vmem:[#allocation33_spill] sm:$0xff] }
 0x599   : > { %v2330_v35 = vsel %vm558_vm6, %v10670_v4, %v10672_v45  ;;  %v2326_v63 = vsel %vm558_vm6, %v10672_v45, %v10673_v40  ;;  %2809 = vmatprep.subr.bf16.mxu1 %v2612_v51  ;;  %v8225_v38 = vmul.f32 %v4546_v23, %v2334_v5  ;;  %v2325_v46 = vsel %vm558_vm6, %v10674_v6, %v10677_v20  ;;  %v10682_v3 = vld [vmem:[#allocation19_spill] sm:$0xff]  ;;  %v4553_v5 = vld [vmem:[%s10228_s2 + $0x318] sm:$0xff]  ;;  %v10686_v51 = vld [vmem:[#allocation37_spill] sm:$0xff] }
 0x59a   : > { %v2338_v10 = vsel %vm558_vm6, %v10673_v40, %v10671_v55  ;;  %v10678_v13 = vpack.c.bf16 %v7529_v32, %v7537_v59  ;;  %v2623_v1 = vpack.c.bf16 %v8191_v28, %v8175_v34  ;;  %v8243_v61 = vmul.f32 %v4547_v21, %v2330_v35  ;;  %v4548_v59 = vld [vmem:[%s10228_s2 + $0x330] sm:$0xff]  ;;  %v8254_v56 = vpop.permute.xlu1 %2415  ;;  %v4554_v35 = vld [vmem:[%s10228_s2 + $0x380] sm:$0xff]  ;;  %v10707_v28 = vld [vmem:[#allocation68_spill] sm:$0xff] }
 0x59b   : > { %2704 = vmatpush1.bf16.msra.mxu0 %v2609_v11  ;;  %v2337_v29 = vsel %vm558_vm6, %v10677_v20, %v10676_v36  ;;  %v8252_v32 = vmul.f32 %v4548_v59, %v2326_v63  ;;  %v10679_v15 = vpack.c.bf16 %v7543_v41, %v7568_v49  ;;  %v8262_v7 = vmul.f32 %v4549_v12, %v2333_v33  ;;  %v4551_v49 = vld [vmem:[%s10228_s2 + $0x310] sm:$0xff]  ;;  %v10690_v63 = vld [vmem:[#allocation21_spill] sm:$0xff]  ;;  %v4557_v59 = vld [vmem:[%s10228_s2 + $0x2c8] sm:$0xff] }
 0x59c   : > { %2705 = vmatprep.subr.bf16.mxu0 %v10678_v13  ;;  %2810 = vmatpush1.bf16.msra.mxu1 %v2611_v14  ;;  %v8267_v52 = vmul.f32 %v4550_v39, %v2329_v24  ;;  %v2381_v57 = vsel %vm583_vm7, %v10681_v22, %v10680_v47  ;;  %v2624_v41 = vpack.c.bf16 %v8202_v54, %v8180_v42  ;;  %v2274_v4 = vpop.permute.xlu0 %2273  ;;  %v10687_v54 = vld [vmem:[#allocation65_spill] sm:$0xff]  ;;  %v10694_v20 = vld [vmem:[#allocation23_spill] sm:$0xff]  ;;  %v4558_v12 = vld [vmem:[%s10228_s2 + $0x2e8] sm:$0xff] }
 0x59d   : > { %2811 = vmatprep.subr.bf16.mxu1 %v10679_v15  ;;  %v8278_v50 = vmul.f32 %v4551_v49, %v2325_v46  ;;  %v8283_v18 = vmul.f32 %v4552_v43, %v2338_v10  ;;  %v2377_v26 = vsel %vm583_vm7, %v10680_v47, %v10682_v3  ;;  %v2382_v42 = vsel %vm583_vm7, %v10684_v25, %v10683_v17  ;;  %v10691_v6 = vld [vmem:[#allocation69_spill] sm:$0xff]  ;;  %v10695_v10 = vld [vmem:[#allocation51_spill] sm:$0xff]  ;;  %v10697_v47 = vld [vmem:[#allocation70_spill] sm:$0xff] }
 0x59e   : > { %v10685_v30 = vpack.c.bf16 %v7552_v44, %v7577_v27  ;;  %v2629_v55 = vpack.c.bf16 %v8225_v38, %v8262_v7  ;;  %v8301_v11 = vmul.f32 %v4553_v5, %v2337_v29  ;;  %v2283_v62 = vsel %vm533_vm5, %v2258_v37, %v10686_v51  ;;  %v10692_v2 = vld [vmem:[#allocation73_spill] sm:$0xff]  ;;  %v10696_v21 = vld [vmem:[#allocation55_spill] sm:$0xff] }
 0x59f   : > { %v10688_v45 = vpack.c.bf16 %v7560_v58, %v10687_v54  ;;  %v10689_v44 = vpack.c.bf16 %v7595_v16, %v7617_v48  ;;  %v2631_v27 = vpack.c.bf16 %v8252_v32, %v8278_v50  ;;  %v8317_v40 = vmul.f32 %v4554_v35, %v2381_v57  ;;  %v2260_v58 = vpop.permute.xlu1 %2259  ;;  %v4555_v48 = vld [vmem:[%s10228_s2 + $0x388] sm:$0xff]  ;;  %v4556_v33 = vld [vmem:[%s10228_s2 + $0x3a0] sm:$0xff]  ;;  %v10700_v5 = vld [vmem:[#allocation71_spill] sm:$0xff] }
 0x5a0   : > { %2706 = vmatpush1.bf16.msra.mxu0 %v10685_v30  ;;  %v2378_v14 = vsel %vm583_vm7, %v10683_v17, %v10690_v63  ;;  %v10693_v24 = vpack.c.bf16 %v10691_v6, %v10692_v2  ;;  %v2630_v16 = vpack.c.bf16 %v8243_v61, %v8267_v52  ;;  %v8331_v36 = vmul.f32 %v4555_v48, %v2377_v26  ;;  %v10698_v57 = vld [vmem:[#allocation74_spill] sm:$0xff]  ;;  %v2306_v43 = vpop.permute.xlu0 %2305  ;;  %v4563_v48 = vld [vmem:[%s10228_s2 + $0x2d8] sm:$0xff]  ;;  %v4573_v52 = vld [vmem:[%s10228_s2 + $0x340] sm:$0xff] }
 0x5a1   : > { %2707 = vmatprep.subr.bf16.mxu0 %v10688_v45  ;;  %2812 = vmatpush1.bf16.msra.mxu1 %v10689_v44  ;;  %v8336_v23 = vmul.f32 %v4556_v33, %v2382_v42  ;;  %v2284_v46 = vsel %vm533_vm5, %v2260_v58, %v10694_v20  ;;  %v2288_v13 = vsel %vm533_vm5, %v10695_v10, %v2260_v58  ;;  %v10703_v45 = vld [vmem:[#allocation57_spill] sm:$0xff]  ;;  %v4578_v32 = vld [vmem:[%s10228_s2 + $0x3c8] sm:$0xff] }
 0x5a2   : > { %2813 = vmatprep.subr.bf16.mxu1 %v10693_v24  ;;  %v2287_v29 = vsel %vm533_vm5, %v10696_v21, %v2258_v37  ;;  %v2526_v15 = vmul.f32 %v4557_v59, %v2283_v62  ;;  %v2530_v39 = vmul.f32 %v4558_v12, %v2284_v46  ;;  %v10699_v49 = vpack.c.bf16 %v10697_v47, %v10698_v57  ;;  %v4559_v37 = vld [vmem:[%s10228_s2 + $0x3a8] sm:$0xff]  ;;  %v10701_v62 = vld [vmem:[#allocation75_spill] sm:$0xff] }
 0x5a3   : > { %v2632_v26 = vpack.c.bf16 %v8283_v18, %v8301_v11  ;;  %v8361_v17 = vmul.f32 %v4559_v37, %v2378_v14  ;;  %v2279_v42 = vsel %vm533_vm5, %v10686_v51, %v2274_v4  ;;  %v2291_v30 = vsel %vm533_vm5, %v2274_v4, %v10696_v21  ;;  %v4560_v51 = vld [vmem:[%s10228_s2 + $0x2e0] sm:$0xff]  ;;  %v4564_v46 = vld [vmem:[%s10228_s2 + $0x2f0] sm:$0xff]  ;;  %v4575_v11 = vld [vmem:[%s10228_s2 + $0x358] sm:$0xff] }
 0x5a4   : > { %2708 = vmatpush1.bf16.msra.mxu0 %v10699_v49  ;;  %v10702_v54 = vpack.c.bf16 %v10700_v5, %v10701_v62  ;;  %v2373_v44 = vsel %vm583_vm7, %v10682_v3, %v10703_v45  ;;  %v2385_v35 = vsel %vm583_vm7, %v10703_v45, %v10681_v22  ;;  %v2529_v4 = vmul.f32 %v4560_v51, %v2288_v13  ;;  %v4561_v3 = vld [vmem:[%s10228_s2 + $0x2c0] sm:$0xff]  ;;  %v2322_v21 = vpop.permute.xlu0 %2321  ;;  %v4568_v5 = vld [vmem:[%s10228_s2 + $0x348] sm:$0xff] }
 0x5a5   : > { %2709 = vmatprep.subr.bf16.mxu0 %v2622_v31  ;;  %v2276_v31 = vpop.permute.xlu1 %2275  ;;  %v2626_v14 = vpack.c.bf16 %v2530_v39, %v2526_v15  ;;  %v2637_v58 = vpack.c.bf16 %v8336_v23, %v8317_v40  ;;  %v2525_v6 = vmul.f32 %v4561_v3, %v2287_v29  ;;  %v2528_v33 = vmul.f32 %v4563_v48, %v2291_v30  ;;  %v4566_v29 = vld [vmem:[%s10228_s2 + $0x390] sm:$0xff]  ;;  %v10704_v15 = vld [vmem:[#allocation62_spill] sm:$0xff]  ;;  %v10705_v39 = vld [vmem:[#allocation61_spill] sm:$0xff] }
 0x5a6   : > { %2814 = vmatpush1.bf16.msra.mxu1 %v10702_v54  ;;  %v2280_v22 = vsel %vm533_vm5, %v10694_v20, %v2276_v31  ;;  %v2292_v2 = vsel %vm533_vm5, %v2276_v31, %v10695_v10  ;;  %v4565_v20 = vld [vmem:[%s10228_s2 + $0x2f8] sm:$0xff]  ;;  %v8412_v59 = vmul.f32 %v4566_v29, %v2373_v44  ;;  %v2374_v12 = vsel %vm583_vm7, %v10690_v63, %v10704_v15  ;;  %v10708_v30 = vld [vmem:[#allocation38_spill] sm:$0xff] }
 0x5a7   : > { %2815 = vmatprep.subr.bf16.mxu1 %v2624_v41  ;;  %v4562_v41 = vld [vmem:[%s10228_s2 + $0x2d0] sm:$0xff]  ;;  %v2531_v13 = vmul.f32 %v4564_v46, %v2280_v22  ;;  %v2532_v10 = vmul.f32 %v4565_v20, %v2292_v2  ;;  %v2331_v47 = vsel %vm558_vm6, %v2306_v43, %v10705_v39  ;;  %v2386_v60 = vsel %vm583_vm7, %v10704_v15, %v10684_v25  ;;  %v4567_v63 = vld [vmem:[%s10228_s2 + $0x398] sm:$0xff]  ;;  %v10709_v3 = vld [vmem:[#allocation58_spill] sm:$0xff] }
 0x5a8   : > { %v2527_v24 = vmul.f32 %v4562_v41, %v2279_v42  ;;  %2710 = vmatpush1.bf16.msra.mxu0 %v2621_v53  ;;  %v2625_v0 = vpack.c.bf16 %v2529_v4, %v2525_v6  ;;  %v8431_v37 = vmul.f32 %v4567_v63, %v2385_v35  ;;  %v10706_v42 = vld [vmem:[#allocation66_spill] sm:$0xff]  ;;  %v2542_v62 = vmul.f32 %v4568_v5, %v2331_v47  ;;  %v2354_v44 = vpop.permute.xlu0 %2353  ;;  %v4570_v35 = vld [vmem:[%s10228_s2 + $0x3b0] sm:$0xff]  ;;  %v4571_v4 = vld [vmem:[%s10228_s2 + $0x3b8] sm:$0xff] }
 0x5a9   : > { %2711 = vmatprep.subr.bf16.mxu0 %v2626_v14  ;;  %v2308_v57 = vpop.permute.xlu1 %2307  ;;  %v2628_v49 = vpack.c.bf16 %v2532_v10, %v2528_v33  ;;  %v2335_v34 = vsel %vm558_vm6, %v10706_v42, %v2306_v43  ;;  %v2327_v54 = vsel %vm558_vm6, %v10705_v39, %v2322_v21  ;;  %v4569_v43 = vld [vmem:[%s10228_s2 + $0x368] sm:$0xff]  ;;  %v8454_v51 = vmul.f32 %v4570_v35, %v2374_v12  ;;  %v4572_v2 = vld [vmem:[%s10228_s2 + $0x360] sm:$0xff]  ;;  %v4574_v33 = vld [vmem:[%s10228_s2 + $0x350] sm:$0xff] }
 0x5aa   : > { %2816 = vmatpush1.bf16.msra.mxu1 %v2623_v1  ;;  %v2627_v53 = vpack.c.bf16 %v2531_v13, %v2527_v24  ;;  %v2332_v1 = vsel %vm558_vm6, %v2308_v57, %v10707_v28  ;;  %v2336_v25 = vsel %vm558_vm6, %v10708_v30, %v2308_v57  ;;  %v2556_v31 = vmul.f32 %v4571_v4, %v2386_v60  ;;  %v10710_v6 = vld [vmem:[#allocation34_spill] sm:$0xff]  ;;  %v4576_v20 = vld [vmem:[%s10228_s2 + $0x370] sm:$0xff]  ;;  %v10713_v47 = vld [vmem:[#allocation20_spill] sm:$0xff] }
 0x5ab   : > { %v2546_v45 = vmul.f32 %v4569_v43, %v2332_v1  ;;  %2817 = vmatprep.subr.bf16.mxu1 %v2628_v49  ;;  %v2339_v14 = vsel %vm558_vm6, %v2322_v21, %v10706_v42  ;;  %v8469_v22 = vsel %vm608_vm8, %v10710_v6, %v10709_v3  ;;  %v2545_v41 = vmul.f32 %v4572_v2, %v2336_v25  ;;  %v4577_v21 = vld [vmem:[%s10228_s2 + $0x378] sm:$0xff]  ;;  %v10712_v39 = vld [vmem:[#allocation63_spill] sm:$0xff]  ;;  %v4579_v1 = vld [vmem:[%s10228_s2 + $0x3e8] sm:$0xff] }
 0x5ac   : > { %2712 = vmatpush1.bf16.msra.mxu0 %v2625_v0  ;;  %v2638_v61 = vpack.c.bf16 %v8361_v17, %v8331_v36  ;;  %v2543_v46 = vmul.f32 %v4574_v33, %v2327_v54  ;;  %v2544_v36 = vmul.f32 %v4575_v11, %v2339_v14  ;;  %v2370_v15 = vpop.permute.xlu0 %2369  ;;  %v2639_v12 = vpack.c.bf16 %v8454_v51, %v8412_v59  ;;  %v10714_v57 = vld [vmem:[#allocation72_spill] sm:$0xff]  ;;  %v4582_v51 = vld [vmem:[%s10228_s2 + $0x3e0] sm:$0xff]  ;;  %v4586_v33 = vld [vmem:[%s10228_s2 + $0x3f0] sm:$0xff] }
 0x5ad   : > { %2713 = vmatprep.subr.bf16.mxu0 %v2630_v16  ;;  %v2324_v24 = vpop.permute.xlu1 %2323  ;;  %v2634_v48 = vpack.c.bf16 %v2546_v45, %v2542_v62  ;;  %v2541_v16 = vmul.f32 %v4573_v52, %v2335_v34  ;;  %v2430_v60 = vsel %vm608_vm8, %v10713_v47, %v10712_v39  ;;  %v2640_v0 = vpack.c.bf16 %v2556_v31, %v8431_v37  ;;  %v10716_v37 = vld [vmem:[#allocation76_spill] sm:$0xff]  ;;  %v4580_v62 = vld [vmem:[%s10228_s2 + $0x428] sm:$0xff]  ;;  %v4588_v11 = vld [vmem:[%s10228_s2 + $0x420] sm:$0xff] }
 0x5ae   : > { %2818 = vmatpush1.bf16.msra.mxu1 %v2627_v53  ;;  %v2328_v13 = vsel %vm558_vm6, %v10707_v28, %v2324_v24  ;;  %v2340_v18 = vsel %vm558_vm6, %v2324_v24, %v10708_v30  ;;  %v2426_v38 = vsel %vm608_vm8, %v10712_v39, %v8197_v19  ;;  %v2383_v49 = vsel %vm583_vm7, %v10714_v57, %v2354_v44  ;;  %v4584_v2 = vld [vmem:[%s10228_s2 + $0x3d8] sm:$0xff] }
 0x5af   : > { %2819 = vmatprep.subr.bf16.mxu1 %v2632_v26  ;;  %v10711_v26 = vld [vmem:[#allocation77_spill] sm:$0xff]  ;;  %v2547_v10 = vmul.f32 %v4576_v20, %v2328_v13  ;;  %v2548_v29 = vmul.f32 %v4577_v21, %v2340_v18  ;;  %v2633_v7 = vpack.c.bf16 %v2545_v41, %v2541_v16  ;;  %v2387_v28 = vsel %vm583_vm7, %v2370_v15, %v10714_v57  ;;  %v4585_v52 = vld [vmem:[%s10228_s2 + $0x418] sm:$0xff] }
 0x5b0   : > { %v2379_v17 = vsel %vm583_vm7, %v2354_v44, %v10711_v26  ;;  %2714 = vmatpush1.bf16.msra.mxu0 %v2629_v55  ;;  %v2375_v34 = vsel %vm583_vm7, %v10711_v26, %v2370_v15  ;;  %v2414_v25 = vpop.permute.xlu0 %2413  ;;  %v2425_v5 = vsel %vm608_vm8, %v10709_v3, %v8170_v8  ;;  %v2570_v54 = vmul.f32 %v4580_v62, %v2426_v38  ;;  %v4581_v44 = vld [vmem:[%s10228_s2 + $0x3c0] sm:$0xff]  ;;  %v4583_v3 = vld [vmem:[%s10228_s2 + $0x3d0] sm:$0xff]  ;;  %v4587_v13 = vld [vmem:[%s10228_s2 + $0x3f8] sm:$0xff] }
 0x5b1   : > { %2715 = vmatprep.subr.bf16.mxu0 %v2634_v48  ;;  %v2635_v55 = vpack.c.bf16 %v2547_v10, %v2543_v46  ;;  %v2356_v59 = vpop.permute.xlu1 %2355  ;;  %v2636_v53 = vpack.c.bf16 %v2548_v29, %v2544_v36  ;;  %v2558_v50 = vmul.f32 %v4578_v32, %v2379_v17  ;;  %v2433_v43 = vsel %vm608_vm8, %v2414_v25, %v10710_v6  ;;  %v4589_v26 = vld [vmem:[%s10228_s2 + $0x408] sm:$0xff]  ;;  %v4590_v40 = vld [vmem:[%s10228_s2 + $0x438] sm:$0xff]  ;;  %v4591_v15 = vld [vmem:[%s10228_s2 + $0x410] sm:$0xff] }
 0x5b2   : > { %2820 = vmatpush1.bf16.msra.mxu1 %v2631_v27  ;;  %v10715_v27 = vld [vmem:[#allocation78_spill] sm:$0xff]  ;;  %v2384_v42 = vsel %vm583_vm7, %v10716_v37, %v2356_v59  ;;  %v2434_v45 = vsel %vm608_vm8, %v8254_v56, %v10713_v47  ;;  %v2557_v35 = vmul.f32 %v4581_v44, %v2383_v49  ;;  %v2559_v6 = vmul.f32 %v4583_v3, %v2375_v34  ;;  %v4593_v38 = vld [vmem:[%s10228_s2 + $0x430] sm:$0xff] }
 0x5b3   : > { %v2380_v63 = vsel %vm583_vm7, %v2356_v59, %v10715_v27  ;;  %2821 = vmatprep.subr.bf16.mxu1 %v2636_v53  ;;  %v2561_v4 = vmul.f32 %v4582_v51, %v2384_v42  ;;  %v2560_v41 = vmul.f32 %v4584_v2, %v2387_v28  ;;  %v2568_v16 = vmul.f32 %v4585_v52, %v2433_v43  ;;  %v4594_v42 = vld [vmem:[%s10228_s2 + $0x440] sm:$0xff]  ;;  %v4595_v28 = vld [vmem:[%s10228_s2 + $0x448] sm:$0xff] }
 0x5b4   : > { %v2562_v30 = vmul.f32 %v4579_v1, %v2380_v63  ;;  %2716 = vmatpush1.bf16.msra.mxu0 %v2633_v7  ;;  %v2569_v36 = vmul.f32 %v4588_v11, %v2430_v60  ;;  %v2566_v17 = vmul.f32 %v4589_v26, %v2425_v5  ;;  %v2422_v20 = vsel %vm608_vm8, %v8197_v19, %v8254_v56  ;;  %v4422_v60 = vld [vmem:[%s5105_s19] ss:$12 sps:$4 sm:$0xff]  }
 0x5b5   : > { %2717 = vmatprep.subr.bf16.mxu0 %v2638_v61  ;;  %v2372_v31 = vpop.permute.xlu1 %2371  ;;  %v2421_v61 = vsel %vm608_vm8, %v8170_v8, %v2414_v25  ;;  %v2394_v8 = vpop.permute.xlu0 %2393  ;;  %v2572_v23 = vmul.f32 %v4590_v40, %v2434_v45  ;;  %v4592_v19 = vld [vmem:[%s10228_s2 + $0x400] sm:$0xff]  ;;  %v2571_v7 = vmul.f32 %v4593_v38, %v2422_v20  ;;  %v4597_v5 = vld [vmem:[%s10228_s2 + $0x468] sm:$0xff]  ;;  %v10717_v52 = vmov 0  }
 0x5b6   : > { %2822 = vmatpush1.bf16.msra.mxu1 %v2635_v55  ;;  %v2642_v14 = vpack.c.bf16 %v2562_v30, %v2558_v50  ;;  %v2376_v24 = vsel %vm583_vm7, %v10715_v27, %v2372_v31  ;;  %v2388_v48 = vsel %vm583_vm7, %v2372_v31, %v10716_v37  ;;  %v2567_v39 = vmul.f32 %v4591_v15, %v2421_v61  ;;  %v4425_v55 = vld [vmem:[%s5105_s19 + $0x1c] ss:$12 sps:$4 sm:$0xff]   ;;  %v4427_v37 = vld [vmem:[%s5105_s19 + $0x18] ss:$12 sps:$4 sm:$0xff]  }
 0x5b7   : > { %2823 = vmatprep.subr.bf16.mxu1 %v2640_v0  ;;  %v2563_v46 = vmul.f32 %v4586_v33, %v2376_v24  ;;  %v2564_v18 = vmul.f32 %v4587_v13, %v2388_v48  ;;  %v2646_v47 = vpack.c.bf16 %v2570_v54, %v2566_v17  ;;  %v2565_v56 = vmul.f32 %v4592_v19, %v8469_v22  ;;  %v4596_v30 = vld [vmem:[%s10228_s2 + $0x460] sm:$0xff]  ;;  %v4601_v48 = vld [vmem:[%s10228_s2 + $0x478] sm:$0xff] }
 0x5b8   : > { %2718 = vmatpush1.bf16.msra.mxu0 %v2637_v58  ;;  %v2641_v58 = vpack.c.bf16 %v2561_v4, %v2557_v35  ;;  %v2648_v0 = vpack.c.bf16 %v2572_v23, %v2568_v16  ;;  %v2647_v57 = vpack.c.bf16 %v2571_v7, %v2567_v39  ;;  %v4598_v4 = vld [vmem:[%s10228_s2 + $0x450] sm:$0xff]  ;;  %v4429_v13 = vld [vmem:[%s5105_s19 + $0x20] ss:$12 sps:$4 sm:$0xff]  }
 0x5b9   : > { %2719 = vmatprep.subr.bf16.mxu0 %v2642_v14  ;;  %v2643_v10 = vpack.c.bf16 %v2563_v46, %v2559_v6  ;;  %v2396_v21 = vpop.permute.xlu1 %2395  ;;  %v2644_v29 = vpack.c.bf16 %v2564_v18, %v2560_v41  ;;  %v2645_v59 = vpack.c.bf16 %v2569_v36, %v2565_v56  ;;  %v4599_v6 = vld [vmem:[%s10228_s2 + $0x458] sm:$0xff]  ;;  %v4600_v41 = vld [vmem:[%s10228_s2 + $0x470] sm:$0xff]  ;;  %v10718_v11 = vld [vmem:[#allocation5_spill] sm:$0xff] }
 0x5ba   : > { %2824 = vmatpush1.bf16.msra.mxu1 %v2639_v12  ;;  %v2402_v12 = vpop.permute.xlu0 %2401  ;;  %v4428_v46 = vld [vmem:[%s5105_s19 + $0x8] ss:$12 sps:$4 sm:$0xff]   ;;  %v4602_v18 = vld [vmem:[%s5091_s16 + $0x4] ss:$12 sps:$4 sm:$0xff]   ;;  %s10724_s19 = smov 127  }
 0x5bb   : > { %2825 = vmatprep.subr.bf16.mxu1 %v2644_v29  ;;  %v2431_v49 = vsel %vm608_vm8, %v2394_v8, %v2402_v12 }
 0x5bc   : > { %2720 = vmatpush1.bf16.msra.mxu0 %v2641_v58  ;;  %v2573_v34 = vmul.f32 %v4594_v42, %v2431_v49 }
 0x5bd   : > { %2742 = vmatprep.subr.bf16.mxu0 %v2646_v47  ;;  %v2412_v53 = vpop.permute.xlu1 %2411 }
 0x5be   : > { %2826 = vmatpush1.bf16.msra.mxu1 %v2643_v10  ;;  %v2410_v22 = vpop.permute.xlu0 %2409  ;;  %v10719_v10 = vld [vmem:[#allocation6_spill] sm:$0xff] }
 0x5bf   : > { %2848 = vmatprep.subr.bf16.mxu1 %v2648_v0  ;;  %2722 = vmatmul.mubr.bf16.vlgmr.msra.gmra.mrb[16].mxu0 %v4422_v60  ;;  %v2427_v32 = vsel %vm608_vm8, %v2402_v12, %v2410_v22 }
 0x5c0   : > { %2743 = vmatpush1.bf16.msra.mxu0 %v2645_v59  ;;  %2731 = vmatprep.mubr.bf16.mxu0 %v4425_v55  ;;  %v2574_v1 = vmul.f32 %v4595_v28, %v2427_v32 }
 0x5c1   : > { %2828 = vmatmul.mubr.bf16.vlgmr.msra.gmra.mrb[16].mxu1 %v4422_v60  ;;  %v2404_v50 = vpop.permute.xlu1 %2403 }
 0x5c2   : > { %2849 = vmatpush1.bf16.msra.mxu1 %v2647_v57  ;;  %2837 = vmatprep.mubr.bf16.mxu1 %v4425_v55  ;;  %v2428_v27 = vsel %vm608_vm8, %v2404_v50, %v2412_v53  ;;  %v2432_v63 = vsel %vm608_vm8, %v2396_v21, %v2404_v50  ;;  %v2418_v54 = vpop.permute.xlu0 %2417 }
 0x5c3   : > { %v2577_v25 = vmul.f32 %v4596_v30, %v2432_v63  ;;  %v2578_v62 = vmul.f32 %v4597_v5, %v2428_v27  ;;  %v2423_v43 = vsel %vm608_vm8, %v2410_v22, %v2418_v54  ;;  %v2435_v45 = vsel %vm608_vm8, %v2418_v54, %v2394_v8  ;;  %v10720_v27 = vld [vmem:[#allocation24_spill] sm:$0xff] }
 0x5c4   : > { %v2575_v31 = vmul.f32 %v4598_v4, %v2423_v43  ;;  %v2576_v2 = vmul.f32 %v4599_v6, %v2435_v45  ;;  %v10725_v4 = vld [vmem:[#allocation9_spill] sm:$0xff] }
 0x5c5   : > { %v2649_v44 = vpack.c.bf16 %v2577_v25, %v2573_v34  ;;  %v2420_v35 = vpop.permute.xlu1 %2419  ;;  %v2650_v51 = vpack.c.bf16 %v2578_v62, %v2574_v1 }
 0x5c6   : > { %v2424_v14 = vsel %vm608_vm8, %v2412_v53, %v2420_v35  ;;  %v2436_v3 = vsel %vm608_vm8, %v2420_v35, %v2396_v21 }
 0x5c7   : > { %2732 = vmatmul.mubr.bf16.gmra.mrb[20].mxu0 %v4427_v37  ;;  %v2579_v24 = vmul.f32 %v4600_v41, %v2424_v14  ;;  %v2580_v61 = vmul.f32 %v4601_v48, %v2436_v3  ;;  %2744 = vmatprep.subr.bf16.mxu0 %v2650_v51  ;;  %v10726_v14 = vld [vmem:[#allocation10_spill] sm:$0xff] }
 0x5c8   : > { %2745 = vmatpush1.bf16.msra.mxu0 %v2649_v44  ;;  %2774 = vmatprep.mubr.bf16.mxu0 %v10717_v52 }
 0x5c9   : > { %2838 = vmatmul.mubr.bf16.gmra.mrb[20].mxu1 %v4427_v37  ;;  %v2651_v16 = vpack.c.bf16 %v2579_v24, %v2575_v31  ;;  %v2652_v33 = vpack.c.bf16 %v2580_v61, %v2576_v2  ;;  %v10722_v37 = vld [vmem:[#allocation67_spill] sm:$0xff] }
 0x5ca   : > { %2880 = vmatprep.mubr.bf16.mxu1 %v10717_v52 }
 0x5cb   : > { %2850 = vmatprep.subr.bf16.mxu1 %v2652_v33 }
 0x5cc   : > { %2851 = vmatpush1.bf16.msra.mxu1 %v2651_v16 }
 0x5cf   : > { %4236 = vmatmul.mubr.msk.bf16.vlgmr.msra.gmra.mrb[16].mxu0 %vm1778_vm9, %v4428_v46 }
 0x5d0   : > { %2784 = vmatprep.mubr.bf16.mxu0 %v10717_v52 }
 0x5d1   : > { %4238 = vmatmul.mubr.msk.bf16.vlgmr.msra.gmra.mrb[16].mxu1 %vm1778_vm9, %v4428_v46 }
 0x5d2   : > { %2890 = vmatprep.mubr.bf16.mxu1 %v10717_v52  ;;  %v4636_v52 = vld [vmem:[%s10228_s2 + $0x288] sm:$0xff] }
 0x5d7   : > { %4237 = vmatmul.mubr.msk.bf16.gmra.mrb[20].mxu0 %vm1778_vm9, %v4429_v13 }
 0x5d8   : > { %3565 = vmatprep.mubr.bf16.mxu0 %v4602_v18 }
 0x5d9   : > { %4239 = vmatmul.mubr.msk.bf16.gmra.mrb[20].mxu1 %vm1778_vm9, %v4429_v13 }
 0x5da   : > { %3671 = vmatprep.mubr.bf16.mxu1 %v4602_v18 }
 0x6a2   : > { %v2776_v8 = vpop.f32.mrb[16].mxu0 }
 0x6a3   : > { %v4284_v36 = vadd.f32 %v2776_v8, %v10718_v11  ;;  %v2778_v26 = vpop.f32.mrb[17].mxu0 }
 0x6a4   : > { %v2882_v17 = vpop.f32.mrb[16].mxu1  ;;  %v2780_v40 = vpop.f32.mrb[18].mxu0  ;;  %v4285_v28 = vadd.f32 %v2778_v26, %v10718_v11 }
 0x6a5   : > { %v4292_v20 = vadd.f32 %v2882_v17, %v10718_v11  ;;  %v2884_v23 = vpop.f32.mrb[17].mxu1  ;;  %v2901_v58 = vmul.f32 0.1, %v4284_v36  ;;  %v4286_v21 = vadd.f32 %v2780_v40, %v10719_v10  ;;  %v2782_v29 = vpop.f32.mrb[19].mxu0 }
 0x6a6   : > { %v2886_v15 = vpop.f32.mrb[18].mxu1  ;;  %v4287_v1 = vadd.f32 %v2782_v29, %v10719_v10  ;;  %v2902_v30 = vmul.f32 0.1, %v4285_v28  ;;  %v4293_v25 = vadd.f32 %v2884_v23, %v10718_v11 }
 0x6a7   : > { %v4294_v39 = vadd.f32 %v2886_v15, %v10719_v10  ;;  %v2888_v47 = vpop.f32.mrb[19].mxu1  ;;  %v2917_v60 = vmax.f32 %v4284_v36, %v2901_v58  ;;  %v2903_v19 = vmul.f32 0.1, %v4292_v20  ;;  %v2905_v56 = vmul.f32 0.1, %v4286_v21 }
 0x6a8   : > { %v2906_v5 = vmul.f32 0.1, %v4287_v1  ;;  %v4295_v62 = vadd.f32 %v2888_v47, %v10719_v10  ;;  %v8744_v54 = vmax.f32 %v4285_v28, %v2902_v30  ;;  %v2904_v43 = vmul.f32 0.1, %v4293_v25 }
 0x6a9   : > { %v2921_v12 = vmax.f32 %v4286_v21, %v2905_v56  ;;  %v2907_v0 = vmul.f32 0.1, %v4294_v39  ;;  %2933 = vrot.lane.b32.xlu0 %v2917_v60, %s4810_s29  ;;  %v8672_v7 = vmax.f32 %v4292_v20, %v2903_v19  ;;  %v8699_v42 = vmul.f32 %v10722_v37, %v2917_v60 }
 0x6aa   : > { %v8670_v38 = vpop.f32.mrb[20].mxu0  ;;  %v8747_v45 = vmax.f32 %v4287_v1, %v2906_v5  ;;  %v2908_v44 = vmul.f32 0.1, %v4295_v62  ;;  %v8751_v35 = vmax.f32 %v4293_v25, %v2904_v43 }
 0x6ab   : > { %v8674_v55 = vpop.f32.mrb[21].mxu0  ;;  %2935 = vrot.lane.b32.xlu1 %v2921_v12, %s4810_s29  ;;  %v8683_v22 = vmax.f32 %v4294_v39, %v2907_v0  ;;  %v8694_v63 = vmul.f32 %v10720_v27, %v2921_v12  ;;  %10723 = vst [vmem:[#allocation18_spill] sm:$0xff] %v8699_v42  ;;  %v4288_v31 = vadd.f32 %v8670_v38, %v10725_v4 }
 0x6ac   : > { %v8677_v59 = vpop.f32.mrb[20].mxu1  ;;  %v8679_v53 = vpop.f32.mrb[22].mxu0  ;;  %v8755_v51 = vmax.f32 %v4295_v62, %v2908_v44  ;;  %v4289_v37 = vadd.f32 %v8674_v55, %v10725_v4 }
 0x6ad   : > { %v8681_v57 = vpop.f32.mrb[21].mxu1  ;;  %v8685_v49 = vpop.f32.mrb[23].mxu0  ;;  %2949 = vrot.lane.b32.xlu0 %v8672_v7, %s4810_s29  ;;  %10721 = vst [vmem:[#allocation35_spill] sm:$0xff] %v8694_v63  ;;  %v4290_v3 = vadd.f32 %v8679_v53, %v10726_v14  ;;  %v2909_v6 = vmul.f32 0.1, %v4288_v31  ;;  %v4296_v2 = vadd.f32 %v8677_v59, %v10725_v4 }
 0x6ae   : > { %v8687_v32 = vpop.f32.mrb[22].mxu1  ;;  %v4291_v1 = vadd.f32 %v8685_v49, %v10726_v14  ;;  %v2910_v25 = vmul.f32 0.1, %v4289_v37  ;;  %v4297_v5 = vadd.f32 %v8681_v57, %v10725_v4 }
 0x6af   : > { %v8691_v50 = vpop.f32.mrb[23].mxu1  ;;  %2951 = vrot.lane.b32.xlu1 %v8683_v22, %s4810_s29  ;;  %v2913_v24 = vmul.f32 0.1, %v4290_v3  ;;  %v4298_v48 = vadd.f32 %v8687_v32, %v10726_v14  ;;  %v8823_v16 = vmax.f32 %v4288_v31, %v2909_v6  ;;  %v2911_v33 = vmul.f32 0.1, %v4296_v2 }
 0x6b0   : > { %v2914_v62 = vmul.f32 0.1, %v4291_v1  ;;  %v4299_v43 = vadd.f32 %v8691_v50, %v10726_v14  ;;  %v8951_v49 = vmax.f32 %v4289_v37, %v2910_v25  ;;  %v2912_v31 = vmul.f32 0.1, %v4297_v5 }
 0x6b1   : > { %2981 = vrot.lane.b32.xlu0 %v2917_v60, %s4811_s20  ;;  %10727 = vst [vmem:[#allocation59_spill] sm:$0xff] %v8823_v16  ;;  %v8829_v13 = vmax.f32 %v4290_v3, %v2913_v24  ;;  %v2915_v18 = vmul.f32 0.1, %v4298_v48  ;;  %v8835_v11 = vmax.f32 %v4296_v2, %v2911_v33  ;;  %v4603_v24 = vld [vmem:[%s10228_s2 + $0x8] sm:$0xff] }
 0x6b2   : > { %v8958_v3 = vmax.f32 %v4291_v1, %v2914_v62  ;;  %v2916_v6 = vmul.f32 0.1, %v4299_v43  ;;  %v8965_v2 = vmax.f32 %v4297_v5, %v2912_v31 }
 0x6b3   : > { %2983 = vrot.lane.b32.xlu1 %v2921_v12, %s4811_s20  ;;  %10728 = vst [vmem:[#allocation16_spill] sm:$0xff] %v8829_v13  ;;  %10729 = vst [vmem:[#allocation36_spill] sm:$0xff] %v8835_v11  ;;  %v8841_v26 = vmax.f32 %v4298_v48, %v2915_v18  ;;  %v4604_v18 = vld [vmem:[%s10228_s2 + $0x28] sm:$0xff] }
 0x6b4   : > { %10733 = vst [vmem:[#allocation54_spill] sm:$0xff] %v8965_v2  ;;  %v8984_v62 = vmax.f32 %v4299_v43, %v2916_v6 }
 0x6b5   : > { %2997 = vrot.lane.b32.xlu0 %v8672_v7, %s4811_s20  ;;  %10730 = vst [vmem:[#allocation53_spill] sm:$0xff] %v8841_v26 }
 0x6b7   : > { %2999 = vrot.lane.b32.xlu1 %v8683_v22, %s4811_s20 }
 0x6b9   : > { %3029 = vrot.lane.b32.xlu0 %v2917_v60, %s4812_s21 }
 0x6bb   : > { %3031 = vrot.lane.b32.xlu1 %v2921_v12, %s4812_s21 }
 0x6bd   : > { %3045 = vrot.lane.b32.xlu0 %v8672_v7, %s4812_s21 }
 0x6bf   : > { %3047 = vrot.lane.b32.xlu1 %v8683_v22, %s4812_s21 }
 0x6c1   : > { %3077 = vrot.lane.b32.xlu0 %v2917_v60, %s4813_s22 }
 0x6c3   : > { %3079 = vrot.lane.b32.xlu1 %v2921_v12, %s4813_s22 }
 0x6c5   : > { %3093 = vrot.lane.b32.xlu0 %v8672_v7, %s4813_s22 }
 0x6c7   : > { %3095 = vrot.lane.b32.xlu1 %v8683_v22, %s4813_s22 }
 0x6c9   : > { %3125 = vrot.lane.b32.xlu0 %v2917_v60, %s10724_s19 }
 0x6cb   : > { %3127 = vrot.lane.b32.xlu1 %v2921_v12, %s10724_s19 }
 0x6cd   : > { %3141 = vrot.lane.b32.xlu0 %v8672_v7, %s10724_s19 }
 0x6cf   : > { %3143 = vrot.lane.b32.xlu1 %v8683_v22, %s10724_s19 }
 0x6d1   : > { %3173 = vrot.lane.b32.xlu0 %v2917_v60, %s10586_s24 }
 0x6d3   : > { %3175 = vrot.lane.b32.xlu1 %v2921_v12, %s10586_s24 }
 0x6d5   : > { %3189 = vrot.lane.b32.xlu0 %v8672_v7, %s10586_s24 }
 0x6d7   : > { %3191 = vrot.lane.b32.xlu1 %v8683_v22, %s10586_s24 }
 0x6d9   : > { %3221 = vrot.lane.b32.xlu0 %v2917_v60, %s10587_s25 }
 0x6db   : > { %3223 = vrot.lane.b32.xlu1 %v2921_v12, %s10587_s25 }
 0x6dd   : > { %3237 = vrot.lane.b32.xlu0 %v8672_v7, %s10587_s25 }
 0x6df   : > { %3239 = vrot.lane.b32.xlu1 %v8683_v22, %s10587_s25 }
 0x6e1   : > { %3269 = vrot.lane.b32.xlu0 %v2917_v60, %s10588_s18 }
 0x6e3   : > { %3271 = vrot.lane.b32.xlu1 %v2921_v12, %s10588_s18 }
 0x6e5   : > { %2941 = vrot.lane.b32.xlu0 %v8744_v54, %s4810_s29 }
 0x6e7   : > { %2943 = vrot.lane.b32.xlu1 %v8747_v45, %s4810_s29 }
 0x6e9   : > { %2957 = vrot.lane.b32.xlu0 %v8751_v35, %s4810_s29 }
 0x6eb   : > { %2959 = vrot.lane.b32.xlu1 %v8755_v51, %s4810_s29 }
 0x6ed   : > { %2989 = vrot.lane.b32.xlu0 %v8744_v54, %s4811_s20 }
 0x6ef   : > { %2991 = vrot.lane.b32.xlu1 %v8747_v45, %s4811_s20 }
 0x6f1   : > { %3005 = vrot.lane.b32.xlu0 %v8751_v35, %s4811_s20 }
 0x6f3   : > { %3007 = vrot.lane.b32.xlu1 %v8755_v51, %s4811_s20 }
 0x6f5   : > { %3037 = vrot.lane.b32.xlu0 %v8744_v54, %s4812_s21 }
 0x6f7   : > { %3039 = vrot.lane.b32.xlu1 %v8747_v45, %s4812_s21 }
 0x6f9   : > { %3053 = vrot.lane.b32.xlu0 %v8751_v35, %s4812_s21 }
 0x6fb   : > { %3055 = vrot.lane.b32.xlu1 %v8755_v51, %s4812_s21 }
 0x6fd   : > { %3085 = vrot.lane.b32.xlu0 %v8744_v54, %s4813_s22 }
 0x6ff   : > { %3087 = vrot.lane.b32.xlu1 %v8747_v45, %s4813_s22 }
 0x701   : > { %3101 = vrot.lane.b32.xlu0 %v8751_v35, %s4813_s22 }
 0x703   : > { %3103 = vrot.lane.b32.xlu1 %v8755_v51, %s4813_s22 }
 0x705   : > { %3133 = vrot.lane.b32.xlu0 %v8744_v54, %s10724_s19 }
 0x707   : > { %3135 = vrot.lane.b32.xlu1 %v8747_v45, %s10724_s19 }
 0x709   : > { %3149 = vrot.lane.b32.xlu0 %v8751_v35, %s10724_s19 }
 0x70b   : > { %3151 = vrot.lane.b32.xlu1 %v8755_v51, %s10724_s19 }
 0x70d   : > { %3181 = vrot.lane.b32.xlu0 %v8744_v54, %s10586_s24 }
 0x70f   : > { %3183 = vrot.lane.b32.xlu1 %v8747_v45, %s10586_s24 }
 0x711   : > { %3197 = vrot.lane.b32.xlu0 %v8751_v35, %s10586_s24 }
 0x713   : > { %3199 = vrot.lane.b32.xlu1 %v8755_v51, %s10586_s24 }
 0x715   : > { %3229 = vrot.lane.b32.xlu0 %v8744_v54, %s10587_s25 }
 0x717   : > { %3231 = vrot.lane.b32.xlu1 %v8747_v45, %s10587_s25 }
 0x719   : > { %3245 = vrot.lane.b32.xlu0 %v8751_v35, %s10587_s25 }
 0x71b   : > { %3247 = vrot.lane.b32.xlu1 %v8755_v51, %s10587_s25  ;;  %v8815_v41 = vpop.permute.xlu0 %2933 }
 0x71d   : > { %v8819_v61 = vpop.permute.xlu1 %2935  ;;  %3277 = vrot.lane.b32.xlu0 %v8744_v54, %s10588_s18 }
 0x71f   : > { %3279 = vrot.lane.b32.xlu1 %v8747_v45, %s10588_s18  ;;  %v8827_v46 = vpop.permute.xlu0 %2949 }
 0x721   : > { %v8831_v8 = vpop.permute.xlu1 %2951  ;;  %2937 = vrot.lane.b32.xlu0 %v8823_v16, %s4810_s29 }
 0x723   : > { %2939 = vrot.lane.b32.xlu1 %v8829_v13, %s4810_s29  ;;  %v8839_v36 = vpop.permute.xlu0 %2981 }
 0x725   : > { %v8843_v17 = vpop.permute.xlu1 %2983  ;;  %2953 = vrot.lane.b32.xlu0 %v8835_v11, %s4810_s29 }
 0x727   : > { %2955 = vrot.lane.b32.xlu1 %v8841_v26, %s4810_s29  ;;  %v8849_v20 = vpop.permute.xlu0 %2997 }
 0x729   : > { %v8851_v40 = vpop.permute.xlu1 %2999  ;;  %2985 = vrot.lane.b32.xlu0 %v8823_v16, %s4811_s20 }
 0x72b   : > { %2987 = vrot.lane.b32.xlu1 %v8829_v13, %s4811_s20  ;;  %v8857_v23 = vpop.permute.xlu0 %3029 }
 0x72d   : > { %v8859_v58 = vpop.permute.xlu1 %3031  ;;  %3001 = vrot.lane.b32.xlu0 %v8835_v11, %s4811_s20 }
 0x72f   : > { %3003 = vrot.lane.b32.xlu1 %v8841_v26, %s4811_s20  ;;  %v8865_v10 = vpop.permute.xlu0 %3045 }
 0x731   : > { %v8867_v21 = vpop.permute.xlu1 %3047  ;;  %3033 = vrot.lane.b32.xlu0 %v8823_v16, %s4812_s21 }
 0x733   : > { %3035 = vrot.lane.b32.xlu1 %v8829_v13, %s4812_s21  ;;  %v8873_v29 = vpop.permute.xlu0 %3077 }
 0x735   : > { %v8875_v15 = vpop.permute.xlu1 %3079  ;;  %3049 = vrot.lane.b32.xlu0 %v8835_v11, %s4812_s21 }
 0x737   : > { %3051 = vrot.lane.b32.xlu1 %v8841_v26, %s4812_s21  ;;  %v8881_v39 = vpop.permute.xlu0 %3093 }
 0x739   : > { %v8883_v47 = vpop.permute.xlu1 %3095  ;;  %3081 = vrot.lane.b32.xlu0 %v8823_v16, %s4813_s22 }
 0x73b   : > { %3083 = vrot.lane.b32.xlu1 %v8829_v13, %s4813_s22  ;;  %v8889_v60 = vpop.permute.xlu0 %3125 }
 0x73d   : > { %v8891_v19 = vpop.permute.xlu1 %3127  ;;  %3097 = vrot.lane.b32.xlu0 %v8835_v11, %s4813_s22 }
 0x73f   : > { %3099 = vrot.lane.b32.xlu1 %v8841_v26, %s4813_s22  ;;  %v8897_v56 = vpop.permute.xlu0 %3141 }
 0x741   : > { %v8899_v12 = vpop.permute.xlu1 %3143  ;;  %3129 = vrot.lane.b32.xlu0 %v8823_v16, %s10724_s19 }
 0x743   : > { %3131 = vrot.lane.b32.xlu1 %v8829_v13, %s10724_s19  ;;  %v8905_v0 = vpop.permute.xlu0 %3173 }
 0x745   : > { %v8907_v38 = vpop.permute.xlu1 %3175  ;;  %3145 = vrot.lane.b32.xlu0 %v8835_v11, %s10724_s19 }
 0x747   : > { %3147 = vrot.lane.b32.xlu1 %v8841_v26, %s10724_s19  ;;  %v8913_v59 = vpop.permute.xlu0 %3189 }
 0x749   : > { %v8915_v53 = vpop.permute.xlu1 %3191  ;;  %3177 = vrot.lane.b32.xlu0 %v8823_v16, %s10586_s24 }
 0x74b   : > { %3179 = vrot.lane.b32.xlu1 %v8829_v13, %s10586_s24  ;;  %v8921_v32 = vpop.permute.xlu0 %3221 }
 0x74d   : > { %v8923_v27 = vpop.permute.xlu1 %3223  ;;  %3193 = vrot.lane.b32.xlu0 %v8835_v11, %s10586_s24 }
 0x74f   : > { %3195 = vrot.lane.b32.xlu1 %v8841_v26, %s10586_s24  ;;  %v8931_v28 = vpop.permute.xlu0 %3237 }
 0x751   : > { %v8935_v30 = vpop.permute.xlu1 %3239  ;;  %3225 = vrot.lane.b32.xlu0 %v8823_v16, %s10587_s25 }
 0x753   : > { %3227 = vrot.lane.b32.xlu1 %v8829_v13, %s10587_s25  ;;  %v8943_v55 = vpop.permute.xlu0 %3269 }
 0x754   : > { %10731 = vst [vmem:[#allocation52_spill] sm:$0xff] %v8943_v55 }
 0x755   : > { %v8947_v44 = vpop.permute.xlu1 %3271  ;;  %3241 = vrot.lane.b32.xlu0 %v8835_v11, %s10587_s25 }
 0x756   : > { %10732 = vst [vmem:[#allocation50_spill] sm:$0xff] %v8947_v44 }
 0x757   : > { %3243 = vrot.lane.b32.xlu1 %v8841_v26, %s10587_s25  ;;  %v2942_v57 = vpop.permute.xlu0 %2941 }
 0x758   : > { %v2973_v4 = vsel %vm433_vm0, %v8815_v41, %v2942_v57  ;;  %v2969_v31 = vsel %vm433_vm0, %v2942_v57, %v8827_v46  ;;  %v4607_v57 = vld [vmem:[%s10228_s2 + $0x18] sm:$0xff] }
 0x759   : > { %v2944_v50 = vpop.permute.xlu1 %2943  ;;  %2945 = vrot.lane.b32.xlu0 %v8951_v49, %s4810_s29  ;;  %v3318_v48 = vmul.f32 %v4603_v24, %v2973_v4 }
 0x75a   : > { %v2974_v14 = vsel %vm433_vm0, %v8819_v61, %v2944_v50  ;;  %v2970_v33 = vsel %vm433_vm0, %v2944_v50, %v8831_v8 }
 0x75b   : > { %v3322_v37 = vmul.f32 %v4604_v18, %v2974_v14  ;;  %2947 = vrot.lane.b32.xlu1 %v8958_v3, %s4810_s29  ;;  %v2958_v1 = vpop.permute.xlu0 %2957  ;;  %v4605_v14 = vld [vmem:[%s10228_s2 + $0x30] sm:$0xff] }
 0x75c   : > { %v2965_v25 = vsel %vm433_vm0, %v8827_v46, %v2958_v1  ;;  %v2977_v5 = vsel %vm433_vm0, %v2958_v1, %v8815_v41  ;;  %v3323_v24 = vmul.f32 %v4605_v14, %v2970_v33  ;;  %v4606_v41 = vld [vmem:[%s10228_s2] sm:$0xff] }
 0x75d   : > { %v2960_v4 = vpop.permute.xlu1 %2959  ;;  %2961 = vrot.lane.b32.xlu0 %v8965_v2, %s4810_s29  ;;  %v3462_v50 = vpack.c.bf16 %v3322_v37, %v3318_v48  ;;  %v3317_v43 = vmul.f32 %v4606_v41, %v2977_v5  ;;  %v3320_v48 = vmul.f32 %v4607_v57, %v2965_v25  ;;  %v4608_v33 = vld [vmem:[%s10228_s2 + $0x20] sm:$0xff]  ;;  %v4609_v37 = vld [vmem:[%s10228_s2 + $0x38] sm:$0xff] }
 0x75e   : > { %v2966_v6 = vsel %vm433_vm0, %v8831_v8, %v2960_v4  ;;  %v2978_v46 = vsel %vm433_vm0, %v2960_v4, %v8819_v61  ;;  %v4610_v8 = vld [vmem:[%s10228_s2 + $0x10] sm:$0xff] }
 0x75f   : > { %v3321_v18 = vmul.f32 %v4608_v33, %v2978_v46  ;;  %v3324_v1 = vmul.f32 %v4609_v37, %v2966_v6  ;;  %2963 = vrot.lane.b32.xlu1 %v8984_v62, %s4810_s29  ;;  %3533 = vmatprep.subr.bf16.mxu0 %v3462_v50  ;;  %v2990_v61 = vpop.permute.xlu0 %2989  ;;  %v3319_v25 = vmul.f32 %v4610_v8, %v2969_v31  ;;  %v4612_v33 = vld [vmem:[%s10228_s2 + $0xa8] sm:$0xff] }
 0x760   : > { %v3017_v5 = vsel %vm458_vm2, %v2990_v61, %v8849_v20  ;;  %v3021_v14 = vsel %vm458_vm2, %v8839_v36, %v2990_v61 }
 0x761   : > { %v3461_v4 = vpack.c.bf16 %v3321_v18, %v3317_v43  ;;  %v2992_v41 = vpop.permute.xlu1 %2991  ;;  %2993 = vrot.lane.b32.xlu0 %v8951_v49, %s4811_s20  ;;  %v3464_v50 = vpack.c.bf16 %v3324_v1, %v3320_v48  ;;  %v3463_v6 = vpack.c.bf16 %v3323_v24, %v3319_v25  ;;  %v4611_v43 = vld [vmem:[%s10228_s2 + $0x90] sm:$0xff]  ;;  %v4614_v1 = vld [vmem:[%s10228_s2 + $0x88] sm:$0xff] }
 0x762   : > { %v3018_v46 = vsel %vm458_vm2, %v2992_v41, %v8851_v40  ;;  %v3022_v31 = vsel %vm458_vm2, %v8843_v17, %v2992_v41  ;;  %v9034_v57 = vmul.f32 %v4611_v43, %v3017_v5  ;;  %v4613_v24 = vld [vmem:[%s10228_s2 + $0xb0] sm:$0xff]  ;;  %v9051_v61 = vmul.f32 %v4614_v1, %v3021_v14 }
 0x763   : > { %v9039_v48 = vmul.f32 %v4612_v33, %v3022_v31  ;;  %v9044_v18 = vmul.f32 %v4613_v24, %v3018_v46  ;;  %2995 = vrot.lane.b32.xlu1 %v8958_v3, %s4811_s20  ;;  %3534 = vmatpush1.bf16.msra.mxu0 %v3461_v4  ;;  %v3006_v37 = vpop.permute.xlu0 %3005  ;;  %v4618_v31 = vld [vmem:[%s10228_s2 + $0xb8] sm:$0xff]  ;;  %v4628_v5 = vld [vmem:[%s10228_s2 + $0x190] sm:$0xff] }
 0x764   : > { %3639 = vmatprep.subr.bf16.mxu1 %v3464_v50  ;;  %v3013_v8 = vsel %vm458_vm2, %v8849_v20, %v3006_v37  ;;  %v3025_v25 = vsel %vm458_vm2, %v3006_v37, %v8839_v36  ;;  %v4615_v36 = vld [vmem:[%s10228_s2 + $0x80] sm:$0xff] }
 0x765   : > { %3640 = vmatpush1.bf16.msra.mxu1 %v3463_v6  ;;  %v3008_v4 = vpop.permute.xlu1 %3007  ;;  %3009 = vrot.lane.b32.xlu0 %v8965_v2, %s4811_s20  ;;  %v9074_v50 = vmul.f32 %v4615_v36, %v3025_v25  ;;  %v4616_v6 = vld [vmem:[%s10228_s2 + $0x98] sm:$0xff] }
 0x766   : > { %v3014_v14 = vsel %vm458_vm2, %v8851_v40, %v3008_v4  ;;  %v3026_v20 = vsel %vm458_vm2, %v3008_v4, %v8843_v17  ;;  %v9079_v46 = vmul.f32 %v4616_v6, %v3013_v8  ;;  %v4617_v40 = vld [vmem:[%s10228_s2 + $0xa0] sm:$0xff]  ;;  %v4620_v6 = vld [vmem:[%s10228_s2 + $0x110] sm:$0xff] }
 0x767   : > { %v9084_v17 = vmul.f32 %v4617_v40, %v3026_v20  ;;  %v9089_v43 = vmul.f32 %v4618_v31, %v3014_v14  ;;  %3011 = vrot.lane.b32.xlu1 %v8984_v62, %s4811_s20  ;;  %v3038_v33 = vpop.permute.xlu0 %3037  ;;  %v4619_v20 = vld [vmem:[%s10228_s2 + $0x108] sm:$0xff] }
 0x768   : > { %v3065_v24 = vsel %vm483_vm3, %v3038_v33, %v8865_v10  ;;  %v3069_v37 = vsel %vm483_vm3, %v8857_v23, %v3038_v33  ;;  %v4621_v31 = vld [vmem:[%s10228_s2 + $0x128] sm:$0xff] }
 0x769   : > { %v3040_v8 = vpop.permute.xlu1 %3039  ;;  %3041 = vrot.lane.b32.xlu0 %v8951_v49, %s4812_s21  ;;  %v9114_v36 = vmul.f32 %v4619_v20, %v3069_v37  ;;  %v9119_v40 = vmul.f32 %v4620_v6, %v3065_v24 }
 0x76a   : > { %v3066_v4 = vsel %vm483_vm3, %v3040_v8, %v8867_v21  ;;  %v3070_v14 = vsel %vm483_vm3, %v8859_v58, %v3040_v8  ;;  %v4622_v8 = vld [vmem:[%s10228_s2 + $0x130] sm:$0xff] }
 0x76b   : > { %v9124_v33 = vmul.f32 %v4621_v31, %v3070_v14  ;;  %v9129_v34 = vmul.f32 %v4622_v8, %v3066_v4  ;;  %3043 = vrot.lane.b32.xlu1 %v8958_v3, %s4812_s21  ;;  %v3054_v37 = vpop.permute.xlu0 %3053 }
 0x76c   : > { %v3061_v24 = vsel %vm483_vm3, %v8865_v10, %v3054_v37  ;;  %v3073_v20 = vsel %vm483_vm3, %v3054_v37, %v8857_v23  ;;  %v4623_v23 = vld [vmem:[%s10228_s2 + $0x100] sm:$0xff]  ;;  %v4624_v37 = vld [vmem:[%s10228_s2 + $0x118] sm:$0xff] }
 0x76d   : > { %v3056_v6 = vpop.permute.xlu1 %3055  ;;  %3057 = vrot.lane.b32.xlu0 %v8965_v2, %s4812_s21  ;;  %v9154_v8 = vmul.f32 %v4623_v23, %v3073_v20  ;;  %v9159_v14 = vmul.f32 %v4624_v37, %v3061_v24 }
 0x76e   : > { %v3062_v31 = vsel %vm483_vm3, %v8867_v21, %v3056_v6  ;;  %v3074_v10 = vsel %vm483_vm3, %v3056_v6, %v8859_v58  ;;  %v4625_v21 = vld [vmem:[%s10228_s2 + $0x120] sm:$0xff]  ;;  %v4626_v58 = vld [vmem:[%s10228_s2 + $0x138] sm:$0xff] }
 0x76f   : > { %v9164_v4 = vmul.f32 %v4625_v21, %v3074_v10  ;;  %v9169_v6 = vmul.f32 %v4626_v58, %v3062_v31  ;;  %3059 = vrot.lane.b32.xlu1 %v8984_v62, %s4812_s21  ;;  %v3086_v20 = vpop.permute.xlu0 %3085  ;;  %v4629_v31 = vld [vmem:[%s10228_s2 + $0x1a8] sm:$0xff] }
 0x770   : > { %v3113_v24 = vsel %vm508_vm4, %v3086_v20, %v8881_v39  ;;  %v3117_v23 = vsel %vm508_vm4, %v8873_v29, %v3086_v20  ;;  %v4627_v20 = vld [vmem:[%s10228_s2 + $0x188] sm:$0xff] }
 0x771   : > { %v3088_v37 = vpop.permute.xlu1 %3087  ;;  %3089 = vrot.lane.b32.xlu0 %v8951_v49, %s4813_s22  ;;  %v9194_v10 = vmul.f32 %v4627_v20, %v3117_v23  ;;  %v9199_v1 = vmul.f32 %v4628_v5, %v3113_v24 }
 0x772   : > { %v3114_v21 = vsel %vm508_vm4, %v3088_v37, %v8883_v47  ;;  %v3118_v58 = vsel %vm508_vm4, %v8875_v15, %v3088_v37  ;;  %v4630_v37 = vld [vmem:[%s10228_s2 + $0x1b0] sm:$0xff] }
 0x773   : > { %v9204_v25 = vmul.f32 %v4629_v31, %v3118_v58  ;;  %v9209_v41 = vmul.f32 %v4630_v37, %v3114_v21  ;;  %3091 = vrot.lane.b32.xlu1 %v8958_v3, %s4813_s22  ;;  %v3102_v23 = vpop.permute.xlu0 %3101 }
 0x774   : > { %v3109_v5 = vsel %vm508_vm4, %v8881_v39, %v3102_v23  ;;  %v3121_v24 = vsel %vm508_vm4, %v3102_v23, %v8873_v29  ;;  %v4631_v29 = vld [vmem:[%s10228_s2 + $0x180] sm:$0xff]  ;;  %v4632_v23 = vld [vmem:[%s10228_s2 + $0x198] sm:$0xff] }
 0x775   : > { %v3104_v58 = vpop.permute.xlu1 %3103  ;;  %3105 = vrot.lane.b32.xlu0 %v8965_v2, %s4813_s22  ;;  %v9234_v37 = vmul.f32 %v4631_v29, %v3121_v24  ;;  %v9239_v31 = vmul.f32 %v4632_v23, %v3109_v5 }
 0x776   : > { %v3110_v20 = vsel %vm508_vm4, %v8883_v47, %v3104_v58  ;;  %v3122_v39 = vsel %vm508_vm4, %v3104_v58, %v8875_v15  ;;  %v4633_v47 = vld [vmem:[%s10228_s2 + $0x1a0] sm:$0xff]  ;;  %v4634_v15 = vld [vmem:[%s10228_s2 + $0x1b8] sm:$0xff] }
 0x777   : > { %v9244_v21 = vmul.f32 %v4633_v47, %v3122_v39  ;;  %v9249_v58 = vmul.f32 %v4634_v15, %v3110_v20  ;;  %3107 = vrot.lane.b32.xlu1 %v8984_v62, %s4813_s22  ;;  %v3134_v24 = vpop.permute.xlu0 %3133  ;;  %v4637_v20 = vld [vmem:[%s10228_s2 + $0x2a0] sm:$0xff] }
 0x778   : > { %v3161_v5 = vsel %vm533_vm5, %v3134_v24, %v8897_v56  ;;  %v3165_v29 = vsel %vm533_vm5, %v8889_v60, %v3134_v24  ;;  %v4635_v24 = vld [vmem:[%s10228_s2 + $0x280] sm:$0xff] }
 0x779   : > { %v3136_v23 = vpop.permute.xlu1 %3135  ;;  %3285 = vrot.lane.b32.xlu0 %v8672_v7, %s10588_s18  ;;  %v9274_v39 = vmul.f32 %v4635_v24, %v3165_v29  ;;  %v9279_v44 = vmul.f32 %v4636_v52, %v3161_v5 }
 0x77a   : > { %v3162_v47 = vsel %vm533_vm5, %v3136_v23, %v8899_v12  ;;  %v3166_v15 = vsel %vm533_vm5, %v8891_v19, %v3136_v23  ;;  %v4638_v23 = vld [vmem:[%s10228_s2 + $0x2a8] sm:$0xff] }
 0x77b   : > { %10734 = vst [vmem:[#allocation60_spill] sm:$0xff] %v9274_v39  ;;  %10735 = vst [vmem:[#allocation17_spill] sm:$0xff] %v9279_v44  ;;  %v9284_v55 = vmul.f32 %v4637_v20, %v3166_v15  ;;  %v9289_v42 = vmul.f32 %v4638_v23, %v3162_v47  ;;  %3287 = vrot.lane.b32.xlu1 %v8683_v22, %s10588_s18  ;;  %v3150_v29 = vpop.permute.xlu0 %3149 }
 0x77c   : > { %v3157_v52 = vsel %vm533_vm5, %v8897_v56, %v3150_v29  ;;  %v3169_v5 = vsel %vm533_vm5, %v3150_v29, %v8889_v60  ;;  %v4639_v60 = vld [vmem:[%s10228_s2 + $0x290] sm:$0xff]  ;;  %v4640_v29 = vld [vmem:[%s10228_s2 + $0x298] sm:$0xff] }
 0x77d   : > { %10736 = vst [vmem:[#allocation15_spill] sm:$0xff] %v9284_v55  ;;  %10737 = vst [vmem:[#allocation49_spill] sm:$0xff] %v9289_v42  ;;  %v3152_v15 = vpop.permute.xlu1 %3151  ;;  %3137 = vrot.lane.b32.xlu0 %v8951_v49, %s10724_s19  ;;  %v9314_v23 = vmul.f32 %v4639_v60, %v3157_v52  ;;  %v9319_v20 = vmul.f32 %v4640_v29, %v3169_v5 }
 0x77e   : > { %v3158_v24 = vsel %vm533_vm5, %v8899_v12, %v3152_v15  ;;  %v3170_v56 = vsel %vm533_vm5, %v3152_v15, %v8891_v19  ;;  %v4641_v12 = vld [vmem:[%s10228_s2 + $0x2b0] sm:$0xff]  ;;  %v4642_v19 = vld [vmem:[%s10228_s2 + $0x2b8] sm:$0xff] }
 0x77f   : > { %10738 = vst [vmem:[#allocation29_spill] sm:$0xff] %v9314_v23  ;;  %10739 = vst [vmem:[#allocation22_spill] sm:$0xff] %v9319_v20  ;;  %v9324_v47 = vmul.f32 %v4641_v12, %v3158_v24  ;;  %v9329_v15 = vmul.f32 %v4642_v19, %v3170_v56  ;;  %3295 = vrot.lane.b32.xlu1 %v8755_v51, %s10588_s18  ;;  %v3182_v52 = vpop.permute.xlu0 %3181  ;;  %v4644_v23 = vld [vmem:[%s10228_s2 + $0x308] sm:$0xff]  ;;  %v4645_v56 = vld [vmem:[%s10228_s2 + $0x320] sm:$0xff] }
 0x780   : > { %v3209_v5 = vsel %vm558_vm6, %v3182_v52, %v8913_v59  ;;  %v3213_v60 = vsel %vm558_vm6, %v8905_v0, %v3182_v52  ;;  %v4643_v52 = vld [vmem:[%s10228_s2 + $0x300] sm:$0xff] }
 0x781   : > { %10740 = vst [vmem:[#allocation32_spill] sm:$0xff] %v9324_v47  ;;  %10741 = vst [vmem:[#allocation64_spill] sm:$0xff] %v9329_v15  ;;  %v3184_v29 = vpop.permute.xlu1 %3183  ;;  %3153 = vrot.lane.b32.xlu0 %v8965_v2, %s10724_s19  ;;  %v9354_v24 = vmul.f32 %v4643_v52, %v3213_v60  ;;  %v9359_v47 = vmul.f32 %v4644_v23, %v3209_v5 }
 0x782   : > { %v3210_v12 = vsel %vm558_vm6, %v3184_v29, %v8915_v53  ;;  %v3214_v19 = vsel %vm558_vm6, %v8907_v38, %v3184_v29  ;;  %v4646_v29 = vld [vmem:[%s10228_s2 + $0x328] sm:$0xff] }
 0x783   : > { %10742 = vst [vmem:[#allocation47_spill] sm:$0xff] %v9354_v24  ;;  %10743 = vst [vmem:[#allocation31_spill] sm:$0xff] %v9359_v47  ;;  %v9364_v39 = vmul.f32 %v4645_v56, %v3214_v19  ;;  %v9369_v55 = vmul.f32 %v4646_v29, %v3210_v12  ;;  %3139 = vrot.lane.b32.xlu1 %v8958_v3, %s10724_s19  ;;  %v3198_v60 = vpop.permute.xlu0 %3197 }
 0x784   : > { %v3205_v23 = vsel %vm558_vm6, %v8913_v59, %v3198_v60  ;;  %v3217_v5 = vsel %vm558_vm6, %v3198_v60, %v8905_v0  ;;  %v4647_v0 = vld [vmem:[%s10228_s2 + $0x310] sm:$0xff]  ;;  %v4648_v60 = vld [vmem:[%s10228_s2 + $0x318] sm:$0xff] }
 0x785   : > { %10744 = vst [vmem:[#allocation19_spill] sm:$0xff] %v9364_v39  ;;  %10745 = vst [vmem:[#allocation46_spill] sm:$0xff] %v9369_v55  ;;  %v3200_v19 = vpop.permute.xlu1 %3199  ;;  %3185 = vrot.lane.b32.xlu0 %v8951_v49, %s10586_s24  ;;  %v9394_v29 = vmul.f32 %v4647_v0, %v3205_v23  ;;  %v9399_v56 = vmul.f32 %v4648_v60, %v3217_v5 }
 0x786   : > { %v3206_v52 = vsel %vm558_vm6, %v8915_v53, %v3200_v19  ;;  %v3218_v59 = vsel %vm558_vm6, %v3200_v19, %v8907_v38  ;;  %v4649_v53 = vld [vmem:[%s10228_s2 + $0x330] sm:$0xff]  ;;  %v4650_v38 = vld [vmem:[%s10228_s2 + $0x338] sm:$0xff] }
 0x787   : > { %10746 = vst [vmem:[#allocation33_spill] sm:$0xff] %v9394_v29  ;;  %10747 = vst [vmem:[#allocation37_spill] sm:$0xff] %v9399_v56  ;;  %v9404_v12 = vmul.f32 %v4649_v53, %v3206_v52  ;;  %v9409_v19 = vmul.f32 %v4650_v38, %v3218_v59  ;;  %3155 = vrot.lane.b32.xlu1 %v8984_v62, %s10724_s19  ;;  %v3230_v23 = vpop.permute.xlu0 %3229  ;;  %v4652_v29 = vld [vmem:[%s10228_s2 + $0x388] sm:$0xff]  ;;  %v4653_v59 = vld [vmem:[%s10228_s2 + $0x3a0] sm:$0xff] }
 0x788   : > { %v3257_v5 = vsel %vm583_vm7, %v3230_v23, %v8931_v28  ;;  %v3261_v0 = vsel %vm583_vm7, %v8921_v32, %v3230_v23  ;;  %v4651_v23 = vld [vmem:[%s10228_s2 + $0x380] sm:$0xff] }
 0x789   : > { %10748 = vst [vmem:[#allocation65_spill] sm:$0xff] %v9404_v12  ;;  %10749 = vst [vmem:[#allocation21_spill] sm:$0xff] %v9409_v19  ;;  %v3232_v60 = vpop.permute.xlu1 %3231  ;;  %3201 = vrot.lane.b32.xlu0 %v8965_v2, %s10586_s24  ;;  %v9434_v52 = vmul.f32 %v4651_v23, %v3261_v0  ;;  %v9439_v12 = vmul.f32 %v4652_v29, %v3257_v5 }
 0x78a   : > { %v3258_v53 = vsel %vm583_vm7, %v3232_v60, %v8935_v30  ;;  %v3262_v38 = vsel %vm583_vm7, %v8923_v27, %v3232_v60  ;;  %v4654_v60 = vld [vmem:[%s10228_s2 + $0x3a8] sm:$0xff] }
 0x78b   : > { %10750 = vst [vmem:[#allocation69_spill] sm:$0xff] %v9434_v52  ;;  %10751 = vst [vmem:[#allocation73_spill] sm:$0xff] %v9439_v12  ;;  %v9444_v24 = vmul.f32 %v4653_v59, %v3262_v38  ;;  %v9449_v39 = vmul.f32 %v4654_v60, %v3258_v53  ;;  %3187 = vrot.lane.b32.xlu1 %v8958_v3, %s10586_s24  ;;  %v3246_v0 = vpop.permute.xlu0 %3245 }
 0x78c   : > { %v3253_v29 = vsel %vm583_vm7, %v8931_v28, %v3246_v0  ;;  %v3265_v5 = vsel %vm583_vm7, %v3246_v0, %v8921_v32  ;;  %v4655_v32 = vld [vmem:[%s10228_s2 + $0x390] sm:$0xff]  ;;  %v4656_v0 = vld [vmem:[%s10228_s2 + $0x398] sm:$0xff] }
 0x78d   : > { %10752 = vst [vmem:[#allocation23_spill] sm:$0xff] %v9444_v24  ;;  %10753 = vst [vmem:[#allocation51_spill] sm:$0xff] %v9449_v39  ;;  %v3248_v38 = vpop.permute.xlu1 %3247  ;;  %3233 = vrot.lane.b32.xlu0 %v8951_v49, %s10587_s25  ;;  %v9474_v60 = vmul.f32 %v4655_v32, %v3253_v29  ;;  %v9479_v59 = vmul.f32 %v4656_v0, %v3265_v5 }
 0x78e   : > { %v3254_v23 = vsel %vm583_vm7, %v8935_v30, %v3248_v38  ;;  %v3266_v28 = vsel %vm583_vm7, %v3248_v38, %v8923_v27  ;;  %v4657_v30 = vld [vmem:[%s10228_s2 + $0x3b0] sm:$0xff]  ;;  %v4658_v27 = vld [vmem:[%s10228_s2 + $0x3b8] sm:$0xff] }
 0x78f   : > { %10754 = vst [vmem:[#allocation55_spill] sm:$0xff] %v9474_v60  ;;  %10755 = vst [vmem:[#allocation70_spill] sm:$0xff] %v9479_v59  ;;  %v9484_v53 = vmul.f32 %v4657_v30, %v3254_v23  ;;  %v9489_v38 = vmul.f32 %v4658_v27, %v3266_v28  ;;  %3203 = vrot.lane.b32.xlu1 %v8984_v62, %s10586_s24  ;;  %v9493_v29 = vpop.permute.xlu0 %3277 }
 0x790   : > { %10758 = vst [vmem:[#allocation75_spill] sm:$0xff] %v9493_v29 }
 0x791   : > { %10756 = vst [vmem:[#allocation74_spill] sm:$0xff] %v9484_v53  ;;  %10757 = vst [vmem:[#allocation71_spill] sm:$0xff] %v9489_v38  ;;  %v9497_v32 = vpop.permute.xlu1 %3279  ;;  %3249 = vrot.lane.b32.xlu0 %v8965_v2, %s10587_s25 }
 0x792   : > { %10759 = vst [vmem:[#allocation57_spill] sm:$0xff] %v9497_v32 }
 0x793   : > { %3235 = vrot.lane.b32.xlu1 %v8958_v3, %s10587_s25  ;;  %v2938_v28 = vpop.permute.xlu0 %2937 }
 0x795   : > { %v2940_v0 = vpop.permute.xlu1 %2939  ;;  %3293 = vrot.lane.b32.xlu0 %v8751_v35, %s10588_s18 }
 0x797   : > { %3251 = vrot.lane.b32.xlu1 %v8984_v62, %s10587_s25  ;;  %v2954_v30 = vpop.permute.xlu0 %2953 }
 0x799   : > { %v2956_v27 = vpop.permute.xlu1 %2955  ;;  %3273 = vrot.lane.b32.xlu0 %v8823_v16, %s10588_s18 }
 0x79b   : > { %3275 = vrot.lane.b32.xlu1 %v8829_v13, %s10588_s18  ;;  %v9513_v5 = vpop.permute.xlu0 %2985 }
 0x79d   : > { %v9515_v23 = vpop.permute.xlu1 %2987  ;;  %3281 = vrot.lane.b32.xlu0 %v8951_v49, %s10588_s18 }
 0x79f   : > { %3291 = vrot.lane.b32.xlu1 %v8841_v26, %s10588_s18  ;;  %v9521_v60 = vpop.permute.xlu0 %3001 }
 0x7a1   : > { %v9523_v53 = vpop.permute.xlu1 %3003  ;;  %3289 = vrot.lane.b32.xlu0 %v8835_v11, %s10588_s18 }
 0x7a3   : > { %3283 = vrot.lane.b32.xlu1 %v8958_v3, %s10588_s18  ;;  %v9529_v52 = vpop.permute.xlu0 %3033 }
 0x7a5   : > { %v9531_v24 = vpop.permute.xlu1 %3035  ;;  %3297 = vrot.lane.b32.xlu0 %v8965_v2, %s10588_s18 }
 0x7a7   : > { %3299 = vrot.lane.b32.xlu1 %v8984_v62, %s10588_s18  ;;  %v9537_v59 = vpop.permute.xlu0 %3049 }
 0x7a9   : > { %v9539_v38 = vpop.permute.xlu1 %3051 }
 0x7ab   : > { %v9541_v12 = vpop.permute.xlu0 %3081 }
 0x7ad   : > { %v9543_v39 = vpop.permute.xlu1 %3083 }
 0x7af   : > { %v9545_v32 = vpop.permute.xlu0 %3097 }
 0x7b1   : > { %v9547_v29 = vpop.permute.xlu1 %3099 }
 0x7b3   : > { %v9549_v56 = vpop.permute.xlu0 %3129 }
 0x7b4   : > { %10760 = vst [vmem:[#allocation62_spill] sm:$0xff] %v9549_v56 }
 0x7b5   : > { %v9551_v19 = vpop.permute.xlu1 %3131 }
 0x7b6   : > { %10761 = vst [vmem:[#allocation61_spill] sm:$0xff] %v9551_v19 }
 0x7b7   : > { %v9553_v47 = vpop.permute.xlu0 %3145 }
 0x7b8   : > { %10762 = vst [vmem:[#allocation66_spill] sm:$0xff] %v9553_v47 }
 0x7b9   : > { %v9555_v55 = vpop.permute.xlu1 %3147 }
 0x7ba   : > { %10763 = vst [vmem:[#allocation68_spill] sm:$0xff] %v9555_v55 }
 0x7bb   : > { %v9557_v20 = vpop.permute.xlu0 %3177 }
 0x7bc   : > { %10764 = vst [vmem:[#allocation38_spill] sm:$0xff] %v9557_v20 }
 0x7bd   : > { %v9559_v15 = vpop.permute.xlu1 %3179 }
 0x7be   : > { %10765 = vst [vmem:[#allocation58_spill] sm:$0xff] %v9559_v15 }
 0x7bf   : > { %v9561_v44 = vpop.permute.xlu0 %3193 }
 0x7c0   : > { %10766 = vst [vmem:[#allocation34_spill] sm:$0xff] %v9561_v44 }
 0x7c1   : > { %v9563_v42 = vpop.permute.xlu1 %3195 }
 0x7c2   : > { %10767 = vst [vmem:[#allocation77_spill] sm:$0xff] %v9563_v42  ;;  %v4659_v42 = vld [vmem:[%s10228_s2 + $0x48] sm:$0xff] }
 0x7c3   : > { %v9565_v11 = vpop.permute.xlu0 %3225 }
 0x7c4   : > { %10768 = vst [vmem:[#allocation63_spill] sm:$0xff] %v9565_v11 }
 0x7c5   : > { %v9567_v16 = vpop.permute.xlu1 %3227 }
 0x7c6   : > { %10769 = vst [vmem:[#allocation20_spill] sm:$0xff] %v9567_v16 }
 0x7c7   : > { %v9569_v63 = vpop.permute.xlu0 %3241 }
 0x7c8   : > { %10770 = vst [vmem:[#allocation72_spill] sm:$0xff] %v9569_v63 }
 0x7c9   : > { %v9571_v56 = vpop.permute.xlu1 %3243 }
 0x7ca   : > { %10771 = vst [vmem:[#allocation78_spill] sm:$0xff] %v9571_v56  ;;  %v4660_v56 = vld [vmem:[%s10228_s2 + $0x68] sm:$0xff] }
 0x7cb   : > { %v2946_v19 = vpop.permute.xlu0 %2945 }
 0x7cc   : > { %v2975_v55 = vsel %vm433_vm0, %v2938_v28, %v2946_v19  ;;  %v2971_v13 = vsel %vm433_vm0, %v2946_v19, %v2954_v30 }
 0x7cd   : > { %v2948_v47 = vpop.permute.xlu1 %2947  ;;  %v3326_v20 = vmul.f32 %v4659_v42, %v2975_v55  ;;  %v4661_v55 = vld [vmem:[%s10228_s2 + $0x70] sm:$0xff] }
 0x7ce   : > { %v2976_v15 = vsel %vm433_vm0, %v2940_v0, %v2948_v47  ;;  %v2972_v16 = vsel %vm433_vm0, %v2948_v47, %v2956_v27 }
 0x7cf   : > { %v3330_v11 = vmul.f32 %v4660_v56, %v2976_v15  ;;  %v2962_v63 = vpop.permute.xlu0 %2961  ;;  %v3331_v47 = vmul.f32 %v4661_v55, %v2972_v16  ;;  %v4664_v16 = vld [vmem:[%s10228_s2 + $0x60] sm:$0xff] }
 0x7d0   : > { %v2967_v44 = vsel %vm433_vm0, %v2954_v30, %v2962_v63  ;;  %v2979_v26 = vsel %vm433_vm0, %v2962_v63, %v2938_v28  ;;  %v4662_v63 = vld [vmem:[%s10228_s2 + $0x40] sm:$0xff]  ;;  %v4665_v30 = vld [vmem:[%s10228_s2 + $0x78] sm:$0xff] }
 0x7d1   : > { %v2964_v2 = vpop.permute.xlu1 %2963  ;;  %v3466_v42 = vpack.c.bf16 %v3330_v11, %v3326_v20  ;;  %v3325_v28 = vmul.f32 %v4662_v63, %v2979_v26  ;;  %v4663_v11 = vld [vmem:[%s10228_s2 + $0x58] sm:$0xff]  ;;  %v4666_v26 = vld [vmem:[%s10228_s2 + $0x50] sm:$0xff] }
 0x7d2   : > { %v2968_v15 = vsel %vm433_vm0, %v2956_v27, %v2964_v2  ;;  %v2980_v56 = vsel %vm433_vm0, %v2964_v2, %v2940_v0  ;;  %v3328_v20 = vmul.f32 %v4663_v11, %v2967_v44  ;;  %v3327_v27 = vmul.f32 %v4666_v26, %v2971_v13 }
 0x7d3   : > { %v3329_v19 = vmul.f32 %v4664_v16, %v2980_v56  ;;  %v3332_v2 = vmul.f32 %v4665_v30, %v2968_v15  ;;  %3535 = vmatprep.subr.bf16.mxu0 %v3466_v42  ;;  %v2994_v0 = vpop.permute.xlu0 %2993  ;;  %v4667_v42 = vld [vmem:[%s10228_s2 + $0xc8] sm:$0xff] }
 0x7d4   : > { %v3023_v44 = vsel %vm458_vm2, %v9513_v5, %v2994_v0  ;;  %v3467_v56 = vpack.c.bf16 %v3331_v47, %v3327_v27  ;;  %v3019_v26 = vsel %vm458_vm2, %v2994_v0, %v9521_v60 }
 0x7d5   : > { %v3465_v55 = vpack.c.bf16 %v3329_v19, %v3325_v28  ;;  %v2996_v63 = vpop.permute.xlu1 %2995  ;;  %v3468_v11 = vpack.c.bf16 %v3332_v2, %v3328_v20  ;;  %v3342_v15 = vmul.f32 %v4667_v42, %v3023_v44  ;;  %v4668_v28 = vld [vmem:[%s10228_s2 + $0xe8] sm:$0xff]  ;;  %v10772_v2 = vpack.c.bf16 %v9039_v48, %v9051_v61 }
 0x7d6   : > { %v3024_v16 = vsel %vm458_vm2, %v9515_v23, %v2996_v63  ;;  %v3020_v13 = vsel %vm458_vm2, %v2996_v63, %v9523_v53  ;;  %v10773_v44 = vpack.c.bf16 %v9089_v43, %v9079_v46  ;;  %v4669_v63 = vld [vmem:[%s10228_s2 + $0xf0] sm:$0xff]  ;;  %v4671_v43 = vld [vmem:[%s10228_s2 + $0xd8] sm:$0xff] }
 0x7d7   : > { %v3346_v19 = vmul.f32 %v4668_v28, %v3024_v16  ;;  %3536 = vmatpush1.bf16.msra.mxu0 %v3465_v55  ;;  %3641 = vmatprep.subr.bf16.mxu1 %v3468_v11  ;;  %v3010_v47 = vpop.permute.xlu0 %3009  ;;  %v4672_v11 = vld [vmem:[%s10228_s2 + $0xe0] sm:$0xff]  ;;  %v10774_v16 = vpack.c.bf16 %v9084_v17, %v9074_v50 }
 0x7d8   : > { %v3015_v20 = vsel %vm458_vm2, %v9521_v60, %v3010_v47  ;;  %v3027_v30 = vsel %vm458_vm2, %v3010_v47, %v9513_v5  ;;  %3537 = vmatprep.subr.bf16.mxu0 %v10772_v2  ;;  %3642 = vmatpush1.bf16.msra.mxu1 %v3467_v56  ;;  %v3347_v5 = vmul.f32 %v4669_v63, %v3020_v13  ;;  %v4670_v60 = vld [vmem:[%s10228_s2 + $0xc0] sm:$0xff]  ;;  %v4675_v2 = vld [vmem:[%s10228_s2 + $0x148] sm:$0xff] }
 0x7d9   : > { %v3012_v27 = vpop.permute.xlu1 %3011  ;;  %3643 = vmatprep.subr.bf16.mxu1 %v10773_v44  ;;  %v3474_v55 = vpack.c.bf16 %v3346_v19, %v3342_v15  ;;  %v3341_v46 = vmul.f32 %v4670_v60, %v3027_v30  ;;  %v3344_v0 = vmul.f32 %v4671_v43, %v3015_v20  ;;  %v4674_v15 = vld [vmem:[%s10228_s2 + $0xd0] sm:$0xff]  ;;  %v10775_v19 = vpack.c.bf16 %v9044_v18, %v9034_v57  ;;  %v4676_v57 = vld [vmem:[%s10228_s2 + $0x168] sm:$0xff] }
 0x7da   : > { %v3016_v48 = vsel %vm458_vm2, %v9523_v53, %v3012_v27  ;;  %v3028_v61 = vsel %vm458_vm2, %v3012_v27, %v9515_v23  ;;  %v4673_v53 = vld [vmem:[%s10228_s2 + $0xf8] sm:$0xff]  ;;  %v3343_v13 = vmul.f32 %v4674_v15, %v3019_v26  ;;  %v10777_v60 = vpack.c.bf16 %v9169_v6, %v9159_v14  ;;  %v4677_v43 = vld [vmem:[%s10228_s2 + $0x170] sm:$0xff] }
 0x7db   : > { %v3345_v56 = vmul.f32 %v4672_v11, %v3028_v61  ;;  %v3348_v23 = vmul.f32 %v4673_v53, %v3016_v48  ;;  %3538 = vmatpush1.bf16.msra.mxu0 %v10774_v16  ;;  %v3042_v42 = vpop.permute.xlu0 %3041  ;;  %v4679_v6 = vld [vmem:[%s10228_s2 + $0x158] sm:$0xff]  ;;  %v4680_v11 = vld [vmem:[%s10228_s2 + $0x160] sm:$0xff]  ;;  %v10778_v53 = vpack.c.bf16 %v9164_v4, %v9154_v8  ;;  %v4682_v16 = vld [vmem:[%s10228_s2 + $0x150] sm:$0xff] }
 0x7dc   : > { %v3071_v28 = vsel %vm483_vm3, %v9529_v52, %v3042_v42  ;;  %3539 = vmatprep.subr.bf16.mxu0 %v3474_v55  ;;  %3644 = vmatpush1.bf16.msra.mxu1 %v10775_v19  ;;  %v3475_v50 = vpack.c.bf16 %v3347_v5, %v3343_v13  ;;  %v10776_v5 = vpack.c.bf16 %v9124_v33, %v9114_v36 }
 0x7dd   : > { %v3473_v47 = vpack.c.bf16 %v3345_v56, %v3341_v46  ;;  %v3044_v20 = vpop.permute.xlu1 %3043  ;;  %v3476_v30 = vpack.c.bf16 %v3348_v23, %v3344_v0  ;;  %v3358_v26 = vmul.f32 %v4675_v2, %v3071_v28  ;;  %v3067_v48 = vsel %vm483_vm3, %v3042_v42, %v9537_v59 }
 0x7de   : > { %v3072_v17 = vsel %vm483_vm3, %v9531_v24, %v3044_v20  ;;  %v3068_v27 = vsel %vm483_vm3, %v3044_v20, %v9539_v38  ;;  %v3359_v42 = vmul.f32 %v4682_v16, %v3067_v48  ;;  %v10779_v13 = vpack.c.bf16 %v9129_v34, %v9119_v40  ;;  %v4683_v20 = vld [vmem:[%s10228_s2 + $0x1c8] sm:$0xff] }
 0x7df   : > { %v3362_v18 = vmul.f32 %v4676_v57, %v3072_v17  ;;  %3540 = vmatpush1.bf16.msra.mxu0 %v3473_v47  ;;  %3645 = vmatprep.subr.bf16.mxu1 %v3476_v30  ;;  %v3058_v44 = vpop.permute.xlu0 %3057  ;;  %v4684_v34 = vld [vmem:[%s10228_s2 + $0x1e8] sm:$0xff] }
 0x7e0   : > { %v3063_v55 = vsel %vm483_vm3, %v9537_v59, %v3058_v44  ;;  %v3075_v63 = vsel %vm483_vm3, %v3058_v44, %v9529_v52  ;;  %3541 = vmatprep.subr.bf16.mxu0 %v10776_v5  ;;  %3646 = vmatpush1.bf16.msra.mxu1 %v3475_v50  ;;  %v3363_v52 = vmul.f32 %v4677_v43, %v3068_v27  ;;  %v4678_v59 = vld [vmem:[%s10228_s2 + $0x140] sm:$0xff] }
 0x7e1   : > { %v3060_v61 = vpop.permute.xlu1 %3059  ;;  %3647 = vmatprep.subr.bf16.mxu1 %v10777_v60  ;;  %v3482_v46 = vpack.c.bf16 %v3362_v18, %v3358_v26  ;;  %v3357_v14 = vmul.f32 %v4678_v59, %v3075_v63  ;;  %v3360_v0 = vmul.f32 %v4679_v6, %v3063_v55  ;;  %v10780_v27 = vpack.c.bf16 %v9204_v25, %v9194_v10  ;;  %v4685_v63 = vld [vmem:[%s10228_s2 + $0x228] sm:$0xff]  ;;  %v4686_v25 = vld [vmem:[%s10228_s2 + $0x1f0] sm:$0xff] }
 0x7e2   : > { %v3064_v36 = vsel %vm483_vm3, %v9539_v38, %v3060_v61  ;;  %v3076_v33 = vsel %vm483_vm3, %v3060_v61, %v9531_v24  ;;  %v4681_v38 = vld [vmem:[%s10228_s2 + $0x178] sm:$0xff]  ;;  %v3483_v4 = vpack.c.bf16 %v3363_v52, %v3359_v42  ;;  %v10781_v44 = vpack.c.bf16 %v9249_v58, %v9239_v31 }
 0x7e3   : > { %v3361_v56 = vmul.f32 %v4680_v11, %v3076_v33  ;;  %v3364_v24 = vmul.f32 %v4681_v38, %v3064_v36  ;;  %3542 = vmatpush1.bf16.msra.mxu0 %v10778_v53  ;;  %v3090_v23 = vpop.permute.xlu0 %3089  ;;  %v4687_v58 = vld [vmem:[%s10228_s2 + $0x238] sm:$0xff]  ;;  %v10782_v43 = vpack.c.bf16 %v9244_v21, %v9234_v37  ;;  %v4692_v36 = vld [vmem:[%s10228_s2 + $0x1d0] sm:$0xff]  ;;  %v10783_v59 = vpack.c.bf16 %v9209_v41, %v9199_v1  ;;  %v4695_v41 = vld [vmem:[%s10228_s2 + $0x268] sm:$0xff] }
 0x7e4   : > { %v3119_v15 = vsel %vm508_vm4, %v9541_v12, %v3090_v23  ;;  %3543 = vmatprep.subr.bf16.mxu0 %v3482_v46  ;;  %3648 = vmatpush1.bf16.msra.mxu1 %v10779_v13  ;;  %v3115_v57 = vsel %vm508_vm4, %v3090_v23, %v9545_v32  ;;  %v3388_v5 = vmul.f32 %v4687_v58, %v8755_v51  ;;  %v4689_v61 = vld [vmem:[%s10228_s2 + $0x1d8] sm:$0xff] }
 0x7e5   : > { %v3481_v28 = vpack.c.bf16 %v3361_v56, %v3357_v14  ;;  %v3092_v19 = vpop.permute.xlu1 %3091  ;;  %v3484_v47 = vpack.c.bf16 %v3364_v24, %v3360_v0  ;;  %v3374_v30 = vmul.f32 %v4683_v20, %v3119_v15  ;;  %v4691_v46 = vld [vmem:[%s10228_s2 + $0x1f8] sm:$0xff]  ;;  %v3375_v33 = vmul.f32 %v4692_v36, %v3115_v57  ;;  %v4693_v14 = vld [vmem:[%s10228_s2 + $0x208] sm:$0xff]  ;;  %v4703_v57 = vld [vmem:[%s10228_s2 + $0x240] sm:$0xff] }
 0x7e6   : > { %v3120_v8 = vsel %vm508_vm4, %v9543_v39, %v3092_v19  ;;  %v3116_v50 = vsel %vm508_vm4, %v3092_v19, %v9547_v29  ;;  %v3382_v6 = vmul.f32 %v4693_v14, %v8744_v54  ;;  %v4694_v11 = vld [vmem:[%s10228_s2 + $0x218] sm:$0xff]  ;;  %v3394_v1 = vmul.f32 %v4695_v41, %v8958_v3  ;;  %v4696_v54 = vld [vmem:[%s10228_s2 + $0x230] sm:$0xff]  ;;  %v4698_v3 = vld [vmem:[%s10228_s2 + $0x248] sm:$0xff] }
 0x7e7   : > { %v3378_v40 = vmul.f32 %v4684_v34, %v3120_v8  ;;  %3544 = vmatpush1.bf16.msra.mxu0 %v3481_v28  ;;  %3649 = vmatprep.subr.bf16.mxu1 %v3484_v47  ;;  %v3106_v17 = vpop.permute.xlu0 %3105  ;;  %v3379_v10 = vmul.f32 %v4686_v25, %v3116_v50  ;;  %v3384_v56 = vmul.f32 %v4694_v11, %v8751_v35  ;;  %v4697_v35 = vld [vmem:[%s10228_s2 + $0x278] sm:$0xff]  ;;  %v10784_v19 = vld [vmem:[#allocation54_spill] sm:$0xff]  ;;  %v10786_v50 = vld [vmem:[#allocation53_spill] sm:$0xff] }
 0x7e8   : > { %v3111_v2 = vsel %vm508_vm4, %v9545_v32, %v3106_v17  ;;  %v3123_v26 = vsel %vm508_vm4, %v3106_v17, %v9541_v12  ;;  %3545 = vmatprep.subr.bf16.mxu0 %v10780_v27  ;;  %3650 = vmatpush1.bf16.msra.mxu1 %v3483_v4  ;;  %v3386_v12 = vmul.f32 %v4685_v63, %v8747_v45  ;;  %v4688_v45 = vld [vmem:[%s10228_s2 + $0x1c0] sm:$0xff]  ;;  %v10788_v17 = vld [vmem:[#allocation18_spill] sm:$0xff]  ;;  %v10792_v25 = vld [vmem:[#allocation36_spill] sm:$0xff] }
 0x7e9   : > { %v3108_v18 = vpop.permute.xlu1 %3107  ;;  %3651 = vmatprep.subr.bf16.mxu1 %v10781_v44  ;;  %v3490_v55 = vpack.c.bf16 %v3378_v40, %v3374_v30  ;;  %v3373_v48 = vmul.f32 %v4688_v45, %v3123_v26  ;;  %v3491_v38 = vpack.c.bf16 %v3379_v10, %v3375_v33  ;;  %v3387_v53 = vmul.f32 %v4696_v54, %v8683_v22  ;;  %v4699_v22 = vld [vmem:[%s10228_s2 + $0x210] sm:$0xff]  ;;  %v4701_v4 = vld [vmem:[%s10228_s2 + $0x260] sm:$0xff]  ;;  %v10793_v58 = vld [vmem:[#allocation68_spill] sm:$0xff] }
 0x7ea   : > { %v3112_v32 = vsel %vm508_vm4, %v9547_v29, %v3108_v18  ;;  %v3124_v31 = vsel %vm508_vm4, %v3108_v18, %v9543_v39  ;;  %v3376_v29 = vmul.f32 %v4689_v61, %v3111_v2  ;;  %v4690_v39 = vld [vmem:[%s10228_s2 + $0x1e0] sm:$0xff]  ;;  %v3494_v24 = vpack.c.bf16 %v3386_v12, %v3382_v6  ;;  %v10787_v40 = vld [vmem:[#allocation35_spill] sm:$0xff] }
 0x7eb   : > { %v3377_v60 = vmul.f32 %v4690_v39, %v3124_v31  ;;  %v3380_v51 = vmul.f32 %v4691_v46, %v3112_v32  ;;  %3546 = vmatpush1.bf16.msra.mxu0 %v10782_v43  ;;  %v9795_v52 = vpop.permute.xlu0 %3285  ;;  %v3496_v16 = vpack.c.bf16 %v3388_v5, %v3384_v56  ;;  %v3396_v42 = vmul.f32 %v4697_v35, %v8984_v62  ;;  %v4700_v62 = vld [vmem:[%s10228_s2 + $0x258] sm:$0xff]  ;;  %v10790_v18 = vld [vmem:[#allocation59_spill] sm:$0xff]  ;;  %v10794_v45 = vld [vmem:[#allocation61_spill] sm:$0xff] }
 0x7ec   : > { %3547 = vmatprep.subr.bf16.mxu0 %v3490_v55  ;;  %3652 = vmatpush1.bf16.msra.mxu1 %v10783_v59  ;;  %v3390_v15 = vmul.f32 %v4698_v3, %v8951_v49  ;;  %v3383_v13 = vmul.f32 %v4699_v22, %v8672_v7  ;;  %v3392_v47 = vmul.f32 %v4700_v62, %v10784_v19  ;;  %v10785_v49 = vld [vmem:[#allocation16_spill] sm:$0xff]  ;;  %v4702_v7 = vld [vmem:[%s10228_s2 + $0x270] sm:$0xff]  ;;  %v10791_v55 = vld [vmem:[#allocation66_spill] sm:$0xff] }
 0x7ed   : > { %v3489_v21 = vpack.c.bf16 %v3377_v60, %v3373_v48  ;;  %v9807_v37 = vpop.permute.xlu1 %3287  ;;  %v3492_v0 = vpack.c.bf16 %v3380_v51, %v3376_v29  ;;  %v3393_v8 = vmul.f32 %v4701_v4, %v10785_v49  ;;  %v3395_v34 = vmul.f32 %v4702_v7, %v10786_v50  ;;  %v4704_v12 = vld [vmem:[%s10228_s2 + $0x250] sm:$0xff]  ;;  %v10795_v29 = vld [vmem:[#allocation62_spill] sm:$0xff]  ;;  %v10796_v14 = vld [vmem:[#allocation49_spill] sm:$0xff] }
 0x7ee   : > { %v3498_v20 = vpack.c.bf16 %v3394_v1, %v3390_v15  ;;  %v3495_v30 = vpack.c.bf16 %v3387_v53, %v3383_v13  ;;  %v10789_v2 = vpack.c.bf16 %v10787_v40, %v10788_v17  ;;  %v3500_v27 = vpack.c.bf16 %v3396_v42, %v3392_v47  ;;  %v4705_v60 = vld [vmem:[%s10228_s2 + $0x2c8] sm:$0xff]  ;;  %v10797_v6 = vld [vmem:[#allocation17_spill] sm:$0xff]  ;;  %v4709_v35 = vld [vmem:[%s10228_s2 + $0x2d0] sm:$0xff] }
 0x7ef   : > { %3548 = vmatpush1.bf16.msra.mxu0 %v3489_v21  ;;  %3653 = vmatprep.subr.bf16.mxu1 %v3492_v0  ;;  %v3138_v23 = vpop.permute.xlu0 %3137  ;;  %v3389_v44 = vmul.f32 %v4703_v57, %v10790_v18  ;;  %v3391_v10 = vmul.f32 %v4704_v12, %v10792_v25  ;;  %v4706_v51 = vld [vmem:[%s10228_s2 + $0x2e8] sm:$0xff]  ;;  %v10798_v21 = vpack.c.bf16 %v10796_v14, %v10797_v6  ;;  %v4707_v0 = vld [vmem:[%s10228_s2 + $0x2e0] sm:$0xff]  ;;  %v4710_v3 = vld [vmem:[%s10228_s2 + $0x2d8] sm:$0xff] }
 0x7f0   : > { %3549 = vmatprep.subr.bf16.mxu0 %v3494_v24  ;;  %3654 = vmatpush1.bf16.msra.mxu1 %v3491_v38  ;;  %v3163_v63 = vsel %vm533_vm5, %v3138_v23, %v10791_v55  ;;  %v3167_v39 = vsel %vm533_vm5, %v10795_v29, %v3138_v23  ;;  %v10799_v38 = vld [vmem:[#allocation64_spill] sm:$0xff]  ;;  %v10800_v24 = vld [vmem:[#allocation22_spill] sm:$0xff]  ;;  %v4708_v54 = vld [vmem:[%s10228_s2 + $0x2c0] sm:$0xff] }
 0x7f1   : > { %v9833_v28 = vpop.permute.xlu1 %3295  ;;  %3655 = vmatprep.subr.bf16.mxu1 %v3496_v16  ;;  %v3497_v31 = vpack.c.bf16 %v3393_v8, %v3389_v44  ;;  %v3499_v61 = vpack.c.bf16 %v3395_v34, %v3391_v10  ;;  %v3406_v46 = vmul.f32 %v4705_v60, %v3163_v63  ;;  %v10801_v41 = vpack.c.bf16 %v10799_v38, %v10800_v24  ;;  %v4711_v22 = vld [vmem:[%s10228_s2 + $0x2f0] sm:$0xff]  ;;  %v4712_v62 = vld [vmem:[%s10228_s2 + $0x2f8] sm:$0xff]  ;;  %v10807_v50 = vld [vmem:[#allocation29_spill] sm:$0xff] }
 0x7f2   : > { %v3405_v53 = vmul.f32 %v4708_v54, %v3167_v39  ;;  %v10802_v47 = vld [vmem:[#allocation15_spill] sm:$0xff]  ;;  %v10803_v4 = vld [vmem:[#allocation60_spill] sm:$0xff]  ;;  %v10810_v18 = vld [vmem:[#allocation77_spill] sm:$0xff] }
 0x7f3   : > { %3550 = vmatpush1.bf16.msra.mxu0 %v10789_v2  ;;  %v3154_v26 = vpop.permute.xlu0 %3153  ;;  %v10804_v49 = vpack.c.bf16 %v10802_v47, %v10803_v4  ;;  %v10806_v7 = vld [vmem:[#allocation32_spill] sm:$0xff]  ;;  %v4713_v12 = vld [vmem:[%s10228_s2 + $0x348] sm:$0xff]  ;;  %v4717_v14 = vld [vmem:[%s10228_s2 + $0x350] sm:$0xff] }
 0x7f4   : > { %3551 = vmatprep.subr.bf16.mxu0 %v3498_v20  ;;  %3656 = vmatpush1.bf16.msra.mxu1 %v3495_v30  ;;  %v3159_v33 = vsel %vm533_vm5, %v10791_v55, %v3154_v26  ;;  %v3171_v59 = vsel %vm533_vm5, %v3154_v26, %v10795_v29  ;;  %v10805_v20 = vld [vmem:[#allocation34_spill] sm:$0xff]  ;;  %v10808_v34 = vpack.c.bf16 %v10806_v7, %v10807_v50  ;;  %v4715_v29 = vld [vmem:[%s10228_s2 + $0x360] sm:$0xff]  ;;  %v10818_v38 = vld [vmem:[#allocation72_spill] sm:$0xff] }
 0x7f5   : > { %v3140_v32 = vpop.permute.xlu1 %3139  ;;  %3657 = vmatprep.subr.bf16.mxu1 %v3500_v27  ;;  %v3407_v42 = vmul.f32 %v4709_v35, %v3159_v33  ;;  %v3408_v15 = vmul.f32 %v4710_v3, %v3171_v59  ;;  %v10809_v27 = vld [vmem:[#allocation38_spill] sm:$0xff]  ;;  %v4716_v33 = vld [vmem:[%s10228_s2 + $0x340] sm:$0xff]  ;;  %v4720_v54 = vld [vmem:[%s10228_s2 + $0x378] sm:$0xff] }
 0x7f6   : > { %v3164_v5 = vsel %vm533_vm5, %v3140_v32, %v10793_v58  ;;  %v3168_v48 = vsel %vm533_vm5, %v10794_v45, %v3140_v32  ;;  %v10811_v55 = vld [vmem:[#allocation58_spill] sm:$0xff]  ;;  %v10822_v3 = vld [vmem:[#allocation75_spill] sm:$0xff]  ;;  %v10826_v47 = vld [vmem:[#allocation65_spill] sm:$0xff] }
 0x7f7   : > { %v3410_v43 = vmul.f32 %v4706_v51, %v3164_v5  ;;  %3552 = vmatpush1.bf16.msra.mxu0 %v3497_v31  ;;  %v3186_v36 = vpop.permute.xlu0 %3185  ;;  %v3409_v11 = vmul.f32 %v4707_v0, %v3168_v48  ;;  %v4714_v32 = vld [vmem:[%s10228_s2 + $0x368] sm:$0xff]  ;;  %v10813_v48 = vld [vmem:[#allocation31_spill] sm:$0xff]  ;;  %v10816_v51 = vld [vmem:[#allocation37_spill] sm:$0xff] }
 0x7f8   : > { %3553 = vmatprep.subr.bf16.mxu0 %v10798_v21  ;;  %3658 = vmatpush1.bf16.msra.mxu1 %v3499_v61  ;;  %v3211_v30 = vsel %vm558_vm6, %v3186_v36, %v10805_v20  ;;  %v3215_v57 = vsel %vm558_vm6, %v10809_v27, %v3186_v36  ;;  %v10827_v4 = vld [vmem:[#allocation33_spill] sm:$0xff] }
 0x7f9   : > { %v3156_v56 = vpop.permute.xlu1 %3155  ;;  %3659 = vmatprep.subr.bf16.mxu1 %v10801_v41  ;;  %v3506_v1 = vpack.c.bf16 %v3410_v43, %v3406_v46  ;;  %v3505_v40 = vpack.c.bf16 %v3409_v11, %v3405_v53  ;;  %v3422_v25 = vmul.f32 %v4713_v12, %v3211_v30  ;;  %v10815_v46 = vld [vmem:[#allocation21_spill] sm:$0xff]  ;;  %v3421_v59 = vmul.f32 %v4716_v33, %v3215_v57  ;;  %v4718_v11 = vld [vmem:[%s10228_s2 + $0x358] sm:$0xff]  ;;  %v4719_v41 = vld [vmem:[%s10228_s2 + $0x370] sm:$0xff] }
 0x7fa   : > { %v3160_v23 = vsel %vm533_vm5, %v10793_v58, %v3156_v56  ;;  %v3172_v16 = vsel %vm533_vm5, %v3156_v56, %v10794_v45  ;;  %v10812_v45 = vld [vmem:[#allocation46_spill] sm:$0xff]  ;;  %v10817_v43 = vpack.c.bf16 %v10815_v46, %v10816_v51  ;;  %v10831_v57 = vld [vmem:[#allocation20_spill] sm:$0xff] }
 0x7fb   : > { %v3411_v13 = vmul.f32 %v4711_v22, %v3160_v23  ;;  %v3412_v19 = vmul.f32 %v4712_v62, %v3172_v16  ;;  %3554 = vmatpush1.bf16.msra.mxu0 %v10804_v49  ;;  %v3202_v8 = vpop.permute.xlu0 %3201  ;;  %v10814_v61 = vpack.c.bf16 %v10812_v45, %v10813_v48  ;;  %v10819_v23 = vld [vmem:[#allocation19_spill] sm:$0xff]  ;;  %v10825_v62 = vld [vmem:[#allocation50_spill] sm:$0xff]  ;;  %v10828_v49 = vpack.c.bf16 %v10826_v47, %v10827_v4  ;;  %v10833_v45 = vld [vmem:[#allocation73_spill] sm:$0xff] }
 0x7fc   : > { %3555 = vmatprep.subr.bf16.mxu0 %v3506_v1  ;;  %3660 = vmatpush1.bf16.msra.mxu1 %v10808_v34  ;;  %v3207_v10 = vsel %vm558_vm6, %v10805_v20, %v3202_v8  ;;  %v3219_v5 = vsel %vm558_vm6, %v3202_v8, %v10809_v27  ;;  %v10820_v16 = vld [vmem:[#allocation47_spill] sm:$0xff]  ;;  %v3302_v47 = vsel %vm608_vm8, %v9807_v37, %v9833_v28  ;;  %v10841_v4 = vld [vmem:[#allocation74_spill] sm:$0xff] }
 0x7fd   : > { %v3507_v17 = vpack.c.bf16 %v3411_v13, %v3407_v42  ;;  %v3188_v2 = vpop.permute.xlu1 %3187  ;;  %v3508_v26 = vpack.c.bf16 %v3412_v19, %v3408_v15  ;;  %v3423_v6 = vmul.f32 %v4717_v14, %v3207_v10  ;;  %v3424_v56 = vmul.f32 %v4718_v11, %v3219_v5  ;;  %v10823_v15 = vld [vmem:[#allocation52_spill] sm:$0xff]  ;;  %v10824_v13 = vld [vmem:[#allocation57_spill] sm:$0xff]  ;;  %v10829_v34 = vld [vmem:[#allocation63_spill] sm:$0xff] }
 0x7fe   : > { %v3212_v44 = vsel %vm558_vm6, %v3188_v2, %v10810_v18  ;;  %v3216_v63 = vsel %vm558_vm6, %v10811_v55, %v3188_v2  ;;  %v10821_v35 = vpack.c.bf16 %v10819_v23, %v10820_v16  ;;  %v9982_v22 = vsel %vm608_vm8, %v10823_v15, %v10822_v3  ;;  %v10832_v5 = vld [vmem:[#allocation51_spill] sm:$0xff] }
 0x7ff   : > { %v3426_v31 = vmul.f32 %v4714_v32, %v3212_v44  ;;  %3556 = vmatpush1.bf16.msra.mxu0 %v3505_v40  ;;  %3661 = vmatprep.subr.bf16.mxu1 %v3508_v26  ;;  %v3234_v58 = vpop.permute.xlu0 %3233  ;;  %v3425_v39 = vmul.f32 %v4715_v29, %v3216_v63  ;;  %v3310_v19 = vsel %vm608_vm8, %v10825_v62, %v10824_v13  ;;  %v10830_v26 = vld [vmem:[#allocation78_spill] sm:$0xff]  ;;  %v4724_v29 = vld [vmem:[%s10228_s2 + $0x3c0] sm:$0xff]  ;;  %v4726_v14 = vld [vmem:[%s10228_s2 + $0x3d0] sm:$0xff] }
 0x800   : > { %3557 = vmatprep.subr.bf16.mxu0 %v10814_v61  ;;  %3662 = vmatpush1.bf16.msra.mxu1 %v3507_v17  ;;  %v3259_v24 = vsel %vm583_vm7, %v3234_v58, %v10818_v38  ;;  %v3306_v8 = vsel %vm608_vm8, %v10824_v13, %v9807_v37  ;;  %v3263_v40 = vsel %vm583_vm7, %v10829_v34, %v3234_v58  ;;  %v4721_v17 = vld [vmem:[%s10228_s2 + $0x3c8] sm:$0xff]  ;;  %v10838_v16 = vld [vmem:[#allocation23_spill] sm:$0xff] }
 0x801   : > { %v3204_v60 = vpop.permute.xlu1 %3203  ;;  %3663 = vmatprep.subr.bf16.mxu1 %v10817_v43  ;;  %v3514_v36 = vpack.c.bf16 %v3426_v31, %v3422_v25  ;;  %v3513_v20 = vpack.c.bf16 %v3425_v39, %v3421_v59  ;;  %v3438_v2 = vmul.f32 %v4721_v17, %v3259_v24  ;;  %v4722_v63 = vld [vmem:[%s10228_s2 + $0x3e8] sm:$0xff]  ;;  %v3305_v10 = vsel %vm608_vm8, %v10822_v3, %v9795_v52  ;;  %v10835_v43 = vld [vmem:[#allocation71_spill] sm:$0xff]  ;;  %v4728_v24 = vld [vmem:[%s10228_s2 + $0x418] sm:$0xff] }
 0x802   : > { %v3208_v21 = vsel %vm558_vm6, %v10810_v18, %v3204_v60  ;;  %v3220_v0 = vsel %vm558_vm6, %v3204_v60, %v10811_v55  ;;  %v4723_v32 = vld [vmem:[%s10228_s2 + $0x428] sm:$0xff]  ;;  %v10834_v48 = vpack.c.bf16 %v10832_v5, %v10833_v45  ;;  %v3314_v61 = vsel %vm608_vm8, %v9833_v28, %v10825_v62  ;;  %v4725_v60 = vld [vmem:[%s10228_s2 + $0x3e0] sm:$0xff] }
 0x803   : > { %v3427_v1 = vmul.f32 %v4719_v41, %v3208_v21  ;;  %v3428_v53 = vmul.f32 %v4720_v54, %v3220_v0  ;;  %3558 = vmatpush1.bf16.msra.mxu0 %v10821_v35  ;;  %v3250_v42 = vpop.permute.xlu0 %3249  ;;  %v3450_v31 = vmul.f32 %v4723_v32, %v3306_v8  ;;  %v3437_v39 = vmul.f32 %v4724_v29, %v3263_v40  ;;  %v4727_v21 = vld [vmem:[%s10228_s2 + $0x3d8] sm:$0xff]  ;;  %v10839_v35 = vld [vmem:[#allocation69_spill] sm:$0xff]  ;;  %v4732_v13 = vld [vmem:[%s10228_s2 + $0x408] sm:$0xff] }
 0x804   : > { %3559 = vmatprep.subr.bf16.mxu0 %v3514_v36  ;;  %3664 = vmatpush1.bf16.msra.mxu1 %v10828_v49  ;;  %v3255_v44 = vsel %vm583_vm7, %v10818_v38, %v3250_v42  ;;  %v3267_v55 = vsel %vm583_vm7, %v3250_v42, %v10829_v34  ;;  %v10836_v36 = vld [vmem:[#allocation70_spill] sm:$0xff]  ;;  %v10840_v42 = vpack.c.bf16 %v10838_v16, %v10839_v35  ;;  %v4731_v3 = vld [vmem:[%s10228_s2 + $0x420] sm:$0xff]  ;;  %v10842_v49 = vld [vmem:[#allocation55_spill] sm:$0xff] }
 0x805   : > { %v3515_v30 = vpack.c.bf16 %v3427_v1, %v3423_v6  ;;  %v3236_v7 = vpop.permute.xlu1 %3235  ;;  %v3516_v50 = vpack.c.bf16 %v3428_v53, %v3424_v56  ;;  %v10837_v33 = vpack.c.bf16 %v10835_v43, %v10836_v36  ;;  %v3439_v6 = vmul.f32 %v4726_v14, %v3255_v44  ;;  %v4729_v1 = vld [vmem:[%s10228_s2 + $0x3f0] sm:$0xff]  ;;  %v4730_v53 = vld [vmem:[%s10228_s2 + $0x3f8] sm:$0xff]  ;;  %v4735_v28 = vld [vmem:[%s10228_s2 + $0x400] sm:$0xff] }
 0x806   : > { %v3260_v27 = vsel %vm583_vm7, %v3236_v7, %v10830_v26  ;;  %v3264_v18 = vsel %vm583_vm7, %v10831_v57, %v3236_v7  ;;  %v3440_v0 = vmul.f32 %v4727_v21, %v3267_v55  ;;  %v3446_v62 = vmul.f32 %v4732_v13, %v3305_v10  ;;  %v4734_v40 = vld [vmem:[%s10228_s2 + $0x410] sm:$0xff]  ;;  %v4738_v32 = vld [vmem:[%s5091_s16 + $0x1c] ss:$12 sps:$4 sm:$0xff]   ;;  %v4739_v45 = vld [vmem:[%s10228_s2 + $0x440] sm:$0xff] }
 0x807   : > { %v3442_v12 = vmul.f32 %v4722_v63, %v3260_v27  ;;  %3560 = vmatpush1.bf16.msra.mxu0 %v3513_v20  ;;  %3665 = vmatprep.subr.bf16.mxu1 %v3516_v50  ;;  %v3294_v25 = vpop.permute.xlu0 %3293  ;;  %v3441_v46 = vmul.f32 %v4725_v60, %v3264_v18  ;;  %v10843_v8 = vpack.c.bf16 %v10841_v4, %v10842_v49  ;;  %v4733_v20 = vld [vmem:[%s10228_s2 + $0x438] sm:$0xff]  ;;  %v4743_v21 = vld [vmem:[%s10228_s2 + $0x450] sm:$0xff]  ;;  %v4822_v13 = vmov 3   ;;  %v10845_v49 = vld [vmem:[#allocation13_spill] sm:$0xff] }
 0x808   : > { %v3313_v58 = vsel %vm608_vm8, %v3294_v25, %v10823_v15  ;;  %3561 = vmatprep.subr.bf16.mxu0 %v10834_v48  ;;  %3666 = vmatpush1.bf16.msra.mxu1 %v3515_v30  ;;  %v3301_v38 = vsel %vm608_vm8, %v9795_v52, %v3294_v25  ;;  %v3449_v15 = vmul.f32 %v4731_v3, %v3310_v19  ;;  %v4820_v3 = vmov 0.0  }
 0x809   : > { %v3252_v51 = vpop.permute.xlu1 %3251  ;;  %3667 = vmatprep.subr.bf16.mxu1 %v10837_v33  ;;  %v3522_v59 = vpack.c.bf16 %v3442_v12, %v3438_v2  ;;  %v3448_v41 = vmul.f32 %v4728_v24, %v3313_v58  ;;  %v3452_v19 = vmul.f32 %v4733_v20, %v3314_v61  ;;  %v3521_v30 = vpack.c.bf16 %v3441_v46, %v3437_v39  ;;  %v4737_v12 = vld [vmem:[%s5091_s16] ss:$12 sps:$4 sm:$0xff]   ;;  %v4745_v24 = vld [vmem:[%s10228_s2 + $0x458] sm:$0xff] }
 0x80a   : > { %v3256_v11 = vsel %vm583_vm7, %v10830_v26, %v3252_v51  ;;  %v3268_v56 = vsel %vm583_vm7, %v3252_v51, %v10831_v57  ;;  %v3447_v17 = vmul.f32 %v4734_v40, %v3301_v38  ;;  %v3526_v37 = vpack.c.bf16 %v3450_v31, %v3446_v62  ;;  %v4736_v57 = vld [vmem:[%s10228_s2 + $0x430] sm:$0xff]  ;;  %v4740_v61 = vld [vmem:[%s10228_s2 + $0x448] sm:$0xff]  ;;  %v4741_v39 = vld [vmem:[%s10228_s2 + $0x460] sm:$0xff]  ;;  %4405 = vset.pattern.permute.xlu1 %v4822_v13 }
 0x80b   : > { %v3443_v54 = vmul.f32 %v4729_v1, %v3256_v11  ;;  %v3444_v23 = vmul.f32 %v4730_v53, %v3268_v56  ;;  %3562 = vmatpush1.bf16.msra.mxu0 %v10840_v42  ;;  %v3274_v52 = vpop.permute.xlu0 %3273  ;;  %v3445_v2 = vmul.f32 %v4735_v28, %v9982_v22  ;;  %v3528_v27 = vpack.c.bf16 %v3452_v19, %v3448_v41  ;;  %v4742_v46 = vld [vmem:[%s10228_s2 + $0x468] sm:$0xff]  ;;  %v4744_v38 = vld [vmem:[%s5091_s16 + $0x18] ss:$12 sps:$4 sm:$0xff]   ;;  %v4746_v1 = vld [vmem:[%s10228_s2 + $0x470] sm:$0xff] }
 0x80c   : > { %3563 = vmatprep.subr.bf16.mxu0 %v3522_v59  ;;  %3668 = vmatpush1.bf16.msra.mxu1 %v10843_v8  ;;  %v3451_v18 = vmul.f32 %v4736_v57, %v3302_v47  ;;  %v4747_v53 = vld [vmem:[%s10228_s2 + $0x478] sm:$0xff]  ;;  %v4748_v42 = vld [vmem:[%s5091_s16 + $0x8] ss:$12 sps:$4 sm:$0xff]   ;;  %v4750_v62 = vld [vmem:[%s5133_s13] sm:$0xff]  ;;  %v4823_v47 = vmov 4  }
 0x80d   : > { %v3523_v7 = vpack.c.bf16 %v3443_v54, %v3439_v6  ;;  %v3276_v50 = vpop.permute.xlu1 %3275  ;;  %v3524_v34 = vpack.c.bf16 %v3444_v23, %v3440_v0  ;;  %v3525_v44 = vpack.c.bf16 %v3449_v15, %v3445_v2  ;;  %v10844_v23 = vmov 0   ;;  %3964 = vperm.xlu1 %4405, %v4750_v62  }
 0x80e   : > { %v3527_v63 = vpack.c.bf16 %v3451_v18, %v3447_v17  ;;  %v4821_v15 = vmov 2   ;;  %v10846_v17 = vld [vmem:[#allocation25_spill] sm:$0xff] }
 0x80f   : > { %3564 = vmatpush1.bf16.msra.mxu0 %v3521_v30  ;;  %3669 = vmatprep.subr.bf16.mxu1 %v3524_v34  ;;  %v3282_v26 = vpop.permute.xlu0 %3281 }
 0x810   : > { %3586 = vmatprep.subr.bf16.mxu0 %v3526_v37  ;;  %3670 = vmatpush1.bf16.msra.mxu1 %v3523_v7  ;;  %v3311_v25 = vsel %vm608_vm8, %v3274_v52, %v3282_v26 }
 0x811   : > { %v3292_v55 = vpop.permute.xlu1 %3291  ;;  %3692 = vmatprep.subr.bf16.mxu1 %v3528_v27  ;;  %v3453_v48 = vmul.f32 %v4739_v45, %v3311_v25  ;;  %4404 = vset.pattern.permute.xlu0 %v4821_v15 }
 0x812   : > { %3566 = vmatmul.mubr.bf16.vlgmr.msra.gmra.mrb[24].mxu0 %v4737_v12  ;;  %3795 = vperm.xlu0 %4404, %v4750_v62  }
 0x813   : > { %3587 = vmatpush1.bf16.msra.mxu0 %v3525_v44  ;;  %3672 = vmatmul.mubr.bf16.vlgmr.msra.gmra.mrb[24].mxu1 %v4737_v12  ;;  %v3290_v22 = vpop.permute.xlu0 %3289 }
 0x814   : > { %v3307_v10 = vsel %vm608_vm8, %v3282_v26, %v3290_v22  ;;  %3693 = vmatpush1.bf16.msra.mxu1 %v3527_v63  ;;  %3575 = vmatprep.mubr.bf16.mxu0 %v4738_v32 }
 0x815   : > { %v3284_v31 = vpop.permute.xlu1 %3283  ;;  %3681 = vmatprep.mubr.bf16.mxu1 %v4738_v32  ;;  %v3454_v29 = vmul.f32 %v4740_v61, %v3307_v10  ;;  %4406 = vset.pattern.permute.xlu1 %v4823_v47 }
 0x816   : > { %v3308_v58 = vsel %vm608_vm8, %v3284_v31, %v3292_v55  ;;  %v3312_v5 = vsel %vm608_vm8, %v3276_v50, %v3284_v31  ;;  %4407 = vset.pattern.permute.xlu0 %v4823_v47  ;;  %3972 = vperm.xlu1 %4406, %v4750_v62  }
 0x817   : > { %v3457_v60 = vmul.f32 %v4741_v39, %v3312_v5  ;;  %v3458_v51 = vmul.f32 %v4742_v46, %v3308_v58  ;;  %v3298_v43 = vpop.permute.xlu0 %3297 }
 0x818   : > { %v3303_v36 = vsel %vm608_vm8, %v3290_v22, %v3298_v43  ;;  %v3315_v33 = vsel %vm608_vm8, %v3298_v43, %v3274_v52  ;;  %v4749_v52 = vld [vmem:[%s5091_s16 + $0x20] ss:$12 sps:$4 sm:$0xff]   ;;  %s4207_s16 = sshll.u32 %s5071_s26, 3 }
 0x819   : > { %v3529_v59 = vpack.c.bf16 %v3457_v60, %v3453_v48  ;;  %v3300_v14 = vpop.permute.xlu1 %3299  ;;  %v3530_v6 = vpack.c.bf16 %v3458_v51, %v3454_v29  ;;  %v3455_v0 = vmul.f32 %v4743_v21, %v3303_v36  ;;  %v3456_v41 = vmul.f32 %v4745_v24, %v3315_v33  ;;  %v10847_v48 = vld [vmem:[#allocation11_spill] sm:$0xff]  ;;  %v10848_v51 = vld [vmem:[#allocation14_spill] sm:$0xff]  ;;  %v10849_v36 = vld [vmem:[#allocation41_spill] sm:$0xff]  ;;  %s387_s26 = scalar_lea.vmem %s10232_s6, %s4207_s16 }
 0x81a   : > { %v3304_v11 = vsel %vm608_vm8, %v3292_v55, %v3300_v14  ;;  %v3316_v56 = vsel %vm608_vm8, %v3300_v14, %v3276_v50  ;;  %3576 = vmatmul.mubr.bf16.gmra.mrb[28].mxu0 %v4744_v38 }
 0x81b   : > { %v3459_v54 = vmul.f32 %v4746_v1, %v3304_v11  ;;  %v3460_v9 = vmul.f32 %v4747_v53, %v3316_v56  ;;  %3588 = vmatprep.subr.bf16.mxu0 %v3530_v6  ;;  %3682 = vmatmul.mubr.bf16.gmra.mrb[28].mxu1 %v4744_v38  ;;  %v10851_v6 = vld [vmem:[#allocation27_spill] sm:$0xff]  ;;  %v10852_v56 = vld [vmem:[#allocation40_spill] sm:$0xff] }
 0x81c   : > { %3589 = vmatpush1.bf16.msra.mxu0 %v3529_v59  ;;  %3618 = vmatprep.mubr.bf16.mxu0 %v10844_v23  ;;  %v10850_v59 = vld [vmem:[#allocation39_spill] sm:$0xff] }
 0x81d   : > { %v3531_v16 = vpack.c.bf16 %v3459_v54, %v3455_v0  ;;  %v3532_v35 = vpack.c.bf16 %v3460_v9, %v3456_v41  ;;  %3724 = vmatprep.mubr.bf16.mxu1 %v10844_v23 }
 0x81f   : > { %3694 = vmatprep.subr.bf16.mxu1 %v3532_v35 }
 0x820   : > { %3695 = vmatpush1.bf16.msra.mxu1 %v3531_v16 }
 0x822   : > { %4240 = vmatmul.mubr.msk.bf16.vlgmr.msra.gmra.mrb[24].mxu0 %vm1778_vm9, %v4748_v42 }
 0x823   : > { %4242 = vmatmul.mubr.msk.bf16.vlgmr.msra.gmra.mrb[24].mxu1 %vm1778_vm9, %v4748_v42  ;;  %3628 = vmatprep.mubr.bf16.mxu0 %v10844_v23  ;;  %v10854_v42 = vld [vmem:[#allocation43_spill] sm:$0xff] }
 0x824   : > { %3734 = vmatprep.mubr.bf16.mxu1 %v10844_v23  ;;  %v10853_v23 = vld [vmem:[#allocation26_spill] sm:$0xff] }
 0x82a   : > { %4241 = vmatmul.mubr.msk.bf16.gmra.mrb[28].mxu0 %vm1778_vm9, %v4749_v52 }
 0x82b   : > { %4243 = vmatmul.mubr.msk.bf16.gmra.mrb[28].mxu1 %vm1778_vm9, %v4749_v52  ;;  %3865 = vmatprep.mubr.f32.mxu0 %v4820_v3 }
 0x82c   : > { %3936 = vmatprep.mubr.f32.mxu1 %v4820_v3 }
 0x8f5   : > { %v3620_v4 = vpop.f32.mrb[24].mxu0 }
 0x8f6   : > { %v4300_v8 = vadd.f32 %v3620_v4, %v10845_v49  ;;  %v3622_v20 = vpop.f32.mrb[25].mxu0  ;;  %v3726_v19 = vpop.f32.mrb[24].mxu1 }
 0x8f7   : > { %v4301_v30 = vadd.f32 %v3622_v20, %v10845_v49  ;;  %v4308_v7 = vadd.f32 %v3726_v19, %v10845_v49  ;;  %v3624_v50 = vpop.f32.mrb[26].mxu0  ;;  %v3728_v34 = vpop.f32.mrb[25].mxu1 }
 0x8f8   : > { %v3745_v40 = vmul.f32 0.1, %v4300_v8  ;;  %v4302_v37 = vadd.f32 %v3624_v50, %v10846_v17  ;;  %v4309_v28 = vadd.f32 %v3728_v34, %v10845_v49  ;;  %v3626_v2 = vpop.f32.mrb[27].mxu0  ;;  %v3730_v26 = vpop.f32.mrb[26].mxu1 }
 0x8f9   : > { %v3746_v27 = vmul.f32 0.1, %v4301_v30  ;;  %v3747_v57 = vmul.f32 0.1, %v4308_v7  ;;  %v4303_v18 = vadd.f32 %v3626_v2, %v10846_v17  ;;  %v4310_v44 = vadd.f32 %v3730_v26, %v10846_v17  ;;  %v3732_v55 = vpop.f32.mrb[27].mxu1 }
 0x8fa   : > { %v3761_v63 = vmax.f32 %v4300_v8, %v3745_v40  ;;  %v3749_v12 = vmul.f32 0.1, %v4302_v37  ;;  %v3748_v22 = vmul.f32 0.1, %v4309_v28  ;;  %v4311_v25 = vadd.f32 %v3732_v55, %v10846_v17 }
 0x8fb   : > { %v3762_v10 = vmax.f32 %v4301_v30, %v3746_v27  ;;  %v3763_v32 = vmax.f32 %v4308_v7, %v3747_v57  ;;  %v3750_v31 = vmul.f32 0.1, %v4303_v18  ;;  %v3751_v58 = vmul.f32 0.1, %v4310_v44  ;;  %v10855_v7 = vld [vmem:[#allocation42_spill] sm:$0xff]  ;;  %v10856_v27 = vld [vmem:[#allocation12_spill] sm:$0xff] }
 0x8fc   : > { %v3765_v5 = vmax.f32 %v4302_v37, %v3749_v12  ;;  %v3752_v45 = vmul.f32 0.1, %v4311_v25  ;;  %v3777_v61 = vadd.f32 %v3761_v63, %v10847_v48  ;;  %v3764_v29 = vmax.f32 %v4309_v28, %v3748_v22  ;;  %v10858_v12 = vld [vmem:[#allocation44_spill] sm:$0xff] }
 0x8fd   : > { %v3766_v39 = vmax.f32 %v4303_v18, %v3750_v31  ;;  %v3767_v60 = vmax.f32 %v4310_v44, %v3751_v58  ;;  %v3630_v46 = vpop.f32.mrb[28].mxu0  ;;  %v3778_v43 = vadd.f32 %v3762_v10, %v10848_v51  ;;  %v3779_v33 = vadd.f32 %v3763_v32, %v10849_v36  ;;  %v10857_v18 = vld [vmem:[#allocation45_spill] sm:$0xff]  ;;  %v10859_v31 = vld [vmem:[#allocation8_spill] sm:$0xff] }
 0x8fe   : > { %v3781_v14 = vadd.f32 %v3765_v5, %v10850_v59  ;;  %v4304_v21 = vadd.f32 %v3630_v46, %v10851_v6  ;;  %v3632_v0 = vpop.f32.mrb[29].mxu0  ;;  %v3736_v11 = vpop.f32.mrb[28].mxu1  ;;  %v3768_v24 = vmax.f32 %v4311_v25, %v3752_v45  ;;  %v3780_v57 = vadd.f32 %v3764_v29, %v10856_v27  ;;  %v10860_v48 = vld [vmem:[#allocation28_spill] sm:$0xff]  ;;  %v10862_v29 = vld [vmem:[#allocation30_spill] sm:$0xff] }
 0x8ff   : > { %v3783_v38 = vadd.f32 %v3767_v60, %v10852_v56  ;;  %v4305_v41 = vadd.f32 %v3632_v0, %v10851_v6  ;;  %v4312_v1 = vadd.f32 %v3736_v11, %v10851_v6  ;;  %v3634_v54 = vpop.f32.mrb[30].mxu0  ;;  %v3738_v53 = vpop.f32.mrb[29].mxu1  ;;  %v3782_v16 = vadd.f32 %v3766_v39, %v10853_v23  ;;  %v10861_v60 = vld [vmem:[#allocation7_spill] sm:$0xff]  ;;  %v10863_v36 = vld [vmem:[#allocation48_spill] sm:$0xff]  ;;  %v3793_v0 = vld [vmem:[%s387_s26] sm:$0xff] }
 0x900   : > { %v4254_v9 = vpack.c.bf16 %v3781_v14, %v3777_v61  ;;  %v3753_v35 = vmul.f32 0.1, %v4304_v21  ;;  %v4306_v52 = vadd.f32 %v3634_v54, %v10854_v42  ;;  %v3636_v3 = vpop.f32.mrb[31].mxu0  ;;  %v3740_v15 = vpop.f32.mrb[30].mxu1  ;;  %v4313_v4 = vadd.f32 %v3738_v53, %v10851_v6  ;;  %v10864_v59 = vld [vmem:[#allocation56_spill] sm:$0xff] }
 0x901   : > { %v4262_v13 = vpack.c.bf16 %v3783_v38, %v3779_v33  ;;  %v3754_v62 = vmul.f32 0.1, %v4305_v41  ;;  %v3755_v47 = vmul.f32 0.1, %v4312_v1  ;;  %v3742_v49 = vpop.f32.mrb[31].mxu1  ;;  %v4307_v19 = vadd.f32 %v3636_v3, %v10854_v42  ;;  %v3796_v11 = vpop.permute.xlu0 %3795 }
 0x902   : > { %v3769_v8 = vmax.f32 %v4304_v21, %v3753_v35  ;;  %v3757_v20 = vmul.f32 0.1, %v4306_v52  ;;  %v4314_v30 = vadd.f32 %v3740_v15, %v10854_v42  ;;  %v3784_v50 = vadd.f32 %v3768_v24, %v10855_v7  ;;  %v3965_v7 = vpop.permute.xlu1 %3964 }
 0x903   : > { %v3770_v34 = vmax.f32 %v4305_v41, %v3754_v62  ;;  %v3756_v40 = vmul.f32 0.1, %v4313_v4  ;;  %v4315_v17 = vadd.f32 %v3742_v49, %v10854_v42  ;;  %v3771_v37 = vmax.f32 %v4312_v1, %v3755_v47 }
 0x904   : > { %v3773_v28 = vmax.f32 %v4306_v52, %v3757_v20  ;;  %v3758_v2 = vmul.f32 0.1, %v4307_v19  ;;  %v3759_v26 = vmul.f32 0.1, %v4314_v30  ;;  %v3785_v44 = vadd.f32 %v3769_v8, %v10857_v18 }
 0x905   : > { %v3772_v55 = vmax.f32 %v4313_v4, %v3756_v40  ;;  %v3760_v63 = vmul.f32 0.1, %v4315_v17  ;;  %v4252_v32 = vpack.c.bf16 %v3782_v16, %v3778_v43  ;;  %v3786_v58 = vadd.f32 %v3770_v34, %v10859_v31 }
 0x906   : > { %v3789_v22 = vadd.f32 %v3773_v28, %v10858_v12  ;;  %v3774_v25 = vmax.f32 %v4307_v19, %v3758_v2  ;;  %v3775_v10 = vmax.f32 %v4314_v30, %v3759_v26  ;;  %v4260_v45 = vpack.c.bf16 %v3784_v50, %v3780_v57  ;;  %v3973_v34 = vpop.permute.xlu1 %3972 }
 0x907   : > { %v3776_v5 = vmax.f32 %v4315_v17, %v3760_v63  ;;  %v3787_v61 = vadd.f32 %v3771_v37, %v10860_v48  ;;  %4253 = vmatprep.subr.bf16.mxu0 %v4252_v32  ;;  %v3788_v33 = vadd.f32 %v3772_v55, %v10863_v36 }
 0x908   : > { %v4258_v39 = vpack.c.bf16 %v3789_v22, %v3785_v44  ;;  %v3790_v46 = vadd.f32 %v3774_v25, %v10861_v60  ;;  %v3791_v51 = vadd.f32 %v3775_v10, %v10862_v29  ;;  %4255 = vmatpush1.bf16.msra.mxu0 %v4254_v9  ;;  %4261 = vmatprep.subr.bf16.mxu1 %v4260_v45 }
 0x909   : > { %v3792_v14 = vadd.f32 %v3776_v5, %v10864_v59  ;;  %4263 = vmatpush1.bf16.msra.mxu1 %v4262_v13 }
 0x90a   : > { %v4266_v43 = vpack.c.bf16 %v3791_v51, %v3787_v61  ;;  %v4256_v6 = vpack.c.bf16 %v3790_v46, %v3786_v58 }
 0x90b   : > { %v4264_v21 = vpack.c.bf16 %v3792_v14, %v3788_v33 }
 0x90c   : > { %4257 = vmatprep.subr.bf16.mxu0 %v4256_v6 }
 0x90d   : > { %4259 = vmatpush1.bf16.msra.mxu0 %v4258_v39  ;;  %4265 = vmatprep.subr.bf16.mxu1 %v4264_v21 }
 0x90e   : > { %4267 = vmatpush1.bf16.msra.mxu1 %v4266_v43 }
 0x910   : > { %4244 = vmatmul.mubr.msk.f32.vlgmr.msra.gmra.mrb[32].mxu0 %vm1778_vm9, %v3793_v0 }
 0x911   : > { %4245 = vmatmul.mubr.msk.f32.vlgmr.msra.gmra.mrb[32].mxu1 %vm1778_vm9, %v3793_v0 }
 0x9e3   : > { %v3867_v56 = vpop.f32.mrb[32].mxu0 }
 0x9e4   : > { %v3938_v38 = vpop.f32.mrb[32].mxu1  ;;  %v3869_v24 = vpop.f32.mrb[33].mxu0  ;;  %v10187_v41 = vadd.f32 %v3867_v56, %v3796_v11 }
 0x9e5   : > { %v3940_v1 = vpop.f32.mrb[33].mxu1  ;;  %v10189_v54 = vadd.f32 %v3869_v24, %v3796_v11  ;;  %v10191_v53 = vadd.f32 %v3938_v38, %v3796_v11 }
 0x9e6   : > { %v10193_v9 = vadd.f32 %v3940_v1, %v3796_v11  ;;  %v3943_v23 = vsub.f32 0.0, %v10187_v41  ;;  %v3988_v63 = vsel (!%p10865_p3), %vm3987_vm10, %v10187_v41, -inf }
 0x9e7   : > { %v3944_v16 = vsub.f32 0.0, %v10189_v54  ;;  %v3945_v35 = vsub.f32 0.0, %v10191_v53  ;;  %v3995_v12 = vsel (!%p10865_p3), %vm3987_vm10, %v10189_v54, -inf  ;;  %v4002_v22 = vsel (!%p10865_p3), %vm3987_vm10, %v10191_v53, -inf }
 0x9e8   : > { %v3946_v42 = vsub.f32 0.0, %v10193_v9  ;;  %v3947_v52 = vmul.f32 1.442695, %v3943_v23  ;;  %v4009_v25 = vsel (!%p10865_p3), %vm3987_vm10, %v10193_v9, -inf  ;;  %v3989_v10 = vrot.slane (!%p10865_p3), %v3988_v63, 4 }
 0x9e9   : > { %v3949_v3 = vmul.f32 1.442695, %v3944_v16  ;;  %v3951_v15 = vmul.f32 1.442695, %v3945_v35  ;;  %v3996_v32 = vrot.slane (!%p10865_p3), %v3995_v12, 4  ;;  %v4003_v31 = vrot.slane (!%p10865_p3), %v4002_v22, 4 }
 0x9ea   : > { %4430 = vpow2.f32 %v3947_v52  ;;  %v3953_v13 = vmul.f32 1.442695, %v3946_v42  ;;  %v4010_v58 = vrot.slane (!%p10865_p3), %v4009_v25, 4  ;;  %v3990_v5 = vmax.f32 (!%p10865_p3), %v3988_v63, %v3989_v10 }
 0x9eb   : > { %4432 = vpow2.f32 %v3949_v3  ;;  %v3997_v45 = vmax.f32 (!%p10865_p3), %v3995_v12, %v3996_v32  ;;  %v4004_v48 = vmax.f32 (!%p10865_p3), %v4002_v22, %v4003_v31 }
 0x9ec   : > { %4434 = vpow2.f32 %v3951_v15  ;;  %v4011_v61 = vmax.f32 (!%p10865_p3), %v4009_v25, %v4010_v58  ;;  %v3991_v39 = vrot.slane (!%p10865_p3), %v3990_v5, 2 }
 0x9ed   : > { %4436 = vpow2.f32 %v3953_v13  ;;  %v3998_v60 = vrot.slane (!%p10865_p3), %v3997_v45, 2  ;;  %v4005_v46 = vrot.slane (!%p10865_p3), %v4004_v48, 2 }
 0x9ee   : > { %v4012_v29 = vrot.slane (!%p10865_p3), %v4011_v61, 2  ;;  %v3992_v51 = vmax.f32 (!%p10865_p3), %v3990_v5, %v3991_v39 }
 0x9ef   : > { %v3999_v36 = vmax.f32 (!%p10865_p3), %v3997_v45, %v3998_v60  ;;  %v4006_v33 = vmax.f32 (!%p10865_p3), %v4004_v48, %v4005_v46 }
 0x9f0   : > { %v4013_v59 = vmax.f32 (!%p10865_p3), %v4011_v61, %v4012_v29  ;;  %v3993_v14 = vrot.slane (!%p10865_p3), %v3992_v51, 1 }
 0x9f1   : > { %v4000_v43 = vrot.slane (!%p10865_p3), %v3999_v36, 1  ;;  %v4007_v6 = vrot.slane (!%p10865_p3), %v4006_v33, 1 }
 0x9f2   : > { %v4014_v21 = vrot.slane (!%p10865_p3), %v4013_v59, 1  ;;  %v3994_v0 = vmax.f32 (!%p10865_p3), %v3992_v51, %v3993_v14 }
 0x9f3   : > { %v4001_v11 = vmax.f32 (!%p10865_p3), %v3999_v36, %v4000_v43  ;;  %v4008_v56 = vmax.f32 (!%p10865_p3), %v4006_v33, %v4007_v6 }
 0x9f4   : > { %v4431_v62 = vpop.eup %4430  ;;  %v4015_v38 = vmax.f32 (!%p10865_p3), %v4013_v59, %v4014_v21  ;;  %v4016_v24 = vsub.f32 (!%p10865_p3), %v10187_v41, %v3994_v0 }
 0x9f5   : > { %v4433_v47 = vpop.eup %4432  ;;  %v3955_v4 = vadd.f32 1.0, %v4431_v62  ;;  %v4017_v1 = vsub.f32 (!%p10865_p3), %v10189_v54, %v4001_v11  ;;  %v4018_v23 = vsub.f32 (!%p10865_p3), %v10191_v53, %v4008_v56 }
 0x9f6   : > { %v4435_v49 = vpop.eup %4434  ;;  %v3956_v8 = vadd.f32 1.0, %v4433_v47  ;;  %v4019_v16 = vsub.f32 (!%p10865_p3), %v10193_v9, %v4015_v38  ;;  %v4020_v35 = vmul.f32 (!%p10865_p3), 1.442695, %v4016_v24 }
 0x9f7   : > { %v4437_v20 = vpop.eup %4436  ;;  %v3957_v19 = vadd.f32 1.0, %v4435_v49  ;;  %4438 = vrcp.f32 %v3955_v4  ;;  %v4022_v42 = vmul.f32 (!%p10865_p3), 1.442695, %v4017_v1  ;;  %v4024_v52 = vmul.f32 (!%p10865_p3), 1.442695, %v4018_v23 }
 0x9f8   : > { %v3958_v30 = vadd.f32 1.0, %v4437_v20  ;;  %4440 = vrcp.f32 %v3956_v8  ;;  %v4026_v3 = vmul.f32 (!%p10865_p3), 1.442695, %v4019_v16 }
 0x9f9   : > { %4442 = vrcp.f32 %v3957_v19 }
 0x9fa   : > { %4444 = vrcp.f32 %v3958_v30 }
 0x9fb   : > { %4751 = vpow2.f32 (!%p10865_p3), %v4020_v35 }
 0x9fc   : > { %4753 = vpow2.f32 (!%p10865_p3), %v4022_v42 }
 0x9fd   : > { %4755 = vpow2.f32 (!%p10865_p3), %v4024_v52 }
 0x9fe   : > { %4757 = vpow2.f32 (!%p10865_p3), %v4026_v3 }
 0xa01   : > { %v4439_v50 = vpop.eup %4438 }
 0xa02   : > { %v4441_v40 = vpop.eup %4440  ;;  %v3967_v17 = vmul.f32 %v4439_v50, %v3965_v7 }
 0xa03   : > { %v4443_v37 = vpop.eup %4442  ;;  %v3968_v28 = vmul.f32 %v4441_v40, %v3965_v7  ;;  %3986 = sbr.rel (%p10865_p3) target bundleno = 2598 (0xa26), region = 60 }
 0xa04   : > { %v4445_v2 = vpop.eup %4444  ;;  %v3969_v26 = vmul.f32 %v4443_v37, %v3965_v7  ;;  %v3975_v27 = vadd.f32 %v3973_v34, %v3967_v17 }
 0xa05   : > { %v3970_v57 = vmul.f32 %v4445_v2, %v3965_v7  ;;  %v3976_v18 = vadd.f32 %v3973_v34, %v3968_v28  ;;  %v4752_v15 = vpop.eup (!%p10865_p3), %4751 }
 0xa06   : > { %v3977_v44 = vadd.f32 %v3973_v34, %v3969_v26  ;;  %3979 = vst [vmem:[%s10203_s11] sm:$0xff] %v3975_v27  ;;  %v4754_v13 = vpop.eup (!%p10865_p3), %4753  ;;  %v4032_v62 = vrot.slane (!%p10865_p3), %v4752_v15, 1 }
 0xa07   : > { %v3978_v55 = vadd.f32 %v3973_v34, %v3970_v57  ;;  %3980 = vst [vmem:[%s10203_s11 + $0x8] sm:$0xff] %v3976_v18  ;;  %v4756_v47 = vpop.eup (!%p10865_p3), %4755  ;;  %v4033_v41 = vrot.slane (!%p10865_p3), %v4754_v13, 1 }
 0xa08   : > { %3981 = vst [vmem:[%s10203_s11 + $0x10] sm:$0xff] %v3977_v44  ;;  %v4758_v4 = vpop.eup (!%p10865_p3), %4757  ;;  %v4041_v54 = vsel (!%p10865_p3), %vm4040_vm11, %v4032_v62, 0.0  ;;  %v4034_v49 = vrot.slane (!%p10865_p3), %v4756_v47, 1 }
 0xa09   : > { %3982 = vst [vmem:[%s10203_s11 + $0x18] sm:$0xff] %v3978_v55  ;;  %v4042_v53 = vrot.slane (!%p10865_p3), %v4041_v54, 4  ;;  %v4048_v8 = vsel (!%p10865_p3), %vm4040_vm11, %v4033_v41, 0.0  ;;  %v4035_v9 = vrot.slane (!%p10865_p3), %v4758_v4, 1 }
 0xa0a   : > { %v4049_v20 = vrot.slane %v4048_v8, 4  ;;  %v4055_v19 = vsel %vm4040_vm11, %v4034_v49, 0.0 }
 0xa0b   : > { %v4043_v30 = vadd.f32 %v4042_v53, %v4041_v54  ;;  %v4056_v7 = vrot.slane %v4055_v19, 4  ;;  %v4062_v50 = vsel %vm4040_vm11, %v4035_v9, 0.0 }
 0xa0c   : > { %v4050_v34 = vadd.f32 %v4049_v20, %v4048_v8  ;;  %v4063_v40 = vrot.slane %v4062_v50, 4 }
 0xa0d   : > { %v4044_v17 = vrot.slane %v4043_v30, 2  ;;  %v4057_v37 = vadd.f32 %v4056_v7, %v4055_v19 }
 0xa0e   : > { %v4051_v28 = vrot.slane %v4050_v34, 2  ;;  %v4064_v2 = vadd.f32 %v4063_v40, %v4062_v50 }
 0xa0f   : > { %v4045_v26 = vadd.f32 %v4044_v17, %v4043_v30  ;;  %v4058_v27 = vrot.slane %v4057_v37, 2 }
 0xa10   : > { %v4052_v57 = vadd.f32 %v4051_v28, %v4050_v34  ;;  %v4065_v18 = vrot.slane %v4064_v2, 2 }
 0xa11   : > { %v4046_v44 = vrot.slane %v4045_v26, 1  ;;  %v4059_v55 = vadd.f32 %v4058_v27, %v4057_v37 }
 0xa12   : > { %v4053_v63 = vrot.slane %v4052_v57, 1  ;;  %v4066_v12 = vadd.f32 %v4065_v18, %v4064_v2 }
 0xa13   : > { %v4047_v22 = vadd.f32 %v4046_v44, %v4045_v26  ;;  %v4060_v25 = vrot.slane %v4059_v55, 1 }
 0xa14   : > { %v4054_v10 = vadd.f32 %v4053_v63, %v4052_v57  ;;  %v4067_v32 = vrot.slane %v4066_v12, 1 }
 0xa15   : > { %4759 = vrcp.f32 %v4047_v22  ;;  %v4061_v31 = vadd.f32 %v4060_v25, %v4059_v55 }
 0xa16   : > { %4761 = vrcp.f32 %v4054_v10  ;;  %v4068_v58 = vadd.f32 %v4067_v32, %v4066_v12 }
 0xa17   : > { %4763 = vrcp.f32 %v4061_v31 }
 0xa18   : > { %4765 = vrcp.f32 %v4068_v58 }
 0xa1f   : > { %v4760_v5 = vpop.eup %4759 }
 0xa20   : > { %v4762_v45 = vpop.eup %4761  ;;  %v4073_v48 = vmul.f32 %v4760_v5, %v4752_v15 }
 0xa21   : > { %v4764_v61 = vpop.eup %4763  ;;  %v4074_v39 = vmul.f32 %v4762_v45, %v4754_v13 }
 0xa22   : > { %v4766_v60 = vpop.eup %4765  ;;  %4077 = vst [vmem:[%s10203_s11] sm:$0xe] %v4073_v48  ;;  %v4075_v46 = vmul.f32 %v4764_v61, %v4756_v47 }
 0xa23   : > { %4078 = vst [vmem:[%s10203_s11 + $0x8] sm:$0xe] %v4074_v39  ;;  %v4076_v29 = vmul.f32 %v4766_v60, %v4758_v4 }
 0xa24   : > { %4079 = vst [vmem:[%s10203_s11 + $0x10] sm:$0xe] %v4075_v46 }
 0xa25   : > { %4080 = vst [vmem:[%s10203_s11 + $0x18] sm:$0xe] %v4076_v29 }
 0xa26 PF: > { %s19_s27 = sadd.s32 1, %s4805_s27  }
 0xa27   : > { %p16_p4 = scmp.ge.s32.totalorder %s19_s27, 4  }
 0xa29   :  { %18 = sbr.rel (!%p16_p4) target bundleno = 1 (0x1), region = 103 }
 0xa30   :  { %4102 = vsyncpa [#allocation3], 1 }
 0xa31   :  { %4104 = vsyncpa [#allocation3 + $0x1], 1 }

</bundles_post_ra>
